<compile_context>
chip_gen: v7x
topology: tpu7x:2x2x1
jax: 0.10.0
libtpu: 0.0.40
codegen_flags: <defaults>
</compile_context>

<pallas_src>
import math

import jax
import jax.numpy as jnp
from jax.experimental import pallas as pl
from jax.experimental.pallas import tpu as pltpu

NEG_INF = -1e30


def _round_up(x, m):
    return (x + m - 1) // m * m


def output_kernel(m1_ref, m2_ref, m3_ref, mask_ref, w_ref, lp_ref):
    tb = m1_ref.shape[0]
    w = w_ref[...]                                  # (3, 2, H), native dtype

    def head(m_ref, wi):
        # (TB, 2, H) x (TB, L, H) -> (TB, 2, L), contraction over H on the MXU,
        # f32 accumulation.  Inputs stay in their native dtype (bf16 friendly).
        wb = jnp.broadcast_to(wi[None], (tb,) + wi.shape)
        return jnp.einsum(
            "bkh,blh->bkl", wb, m_ref[...],
            preferred_element_type=jnp.float32,
            precision=jax.lax.Precision.HIGHEST)

    # Linear(2H -> 1, bias=False) on the (never materialized) concatenations:
    #   row 0 of the weight operands builds logits1, row 1 builds logits2.
    logits = head(m1_ref, w[0]) + head(m2_ref, w[1]) + head(m3_ref, w[2])

    keep = mask_ref[...] != 0                       # (TB, 1, L) -> broadcasts
    neg = jnp.float32(NEG_INF)

    # Fused masked log-softmax over the lane (L) axis for both heads at once.
    masked = jnp.where(keep, logits, neg)           # (TB, 2, L) f32
    mmax = jnp.max(masked, axis=-1, keepdims=True)
    shifted = masked - mmax
    lse = jnp.log(jnp.sum(jnp.exp(shifted), axis=-1, keepdims=True))
    lp_ref[...] = (shifted - lse).astype(lp_ref.dtype)


def _vmem_budget_bytes():
    """Generation-aware VMEM budget: ~5/8 of physical capacity.
    v5e/v6e (128 MiB) -> 80 MiB, v7x (64 MiB) -> 40 MiB."""
    cap = 64 * 1024 * 1024
    try:
        cap = int(getattr(pltpu.get_tpu_info(), "vmem_capacity_bytes", cap))
    except Exception:
        pass
    return min(cap * 5 // 8, 96 * 1024 * 1024)


def _choose_batch_tile(B, Lp, H, in_itemsize, mask_itemsize, budget):
    """Largest batch tile whose double-buffered blocks + in-kernel f32
    intermediates fit the VMEM budget, counting lane padding of the minor
    dims, with >= 2 grid steps when B >= 16 (v7x megacore)."""
    Hp = _round_up(H, 128)
    inputs = 3 * Lp * Hp * in_itemsize * 2          # M1/M2/M3, double-buffered
    maskb = 8 * Lp * mask_itemsize * 2              # (tb,1,L) sublane-padded
    outb = 8 * Lp * 4 * 2                           # (tb,2,L) f32, sublane-padded
    tmps = 5 * 8 * Lp * 4                           # logits/masked/exp/result/keep
    per_row = inputs + maskb + outb + tmps
    rows = max(1, int(budget * 0.9) // per_row)
    tb = B if rows >= B else max(8, (rows // 8) * 8)
    if B >= 16:
        # Guarantee >= 2 "parallel" grid steps so both v7x TensorCores work.
        tb = min(tb, max(8, (pl.cdiv(B, 2) // 8) * 8))
    return min(tb, B)


def qanet_output(M1, M2, M3, mask, w1, w2, *, tb=None):
    """M1/M2/M3: (B, L, H); mask: (B, L); w1/w2: (2H,) -> (log_p1, log_p2), each (B, L)."""
    B, L, H = M1.shape
    in_dtype = M1.dtype
    in_itemsize = jnp.dtype(in_dtype).itemsize

    if mask.dtype == jnp.bool_:
        mask = mask.astype(jnp.int32)
    mask3 = mask.reshape(B, 1, L)                   # DMA'd in its native dtype
    mask_itemsize = jnp.dtype(mask3.dtype).itemsize

    # Pad the sequence axis to a multiple of 128: lane-dense softmax + stores.
    Lp = _round_up(L, 128)
    if Lp != L:
        pad = Lp - L
        M1 = jnp.pad(M1, ((0, 0), (0, pad), (0, 0)))
        M2 = jnp.pad(M2, ((0, 0), (0, pad), (0, 0)))
        M3 = jnp.pad(M3, ((0, 0), (0, pad), (0, 0)))
        mask3 = jnp.pad(mask3, ((0, 0), (0, 0), (0, pad)))  # pad cols masked out

    # Per-input (2, H) weight operands, kept in the input dtype (bf16 stays
    # bf16 end-to-end into the MXU; accumulation is f32 in-kernel):
    #   M1 contributes to both heads, M2 only to head 1, M3 only to head 2.
    zeros_h = jnp.zeros((H,), dtype=in_dtype)
    w1 = w1.astype(in_dtype)
    w2 = w2.astype(in_dtype)
    W = jnp.stack([
        jnp.stack([w1[:H], w2[:H]], axis=0),
        jnp.stack([w1[H:], zeros_h], axis=0),
        jnp.stack([zeros_h, w2[H:]], axis=0),
    ], axis=0)                                      # (3, 2, H)

    budget = _vmem_budget_bytes()
    if tb is None:
        tb = _choose_batch_tile(B, Lp, H, in_itemsize, mask_itemsize, budget)
    tb = min(tb, B)

    grid = (pl.cdiv(B, tb),)

    cost = pl.CostEstimate(
        flops=int(8 * B * Lp * H + 12 * B * Lp),
        transcendentals=int(2 * B * Lp + 2 * B),
        bytes_accessed=int(3 * B * Lp * H * in_itemsize
                           + B * Lp * mask_itemsize
                           + 2 * B * Lp * 4
                           + W.size * jnp.dtype(in_dtype).itemsize),
    )

    out = pl.pallas_call(
        output_kernel,
        grid=grid,
        in_specs=[
            pl.BlockSpec((tb, Lp, H), lambda i: (i, 0, 0)),   # M1
            pl.BlockSpec((tb, Lp, H), lambda i: (i, 0, 0)),   # M2
            pl.BlockSpec((tb, Lp, H), lambda i: (i, 0, 0)),   # M3
            pl.BlockSpec((tb, 1, Lp), lambda i: (i, 0, 0)),   # mask
            pl.BlockSpec((3, 2, H), lambda i: (0, 0, 0)),     # weights
        ],
        out_specs=pl.BlockSpec((tb, 2, Lp), lambda i: (i, 0, 0)),
        out_shape=jax.ShapeDtypeStruct((B, 2, Lp), jnp.float32),
        compiler_params=pltpu.CompilerParams(
            dimension_semantics=("parallel",),
            vmem_limit_bytes=int(budget)),
        cost_estimate=cost,
    )(M1, M2, M3, mask3, W)

    log_p1 = out[:, 0, :L]
    log_p2 = out[:, 1, :L]
    return log_p1, log_p2


def _reference(M1, M2, M3, mask, w1, w2):
    """Pure-JAX reference matching the PyTorch module (exact f32 VPU reduce)."""
    X1 = jnp.concatenate([M1, M2], axis=-1).astype(jnp.float32)
    X2 = jnp.concatenate([M1, M3], axis=-1).astype(jnp.float32)
    maskf = mask.astype(jnp.float32)

    def one(X, w):
        logits = jnp.sum(X * w.astype(jnp.float32), axis=-1)
        masked = maskf * logits + (1.0 - maskf) * NEG_INF
        return jax.nn.log_softmax(masked, axis=-1)

    return one(X1, w1), one(X2, w2)


if __name__ == "__main__":
    B, L, H = 16, 120, 32          # L=120 exercises the pad-to-128 path
    key = jax.random.PRNGKey(0)
    k1, k2, k3, k4, k5 = jax.random.split(key, 5)

    M1 = jax.random.normal(k1, (B, L, H), dtype=jnp.float32)
    M2 = jax.random.normal(k2, (B, L, H), dtype=jnp.float32)
    M3 = jax.random.normal(k3, (B, L, H), dtype=jnp.float32)

    # Valid-length mask: 1.0 for real tokens, 0.0 for padding (varied lengths).
    lengths = jnp.maximum(1, L - 9 * jnp.arange(B, dtype=jnp.int32))
    mask = (jnp.arange(L)[None, :] < lengths[:, None]).astype(jnp.float32)

    # FeedForward(hidden*2, 1, relu=False, bias=False): xavier_uniform_ init,
    # weight shape (out=1, in=2H) -> flattened to (2H,).
    fan_in, fan_out = 2 * H, 1
    bound = math.sqrt(6.0 / (fan_in + fan_out))
    w1 = jax.random.uniform(k4, (2 * H,), minval=-bound, maxval=bound,
                            dtype=jnp.float32)
    w2 = jax.random.uniform(k5, (2 * H,), minval=-bound, maxval=bound,
                            dtype=jnp.float32)

    # Auto tile: B=16 -> tb=8 -> grid=(2,), the batch-parallel path is exercised.
    log_p1, log_p2 = qanet_output(M1, M2, M3, mask, w1, w2)
    jax.block_until_ready((log_p1, log_p2))

    ref_p1, ref_p2 = _reference(M1, M2, M3, mask, w1, w2)
    assert log_p1.shape == (B, L) and log_p2.shape == (B, L)
    # Tolerance accommodates MXU f32 emulation on the logits; masked positions
    # (~-1e30) are covered by rtol.
    assert jnp.allclose(log_p1, ref_p1, atol=1e-3, rtol=1e-3)
    assert jnp.allclose(log_p2, ref_p2, atol=1e-3, rtol=1e-3)

    print("KERNEL_OK")
</pallas_src>

<mosaic_0001>
module attributes {stable_mosaic.version = 11 : i64} {
  func.func @output_kernel(%arg0: i32, %arg1: memref<8x128x32xf32, #tpu.memory_space<vmem>>, %arg2: memref<8x128x32xf32, #tpu.memory_space<vmem>>, %arg3: memref<8x128x32xf32, #tpu.memory_space<vmem>>, %arg4: memref<8x1x128xf32, #tpu.memory_space<vmem>>, %arg5: memref<3x2x32xf32, #tpu.memory_space<vmem>>, %arg6: memref<8x2x128xf32, #tpu.memory_space<vmem>>) attributes {dimension_semantics = [#tpu.dimension_semantics<parallel>], iteration_bounds = array<i64: 2>, scalar_prefetch = 0 : i64, scratch_operands = 0 : i64, tpu.core_type = #tpu.core_type<tc>, window_params = [{transform_indices = @transform_0, window_bounds = array<i64: 8, 128, 32>}, {transform_indices = @transform_1, window_bounds = array<i64: 8, 128, 32>}, {transform_indices = @transform_2, window_bounds = array<i64: 8, 128, 32>}, {transform_indices = @transform_3, window_bounds = array<i64: 8, 1, 128>}, {pipeline_mode = #tpu.pipeline_mode<synchronous>, transform_indices = @transform_4, window_bounds = array<i64: 3, 2, 32>}, {transform_indices = @transform_5, window_bounds = array<i64: 8, 2, 128>}]} {
    %c0 = arith.constant 0 : index
    %c0_0 = arith.constant 0 : index
    %c0_1 = arith.constant 0 : index
    %0 = vector.load %arg5[%c0, %c0_0, %c0_1] : memref<3x2x32xf32, #tpu.memory_space<vmem>>, vector<3x2x32xf32>
    %1 = vector.extract_strided_slice %0 {offsets = [0, 0, 0], sizes = [1, 2, 32], strides = [1, 1, 1]} : vector<3x2x32xf32> to vector<1x2x32xf32>
    %2 = vector.shape_cast %1 : vector<1x2x32xf32> to vector<2x32xf32>
    %3 = vector.shape_cast %2 : vector<2x32xf32> to vector<1x2x32xf32>
    %4 = vector.shape_cast %3 : vector<1x2x32xf32> to vector<1x2x32xf32>
    %5 = vector.broadcast %4 : vector<1x2x32xf32> to vector<8x2x32xf32>
    %c0_2 = arith.constant 0 : index
    %c0_3 = arith.constant 0 : index
    %c0_4 = arith.constant 0 : index
    %6 = vector.load %arg1[%c0_2, %c0_3, %c0_4] : memref<8x128x32xf32, #tpu.memory_space<vmem>>, vector<8x128x32xf32>
    "tpu.trace_start"() <{level = 10 : i32, message = "bkh,blh->bkl"}> : () -> ()
    %cst = arith.constant dense<0.000000e+00> : vector<8x2x128xf32>
    %7 = tpu.matmul %5, %6, %cst {dimension_numbers = #tpu.dot_dimension_numbers<[2], [2], [1], [1], [0, 0, 0, 1, 1, 1], [0], [0]>, precision = #tpu.contract_precision<fp32>} : vector<8x2x32xf32>, vector<8x128x32xf32>, vector<8x2x128xf32> -> vector<8x2x128xf32>
    "tpu.trace_stop"() : () -> ()
    %8 = vector.extract_strided_slice %0 {offsets = [1, 0, 0], sizes = [1, 2, 32], strides = [1, 1, 1]} : vector<3x2x32xf32> to vector<1x2x32xf32>
    %9 = vector.shape_cast %8 : vector<1x2x32xf32> to vector<2x32xf32>
    %10 = vector.shape_cast %9 : vector<2x32xf32> to vector<1x2x32xf32>
    %11 = vector.shape_cast %10 : vector<1x2x32xf32> to vector<1x2x32xf32>
    %12 = vector.broadcast %11 : vector<1x2x32xf32> to vector<8x2x32xf32>
    %c0_5 = arith.constant 0 : index
    %c0_6 = arith.constant 0 : index
    %c0_7 = arith.constant 0 : index
    %13 = vector.load %arg2[%c0_5, %c0_6, %c0_7] : memref<8x128x32xf32, #tpu.memory_space<vmem>>, vector<8x128x32xf32>
    "tpu.trace_start"() <{level = 10 : i32, message = "bkh,blh->bkl"}> : () -> ()
    %cst_8 = arith.constant dense<0.000000e+00> : vector<8x2x128xf32>
    %14 = tpu.matmul %12, %13, %cst_8 {dimension_numbers = #tpu.dot_dimension_numbers<[2], [2], [1], [1], [0, 0, 0, 1, 1, 1], [0], [0]>, precision = #tpu.contract_precision<fp32>} : vector<8x2x32xf32>, vector<8x128x32xf32>, vector<8x2x128xf32> -> vector<8x2x128xf32>
    "tpu.trace_stop"() : () -> ()
    %15 = arith.addf %7, %14 : vector<8x2x128xf32>
    %16 = vector.extract_strided_slice %0 {offsets = [2, 0, 0], sizes = [1, 2, 32], strides = [1, 1, 1]} : vector<3x2x32xf32> to vector<1x2x32xf32>
    %17 = vector.shape_cast %16 : vector<1x2x32xf32> to vector<2x32xf32>
    %18 = vector.shape_cast %17 : vector<2x32xf32> to vector<1x2x32xf32>
    %19 = vector.shape_cast %18 : vector<1x2x32xf32> to vector<1x2x32xf32>
    %20 = vector.broadcast %19 : vector<1x2x32xf32> to vector<8x2x32xf32>
    %c0_9 = arith.constant 0 : index
    %c0_10 = arith.constant 0 : index
    %c0_11 = arith.constant 0 : index
    %21 = vector.load %arg3[%c0_9, %c0_10, %c0_11] : memref<8x128x32xf32, #tpu.memory_space<vmem>>, vector<8x128x32xf32>
    "tpu.trace_start"() <{level = 10 : i32, message = "bkh,blh->bkl"}> : () -> ()
    %cst_12 = arith.constant dense<0.000000e+00> : vector<8x2x128xf32>
    %22 = tpu.matmul %20, %21, %cst_12 {dimension_numbers = #tpu.dot_dimension_numbers<[2], [2], [1], [1], [0, 0, 0, 1, 1, 1], [0], [0]>, precision = #tpu.contract_precision<fp32>} : vector<8x2x32xf32>, vector<8x128x32xf32>, vector<8x2x128xf32> -> vector<8x2x128xf32>
    "tpu.trace_stop"() : () -> ()
    %23 = arith.addf %15, %22 : vector<8x2x128xf32>
    %c0_13 = arith.constant 0 : index
    %c0_14 = arith.constant 0 : index
    %c0_15 = arith.constant 0 : index
    %24 = vector.load %arg4[%c0_13, %c0_14, %c0_15] : memref<8x1x128xf32, #tpu.memory_space<vmem>>, vector<8x1x128xf32>
    %cst_16 = arith.constant 0.000000e+00 : f32
    %25 = vector.broadcast %cst_16 : f32 to vector<8x1x128xf32>
    %26 = arith.cmpf one, %24, %25 : vector<8x1x128xf32>
    %cst_17 = arith.constant -1.000000e+30 : f32
    %27 = vector.shape_cast %26 : vector<8x1x128xi1> to vector<8x1x128xi1>
    %28 = vector.broadcast %27 : vector<8x1x128xi1> to vector<8x2x128xi1>
    %29 = vector.broadcast %cst_17 : f32 to vector<8x2x128xf32>
    %30 = arith.select %28, %23, %29 : vector<8x2x128xi1>, vector<8x2x128xf32>
    %cst_18 = arith.constant dense<0xFF800000> : vector<8x2xf32>
    %31 = vector.multi_reduction <maximumf>, %30, %cst_18 [2] : vector<8x2x128xf32> to vector<8x2xf32>
    %32 = vector.shape_cast %31 : vector<8x2xf32> to vector<8x2x1xf32>
    %33 = vector.broadcast %32 : vector<8x2x1xf32> to vector<8x2x128xf32>
    %34 = arith.subf %30, %33 : vector<8x2x128xf32>
    %35 = math.exp %34 : vector<8x2x128xf32>
    %cst_19 = arith.constant dense<0.000000e+00> : vector<8x2xf32>
    %36 = vector.multi_reduction <add>, %35, %cst_19 [2] : vector<8x2x128xf32> to vector<8x2xf32>
    %37 = vector.shape_cast %36 : vector<8x2xf32> to vector<8x2x1xf32>
    %38 = math.log %37 : vector<8x2x1xf32>
    %39 = vector.broadcast %38 : vector<8x2x1xf32> to vector<8x2x128xf32>
    %40 = arith.subf %34, %39 : vector<8x2x128xf32>
    %c0_20 = arith.constant 0 : index
    %c0_21 = arith.constant 0 : index
    %c0_22 = arith.constant 0 : index
    %41 = vector.load %arg6[%c0_20, %c0_21, %c0_22] : memref<8x2x128xf32, #tpu.memory_space<vmem>>, vector<8x2x128xf32>
    tpu.vector_store %arg6[%c0_20, %c0_21, %c0_22], %40 {strides = array<i32>} : memref<8x2x128xf32, #tpu.memory_space<vmem>>, vector<8x2x128xf32>,
    return
  }
  func.func @transform_0(%arg0: i32) -> (i32, i32, i32) {
    %c0_i32 = arith.constant 0 : i32
    %c0_i32_0 = arith.constant 0 : i32
    %c0_i32_1 = arith.constant 0 : i32
    return %arg0, %c0_i32, %c0_i32_0 : i32, i32, i32
  }
  func.func @transform_1(%arg0: i32) -> (i32, i32, i32) {
    %c0_i32 = arith.constant 0 : i32
    %c0_i32_0 = arith.constant 0 : i32
    %c0_i32_1 = arith.constant 0 : i32
    return %arg0, %c0_i32, %c0_i32_0 : i32, i32, i32
  }
  func.func @transform_2(%arg0: i32) -> (i32, i32, i32) {
    %c0_i32 = arith.constant 0 : i32
    %c0_i32_0 = arith.constant 0 : i32
    %c0_i32_1 = arith.constant 0 : i32
    return %arg0, %c0_i32, %c0_i32_0 : i32, i32, i32
  }
  func.func @transform_3(%arg0: i32) -> (i32, i32, i32) {
    %c0_i32 = arith.constant 0 : i32
    %c0_i32_0 = arith.constant 0 : i32
    %c0_i32_1 = arith.constant 0 : i32
    return %arg0, %c0_i32, %c0_i32_0 : i32, i32, i32
  }
  func.func @transform_4(%arg0: i32) -> (i32, i32, i32) {
    %c0_i32 = arith.constant 0 : i32
    %c0_i32_0 = arith.constant 0 : i32
    %c0_i32_1 = arith.constant 0 : i32
    %c0_i32_2 = arith.constant 0 : i32
    return %c0_i32, %c0_i32_0, %c0_i32_1 : i32, i32, i32
  }
  func.func @transform_5(%arg0: i32) -> (i32, i32, i32) {
    %c0_i32 = arith.constant 0 : i32
    %c0_i32_0 = arith.constant 0 : i32
    %c0_i32_1 = arith.constant 0 : i32
    return %arg0, %c0_i32, %c0_i32_0 : i32, i32, i32
  }
}

</mosaic_0001>

<bundles_post_ra>
// kernel: tpu_custom_call.1
= control target key start
LH: loop header
LB: loop body
LE: loop exit
PB: predicated region body
PF: predicated region fallthrough
CT: control target
= control target key end

     0   :  { %10 = vsyncpa [#allocation3], 0  ;;  %s39025_s0 = inlined_call_operand.vmem [shape: f32[16,128,32], index: 0, kind: input, shape index: {}]   ;;  %s39026_s1 = inlined_call_operand.vmem [shape: f32[16,128,32], index: 1, kind: input, shape index: {}]   ;;  %s39027_s2 = inlined_call_operand.vmem [shape: f32[16,128,32], index: 2, kind: input, shape index: {}]   ;;  %s39028_s3 = inlined_call_operand.vmem [shape: f32[16,1,128], index: 3, kind: input, shape index: {}]   ;;  %s39029_s4 = inlined_call_operand.vmem [shape: f32[3,2,32], index: 4, kind: input, shape index: {}]   ;;  %s39030_s5 = inlined_call_operand.hbm [shape: f32[16,2,128], index: 5, kind: output, shape index: {}]  }
   0x1   :  { %12 = vsyncpa [#allocation3 + $0x1], 0  ;;  %s28943_s18 = smov 0   ;;  %s28945_s19 = smov 0  }
   0x2   :  { %s28947_s20 = smov 0   ;;  %s28949_s21 = smov 0  }
   0x3 LB: > { %s28964_s22 = sadd.s32 4294967295, %s28904_s21   ;;  %s17525_s23 = sadd.s32 4294967294, %s28904_s21   ;;  %s28904_s21 = sphi %s28949_s21, %s40607_s21   ;;  %s28900_s20 = sphi %s28947_s20, %s40606_s20   ;;  %s28896_s19 = sphi %s28945_s19, %s40605_s19   ;;  %s28892_s18 = sphi %s28943_s18, %s40604_s18  }
   0x4   : > { %s28968_s24 = sadd.s32 1, %s28904_s21   ;;  %s150_s25 = sadd.s32 1, %s28900_s20 }
   0x5   : > { %s147_s26 = ssub.s32 %s28904_s21, %s28968_s24  ;;  %p160_p0 = scmp.ne.s32.totalorder %s28900_s20, %s28896_s19 }
   0x6   : > { %p148_p1 = scmp.eq.s32.totalorder %s147_s26, 0  ;;  %p161_p2 = scmp.eq.s32.totalorder %s28964_s22, 1 }
   0x7   : > { %p166_p3 = scmp.ne.s32.totalorder %s28896_s19, %s28892_s18  ;;  %p167_p4 = scmp.eq.s32.totalorder %s17525_s23, 1 }
   0x8   : > { %s28979_s27 = scalar_select %p148_p1, %s28900_s20, %s150_s25  }
   0x9   : > { %p28981_p5 = por %p161_p2, %p160_p0  ;;  %p28985_p6 = por %p167_p4, %p166_p3 }
   0xa   : > { %p17528_p7 = scmp.ge.s32.totalorder %s28904_s21, 1  ;;  %p226_p8 = scmp.lt.s32.totalorder %s28904_s21, 3 }
   0xc   : > { %p227_p9 = pnand %p17528_p7, %p226_p8 }
   0xe   : > { %230 = sbr.rel (%p227_p9) target bundleno = 5185 (0x1441), region = 40 }
  0x15   : > { %s17530_s30 = sshll.u32 %s28964_s22, 3  ;;  %v39040_v0 = vmov 0.0|0.0   ;;  %vm28907_vm0 = vmmov 0   ;;  %v39031_v1 = vmov 0.0   ;;  %vm557_vm1 = vcmask 261120   ;;  %s17548_s12 = sshll.u32 %s28964_s22, 8 }
  0x16   : > { %25037 = vmatprep.subr.bf16.mxu0 %v39040_v0  ;;  %25181 = vmatprep.subr.bf16.mxu1 %v39040_v0  ;;  %p272_p10 = scmp.lt.s32.totalorder %s17530_s30, 15  ;;  %vm17311_vm5 = vcmask 1041408   ;;  %s38977_s16 = scalar_lea.hbm %s39030_s5, %s17548_s12 }
  0x17   : > { %20029 = vmatprep.mubr.msk.f32.mxu0 %vm28907_vm0, %v39031_v1  ;;  %20239 = vmatprep.mubr.msk.f32.mxu1 %vm28907_vm0, %v39031_v1  ;;  %s28910_s23 = smov [#allocation2]  }
  0x18   : > { %s40609_s30 = smov (!%p272_p10, %s17530_s30), 15 }
  0x19   : > { %s29001_s6 = sshll.u32 %s40609_s30, 7 }
  0x1a   : > { %s29007_s9 = scalar_lea.vmem %s39026_s1, %s29001_s6  ;;  %s32259_s14 = scalar_lea.vmem %s39025_s0, %s29001_s6 }
  0x1b   : > { %v429_v2 = vld [vmem:[%s29007_s9] sm:$0xff]  ;;  %v430_v3 = vld [vmem:[%s29007_s9 + $0x8] sm:$0xff]  ;;  %v431_v9 = vld [vmem:[%s29007_s9 + $0x10] sm:$0xff]  ;;  %s35561_s25 = scalar_lea.vmem %s39027_s2, %s29001_s6 }
  0x1c   : > { %v445_v4 = vld [vmem:[%s29007_s9 + $0x80] sm:$0xff]  ;;  %v29013_v5 = vsel %vm557_vm1, %v429_v2, 0  ;;  %v29016_v6 = vsel %vm557_vm1, %v430_v3, 0  ;;  %v446_v7 = vld [vmem:[%s29007_s9 + $0x88] sm:$0xff]  ;;  %v432_v10 = vld [vmem:[%s29007_s9 + $0x18] sm:$0xff]  ;;  %v29033_v17 = vsel %vm557_vm1, %v431_v9, 0 }
  0x1d   : > { %v29020_v8 = vsel %vm557_vm1, %v445_v4, 0  ;;  %v610_v11 = vand.u32 4294901760, %v29013_v5  ;;  %v613_v12 = vand.u32 4294901760, %v29016_v6  ;;  %v29027_v13 = vsel %vm557_vm1, %v446_v7, 0  ;;  %v447_v15 = vld [vmem:[%s29007_s9 + $0x90] sm:$0xff]  ;;  %v448_v19 = vld [vmem:[%s29007_s9 + $0x98] sm:$0xff] }
  0x1e   : > { %v1299_v14 = vand.u32 4294901760, %v29020_v8  ;;  %v1302_v16 = vand.u32 4294901760, %v29027_v13  ;;  %v29036_v18 = vsel %vm557_vm1, %v432_v10, 0  ;;  %v29046_v21 = vsel %vm557_vm1, %v447_v15, 0  ;;  %v433_v28 = vld [vmem:[%s29007_s9 + $0x20] sm:$0xff]  ;;  %v434_v29 = vld [vmem:[%s29007_s9 + $0x28] sm:$0xff] }
  0x1f   : > { %v29043_v20 = vpack.c.bf16 %v613_v12, %v610_v11  ;;  %v616_v23 = vand.u32 4294901760, %v29033_v17  ;;  %v619_v24 = vand.u32 4294901760, %v29036_v18  ;;  %v29058_v25 = vsel %vm557_vm1, %v448_v19, 0  ;;  %v449_v30 = vld [vmem:[%s29007_s9 + $0xa0] sm:$0xff]  ;;  %v450_v31 = vld [vmem:[%s29007_s9 + $0xa8] sm:$0xff]  ;;  %v435_v42 = vld [vmem:[%s29007_s9 + $0x30] sm:$0xff] }
  0x20   : > { %v29052_v22 = vpack.c.bf16 %v1302_v16, %v1299_v14  ;;  %v1305_v26 = vand.u32 4294901760, %v29046_v21  ;;  %v1308_v27 = vand.u32 4294901760, %v29058_v25  ;;  %v29082_v34 = vsel %vm557_vm1, %v433_v28, 0  ;;  %v436_v43 = vld [vmem:[%s29007_s9 + $0x38] sm:$0xff]  ;;  %v451_v44 = vld [vmem:[%s29007_s9 + $0xb0] sm:$0xff]  ;;  %v437_v56 = vld [vmem:[%s29007_s9 + $0x40] sm:$0xff] }
  0x21   : > { %25039 = vmatpush3.bf16.xpose.msra.mxu0 %v29043_v20  ;;  %v29073_v32 = vpack.c.bf16 %v619_v24, %v616_v23  ;;  %v29085_v35 = vsel %vm557_vm1, %v434_v29, 0  ;;  %v29088_v36 = vsel %vm557_vm1, %v449_v30, 0  ;;  %v29091_v37 = vsel %vm557_vm1, %v450_v31, 0  ;;  %v452_v45 = vld [vmem:[%s29007_s9 + $0xb8] sm:$0xff]  ;;  %v438_v57 = vld [vmem:[%s29007_s9 + $0x48] sm:$0xff]  ;;  %v453_v58 = vld [vmem:[%s29007_s9 + $0xc0] sm:$0xff] }
  0x22   : > { %25183 = vmatpush3.bf16.xpose.msra.mxu1 %v29052_v22  ;;  %25040 = vmatprep.subr.bf16.mxu0 %v39040_v0  ;;  %v29079_v33 = vpack.c.bf16 %v1308_v27, %v1305_v26  ;;  %v622_v38 = vand.u32 4294901760, %v29082_v34  ;;  %v625_v39 = vand.u32 4294901760, %v29085_v35  ;;  %v1311_v40 = vand.u32 4294901760, %v29088_v36  ;;  %v454_v59 = vld [vmem:[%s29007_s9 + $0xc8] sm:$0xff]  ;;  %v299_v4 = vld [vmem:[%s39029_s4 + $0x2] sm:$0x3] }
  0x23   : > { %25184 = vmatprep.subr.bf16.mxu1 %v39040_v0  ;;  %v1314_v41 = vand.u32 4294901760, %v29091_v37  ;;  %v29118_v48 = vsel %vm557_vm1, %v435_v42, 0  ;;  %v29121_v49 = vsel %vm557_vm1, %v436_v43, 0  ;;  %v29124_v50 = vsel %vm557_vm1, %v451_v44, 0  ;;  %v439_v28 = vld [vmem:[%s29007_s9 + $0x50] sm:$0xff]  ;;  %v440_v29 = vld [vmem:[%s29007_s9 + $0x58] sm:$0xff] }
  0x24   : > { %v29109_v46 = vpack.c.bf16 %v625_v39, %v622_v38  ;;  %v29127_v51 = vsel %vm557_vm1, %v452_v45, 0  ;;  %v628_v52 = vand.u32 4294901760, %v29118_v48  ;;  %v39039_v53 = vand.u32 4294901760, %v29121_v49  ;;  %v455_v30 = vld [vmem:[%s29007_s9 + $0xd0] sm:$0xff]  ;;  %v456_v31 = vld [vmem:[%s29007_s9 + $0xd8] sm:$0xff] }
  0x25   : > { %v29115_v47 = vpack.c.bf16 %v1314_v41, %v1311_v40  ;;  %v39038_v54 = vand.u32 4294901760, %v29124_v50  ;;  %v39037_v55 = vand.u32 4294901760, %v29127_v51  ;;  %v29154_v62 = vsel %vm557_vm1, %v437_v56, 0 }
  0x26   : > { %v29145_v60 = vpack.c.bf16 %v39039_v53, %v628_v52  ;;  %v29157_v63 = vsel %vm557_vm1, %v438_v57, 0  ;;  %v29160_v2 = vsel %vm557_vm1, %v453_v58, 0  ;;  %v29163_v3 = vsel %vm557_vm1, %v454_v59, 0 }
  0x27   : > { %v29151_v61 = vpack.c.bf16 %v39037_v55, %v39038_v54  ;;  %v39036_v7 = vand.u32 4294901760, %v29154_v62  ;;  %v39035_v9 = vand.u32 4294901760, %v29157_v63  ;;  %v39034_v10 = vand.u32 4294901760, %v29160_v2 }
  0x28   : > { %v39033_v15 = vand.u32 4294901760, %v29163_v3  ;;  %v559_v19 = vsel %vm557_vm1, %v299_v4, 0  ;;  %v592_v45 = vsel %vm557_vm1, %v439_v28, 0  ;;  %v29197_v56 = vsel %vm557_vm1, %v440_v29, 0 }
  0x29   : > { %25042 = vmatpush3.bf16.xpose.msra.mxu0 %v29073_v32  ;;  %v29185_v42 = vpack.c.bf16 %v39035_v9, %v39036_v7  ;;  %v29187_v43 = vand.u32 4294901760, %v559_v19  ;;  %v29200_v57 = vsel %vm557_vm1, %v455_v30, 0  ;;  %v29203_v58 = vsel %vm557_vm1, %v456_v31, 0  ;;  %v441_v30 = vld [vmem:[%s29007_s9 + $0x60] sm:$0xff]  ;;  %v442_v31 = vld [vmem:[%s29007_s9 + $0x68] sm:$0xff] }
  0x2a   : > { %25186 = vmatpush3.bf16.xpose.msra.mxu1 %v29079_v33  ;;  %25043 = vmatprep.subr.bf16.mxu0 %v39040_v0  ;;  %v29193_v44 = vpack.c.bf16 %v39033_v15, %v39034_v10  ;;  %v640_v59 = vand.u32 4294901760, %v592_v45  ;;  %v643_v4 = vand.u32 4294901760, %v29197_v56  ;;  %v1329_v28 = vand.u32 4294901760, %v29200_v57  ;;  %v457_v15 = vld [vmem:[%s29007_s9 + $0xe0] sm:$0xff]  ;;  %v458_v10 = vld [vmem:[%s29007_s9 + $0xe8] sm:$0xff] }
  0x2b   : > { %25187 = vmatprep.subr.bf16.mxu1 %v39040_v0  ;;  %39680 = vst [vmem:[#allocation5_spill] sm:$0xff] %v29185_v42  ;;  %v29208_v1 = vsub.f32 %v559_v19, %v29187_v43  ;;  %v1332_v29 = vand.u32 4294901760, %v29203_v58  ;;  %v29222_v9 = vsub.f32 %v29013_v5, %v610_v11  ;;  %v29227_v19 = vsub.f32 %v29016_v6, %v613_v12 }
  0x2c   : > { %39681 = vst [vmem:[#allocation6_spill] sm:$0xff] %v29193_v44  ;;  %v29229_v7 = vpack.c.bf16 %v643_v4, %v640_v59  ;;  %v29237_v54 = vsub.f32 %v29020_v8, %v1299_v14  ;;  %v598_v5 = vsel %vm557_vm1, %v441_v30, 0  ;;  %v601_v11 = vsel %vm557_vm1, %v442_v31, 0 }
  0x2d   : > { %v29232_v55 = vand.u32 4294901760, %v29208_v1  ;;  %v29239_v53 = vpack.c.bf16 %v1332_v29, %v1329_v28  ;;  %v29246_v6 = vsub.f32 %v29027_v13, %v1302_v16  ;;  %v29251_v12 = vsub.f32 %v29033_v17, %v616_v23  ;;  %v443_v17 = vld [vmem:[%s29007_s9 + $0x70] sm:$0xff] }
  0x2e   : > { %39682 = vst [vmem:[#allocation7_spill] sm:$0xff] %v29229_v7  ;;  %v1290_v8 = vsel %vm557_vm1, %v458_v10, 0  ;;  %v29258_v14 = vsub.f32 %v29036_v18, %v619_v24  ;;  %v29263_v30 = vsub.f32 %v29046_v21, %v1305_v26  ;;  %v29268_v13 = vsub.f32 %v29058_v25, %v1308_v27  ;;  %v444_v18 = vld [vmem:[%s29007_s9 + $0x78] sm:$0xff] }
  0x2f   : > { %39683 = vst [vmem:[#allocation8_spill] sm:$0xff] %v29232_v55  ;;  %39684 = vst [vmem:[#allocation9_spill] sm:$0xff] %v29239_v53  ;;  %v29273_v16 = vsub.f32 %v29082_v34, %v622_v38  ;;  %v29280_v23 = vsub.f32 %v29085_v35, %v625_v39  ;;  %v29285_v21 = vsub.f32 %v29088_v36, %v1311_v40  ;;  %v646_v24 = vand.u32 4294901760, %v598_v5  ;;  %v459_v38 = vld [vmem:[%s29007_s9 + $0xf0] sm:$0xff]  ;;  %v460_v39 = vld [vmem:[%s29007_s9 + $0xf8] sm:$0xff] }
  0x30   : > { %v649_v25 = vand.u32 4294901760, %v601_v11  ;;  %v29291_v26 = vsub.f32 %v29091_v37, %v1314_v41  ;;  %v29296_v27 = vsub.f32 %v29118_v48, %v628_v52  ;;  %v39685_v34 = vmov 0.0|0.0  }
  0x31   : > { %25045 = vmatpush3.bf16.xpose.msra.mxu0 %v29109_v46  ;;  %v1338_v36 = vand.u32 4294901760, %v1290_v8  ;;  %v39686_v40 = vand.u32 4294901760, %v29121_v49  ;;  %v39687_v37 = vand.u32 4294901760, %v29124_v50  ;;  %v604_v48 = vsel %vm557_vm1, %v443_v17, 0 }
  0x32   : > { %25189 = vmatpush3.bf16.xpose.msra.mxu1 %v29115_v47  ;;  %25046 = vmatprep.subr.bf16.mxu0 %v39040_v0  ;;  %v607_v52 = vsel %vm557_vm1, %v444_v18, 0  ;;  %v39692_v18 = vand.u32 4294901760, %v29163_v3 }
  0x33   : > { %25190 = vmatprep.subr.bf16.mxu1 %v39040_v0  ;;  %v29305_v10 = vsub.f32 %v29121_v49, %v39686_v40  ;;  %v29310_v41 = vsub.f32 %v29124_v50, %v39687_v37  ;;  %v39690_v40 = vand.u32 4294901760, %v29157_v63  ;;  %v39691_v37 = vand.u32 4294901760, %v29160_v2 }
  0x35   : > { %v29328_v50 = vsub.f32 %v29157_v63, %v39690_v40  ;;  %v29333_v17 = vsub.f32 %v29160_v2, %v39691_v37  ;;  %v652_v40 = vand.u32 4294901760, %v604_v48  ;;  %v29349_v2 = vsub.f32 %v29197_v56, %v643_v4 }
  0x36   : > { %v29352_v37 = vsub.f32 %v29200_v57, %v1329_v28  ;;  %v39050_v57 = vand.u32 4294901760, %v29237_v54  ;;  %v29370_v4 = vsub.f32 %v1290_v8, %v1338_v36 }
  0x39   : > { %25048 = vmatpush3.bf16.xpose.msra.mxu0 %v29145_v60 }
  0x3a   : > { %25192 = vmatpush3.bf16.xpose.msra.mxu1 %v29151_v61  ;;  %25049 = vmatprep.subr.bf16.mxu0 %v39040_v0 }
  0x3b   : > { %25193 = vmatprep.subr.bf16.mxu1 %v39040_v0 }
  0x41   : > { %25051 = vmatpush3.bf16.xpose.msra.mxu0 %v29185_v42  ;;  %v29362_v42 = vsub.f32 %v601_v11, %v649_v25 }
  0x42   : > { %25195 = vmatpush3.bf16.xpose.msra.mxu1 %v29193_v44  ;;  %25052 = vmatprep.subr.bf16.mxu0 %v39040_v0  ;;  %v655_v44 = vand.u32 4294901760, %v607_v52 }
  0x43   : > { %25196 = vmatprep.subr.bf16.mxu1 %v39040_v0  ;;  %v1287_v0 = vsel %vm557_vm1, %v457_v15, 0  ;;  %v39688_v15 = vand.u32 4294901760, %v29127_v51 }
  0x44   : > { %v1335_v35 = vand.u32 4294901760, %v1287_v0  ;;  %v29373_v28 = vpack.c.bf16 %v655_v44, %v652_v40 }
  0x45   : > { %v29318_v31 = vsub.f32 %v29127_v51, %v39688_v15  ;;  %v29338_v51 = vsub.f32 %v29163_v3, %v39692_v18  ;;  %v29340_v15 = vpack.c.bf16 %v649_v25, %v646_v24  ;;  %v29355_v3 = vsub.f32 %v29203_v58, %v1332_v29 }
  0x46   : > { %v29346_v63 = vpack.c.bf16 %v1338_v36, %v1335_v35  ;;  %v39052_v18 = vand.u32 4294901760, %v29222_v9  ;;  %v29364_v56 = vsub.f32 %v1287_v0, %v1335_v35  ;;  %v29375_v29 = vsub.f32 %v604_v48, %v652_v40 }
  0x47   : > { %v29379_v0 = vsub.f32 %v607_v52, %v655_v44  ;;  %v1393_v48 = vsub.f32 %v29237_v54, %v39050_v57  ;;  %v39055_v44 = vand.u32 4294901760, %v29263_v30  ;;  %v39056_v57 = vand.u32 4294901760, %v29268_v13 }
  0x49   : > { %25054 = vmatpush3.bf16.xpose.msra.mxu0 %v29229_v7  ;;  %v29344_v7 = vsub.f32 %v592_v45, %v640_v59  ;;  %v39051_v59 = vand.u32 4294901760, %v29227_v19  ;;  %v1394_v52 = vand.u32 4294901760, %v1393_v48  ;;  %v1407_v48 = vsub.f32 %v29263_v30, %v39055_v44 }
  0x4a   : > { %25198 = vmatpush3.bf16.xpose.msra.mxu1 %v29239_v53  ;;  %25055 = vmatprep.subr.bf16.mxu0 %v39685_v34  ;;  %v39689_v53 = vand.u32 4294901760, %v29154_v62  ;;  %v39062_v44 = vand.u32 4294901760, %v29285_v21 }
  0x4b   : > { %25199 = vmatprep.subr.bf16.mxu1 %v39685_v34  ;;  %v711_v36 = vsub.f32 %v29227_v19, %v39051_v59 }
  0x4c   : > { %v29323_v49 = vsub.f32 %v29154_v62, %v39689_v53  ;;  %v1293_v53 = vsel %vm557_vm1, %v459_v38, 0  ;;  %v1296_v62 = vsel %vm557_vm1, %v460_v39, 0  ;;  %v29358_v38 = vsub.f32 %v598_v5, %v646_v24 }
  0x4d   : > { %v1341_v39 = vand.u32 4294901760, %v1293_v53  ;;  %v1344_v45 = vand.u32 4294901760, %v1296_v62  ;;  %v39053_v5 = vand.u32 4294901760, %v29246_v6  ;;  %v704_v24 = vsub.f32 %v29222_v9, %v39052_v18 }
  0x4f   : > { %v29381_v11 = vsub.f32 %v1293_v53, %v1341_v39  ;;  %v29388_v25 = vpack.c.bf16 %v1344_v45, %v1341_v39  ;;  %v29390_v35 = vsub.f32 %v1296_v62, %v1344_v45  ;;  %v1400_v40 = vsub.f32 %v29246_v6, %v39053_v5 }
  0x50   : > { %v693_v39 = vsub.f32 %v29208_v1, %v29232_v55  ;;  %v705_v18 = vand.u32 4294901760, %v704_v24  ;;  %v712_v53 = vand.u32 4294901760, %v711_v36  ;;  %v39057_v62 = vand.u32 4294901760, %v29251_v12 }
  0x51   : > { %25057 = vmatpush3.bf16.xpose.msra.mxu0 %v29340_v15  ;;  %v39054_v5 = vand.u32 4294901760, %v29258_v14  ;;  %v1401_v45 = vand.u32 4294901760, %v1400_v40  ;;  %v1414_v40 = vsub.f32 %v29268_v13, %v39056_v57  ;;  %v39068_v57 = vand.u32 4294901760, %v29291_v26 }
  0x52   : > { %25201 = vmatpush3.bf16.xpose.msra.mxu1 %v29346_v63  ;;  %25058 = vmatprep.subr.bf16.mxu0 %v39685_v34  ;;  %v29439_v59 = vand.u32 4294901760, %v693_v39  ;;  %v25062_v24 = vpack.c.bf16 %v712_v53, %v705_v18  ;;  %v718_v36 = vsub.f32 %v29251_v12, %v39057_v62  ;;  %v39060_v39 = vand.u32 4294901760, %v29273_v16 }
  0x53   : > { %25202 = vmatprep.subr.bf16.mxu1 %v39685_v34  ;;  %v725_v8 = vsub.f32 %v29258_v14, %v39054_v5  ;;  %v25206_v58 = vpack.c.bf16 %v1401_v45, %v1394_v52  ;;  %v39061_v5 = vand.u32 4294901760, %v29280_v23  ;;  %v1408_v52 = vand.u32 4294901760, %v1407_v48 }
  0x54   : > { %39693 = vst [vmem:[#allocation10_spill] sm:$0xff] %v29439_v59  ;;  %v719_v18 = vand.u32 4294901760, %v718_v36  ;;  %v1415_v45 = vand.u32 4294901760, %v1414_v40  ;;  %v1421_v40 = vsub.f32 %v29285_v21, %v39062_v44  ;;  %v1428_v62 = vsub.f32 %v29291_v26, %v39068_v57 }
  0x55   : > { %v726_v53 = vand.u32 4294901760, %v725_v8  ;;  %v739_v36 = vsub.f32 %v29280_v23, %v39061_v5  ;;  %v39072_v44 = vand.u32 4294901760, %v29318_v31 }
  0x56   : > { %v25209_v48 = vpack.c.bf16 %v1415_v45, %v1408_v52  ;;  %v1422_v5 = vand.u32 4294901760, %v1421_v40  ;;  %v1429_v52 = vand.u32 4294901760, %v1428_v62  ;;  %v39067_v45 = vand.u32 4294901760, %v29310_v41 }
  0x57   : > { %v25065_v8 = vpack.c.bf16 %v726_v53, %v719_v18  ;;  %v740_v18 = vand.u32 4294901760, %v739_v36  ;;  %v39065_v53 = vand.u32 4294901760, %v29296_v27 }
  0x58   : > { %v25212_v36 = vpack.c.bf16 %v1429_v52, %v1422_v5  ;;  %v1435_v62 = vsub.f32 %v29310_v41, %v39067_v45  ;;  %v39071_v52 = vand.u32 4294901760, %v29333_v17  ;;  %v39076_v45 = vand.u32 4294901760, %v29338_v51 }
  0x59   : > { %25060 = vmatpush3.bf16.xpose.msra.mxu0 %v29373_v28 }
  0x5a   : > { %25204 = vmatpush3.bf16.xpose.msra.mxu1 %v29388_v25  ;;  %25061 = vmatprep.subr.bf16.mxu0 %v39685_v34 }
  0x5b   : > { %25205 = vmatprep.subr.bf16.mxu1 %v39685_v34 }
  0x60   : > { %20030 = vmatmul.mubr.f32.vlgmr.msra.gmra.mrb[0].mxu0 %v29439_v59 }
  0x61   : > { %25063 = vmatpush3.bf16.xpose.msra.mxu0 %v25062_v24  ;;  %20240 = vmatmul.mubr.f32.vlgmr.msra.gmra.mrb[0].mxu1 %v29439_v59  ;;  %v39694_v24 = vmov 0.0  }
  0x62   : > { %25207 = vmatpush3.bf16.xpose.msra.mxu1 %v25206_v58  ;;  %25064 = vmatprep.subr.bf16.mxu0 %v39685_v34  ;;  %v732_v58 = vsub.f32 %v29273_v16, %v39060_v39  ;;  %v39066_v39 = vand.u32 4294901760, %v29305_v10 }
  0x63   : > { %25208 = vmatprep.subr.bf16.mxu1 %v39685_v34  ;;  %20064 = vmatprep.mubr.msk.f32.mxu0 %vm28907_vm0, %v39694_v24 }
  0x64   : > { %20274 = vmatprep.mubr.msk.f32.mxu1 %vm28907_vm0, %v39694_v24  ;;  %v733_v59 = vand.u32 4294901760, %v732_v58  ;;  %v753_v58 = vsub.f32 %v29305_v10, %v39066_v39  ;;  %v1436_v39 = vand.u32 4294901760, %v1435_v62  ;;  %v1456_v62 = vsub.f32 %v29338_v51, %v39076_v45 }
  0x66   : > { %v25068_v55 = vpack.c.bf16 %v740_v18, %v733_v59  ;;  %v754_v59 = vand.u32 4294901760, %v753_v58  ;;  %v39069_v18 = vand.u32 4294901760, %v29323_v49 }
  0x69   : > { %25066 = vmatpush3.bf16.xpose.msra.mxu0 %v25065_v8  ;;  %v746_v8 = vsub.f32 %v29296_v27, %v39065_v53  ;;  %v39070_v53 = vand.u32 4294901760, %v29328_v50 }
  0x6a   : > { %25210 = vmatpush3.bf16.xpose.msra.mxu1 %v25209_v48  ;;  %25067 = vmatprep.subr.bf16.mxu0 %v39685_v34  ;;  %v1442_v48 = vsub.f32 %v29318_v31, %v39072_v44 }
  0x6b   : > { %25211 = vmatprep.subr.bf16.mxu1 %v39685_v34  ;;  %v747_v40 = vand.u32 4294901760, %v746_v8  ;;  %v767_v8 = vsub.f32 %v29328_v50, %v39070_v53 }
  0x6c   : > { %v1443_v5 = vand.u32 4294901760, %v1442_v48 }
  0x6d   : > { %v25071_v57 = vpack.c.bf16 %v754_v59, %v747_v40  ;;  %v768_v40 = vand.u32 4294901760, %v767_v8  ;;  %v39073_v59 = vand.u32 4294901760, %v29344_v7 }
  0x6e   : > { %v25215_v58 = vpack.c.bf16 %v1443_v5, %v1436_v39  ;;  %v1457_v39 = vand.u32 4294901760, %v1456_v62  ;;  %v39075_v5 = vand.u32 4294901760, %v29352_v37 }
  0x71   : > { %25069 = vmatpush3.bf16.xpose.msra.mxu0 %v25068_v55  ;;  %v760_v55 = vsub.f32 %v29323_v49, %v39069_v18  ;;  %v39074_v18 = vand.u32 4294901760, %v29349_v2 }
  0x72   : > { %25213 = vmatpush3.bf16.xpose.msra.mxu1 %v25212_v36  ;;  %25070 = vmatprep.subr.bf16.mxu0 %v39685_v34  ;;  %v1449_v36 = vsub.f32 %v29333_v17, %v39071_v52  ;;  %v39080_v52 = vand.u32 4294901760, %v29355_v3 }
  0x73   : > { %25214 = vmatprep.subr.bf16.mxu1 %v39685_v34  ;;  %v761_v48 = vand.u32 4294901760, %v760_v55  ;;  %v781_v55 = vsub.f32 %v29349_v2, %v39074_v18 }
  0x74   : > { %v1450_v53 = vand.u32 4294901760, %v1449_v36  ;;  %v1470_v36 = vsub.f32 %v29355_v3, %v39080_v52 }
  0x75   : > { %v25074_v44 = vpack.c.bf16 %v768_v40, %v761_v48  ;;  %v782_v48 = vand.u32 4294901760, %v781_v55  ;;  %v39077_v40 = vand.u32 4294901760, %v29358_v38 }
  0x76   : > { %v25218_v8 = vpack.c.bf16 %v1457_v39, %v1450_v53  ;;  %v1471_v53 = vand.u32 4294901760, %v1470_v36  ;;  %v39079_v39 = vand.u32 4294901760, %v29364_v56 }
  0x79   : > { %25072 = vmatpush3.bf16.xpose.msra.mxu0 %v25071_v57  ;;  %v774_v57 = vsub.f32 %v29344_v7, %v39073_v59  ;;  %v39078_v59 = vand.u32 4294901760, %v29362_v42 }
  0x7a   : > { %25216 = vmatpush3.bf16.xpose.msra.mxu1 %v25215_v58  ;;  %25073 = vmatprep.subr.bf16.mxu0 %v39685_v34  ;;  %v1463_v58 = vsub.f32 %v29352_v37, %v39075_v5  ;;  %v1483_v5 = vand.u32 4294901760, %v29370_v4 }
  0x7b   : > { %25217 = vmatprep.subr.bf16.mxu1 %v39685_v34  ;;  %v775_v62 = vand.u32 4294901760, %v774_v57  ;;  %v795_v57 = vsub.f32 %v29362_v42, %v39078_v59 }
  0x7c   : > { %v1464_v18 = vand.u32 4294901760, %v1463_v58  ;;  %v1484_v58 = vsub.f32 %v29370_v4, %v1483_v5 }
  0x7d   : > { %v25077_v45 = vpack.c.bf16 %v782_v48, %v775_v62  ;;  %v796_v62 = vand.u32 4294901760, %v795_v57  ;;  %v39081_v48 = vand.u32 4294901760, %v29375_v29 }
  0x7e   : > { %v25221_v55 = vpack.c.bf16 %v1471_v53, %v1464_v18  ;;  %v1485_v18 = vand.u32 4294901760, %v1484_v58  ;;  %v1490_v53 = vand.u32 4294901760, %v29381_v11 }
  0x81   : > { %25075 = vmatpush3.bf16.xpose.msra.mxu0 %v25074_v44  ;;  %v788_v44 = vsub.f32 %v29358_v38, %v39077_v40  ;;  %v39082_v40 = vand.u32 4294901760, %v29379_v0 }
  0x82   : > { %25219 = vmatpush3.bf16.xpose.msra.mxu1 %v25218_v8  ;;  %25076 = vmatprep.subr.bf16.mxu0 %v39685_v34  ;;  %v1477_v8 = vsub.f32 %v29364_v56, %v39079_v39  ;;  %v1497_v39 = vand.u32 4294901760, %v29390_v35 }
  0x83   : > { %25220 = vmatprep.subr.bf16.mxu1 %v39685_v34  ;;  %v789_v36 = vand.u32 4294901760, %v788_v44  ;;  %v809_v44 = vsub.f32 %v29379_v0, %v39082_v40 }
  0x84   : > { %v1478_v59 = vand.u32 4294901760, %v1477_v8  ;;  %v1498_v8 = vsub.f32 %v29390_v35, %v1497_v39 }
  0x85   : > { %v25080_v52 = vpack.c.bf16 %v796_v62, %v789_v36  ;;  %v810_v36 = vand.u32 4294901760, %v809_v44  ;;  %v39700_v44 = vpack.c.bf16 %v29291_v26, %v29285_v21 }
  0x86   : > { %v25224_v57 = vpack.c.bf16 %v1485_v18, %v1478_v59  ;;  %v39696_v18 = vpack.c.bf16 %v29246_v6, %v29237_v54 }
  0x89   : > { %25078 = vmatpush3.bf16.xpose.msra.mxu0 %v25077_v45  ;;  %v802_v45 = vsub.f32 %v29375_v29, %v39081_v48  ;;  %v1499_v48 = vand.u32 4294901760, %v1498_v8  ;;  %v39703_v8 = vpack.c.bf16 %v29328_v50, %v29323_v49 }
  0x8a   : > { %25222 = vmatpush3.bf16.xpose.msra.mxu1 %v25221_v55  ;;  %25079 = vmatprep.subr.bf16.mxu0 %v39685_v34  ;;  %v1491_v55 = vsub.f32 %v29381_v11, %v1490_v53 }
  0x8b   : > { %25223 = vmatprep.subr.bf16.mxu1 %v39685_v34  ;;  %v803_v58 = vand.u32 4294901760, %v802_v45  ;;  %v39699_v45 = vpack.c.bf16 %v29280_v23, %v29273_v16 }
  0x8c   : > { %v1492_v62 = vand.u32 4294901760, %v1491_v55  ;;  %v39702_v55 = vpack.c.bf16 %v29318_v31, %v29310_v41 }
  0x8d   : > { %v25083_v40 = vpack.c.bf16 %v810_v36, %v803_v58  ;;  %v39704_v58 = vpack.c.bf16 %v29338_v51, %v29333_v17  ;;  %v39705_v36 = vpack.c.bf16 %v29349_v2, %v29344_v7 }
  0x8e   : > { %v25227_v59 = vpack.c.bf16 %v1499_v48, %v1492_v62  ;;  %v39698_v48 = vpack.c.bf16 %v29268_v13, %v29263_v30  ;;  %v39706_v62 = vpack.c.bf16 %v29355_v3, %v29352_v37 }
  0x91   : > { %25081 = vmatpush3.bf16.xpose.msra.mxu0 %v25080_v52  ;;  %v39695_v52 = vpack.c.bf16 %v29227_v19, %v29222_v9 }
  0x92   : > { %25225 = vmatpush3.bf16.xpose.msra.mxu1 %v25224_v57  ;;  %25082 = vmatprep.subr.bf16.mxu0 %v39685_v34  ;;  %v39701_v57 = vpack.c.bf16 %v29305_v10, %v29296_v27 }
  0x93   : > { %25226 = vmatprep.subr.bf16.mxu1 %v39685_v34 }
  0x99   : > { %25084 = vmatpush3.bf16.xpose.msra.mxu0 %v25083_v40  ;;  %v39697_v40 = vpack.c.bf16 %v29258_v14, %v29251_v12 }
  0x9a   : > { %25228 = vmatpush3.bf16.xpose.msra.mxu1 %v25227_v59  ;;  %25085 = vmatprep.subr.bf16.mxu0 %v39685_v34  ;;  %v39707_v59 = vpack.c.bf16 %v29362_v42, %v29358_v38 }
  0x9b   : > { %25229 = vmatprep.subr.bf16.mxu1 %v39685_v34 }
  0xa0   : > { %20065 = vmatmul.mubr.f32.vlgmr.msra.gmra.mrb[0].mxu0 %v29187_v43 }
  0xa1   : > { %25087 = vmatpush3.bf16.xpose.msra.mxu0 %v39695_v52  ;;  %20275 = vmatmul.mubr.f32.vlgmr.msra.gmra.mrb[0].mxu1 %v29187_v43  ;;  %v39708_v52 = vpack.c.bf16 %v29370_v4, %v29364_v56  ;;  %v463_v4 = vld [vmem:[%s29007_s9 + $0x110] sm:$0xff] }
  0xa2   : > { %25231 = vmatpush3.bf16.xpose.msra.mxu1 %v39696_v18  ;;  %25088 = vmatprep.subr.bf16.mxu0 %v39685_v34  ;;  %v39709_v18 = vpack.c.bf16 %v29379_v0, %v29375_v29 }
  0xa3   : > { %25232 = vmatprep.subr.bf16.mxu1 %v39685_v34  ;;  %20099 = vmatprep.mubr.msk.f32.mxu0 %vm28907_vm0, %v39694_v24 }
  0xa4   : > { %20309 = vmatprep.mubr.msk.f32.mxu1 %vm28907_vm0, %v39694_v24 }
  0xa9   : > { %25090 = vmatpush3.bf16.xpose.msra.mxu0 %v39697_v40  ;;  %v39710_v40 = vpack.c.bf16 %v29390_v35, %v29381_v11  ;;  %v480_v11 = vld [vmem:[%s29007_s9 + $0x198] sm:$0xff]  ;;  %v29840_v35 = vsel %vm557_vm1, %v463_v4, 0 }
  0xaa   : > { %25234 = vmatpush3.bf16.xpose.msra.mxu1 %v39698_v48  ;;  %25091 = vmatprep.subr.bf16.mxu0 %v39685_v34  ;;  %v39711_v48 = vld [vmem:[#allocation5_spill] sm:$0xff] }
  0xab   : > { %25235 = vmatprep.subr.bf16.mxu1 %v39685_v34 }
  0xb1   : > { %25093 = vmatpush3.bf16.xpose.msra.mxu0 %v39699_v45  ;;  %v39712_v45 = vld [vmem:[#allocation6_spill] sm:$0xff] }
  0xb2   : > { %25237 = vmatpush3.bf16.xpose.msra.mxu1 %v39700_v44  ;;  %25094 = vmatprep.subr.bf16.mxu0 %v39685_v34  ;;  %v39713_v44 = vld [vmem:[#allocation7_spill] sm:$0xff] }
  0xb3   : > { %25238 = vmatprep.subr.bf16.mxu1 %v39685_v34 }
  0xb9   : > { %25096 = vmatpush3.bf16.xpose.msra.mxu0 %v39701_v57  ;;  %v39714_v57 = vld [vmem:[#allocation9_spill] sm:$0xff] }
  0xba   : > { %25240 = vmatpush3.bf16.xpose.msra.mxu1 %v39702_v55  ;;  %25097 = vmatprep.subr.bf16.mxu0 %v39685_v34  ;;  %v39715_v55 = vand.u32 4294901760, %v29222_v9  ;;  %v39721_v9 = vand.u32 4294901760, %v29258_v14  ;;  %v39727_v14 = vand.u32 4294901760, %v29291_v26  ;;  %v39733_v26 = vand.u32 4294901760, %v29328_v50 }
  0xbb   : > { %25241 = vmatprep.subr.bf16.mxu1 %v39685_v34  ;;  %v39739_v50 = vand.u32 4294901760, %v29355_v3  ;;  %v39744_v3 = vand.u32 4294901760, %v29379_v0  ;;  %v479_v0 = vld [vmem:[%s29007_s9 + $0x190] sm:$0xff] }
  0xc1   : > { %25099 = vmatpush3.bf16.xpose.msra.mxu0 %v39703_v8  ;;  %v39716_v8 = vand.u32 4294901760, %v29227_v19 }
  0xc2   : > { %25243 = vmatpush3.bf16.xpose.msra.mxu1 %v39704_v58  ;;  %25100 = vmatprep.subr.bf16.mxu0 %v39685_v34 }
  0xc3   : > { %25244 = vmatprep.subr.bf16.mxu1 %v39685_v34  ;;  %v25134_v58 = vpack.c.bf16 %v39716_v8, %v39715_v55  ;;  %v39724_v55 = vand.u32 4294901760, %v29273_v16  ;;  %v39725_v8 = vand.u32 4294901760, %v29280_v23  ;;  %v39730_v16 = vand.u32 4294901760, %v29310_v41 }
  0xc4   : > { %v39731_v23 = vand.u32 4294901760, %v29318_v31  ;;  %v39736_v41 = vand.u32 4294901760, %v29344_v7  ;;  %v39737_v31 = vand.u32 4294901760, %v29349_v2  ;;  %v39742_v7 = vand.u32 4294901760, %v29364_v56 }
  0xc6   : > { %v25296_v2 = vpack.c.bf16 %v1483_v5, %v39742_v7 }
  0xc9   : > { %25102 = vmatpush3.bf16.xpose.msra.mxu0 %v39705_v36  ;;  %v39717_v36 = vand.u32 4294901760, %v29237_v54  ;;  %v39720_v54 = vand.u32 4294901760, %v29251_v12  ;;  %v39726_v12 = vand.u32 4294901760, %v29285_v21  ;;  %v39732_v21 = vand.u32 4294901760, %v29323_v49 }
  0xca   : > { %25246 = vmatpush3.bf16.xpose.msra.mxu1 %v39706_v62  ;;  %25103 = vmatprep.subr.bf16.mxu0 %v39685_v34  ;;  %v39718_v62 = vand.u32 4294901760, %v29246_v6  ;;  %v39722_v6 = vand.u32 4294901760, %v29263_v30  ;;  %v39728_v30 = vand.u32 4294901760, %v29296_v27  ;;  %v39734_v27 = vand.u32 4294901760, %v29333_v17 }
  0xcb   : > { %25247 = vmatprep.subr.bf16.mxu1 %v39685_v34  ;;  %v25137_v19 = vpack.c.bf16 %v39721_v9, %v39720_v54  ;;  %v25146_v54 = vpack.c.bf16 %v39733_v26, %v39732_v21  ;;  %v39738_v49 = vand.u32 4294901760, %v29352_v37  ;;  %v39740_v17 = vand.u32 4294901760, %v29358_v38 }
  0xcc   : > { %v39743_v37 = vand.u32 4294901760, %v29375_v29  ;;  %v464_v29 = vld [vmem:[%s29007_s9 + $0x118] sm:$0xff] }
  0xcd   : > { %v29843_v5 = vsel %vm557_vm1, %v464_v29, 0 }
  0xd1   : > { %25105 = vmatpush3.bf16.xpose.msra.mxu0 %v39707_v59  ;;  %v25278_v59 = vpack.c.bf16 %v39718_v62, %v39717_v36  ;;  %v25284_v36 = vpack.c.bf16 %v39727_v14, %v39726_v12  ;;  %v482_v12 = vld [vmem:[%s29007_s9 + $0x1a8] sm:$0xff] }
  0xd2   : > { %25249 = vmatpush3.bf16.xpose.msra.mxu1 %v39708_v52  ;;  %25106 = vmatprep.subr.bf16.mxu0 %v39685_v34  ;;  %v39719_v52 = vld [vmem:[#allocation8_spill] sm:$0xff] }
  0xd3   : > { %25250 = vmatprep.subr.bf16.mxu1 %v39685_v34 }
  0xd9   : > { %25108 = vmatpush3.bf16.xpose.msra.mxu0 %v39709_v18  ;;  %v39723_v18 = vand.u32 4294901760, %v29268_v13  ;;  %v39729_v13 = vand.u32 4294901760, %v29305_v10  ;;  %v39735_v10 = vand.u32 4294901760, %v29338_v51  ;;  %v39741_v51 = vand.u32 4294901760, %v29362_v42 }
  0xda   : > { %25252 = vmatpush3.bf16.xpose.msra.mxu1 %v39710_v40  ;;  %25109 = vmatprep.subr.bf16.mxu0 %v39685_v34  ;;  %v25299_v42 = vpack.c.bf16 %v1497_v39, %v1490_v53  ;;  %v29846_v39 = vsel %vm557_vm1, %v479_v0, 0  ;;  %v29849_v53 = vsel %vm557_vm1, %v480_v11, 0 }
  0xdb   : > { %25253 = vmatprep.subr.bf16.mxu1 %v39685_v34  ;;  %v25281_v40 = vpack.c.bf16 %v39723_v18, %v39722_v6  ;;  %v25143_v62 = vpack.c.bf16 %v39729_v13, %v39728_v30  ;;  %v25290_v9 = vpack.c.bf16 %v39735_v10, %v39734_v27  ;;  %v25293_v6 = vpack.c.bf16 %v39739_v50, %v39738_v49  ;;  %v468_v27 = vld [vmem:[%s29007_s9 + $0x138] sm:$0xff]  ;;  %v483_v10 = vld [vmem:[%s29007_s9 + $0x1b0] sm:$0xff] }
  0xdc   : > { %v25152_v18 = vpack.c.bf16 %v39741_v51, %v39740_v17  ;;  %v29921_v49 = vsel %vm557_vm1, %v468_v27, 0  ;;  %v29924_v50 = vsel %vm557_vm1, %v483_v10, 0 }
  0xdd   : > { %v39089_v51 = vand.u32 4294901760, %v29921_v49 }
  0xe0   : > { %20100 = vmatmul.mubr.f32.vlgmr.msra.gmra.mrb[0].mxu0 %v29208_v1 }
  0xe1   : > { %25111 = vmatpush3.bf16.xpose.msra.mxu0 %v29043_v20  ;;  %20310 = vmatmul.mubr.f32.vlgmr.msra.gmra.mrb[0].mxu1 %v29208_v1 }
  0xe2   : > { %25255 = vmatpush3.bf16.xpose.msra.mxu1 %v29052_v22  ;;  %25112 = vmatprep.subr.bf16.mxu0 %v39685_v34 }
  0xe3   : > { %25256 = vmatprep.subr.bf16.mxu1 %v39685_v34  ;;  %20134 = vmatprep.mubr.msk.f32.mxu0 %vm28907_vm0, %v39694_v24 }
  0xe4   : > { %20344 = vmatprep.mubr.msk.f32.mxu1 %vm28907_vm0, %v39694_v24 }
  0xe9   : > { %25114 = vmatpush3.bf16.xpose.msra.mxu0 %v29073_v32 }
  0xea   : > { %25258 = vmatpush3.bf16.xpose.msra.mxu1 %v29079_v33  ;;  %25115 = vmatprep.subr.bf16.mxu0 %v39685_v34 }
  0xeb   : > { %25259 = vmatprep.subr.bf16.mxu1 %v39685_v34 }
  0xf1   : > { %25117 = vmatpush3.bf16.xpose.msra.mxu0 %v29109_v46 }
  0xf2   : > { %25261 = vmatpush3.bf16.xpose.msra.mxu1 %v29115_v47  ;;  %25118 = vmatprep.subr.bf16.mxu0 %v39685_v34 }
  0xf3   : > { %25262 = vmatprep.subr.bf16.mxu1 %v39685_v34 }
  0xf9   : > { %25120 = vmatpush3.bf16.xpose.msra.mxu0 %v29145_v60 }
  0xfa   : > { %25264 = vmatpush3.bf16.xpose.msra.mxu1 %v29151_v61  ;;  %25121 = vmatprep.subr.bf16.mxu0 %v39685_v34 }
  0xfb   : > { %25265 = vmatprep.subr.bf16.mxu1 %v39685_v34 }
 0x101   : > { %25123 = vmatpush3.bf16.xpose.msra.mxu0 %v39711_v48 }
 0x102   : > { %25267 = vmatpush3.bf16.xpose.msra.mxu1 %v39712_v45  ;;  %25124 = vmatprep.subr.bf16.mxu0 %v39685_v34 }
 0x103   : > { %25268 = vmatprep.subr.bf16.mxu1 %v39685_v34 }
 0x109   : > { %25126 = vmatpush3.bf16.xpose.msra.mxu0 %v39713_v44 }
 0x10a   : > { %25270 = vmatpush3.bf16.xpose.msra.mxu1 %v39714_v57  ;;  %25127 = vmatprep.subr.bf16.mxu0 %v39685_v34 }
 0x10b   : > { %25271 = vmatprep.subr.bf16.mxu1 %v39685_v34 }
 0x111   : > { %25129 = vmatpush3.bf16.xpose.msra.mxu0 %v29340_v15 }
 0x112   : > { %25273 = vmatpush3.bf16.xpose.msra.mxu1 %v29346_v63  ;;  %25130 = vmatprep.subr.bf16.mxu0 %v39685_v34 }
 0x113   : > { %25274 = vmatprep.subr.bf16.mxu1 %v39685_v34 }
 0x119   : > { %25132 = vmatpush3.bf16.xpose.msra.mxu0 %v29373_v28 }
 0x11a   : > { %25276 = vmatpush3.bf16.xpose.msra.mxu1 %v29388_v25  ;;  %25133 = vmatprep.subr.bf16.mxu0 %v39685_v34 }
 0x11b   : > { %25277 = vmatprep.subr.bf16.mxu1 %v39685_v34 }
 0x120   : > { %20135 = vmatmul.mubr.f32.vlgmr.msra.gmra.mrb[0].mxu0 %v39719_v52 }
 0x121   : > { %25135 = vmatpush3.bf16.xpose.msra.mxu0 %v25134_v58  ;;  %20345 = vmatmul.mubr.f32.vlgmr.msra.gmra.mrb[0].mxu1 %v39719_v52  ;;  %v25140_v58 = vpack.c.bf16 %v39725_v8, %v39724_v55  ;;  %v465_v55 = vld [vmem:[%s29007_s9 + $0x120] sm:$0xff]  ;;  %v466_v8 = vld [vmem:[%s29007_s9 + $0x128] sm:$0xff] }
 0x122   : > { %25279 = vmatpush3.bf16.xpose.msra.mxu1 %v25278_v59  ;;  %25136 = vmatprep.subr.bf16.mxu0 %v39685_v34  ;;  %v25287_v59 = vpack.c.bf16 %v39731_v23, %v39730_v16  ;;  %v29882_v30 = vsel %vm557_vm1, %v465_v55, 0  ;;  %v29885_v13 = vsel %vm557_vm1, %v466_v8, 0  ;;  %v29891_v16 = vsel %vm557_vm1, %v482_v12, 0  ;;  %v471_v8 = vld [vmem:[%s29007_s9 + $0x150] sm:$0xff] }
 0x123   : > { %25280 = vmatprep.subr.bf16.mxu1 %v39685_v34  ;;  %20169 = vmatprep.mubr.msk.f32.mxu0 %vm28907_vm0, %v39694_v24  ;;  %v39098_v23 = vand.u32 4294901760, %v29882_v30  ;;  %v39095_v26 = vand.u32 4294901760, %v29891_v16  ;;  %v487_v12 = vld [vmem:[%s29007_s9 + $0x1d0] sm:$0xff] }
 0x124   : > { %20379 = vmatprep.mubr.msk.f32.mxu1 %vm28907_vm0, %v39694_v24 }
 0x129   : > { %25138 = vmatpush3.bf16.xpose.msra.mxu0 %v25137_v19  ;;  %v25149_v19 = vpack.c.bf16 %v39737_v31, %v39736_v41 }
 0x12a   : > { %25282 = vmatpush3.bf16.xpose.msra.mxu1 %v25281_v40  ;;  %25139 = vmatprep.subr.bf16.mxu0 %v39685_v34  ;;  %v25155_v40 = vpack.c.bf16 %v39744_v3, %v39743_v37  ;;  %v470_v37 = vld [vmem:[%s29007_s9 + $0x148] sm:$0xff]  ;;  %v485_v3 = vld [vmem:[%s29007_s9 + $0x1c0] sm:$0xff] }
 0x12b   : > { %25283 = vmatprep.subr.bf16.mxu1 %v39685_v34 }
 0x131   : > { %25141 = vmatpush3.bf16.xpose.msra.mxu0 %v25140_v58  ;;  %v481_v58 = vld [vmem:[%s29007_s9 + $0x1a0] sm:$0xff] }
 0x132   : > { %25285 = vmatpush3.bf16.xpose.msra.mxu1 %v25284_v36  ;;  %25142 = vmatprep.subr.bf16.mxu0 %v39685_v34 }
 0x133   : > { %25286 = vmatprep.subr.bf16.mxu1 %v39685_v34 }
 0x139   : > { %25144 = vmatpush3.bf16.xpose.msra.mxu0 %v25143_v62  ;;  %v29888_v62 = vsel %vm557_vm1, %v481_v58, 0  ;;  %v472_v58 = vld [vmem:[%s29007_s9 + $0x158] sm:$0xff] }
 0x13a   : > { %25288 = vmatpush3.bf16.xpose.msra.mxu1 %v25287_v59  ;;  %25145 = vmatprep.subr.bf16.mxu0 %v39685_v34  ;;  %v39097_v59 = vand.u32 4294901760, %v29885_v13  ;;  %v39096_v21 = vand.u32 4294901760, %v29888_v62 }
 0x13b   : > { %25289 = vmatprep.subr.bf16.mxu1 %v39685_v34 }
 0x13c   : > { %v29909_v41 = vpack.c.bf16 %v39097_v59, %v39098_v23  ;;  %v29915_v31 = vpack.c.bf16 %v39095_v26, %v39096_v21  ;;  %v492_v26 = vld [vmem:[%s29007_s9 + $0x1f8] sm:$0xff] }
 0x141   : > { %25147 = vmatpush3.bf16.xpose.msra.mxu0 %v25146_v54  ;;  %v467_v54 = vld [vmem:[%s29007_s9 + $0x130] sm:$0xff] }
 0x142   : > { %25291 = vmatpush3.bf16.xpose.msra.mxu1 %v25290_v9  ;;  %25148 = vmatprep.subr.bf16.mxu0 %v39685_v34  ;;  %v484_v9 = vld [vmem:[%s29007_s9 + $0x1b8] sm:$0xff] }
 0x143   : > { %25292 = vmatprep.subr.bf16.mxu1 %v39685_v34 }
 0x149   : > { %25150 = vmatpush3.bf16.xpose.msra.mxu0 %v25149_v19  ;;  %v29918_v19 = vsel %vm557_vm1, %v467_v54, 0  ;;  %v488_v54 = vld [vmem:[%s29007_s9 + $0x1d8] sm:$0xff] }
 0x14a   : > { %25294 = vmatpush3.bf16.xpose.msra.mxu1 %v25293_v6  ;;  %25151 = vmatprep.subr.bf16.mxu0 %v39685_v34  ;;  %v29927_v6 = vsel %vm557_vm1, %v484_v9, 0  ;;  %v39090_v17 = vand.u32 4294901760, %v29918_v19  ;;  %v29990_v9 = vsel %vm557_vm1, %v471_v8, 0 }
 0x14b   : > { %25295 = vmatprep.subr.bf16.mxu1 %v39685_v34  ;;  %v39087_v7 = vand.u32 4294901760, %v29927_v6 }
 0x151   : > { %25153 = vmatpush3.bf16.xpose.msra.mxu0 %v25152_v18  ;;  %v39088_v18 = vand.u32 4294901760, %v29924_v50 }
 0x152   : > { %25297 = vmatpush3.bf16.xpose.msra.mxu1 %v25296_v2  ;;  %25154 = vmatprep.subr.bf16.mxu0 %v39685_v34  ;;  %v469_v2 = vld [vmem:[%s29007_s9 + $0x140] sm:$0xff] }
 0x153   : > { %25298 = vmatprep.subr.bf16.mxu1 %v39685_v34 }
 0x159   : > { %25156 = vmatpush3.bf16.xpose.msra.mxu0 %v25155_v40  ;;  %v486_v40 = vld [vmem:[%s29007_s9 + $0x1c8] sm:$0xff] }
 0x15a   : > { %25300 = vmatpush3.bf16.xpose.msra.mxu1 %v25299_v42  ;;  %25157 = vmatprep.subr.bf16.mxu0 %v39685_v34  ;;  %v29945_v42 = vpack.c.bf16 %v39089_v51, %v39090_v17  ;;  %v29963_v4 = vsel %vm557_vm1, %v486_v40, 0  ;;  %v39092_v40 = vand.u32 4294901760, %v29990_v9 }
 0x15b   : > { %25301 = vmatprep.subr.bf16.mxu1 %v39685_v34  ;;  %v39083_v55 = vand.u32 4294901760, %v29963_v4 }
 0x160   : > { %20170 = vmatmul.mubr.f32.vlgmr.msra.gmra.mrb[0].mxu0 %v29187_v43 }
 0x161   : > { %25159 = vmatpush3.bf16.xpose.msra.mxu0 %v29043_v20  ;;  %20380 = vmatmul.mubr.f32.vlgmr.msra.gmra.mrb[0].mxu1 %v29187_v43  ;;  %v461_v20 = vld [vmem:[%s29007_s9 + $0x100] sm:$0xff] }
 0x162   : > { %25303 = vmatpush3.bf16.xpose.msra.mxu1 %v29052_v22  ;;  %25160 = vmatprep.subr.bf16.mxu0 %v39685_v34  ;;  %v462_v22 = vld [vmem:[%s29007_s9 + $0x108] sm:$0xff] }
 0x163   : > { %25304 = vmatprep.subr.bf16.mxu1 %v39685_v34  ;;  %20204 = vmatprep.mubr.msk.f32.mxu0 %vm28907_vm0, %v39694_v24 }
 0x164   : > { %20414 = vmatprep.mubr.msk.f32.mxu1 %vm28907_vm0, %v39694_v24 }
 0x169   : > { %25162 = vmatpush3.bf16.xpose.msra.mxu0 %v29073_v32  ;;  %v477_v32 = vld [vmem:[%s29007_s9 + $0x180] sm:$0xff] }
 0x16a   : > { %25306 = vmatpush3.bf16.xpose.msra.mxu1 %v29079_v33  ;;  %25163 = vmatprep.subr.bf16.mxu0 %v39685_v34  ;;  %v478_v33 = vld [vmem:[%s29007_s9 + $0x188] sm:$0xff] }
 0x16b   : > { %25307 = vmatprep.subr.bf16.mxu1 %v39685_v34 }
 0x171   : > { %25165 = vmatpush3.bf16.xpose.msra.mxu0 %v29109_v46  ;;  %v29804_v46 = vsel %vm557_vm1, %v461_v20, 0  ;;  %v29951_v20 = vpack.c.bf16 %v39087_v7, %v39088_v18 }
 0x172   : > { %25309 = vmatpush3.bf16.xpose.msra.mxu1 %v29115_v47  ;;  %25166 = vmatprep.subr.bf16.mxu0 %v39685_v34  ;;  %v29807_v47 = vsel %vm557_vm1, %v462_v22, 0  ;;  %v29954_v22 = vsel %vm557_vm1, %v469_v2, 0  ;;  %v29993_v2 = vsel %vm557_vm1, %v472_v58, 0 }
 0x173   : > { %25310 = vmatprep.subr.bf16.mxu1 %v39685_v34  ;;  %v39086_v29 = vand.u32 4294901760, %v29954_v22 }
 0x179   : > { %25168 = vmatpush3.bf16.xpose.msra.mxu0 %v29145_v60  ;;  %v29810_v60 = vsel %vm557_vm1, %v477_v32, 0  ;;  %v29957_v32 = vsel %vm557_vm1, %v470_v37, 0  ;;  %v29996_v37 = vsel %vm557_vm1, %v487_v12, 0  ;;  %v473_v12 = vld [vmem:[%s29007_s9 + $0x160] sm:$0xff] }
 0x17a   : > { %25312 = vmatpush3.bf16.xpose.msra.mxu1 %v29151_v61  ;;  %25169 = vmatprep.subr.bf16.mxu0 %v39685_v34  ;;  %v29813_v61 = vsel %vm557_vm1, %v478_v33, 0  ;;  %v2677_v38 = vand.u32 4294901760, %v29810_v60  ;;  %v29960_v33 = vsel %vm557_vm1, %v485_v3, 0  ;;  %v39085_v0 = vand.u32 4294901760, %v29957_v32 }
 0x17b   : > { %25313 = vmatprep.subr.bf16.mxu1 %v39685_v34  ;;  %v2680_v56 = vand.u32 4294901760, %v29813_v61  ;;  %v39084_v11 = vand.u32 4294901760, %v29960_v33  ;;  %v29999_v3 = vsel %vm557_vm1, %v488_v54, 0  ;;  %v39094_v8 = vand.u32 4294901760, %v29996_v37  ;;  %v489_v54 = vld [vmem:[%s29007_s9 + $0x1e0] sm:$0xff] }
 0x17c   : > { %v29981_v27 = vpack.c.bf16 %v39085_v0, %v39086_v29  ;;  %v39093_v58 = vand.u32 4294901760, %v29999_v3  ;;  %v490_v0 = vld [vmem:[%s29007_s9 + $0x1e8] sm:$0xff]  ;;  %v30026_v18 = vsel %vm557_vm1, %v473_v12, 0  ;;  %v30032_v17 = vsel %vm557_vm1, %v489_v54, 0  ;;  %v475_v54 = vld [vmem:[%s29007_s9 + $0x170] sm:$0xff] }
 0x17d   : > { %v29987_v10 = vpack.c.bf16 %v39083_v55, %v39084_v11  ;;  %v39091_v55 = vand.u32 4294901760, %v29993_v2  ;;  %v474_v11 = vld [vmem:[%s29007_s9 + $0x168] sm:$0xff]  ;;  %v39101_v12 = vand.u32 4294901760, %v30032_v17  ;;  %v30062_v23 = vsub.f32 %v29810_v60, %v2677_v38 }
 0x17e   : > { %v30023_v7 = vpack.c.bf16 %v39093_v58, %v39094_v8  ;;  %v30029_v51 = vsel %vm557_vm1, %v474_v11, 0  ;;  %v476_v8 = vld [vmem:[%s29007_s9 + $0x178] sm:$0xff]  ;;  %v30082_v60 = vsel %vm557_vm1, %v475_v54, 0 }
 0x17f   : > { %v30017_v29 = vpack.c.bf16 %v39091_v55, %v39092_v40  ;;  %v30035_v55 = vsel %vm557_vm1, %v490_v0, 0  ;;  %v39103_v40 = vand.u32 4294901760, %v30026_v18  ;;  %v39102_v58 = vand.u32 4294901760, %v30029_v51  ;;  %v491_v0 = vld [vmem:[%s29007_s9 + $0x1f0] sm:$0xff] }
 0x180   : > { %v39100_v11 = vand.u32 4294901760, %v30035_v55 }
 0x181   : > { %25171 = vmatpush3.bf16.xpose.msra.mxu0 %v39711_v48  ;;  %v1994_v48 = vand.u32 4294901760, %v29840_v35 }
 0x182   : > { %25315 = vmatpush3.bf16.xpose.msra.mxu1 %v39712_v45  ;;  %25172 = vmatprep.subr.bf16.mxu0 %v39685_v34  ;;  %v1997_v45 = vand.u32 4294901760, %v29843_v5 }
 0x183   : > { %25316 = vmatprep.subr.bf16.mxu1 %v39685_v34 }
 0x184   : > { %v29873_v14 = vpack.c.bf16 %v1997_v45, %v1994_v48 }
 0x189   : > { %25174 = vmatpush3.bf16.xpose.msra.mxu0 %v39713_v44  ;;  %v2683_v44 = vand.u32 4294901760, %v29846_v39 }
 0x18a   : > { %25318 = vmatpush3.bf16.xpose.msra.mxu1 %v39714_v57  ;;  %25175 = vmatprep.subr.bf16.mxu0 %v39685_v34  ;;  %v39099_v57 = vand.u32 4294901760, %v29849_v53 }
 0x18b   : > { %25319 = vmatprep.subr.bf16.mxu1 %v39685_v34 }
 0x18c   : > { %v29879_v36 = vpack.c.bf16 %v39099_v57, %v2683_v44  ;;  %v30068_v57 = vpack.c.bf16 %v39102_v58, %v39103_v40  ;;  %v30108_v58 = vsub.f32 %v29840_v35, %v1994_v48  ;;  %v30113_v40 = vsub.f32 %v29843_v5, %v1997_v45 }
 0x18d   : > { %v39748_v48 = vand.u32 4294901760, %v29849_v53 }
 0x18e   : > { %39745 = vst [vmem:[#allocation5_spill] sm:$0xff] %v30068_v57 }
 0x18f   : > { %v30135_v45 = vsub.f32 %v29849_v53, %v39748_v48  ;;  %v39754_v53 = vand.u32 4294901760, %v29888_v62 }
 0x191   : > { %25177 = vmatpush3.bf16.xpose.msra.mxu0 %v29340_v15  ;;  %v1988_v15 = vand.u32 4294901760, %v29804_v46 }
 0x192   : > { %25321 = vmatpush3.bf16.xpose.msra.mxu1 %v29346_v63  ;;  %25178 = vmatprep.subr.bf16.mxu0 %v39685_v34  ;;  %v1991_v63 = vand.u32 4294901760, %v29807_v47 }
 0x193   : > { %25322 = vmatprep.subr.bf16.mxu1 %v39685_v34  ;;  %v30052_v21 = vsub.f32 %v29804_v46, %v1988_v15  ;;  %v30073_v46 = vsub.f32 %v29813_v61, %v2680_v56  ;;  %v39106_v61 = vand.u32 4294901760, %v30082_v60 }
 0x194   : > { %v30057_v59 = vsub.f32 %v29807_v47, %v1991_v63  ;;  %v30079_v47 = vpack.c.bf16 %v39100_v11, %v39101_v12 }
 0x195   : > { %v39105_v11 = vand.u32 4294901760, %v30052_v21 }
 0x196   : > { %39746 = vst [vmem:[#allocation6_spill] sm:$0xff] %v30079_v47  ;;  %v39107_v54 = vand.u32 4294901760, %v30057_v59 }
 0x197   : > { %v2082_v35 = vsub.f32 %v30052_v21, %v39105_v11  ;;  %v39751_v11 = vand.u32 4294901760, %v30073_v46 }
 0x198   : > { %v2089_v5 = vsub.f32 %v30057_v59, %v39107_v54 }
 0x199   : > { %25180 = vmatpush3.bf16.xpose.msra.mxu0 %v29373_v28  ;;  %v29831_v28 = vpack.c.bf16 %v1991_v63, %v1988_v15  ;;  %v30085_v15 = vsel %vm557_vm1, %v476_v8, 0  ;;  %v30088_v63 = vsel %vm557_vm1, %v491_v0, 0  ;;  %v30118_v0 = vsub.f32 %v29846_v39, %v2683_v44 }
 0x19a   : > { %25324 = vmatpush3.bf16.xpose.msra.mxu1 %v29388_v25  ;;  %25325 = vmatprep.subr.bf16.mxu0 %v39685_v34  ;;  %v29837_v25 = vpack.c.bf16 %v2680_v56, %v2677_v38  ;;  %v30091_v38 = vsel %vm557_vm1, %v492_v26, 0  ;;  %v39104_v56 = vand.u32 4294901760, %v30085_v15  ;;  %v39109_v8 = vand.u32 4294901760, %v30088_v63 }
 0x19b   : > { %25469 = vmatprep.subr.bf16.mxu1 %v39685_v34  ;;  %v39110_v26 = vand.u32 4294901760, %v30062_v23  ;;  %v39749_v39 = vand.u32 4294901760, %v30091_v38  ;;  %v2083_v54 = vand.u32 4294901760, %v2082_v35  ;;  %v2090_v52 = vand.u32 4294901760, %v2089_v5 }
 0x19c   : > { %v30124_v12 = vpack.c.bf16 %v39104_v56, %v39106_v61  ;;  %v2778_v61 = vsub.f32 %v30073_v46, %v39751_v11  ;;  %v39752_v11 = vand.u32 4294901760, %v29882_v30  ;;  %v39753_v5 = vand.u32 4294901760, %v29885_v13 }
 0x19d   : > { %v30141_v44 = vpack.c.bf16 %v39749_v39, %v39109_v8  ;;  %v2771_v56 = vsub.f32 %v30062_v23, %v39110_v26 }
 0x19e   : > { %39747 = vst [vmem:[#allocation7_spill] sm:$0xff] %v30124_v12  ;;  %v2779_v8 = vand.u32 4294901760, %v2778_v61  ;;  %v30160_v35 = vsub.f32 %v29882_v30, %v39752_v11  ;;  %v30165_v48 = vsub.f32 %v29885_v13, %v39753_v5  ;;  %v30170_v61 = vsub.f32 %v29888_v62, %v39754_v53  ;;  %v39760_v53 = vld [vmem:[#allocation10_spill] sm:$0xff] }
 0x19f   : > { %39750 = vst [vmem:[#allocation9_spill] sm:$0xff] %v30141_v44  ;;  %v2772_v39 = vand.u32 4294901760, %v2771_v56  ;;  %v25350_v56 = vpack.c.bf16 %v2090_v52, %v2083_v54  ;;  %v39757_v11 = vand.u32 4294901760, %v29891_v16  ;;  %v39758_v5 = vand.u32 4294901760, %v30118_v0 }
 0x1a0   : > { %20205 = vmatmul.mubr.f32.vlgmr.msra.gmra.mrb[0].mxu0 %v29187_v43  ;;  %v39759_v52 = vand.u32 4294901760, %v30135_v45 }
 0x1a1   : > { %20415 = vmatmul.mubr.f32.vlgmr.msra.gmra.mrb[0].mxu1 %v29187_v43  ;;  %25327 = vmatpush3.bf16.xpose.msra.mxu0 %v29831_v28  ;;  %v25494_v13 = vpack.c.bf16 %v2779_v8, %v2772_v39  ;;  %v2785_v62 = vsub.f32 %v30118_v0, %v39758_v5 }
 0x1a2   : > { %25471 = vmatpush3.bf16.xpose.msra.mxu1 %v29837_v25  ;;  %25328 = vmatprep.subr.bf16.mxu0 %v39685_v34  ;;  %v2792_v54 = vsub.f32 %v30135_v45, %v39759_v52 }
 0x1a3   : > { %25472 = vmatprep.subr.bf16.mxu1 %v39685_v34  ;;  %20449 = vmatprep.mubr.msk.f32.mxu0 %vm28907_vm0, %v39694_v24  ;;  %v2786_v8 = vand.u32 4294901760, %v2785_v62  ;;  %v39763_v62 = vand.u32 4294901760, %v29924_v50 }
 0x1a4   : > { %20659 = vmatprep.mubr.msk.f32.mxu1 %vm28907_vm0, %v39694_v24  ;;  %v2793_v39 = vand.u32 4294901760, %v2792_v54 }
 0x1a5   : > { %v30214_v52 = vsub.f32 %v29924_v50, %v39763_v62 }
 0x1a9   : > { %25330 = vmatpush3.bf16.xpose.msra.mxu0 %v29873_v14 }
 0x1aa   : > { %25474 = vmatpush3.bf16.xpose.msra.mxu1 %v29879_v36  ;;  %25331 = vmatprep.subr.bf16.mxu0 %v39685_v34 }
 0x1ab   : > { %25475 = vmatprep.subr.bf16.mxu1 %v39685_v34 }
 0x1b1   : > { %25333 = vmatpush3.bf16.xpose.msra.mxu0 %v29909_v41 }
 0x1b2   : > { %25477 = vmatpush3.bf16.xpose.msra.mxu1 %v29915_v31  ;;  %25334 = vmatprep.subr.bf16.mxu0 %v39685_v34 }
 0x1b3   : > { %25478 = vmatprep.subr.bf16.mxu1 %v39685_v34 }
 0x1b9   : > { %25336 = vmatpush3.bf16.xpose.msra.mxu0 %v29945_v42 }
 0x1ba   : > { %25480 = vmatpush3.bf16.xpose.msra.mxu1 %v29951_v20  ;;  %25337 = vmatprep.subr.bf16.mxu0 %v39685_v34 }
 0x1bb   : > { %25481 = vmatprep.subr.bf16.mxu1 %v39685_v34 }
 0x1c1   : > { %25339 = vmatpush3.bf16.xpose.msra.mxu0 %v29981_v27 }
 0x1c2   : > { %25483 = vmatpush3.bf16.xpose.msra.mxu1 %v29987_v10  ;;  %25340 = vmatprep.subr.bf16.mxu0 %v39685_v34 }
 0x1c3   : > { %25484 = vmatprep.subr.bf16.mxu1 %v39685_v34 }
 0x1c9   : > { %25342 = vmatpush3.bf16.xpose.msra.mxu0 %v30017_v29 }
 0x1ca   : > { %25486 = vmatpush3.bf16.xpose.msra.mxu1 %v30023_v7  ;;  %25343 = vmatprep.subr.bf16.mxu0 %v39685_v34 }
 0x1cb   : > { %25487 = vmatprep.subr.bf16.mxu1 %v39685_v34 }
 0x1d1   : > { %25345 = vmatpush3.bf16.xpose.msra.mxu0 %v30068_v57  ;;  %v39119_v57 = vand.u32 4294901760, %v30160_v35 }
 0x1d2   : > { %25489 = vmatpush3.bf16.xpose.msra.mxu1 %v30079_v47  ;;  %25346 = vmatprep.subr.bf16.mxu0 %v39685_v34  ;;  %v39755_v47 = vand.u32 4294901760, %v30108_v58 }
 0x1d3   : > { %25490 = vmatprep.subr.bf16.mxu1 %v39685_v34  ;;  %v2110_v5 = vsub.f32 %v30160_v35, %v39119_v57 }
 0x1d4   : > { %v2096_v26 = vsub.f32 %v30108_v58, %v39755_v47 }
 0x1d5   : > { %v2111_v62 = vand.u32 4294901760, %v2110_v5 }
 0x1d6   : > { %v2097_v47 = vand.u32 4294901760, %v2096_v26  ;;  %v39761_v26 = vand.u32 4294901760, %v29918_v19 }
 0x1d9   : > { %25348 = vmatpush3.bf16.xpose.msra.mxu0 %v30124_v12  ;;  %v30181_v12 = vsub.f32 %v29891_v16, %v39757_v11  ;;  %v39121_v16 = vand.u32 4294901760, %v30165_v48  ;;  %v39122_v11 = vand.u32 4294901760, %v30170_v61 }
 0x1da   : > { %25492 = vmatpush3.bf16.xpose.msra.mxu1 %v30141_v44  ;;  %25349 = vmatprep.subr.bf16.mxu0 %v39685_v34  ;;  %v39756_v44 = vand.u32 4294901760, %v30113_v40 }
 0x1db   : > { %25493 = vmatprep.subr.bf16.mxu1 %v39685_v34  ;;  %v2799_v50 = vsub.f32 %v30170_v61, %v39122_v11 }
 0x1dc   : > { %v2103_v30 = vsub.f32 %v30113_v40, %v39756_v44 }
 0x1de   : > { %v2104_v44 = vand.u32 4294901760, %v2103_v30  ;;  %v39762_v30 = vand.u32 4294901760, %v29921_v49 }
 0x1e0   : > { %20450 = vmatmul.mubr.f32.vlgmr.msra.gmra.mrb[2].mxu0 %v39760_v53  ;;  %v25353_v54 = vpack.c.bf16 %v2104_v44, %v2097_v47  ;;  %v39765_v47 = vand.u32 4294901760, %v30181_v12 }
 0x1e1   : > { %25351 = vmatpush3.bf16.xpose.msra.mxu0 %v25350_v56  ;;  %20660 = vmatmul.mubr.f32.vlgmr.msra.gmra.mrb[2].mxu1 %v39760_v53  ;;  %v30202_v56 = vsub.f32 %v29918_v19, %v39761_v26  ;;  %v2117_v19 = vsub.f32 %v30165_v48, %v39121_v16 }
 0x1e2   : > { %25495 = vmatpush3.bf16.xpose.msra.mxu1 %v25494_v13  ;;  %25352 = vmatprep.subr.bf16.mxu0 %v39685_v34  ;;  %v30207_v13 = vsub.f32 %v29921_v49, %v39762_v30  ;;  %v39764_v49 = vand.u32 4294901760, %v29927_v6  ;;  %v25497_v30 = vpack.c.bf16 %v2793_v39, %v2786_v8  ;;  %v2806_v44 = vsub.f32 %v30181_v12, %v39765_v47 }
 0x1e3   : > { %25496 = vmatprep.subr.bf16.mxu1 %v39685_v34  ;;  %20484 = vmatprep.mubr.msk.f32.mxu0 %vm28907_vm0, %v39694_v24  ;;  %v2118_v57 = vand.u32 4294901760, %v2117_v19  ;;  %v39123_v53 = vand.u32 4294901760, %v30202_v56  ;;  %v39125_v39 = vand.u32 4294901760, %v30214_v52  ;;  %v39766_v47 = vand.u32 4294901760, %v29954_v22 }
 0x1e4   : > { %20694 = vmatprep.mubr.msk.f32.mxu1 %vm28907_vm0, %v39694_v24  ;;  %v30225_v26 = vsub.f32 %v29927_v6, %v39764_v49  ;;  %v39124_v16 = vand.u32 4294901760, %v30207_v13  ;;  %v2800_v6 = vand.u32 4294901760, %v2799_v50  ;;  %v2807_v8 = vand.u32 4294901760, %v2806_v44 }
 0x1e5   : > { %v30242_v5 = vsub.f32 %v29954_v22, %v39766_v47  ;;  %v25356_v44 = vpack.c.bf16 %v2118_v57, %v2111_v62  ;;  %v2124_v11 = vsub.f32 %v30202_v56, %v39123_v53  ;;  %v39769_v47 = vand.u32 4294901760, %v29963_v4 }
 0x1e6   : > { %v2131_v22 = vsub.f32 %v30207_v13, %v39124_v16  ;;  %v39770_v57 = vand.u32 4294901760, %v30225_v26 }
 0x1e7   : > { %v30263_v49 = vsub.f32 %v29963_v4, %v39769_v47  ;;  %v39126_v53 = vand.u32 4294901760, %v30242_v5 }
 0x1e8   : > { %v2820_v62 = vsub.f32 %v30225_v26, %v39770_v57  ;;  %v39771_v57 = vand.u32 4294901760, %v29990_v9 }
 0x1e9   : > { %25354 = vmatpush3.bf16.xpose.msra.mxu0 %v25353_v54  ;;  %v39767_v54 = vand.u32 4294901760, %v29957_v32 }
 0x1ea   : > { %25498 = vmatpush3.bf16.xpose.msra.mxu1 %v25497_v30  ;;  %25355 = vmatprep.subr.bf16.mxu0 %v39685_v34  ;;  %v39768_v30 = vand.u32 4294901760, %v29960_v33 }
 0x1eb   : > { %25499 = vmatprep.subr.bf16.mxu1 %v39685_v34  ;;  %v30247_v19 = vsub.f32 %v29957_v32, %v39767_v54  ;;  %v25500_v32 = vpack.c.bf16 %v2807_v8, %v2800_v6  ;;  %v2125_v54 = vand.u32 4294901760, %v2124_v11  ;;  %v2821_v6 = vand.u32 4294901760, %v2820_v62 }
 0x1ec   : > { %v30252_v50 = vsub.f32 %v29960_v33, %v39768_v30  ;;  %v2813_v33 = vsub.f32 %v30214_v52, %v39125_v39  ;;  %v2132_v30 = vand.u32 4294901760, %v2131_v22  ;;  %v30280_v11 = vsub.f32 %v29990_v9, %v39771_v57 }
 0x1ed   : > { %v39127_v16 = vand.u32 4294901760, %v30247_v19  ;;  %v2138_v39 = vsub.f32 %v30242_v5, %v39126_v53  ;;  %v39774_v57 = vand.u32 4294901760, %v29999_v3 }
 0x1ee   : > { %v2814_v4 = vand.u32 4294901760, %v2813_v33  ;;  %v39128_v8 = vand.u32 4294901760, %v30252_v50  ;;  %v25359_v62 = vpack.c.bf16 %v2132_v30, %v2125_v54  ;;  %v39775_v54 = vand.u32 4294901760, %v30263_v49 }
 0x1ef   : > { %v2145_v9 = vsub.f32 %v30247_v19, %v39127_v16  ;;  %v30301_v47 = vsub.f32 %v29999_v3, %v39774_v57  ;;  %v39129_v53 = vand.u32 4294901760, %v30280_v11 }
 0x1f0   : > { %v2834_v30 = vsub.f32 %v30263_v49, %v39775_v54  ;;  %v39776_v54 = vand.u32 4294901760, %v30026_v18 }
 0x1f1   : > { %25357 = vmatpush3.bf16.xpose.msra.mxu0 %v25356_v44  ;;  %v39772_v44 = vand.u32 4294901760, %v29993_v2 }
 0x1f2   : > { %25501 = vmatpush3.bf16.xpose.msra.mxu1 %v25500_v32  ;;  %25358 = vmatprep.subr.bf16.mxu0 %v39685_v34  ;;  %v39773_v32 = vand.u32 4294901760, %v29996_v37 }
 0x1f3   : > { %25502 = vmatprep.subr.bf16.mxu1 %v39685_v34  ;;  %v30285_v22 = vsub.f32 %v29993_v2, %v39772_v44  ;;  %v25503_v2 = vpack.c.bf16 %v2821_v6, %v2814_v4  ;;  %v2139_v44 = vand.u32 4294901760, %v2138_v39  ;;  %v2835_v4 = vand.u32 4294901760, %v2834_v30 }
 0x1f4   : > { %v30290_v33 = vsub.f32 %v29996_v37, %v39773_v32  ;;  %v2827_v37 = vsub.f32 %v30252_v50, %v39128_v8  ;;  %v2146_v32 = vand.u32 4294901760, %v2145_v9  ;;  %v30318_v39 = vsub.f32 %v30026_v18, %v39776_v54 }
 0x1f5   : > { %v39130_v16 = vand.u32 4294901760, %v30285_v22  ;;  %v2152_v8 = vsub.f32 %v30280_v11, %v39129_v53  ;;  %v39779_v54 = vand.u32 4294901760, %v30035_v55 }
 0x1f6   : > { %v2828_v3 = vand.u32 4294901760, %v2827_v37  ;;  %v39131_v6 = vand.u32 4294901760, %v30290_v33  ;;  %v25362_v30 = vpack.c.bf16 %v2146_v32, %v2139_v44  ;;  %v39780_v44 = vand.u32 4294901760, %v30301_v47 }
 0x1f7   : > { %v2159_v18 = vsub.f32 %v30285_v22, %v39130_v16  ;;  %v30339_v57 = vsub.f32 %v30035_v55, %v39779_v54  ;;  %v39132_v53 = vand.u32 4294901760, %v30318_v39 }
 0x1f8   : > { %v2848_v32 = vsub.f32 %v30301_v47, %v39780_v44  ;;  %v39781_v44 = vand.u32 4294901760, %v30082_v60 }
 0x1f9   : > { %25360 = vmatpush3.bf16.xpose.msra.mxu0 %v25359_v62  ;;  %v39777_v62 = vand.u32 4294901760, %v30029_v51 }
 0x1fa   : > { %25504 = vmatpush3.bf16.xpose.msra.mxu1 %v25503_v2  ;;  %25361 = vmatprep.subr.bf16.mxu0 %v39685_v34  ;;  %v39778_v2 = vand.u32 4294901760, %v30032_v17 }
 0x1fb   : > { %25505 = vmatprep.subr.bf16.mxu1 %v39685_v34  ;;  %v30323_v9 = vsub.f32 %v30029_v51, %v39777_v62  ;;  %v25506_v51 = vpack.c.bf16 %v2835_v4, %v2828_v3  ;;  %v2153_v62 = vand.u32 4294901760, %v2152_v8  ;;  %v2849_v3 = vand.u32 4294901760, %v2848_v32 }
 0x1fc   : > { %v30328_v37 = vsub.f32 %v30032_v17, %v39778_v2  ;;  %v2841_v17 = vsub.f32 %v30290_v33, %v39131_v6  ;;  %v2160_v2 = vand.u32 4294901760, %v2159_v18  ;;  %v30356_v8 = vsub.f32 %v30082_v60, %v39781_v44 }
 0x1fd   : > { %v39133_v16 = vand.u32 4294901760, %v30323_v9  ;;  %v2166_v6 = vsub.f32 %v30318_v39, %v39132_v53  ;;  %v39784_v44 = vand.u32 4294901760, %v30091_v38 }
 0x1fe   : > { %v2842_v55 = vand.u32 4294901760, %v2841_v17  ;;  %v39134_v4 = vand.u32 4294901760, %v30328_v37  ;;  %v25365_v32 = vpack.c.bf16 %v2160_v2, %v2153_v62  ;;  %v39785_v62 = vand.u32 4294901760, %v30339_v57 }
 0x1ff   : > { %v2173_v60 = vsub.f32 %v30323_v9, %v39133_v16  ;;  %v30377_v54 = vsub.f32 %v30091_v38, %v39784_v44  ;;  %v2179_v53 = vand.u32 4294901760, %v30356_v8 }
 0x200   : > { %v2862_v2 = vsub.f32 %v30339_v57, %v39785_v62 }
 0x201   : > { %25363 = vmatpush3.bf16.xpose.msra.mxu0 %v25362_v30  ;;  %v39782_v30 = vand.u32 4294901760, %v30085_v15  ;;  %v2875_v44 = vand.u32 4294901760, %v30377_v54 }
 0x202   : > { %25507 = vmatpush3.bf16.xpose.msra.mxu1 %v25506_v51  ;;  %25364 = vmatprep.subr.bf16.mxu0 %v39685_v34  ;;  %v39783_v51 = vand.u32 4294901760, %v30088_v63 }
 0x203   : > { %25508 = vmatprep.subr.bf16.mxu1 %v39685_v34  ;;  %v30361_v18 = vsub.f32 %v30085_v15, %v39782_v30  ;;  %v25509_v15 = vpack.c.bf16 %v2849_v3, %v2842_v55  ;;  %v2167_v30 = vand.u32 4294901760, %v2166_v6  ;;  %v2863_v55 = vand.u32 4294901760, %v2862_v2 }
 0x204   : > { %v30366_v17 = vsub.f32 %v30088_v63, %v39783_v51  ;;  %v2855_v63 = vsub.f32 %v30328_v37, %v39134_v4  ;;  %v2174_v51 = vand.u32 4294901760, %v2173_v60  ;;  %v2180_v6 = vsub.f32 %v30356_v8, %v2179_v53 }
 0x205   : > { %v39135_v16 = vand.u32 4294901760, %v30361_v18 }
 0x206   : > { %v2856_v38 = vand.u32 4294901760, %v2855_v63  ;;  %v2868_v3 = vand.u32 4294901760, %v30366_v17  ;;  %v25368_v4 = vpack.c.bf16 %v2174_v51, %v2167_v30  ;;  %v2876_v63 = vsub.f32 %v30377_v54, %v2875_v44 }
 0x207   : > { %v2181_v62 = vand.u32 4294901760, %v2180_v6  ;;  %v25521_v6 = vpack.c.bf16 %v30135_v45, %v30118_v0 }
 0x208   : > { %v25512_v60 = vpack.c.bf16 %v2863_v55, %v2856_v38  ;;  %v2877_v51 = vand.u32 4294901760, %v2876_v63  ;;  %v25518_v55 = vpack.c.bf16 %v30073_v46, %v30062_v23  ;;  %v25527_v63 = vpack.c.bf16 %v30225_v26, %v30214_v52 }
 0x209   : > { %25366 = vmatpush3.bf16.xpose.msra.mxu0 %v25365_v32  ;;  %v2187_v32 = vsub.f32 %v30361_v18, %v39135_v16 }
 0x20a   : > { %25510 = vmatpush3.bf16.xpose.msra.mxu1 %v25509_v15  ;;  %25367 = vmatprep.subr.bf16.mxu0 %v39685_v34  ;;  %v2869_v15 = vsub.f32 %v30366_v17, %v2868_v3 }
 0x20b   : > { %25511 = vmatprep.subr.bf16.mxu1 %v39685_v34  ;;  %v2188_v2 = vand.u32 4294901760, %v2187_v32  ;;  %v25380_v32 = vpack.c.bf16 %v30165_v48, %v30160_v35 }
 0x20c   : > { %v2870_v30 = vand.u32 4294901760, %v2869_v15  ;;  %v25383_v15 = vpack.c.bf16 %v30207_v13, %v30202_v56 }
 0x20d   : > { %v25371_v16 = vpack.c.bf16 %v2188_v2, %v2181_v62  ;;  %v25386_v62 = vpack.c.bf16 %v30247_v19, %v30242_v5  ;;  %v25530_v2 = vpack.c.bf16 %v30263_v49, %v30252_v50 }
 0x20e   : > { %v25515_v38 = vpack.c.bf16 %v2877_v51, %v2870_v30  ;;  %v25389_v30 = vpack.c.bf16 %v30285_v22, %v30280_v11  ;;  %v25533_v51 = vpack.c.bf16 %v30301_v47, %v30290_v33 }
 0x211   : > { %25369 = vmatpush3.bf16.xpose.msra.mxu0 %v25368_v4  ;;  %v25374_v4 = vpack.c.bf16 %v30057_v59, %v30052_v21 }
 0x212   : > { %25513 = vmatpush3.bf16.xpose.msra.mxu1 %v25512_v60  ;;  %25370 = vmatprep.subr.bf16.mxu0 %v39685_v34  ;;  %v25524_v60 = vpack.c.bf16 %v30181_v12, %v30170_v61 }
 0x213   : > { %25514 = vmatprep.subr.bf16.mxu1 %v39685_v34 }
 0x219   : > { %25372 = vmatpush3.bf16.xpose.msra.mxu0 %v25371_v16  ;;  %v25377_v16 = vpack.c.bf16 %v30113_v40, %v30108_v58 }
 0x21a   : > { %25516 = vmatpush3.bf16.xpose.msra.mxu1 %v25515_v38  ;;  %25373 = vmatprep.subr.bf16.mxu0 %v39685_v34  ;;  %v25392_v38 = vpack.c.bf16 %v30323_v9, %v30318_v39 }
 0x21b   : > { %25517 = vmatprep.subr.bf16.mxu1 %v39685_v34 }
 0x220   : > { %20485 = vmatmul.mubr.f32.vlgmr.msra.gmra.mrb[2].mxu0 %v29187_v43 }
 0x221   : > { %25375 = vmatpush3.bf16.xpose.msra.mxu0 %v25374_v4  ;;  %20695 = vmatmul.mubr.f32.vlgmr.msra.gmra.mrb[2].mxu1 %v29187_v43  ;;  %v25536_v4 = vpack.c.bf16 %v30339_v57, %v30328_v37 }
 0x222   : > { %25519 = vmatpush3.bf16.xpose.msra.mxu1 %v25518_v55  ;;  %25376 = vmatprep.subr.bf16.mxu0 %v39685_v34  ;;  %v25395_v55 = vpack.c.bf16 %v30361_v18, %v30356_v8 }
 0x223   : > { %25520 = vmatprep.subr.bf16.mxu1 %v39685_v34  ;;  %20519 = vmatprep.mubr.msk.f32.mxu0 %vm28907_vm0, %v39694_v24 }
 0x224   : > { %20729 = vmatprep.mubr.msk.f32.mxu1 %vm28907_vm0, %v39694_v24 }
 0x229   : > { %25378 = vmatpush3.bf16.xpose.msra.mxu0 %v25377_v16  ;;  %v25539_v16 = vpack.c.bf16 %v30377_v54, %v30366_v17 }
 0x22a   : > { %25522 = vmatpush3.bf16.xpose.msra.mxu1 %v25521_v6  ;;  %25379 = vmatprep.subr.bf16.mxu0 %v39685_v34  ;;  %v39786_v6 = vld [vmem:[#allocation5_spill] sm:$0xff] }
 0x22b   : > { %25523 = vmatprep.subr.bf16.mxu1 %v39685_v34 }
 0x231   : > { %25381 = vmatpush3.bf16.xpose.msra.mxu0 %v25380_v32  ;;  %v39787_v32 = vld [vmem:[#allocation6_spill] sm:$0xff] }
 0x232   : > { %25525 = vmatpush3.bf16.xpose.msra.mxu1 %v25524_v60  ;;  %25382 = vmatprep.subr.bf16.mxu0 %v39685_v34  ;;  %v39788_v60 = vld [vmem:[#allocation7_spill] sm:$0xff] }
 0x233   : > { %25526 = vmatprep.subr.bf16.mxu1 %v39685_v34 }
 0x239   : > { %25384 = vmatpush3.bf16.xpose.msra.mxu0 %v25383_v15  ;;  %v39789_v15 = vld [vmem:[#allocation9_spill] sm:$0xff] }
 0x23a   : > { %25528 = vmatpush3.bf16.xpose.msra.mxu1 %v25527_v63  ;;  %25385 = vmatprep.subr.bf16.mxu0 %v39685_v34  ;;  %v39790_v63 = vand.u32 4294901760, %v30052_v21 }
 0x23b   : > { %25529 = vmatprep.subr.bf16.mxu1 %v39685_v34 }
 0x241   : > { %25387 = vmatpush3.bf16.xpose.msra.mxu0 %v25386_v62  ;;  %v39791_v62 = vand.u32 4294901760, %v30057_v59  ;;  %v39796_v59 = vand.u32 4294901760, %v30113_v40  ;;  %v39802_v40 = vand.u32 4294901760, %v30181_v12  ;;  %v39807_v12 = vand.u32 4294901760, %v30242_v5 }
 0x242   : > { %25531 = vmatpush3.bf16.xpose.msra.mxu1 %v25530_v2  ;;  %25388 = vmatprep.subr.bf16.mxu0 %v39685_v34  ;;  %v39813_v5 = vand.u32 4294901760, %v30290_v33 }
 0x243   : > { %25532 = vmatprep.subr.bf16.mxu1 %v39685_v34  ;;  %v25422_v2 = vpack.c.bf16 %v39791_v62, %v39790_v63  ;;  %v39799_v63 = vand.u32 4294901760, %v30160_v35  ;;  %v39800_v62 = vand.u32 4294901760, %v30165_v48  ;;  %v39805_v35 = vand.u32 4294901760, %v30214_v52 }
 0x244   : > { %v39806_v48 = vand.u32 4294901760, %v30225_v26  ;;  %v39811_v52 = vand.u32 4294901760, %v30280_v11  ;;  %v39812_v26 = vand.u32 4294901760, %v30285_v22  ;;  %v39817_v11 = vand.u32 4294901760, %v30328_v37  ;;  %v512_v37 = vld [vmem:[%s29007_s9 + $0x298] sm:$0xff] }
 0x245   : > { %v39818_v22 = vand.u32 4294901760, %v30339_v57  ;;  %v496_v57 = vld [vmem:[%s29007_s9 + $0x218] sm:$0xff] }
 0x246   : > { %v30663_v17 = vsel %vm557_vm1, %v496_v57, 0 }
 0x249   : > { %25390 = vmatpush3.bf16.xpose.msra.mxu0 %v25389_v30  ;;  %v39792_v30 = vand.u32 4294901760, %v30062_v23  ;;  %v39795_v23 = vand.u32 4294901760, %v30108_v58  ;;  %v39801_v58 = vand.u32 4294901760, %v30170_v61  ;;  %v39808_v61 = vand.u32 4294901760, %v30247_v19 }
 0x24a   : > { %25534 = vmatpush3.bf16.xpose.msra.mxu1 %v25533_v51  ;;  %25391 = vmatprep.subr.bf16.mxu0 %v39685_v34  ;;  %v39793_v51 = vand.u32 4294901760, %v30073_v46  ;;  %v39797_v46 = vand.u32 4294901760, %v30118_v0  ;;  %v39803_v0 = vand.u32 4294901760, %v30202_v56  ;;  %v39809_v56 = vand.u32 4294901760, %v30252_v50 }
 0x24b   : > { %25535 = vmatprep.subr.bf16.mxu1 %v39685_v34  ;;  %v25425_v21 = vpack.c.bf16 %v39796_v59, %v39795_v23  ;;  %v25434_v23 = vpack.c.bf16 %v39808_v61, %v39807_v12  ;;  %v39814_v19 = vand.u32 4294901760, %v30301_v47  ;;  %v39816_v50 = vand.u32 4294901760, %v30323_v9  ;;  %v511_v9 = vld [vmem:[%s29007_s9 + $0x290] sm:$0xff] }
 0x24c   : > { %v39819_v47 = vand.u32 4294901760, %v30361_v18 }
 0x24e   : > { %v25443_v33 = vpack.c.bf16 %v39819_v47, %v2179_v53  ;;  %v495_v53 = vld [vmem:[%s29007_s9 + $0x210] sm:$0xff]  ;;  %v517_v47 = vld [vmem:[%s29007_s9 + $0x2c0] sm:$0xff] }
 0x24f   : > { %v30660_v18 = vsel %vm557_vm1, %v495_v53, 0 }
 0x251   : > { %25393 = vmatpush3.bf16.xpose.msra.mxu0 %v25392_v38  ;;  %v25566_v38 = vpack.c.bf16 %v39793_v51, %v39792_v30  ;;  %v25572_v30 = vpack.c.bf16 %v39802_v40, %v39801_v58  ;;  %v514_v58 = vld [vmem:[%s29007_s9 + $0x2a8] sm:$0xff] }
 0x252   : > { %25537 = vmatpush3.bf16.xpose.msra.mxu1 %v25536_v4  ;;  %25394 = vmatprep.subr.bf16.mxu0 %v39685_v34  ;;  %v39794_v4 = vld [vmem:[#allocation8_spill] sm:$0xff] }
 0x253   : > { %25538 = vmatprep.subr.bf16.mxu1 %v39685_v34 }
 0x259   : > { %25396 = vmatpush3.bf16.xpose.msra.mxu0 %v25395_v55  ;;  %v39798_v55 = vand.u32 4294901760, %v30135_v45  ;;  %v39804_v45 = vand.u32 4294901760, %v30207_v13  ;;  %v39810_v13 = vand.u32 4294901760, %v30263_v49  ;;  %v39815_v49 = vand.u32 4294901760, %v30318_v39 }
 0x25a   : > { %25540 = vmatpush3.bf16.xpose.msra.mxu1 %v25539_v16  ;;  %25397 = vmatprep.subr.bf16.mxu0 %v39685_v34  ;;  %v25587_v39 = vpack.c.bf16 %v2875_v44, %v2868_v3  ;;  %v30666_v3 = vsel %vm557_vm1, %v511_v9, 0  ;;  %v30669_v44 = vsel %vm557_vm1, %v512_v37, 0 }
 0x25b   : > { %25541 = vmatprep.subr.bf16.mxu1 %v39685_v34  ;;  %v25569_v16 = vpack.c.bf16 %v39798_v55, %v39797_v46  ;;  %v25431_v51 = vpack.c.bf16 %v39804_v45, %v39803_v0  ;;  %v25578_v59 = vpack.c.bf16 %v39810_v13, %v39809_v56  ;;  %v25581_v46 = vpack.c.bf16 %v39814_v19, %v39813_v5  ;;  %v500_v56 = vld [vmem:[%s29007_s9 + $0x238] sm:$0xff]  ;;  %v515_v13 = vld [vmem:[%s29007_s9 + $0x2b0] sm:$0xff] }
 0x25c   : > { %v25440_v55 = vpack.c.bf16 %v39816_v50, %v39815_v49  ;;  %v30741_v5 = vsel %vm557_vm1, %v500_v56, 0  ;;  %v30744_v19 = vsel %vm557_vm1, %v515_v13, 0 }
 0x25d   : > { %v39142_v50 = vand.u32 4294901760, %v30741_v5 }
 0x260   : > { %20520 = vmatmul.mubr.f32.vlgmr.msra.gmra.mrb[2].mxu0 %v29208_v1 }
 0x261   : > { %25399 = vmatpush3.bf16.xpose.msra.mxu0 %v29831_v28  ;;  %20730 = vmatmul.mubr.f32.vlgmr.msra.gmra.mrb[2].mxu1 %v29208_v1 }
 0x262   : > { %25543 = vmatpush3.bf16.xpose.msra.mxu1 %v29837_v25  ;;  %25400 = vmatprep.subr.bf16.mxu0 %v39685_v34 }
 0x263   : > { %25544 = vmatprep.subr.bf16.mxu1 %v39685_v34  ;;  %20554 = vmatprep.mubr.msk.f32.mxu0 %vm28907_vm0, %v39694_v24 }
 0x264   : > { %20764 = vmatprep.mubr.msk.f32.mxu1 %vm28907_vm0, %v39694_v24 }
 0x269   : > { %25402 = vmatpush3.bf16.xpose.msra.mxu0 %v29873_v14 }
 0x26a   : > { %25546 = vmatpush3.bf16.xpose.msra.mxu1 %v29879_v36  ;;  %25403 = vmatprep.subr.bf16.mxu0 %v39685_v34 }
 0x26b   : > { %25547 = vmatprep.subr.bf16.mxu1 %v39685_v34 }
 0x271   : > { %25405 = vmatpush3.bf16.xpose.msra.mxu0 %v29909_v41 }
 0x272   : > { %25549 = vmatpush3.bf16.xpose.msra.mxu1 %v29915_v31  ;;  %25406 = vmatprep.subr.bf16.mxu0 %v39685_v34 }
 0x273   : > { %25550 = vmatprep.subr.bf16.mxu1 %v39685_v34 }
 0x279   : > { %25408 = vmatpush3.bf16.xpose.msra.mxu0 %v29945_v42 }
 0x27a   : > { %25552 = vmatpush3.bf16.xpose.msra.mxu1 %v29951_v20  ;;  %25409 = vmatprep.subr.bf16.mxu0 %v39685_v34 }
 0x27b   : > { %25553 = vmatprep.subr.bf16.mxu1 %v39685_v34 }
 0x281   : > { %25411 = vmatpush3.bf16.xpose.msra.mxu0 %v29981_v27 }
 0x282   : > { %25555 = vmatpush3.bf16.xpose.msra.mxu1 %v29987_v10  ;;  %25412 = vmatprep.subr.bf16.mxu0 %v39685_v34 }
 0x283   : > { %25556 = vmatprep.subr.bf16.mxu1 %v39685_v34 }
 0x289   : > { %25414 = vmatpush3.bf16.xpose.msra.mxu0 %v30017_v29 }
 0x28a   : > { %25558 = vmatpush3.bf16.xpose.msra.mxu1 %v30023_v7  ;;  %25415 = vmatprep.subr.bf16.mxu0 %v39685_v34 }
 0x28b   : > { %25559 = vmatprep.subr.bf16.mxu1 %v39685_v34 }
 0x291   : > { %25417 = vmatpush3.bf16.xpose.msra.mxu0 %v39786_v6 }
 0x292   : > { %25561 = vmatpush3.bf16.xpose.msra.mxu1 %v39787_v32  ;;  %25418 = vmatprep.subr.bf16.mxu0 %v39685_v34 }
 0x293   : > { %25562 = vmatprep.subr.bf16.mxu1 %v39685_v34 }
 0x299   : > { %25420 = vmatpush3.bf16.xpose.msra.mxu0 %v39788_v60 }
 0x29a   : > { %25564 = vmatpush3.bf16.xpose.msra.mxu1 %v39789_v15  ;;  %25421 = vmatprep.subr.bf16.mxu0 %v39685_v34 }
 0x29b   : > { %25565 = vmatprep.subr.bf16.mxu1 %v39685_v34 }
 0x2a0   : > { %20555 = vmatmul.mubr.f32.vlgmr.msra.gmra.mrb[2].mxu0 %v39794_v4 }
 0x2a1   : > { %25423 = vmatpush3.bf16.xpose.msra.mxu0 %v25422_v2  ;;  %20765 = vmatmul.mubr.f32.vlgmr.msra.gmra.mrb[2].mxu1 %v39794_v4  ;;  %v25428_v2 = vpack.c.bf16 %v39800_v62, %v39799_v63  ;;  %v497_v63 = vld [vmem:[%s29007_s9 + $0x220] sm:$0xff]  ;;  %v498_v62 = vld [vmem:[%s29007_s9 + $0x228] sm:$0xff] }
 0x2a2   : > { %25567 = vmatpush3.bf16.xpose.msra.mxu1 %v25566_v38  ;;  %25424 = vmatprep.subr.bf16.mxu0 %v39685_v34  ;;  %v25575_v38 = vpack.c.bf16 %v39806_v48, %v39805_v35  ;;  %v30702_v0 = vsel %vm557_vm1, %v497_v63, 0  ;;  %v30705_v45 = vsel %vm557_vm1, %v498_v62, 0  ;;  %v30711_v35 = vsel %vm557_vm1, %v514_v58, 0  ;;  %v503_v62 = vld [vmem:[%s29007_s9 + $0x250] sm:$0xff] }
 0x2a3   : > { %25568 = vmatprep.subr.bf16.mxu1 %v39685_v34  ;;  %20589 = vmatprep.mubr.msk.f32.mxu0 %vm28907_vm0, %v39694_v24  ;;  %v39151_v48 = vand.u32 4294901760, %v30702_v0  ;;  %v39148_v61 = vand.u32 4294901760, %v30711_v35  ;;  %v519_v58 = vld [vmem:[%s29007_s9 + $0x2d0] sm:$0xff] }
 0x2a4   : > { %20799 = vmatprep.mubr.msk.f32.mxu1 %vm28907_vm0, %v39694_v24 }
 0x2a9   : > { %25426 = vmatpush3.bf16.xpose.msra.mxu0 %v25425_v21  ;;  %v25437_v21 = vpack.c.bf16 %v39812_v26, %v39811_v52 }
 0x2aa   : > { %25570 = vmatpush3.bf16.xpose.msra.mxu1 %v25569_v16  ;;  %25427 = vmatprep.subr.bf16.mxu0 %v39685_v34  ;;  %v25584_v16 = vpack.c.bf16 %v39818_v22, %v39817_v11  ;;  %v501_v22 = vld [vmem:[%s29007_s9 + $0x240] sm:$0xff] }
 0x2ab   : > { %25571 = vmatprep.subr.bf16.mxu1 %v39685_v34 }
 0x2b1   : > { %25429 = vmatpush3.bf16.xpose.msra.mxu0 %v25428_v2  ;;  %v513_v2 = vld [vmem:[%s29007_s9 + $0x2a0] sm:$0xff] }
 0x2b2   : > { %25573 = vmatpush3.bf16.xpose.msra.mxu1 %v25572_v30  ;;  %25430 = vmatprep.subr.bf16.mxu0 %v39685_v34 }
 0x2b3   : > { %25574 = vmatprep.subr.bf16.mxu1 %v39685_v34 }
 0x2b9   : > { %25432 = vmatpush3.bf16.xpose.msra.mxu0 %v25431_v51  ;;  %v30708_v51 = vsel %vm557_vm1, %v513_v2, 0  ;;  %v504_v2 = vld [vmem:[%s29007_s9 + $0x258] sm:$0xff] }
 0x2ba   : > { %25576 = vmatpush3.bf16.xpose.msra.mxu1 %v25575_v38  ;;  %25433 = vmatprep.subr.bf16.mxu0 %v39685_v34  ;;  %v39150_v38 = vand.u32 4294901760, %v30705_v45  ;;  %v39149_v12 = vand.u32 4294901760, %v30708_v51 }
 0x2bb   : > { %25577 = vmatprep.subr.bf16.mxu1 %v39685_v34 }
 0x2bc   : > { %v30729_v52 = vpack.c.bf16 %v39150_v38, %v39151_v48  ;;  %v30735_v26 = vpack.c.bf16 %v39148_v61, %v39149_v12  ;;  %v524_v61 = vld [vmem:[%s29007_s9 + $0x2f8] sm:$0xff] }
 0x2c1   : > { %25435 = vmatpush3.bf16.xpose.msra.mxu0 %v25434_v23  ;;  %v499_v23 = vld [vmem:[%s29007_s9 + $0x230] sm:$0xff] }
 0x2c2   : > { %25579 = vmatpush3.bf16.xpose.msra.mxu1 %v25578_v59  ;;  %25436 = vmatprep.subr.bf16.mxu0 %v39685_v34  ;;  %v516_v59 = vld [vmem:[%s29007_s9 + $0x2b8] sm:$0xff] }
 0x2c3   : > { %25580 = vmatprep.subr.bf16.mxu1 %v39685_v34 }
 0x2c9   : > { %25438 = vmatpush3.bf16.xpose.msra.mxu0 %v25437_v21  ;;  %v30738_v21 = vsel %vm557_vm1, %v499_v23, 0  ;;  %v520_v23 = vld [vmem:[%s29007_s9 + $0x2d8] sm:$0xff] }
 0x2ca   : > { %25582 = vmatpush3.bf16.xpose.msra.mxu1 %v25581_v46  ;;  %25439 = vmatprep.subr.bf16.mxu0 %v39685_v34  ;;  %v30747_v46 = vsel %vm557_vm1, %v516_v59, 0  ;;  %v39143_v49 = vand.u32 4294901760, %v30738_v21  ;;  %v30810_v59 = vsel %vm557_vm1, %v503_v62, 0 }
 0x2cb   : > { %25583 = vmatprep.subr.bf16.mxu1 %v39685_v34  ;;  %v39140_v11 = vand.u32 4294901760, %v30747_v46 }
 0x2d1   : > { %25441 = vmatpush3.bf16.xpose.msra.mxu0 %v25440_v55  ;;  %v39141_v55 = vand.u32 4294901760, %v30744_v19 }
 0x2d2   : > { %25585 = vmatpush3.bf16.xpose.msra.mxu1 %v25584_v16  ;;  %25442 = vmatprep.subr.bf16.mxu0 %v39685_v34  ;;  %v502_v16 = vld [vmem:[%s29007_s9 + $0x248] sm:$0xff] }
 0x2d3   : > { %25586 = vmatprep.subr.bf16.mxu1 %v39685_v34 }
 0x2d9   : > { %25444 = vmatpush3.bf16.xpose.msra.mxu0 %v25443_v33  ;;  %v518_v33 = vld [vmem:[%s29007_s9 + $0x2c8] sm:$0xff] }
 0x2da   : > { %25588 = vmatpush3.bf16.xpose.msra.mxu1 %v25587_v39  ;;  %25445 = vmatprep.subr.bf16.mxu0 %v39685_v34  ;;  %v30765_v39 = vpack.c.bf16 %v39142_v50, %v39143_v49  ;;  %v30783_v53 = vsel %vm557_vm1, %v518_v33, 0  ;;  %v39145_v33 = vand.u32 4294901760, %v30810_v59 }
 0x2db   : > { %25589 = vmatprep.subr.bf16.mxu1 %v39685_v34  ;;  %v39136_v63 = vand.u32 4294901760, %v30783_v53 }
 0x2e0   : > { %20590 = vmatmul.mubr.f32.vlgmr.msra.gmra.mrb[2].mxu0 %v29187_v43 }
 0x2e1   : > { %25447 = vmatpush3.bf16.xpose.msra.mxu0 %v29831_v28  ;;  %20800 = vmatmul.mubr.f32.vlgmr.msra.gmra.mrb[2].mxu1 %v29187_v43  ;;  %v493_v28 = vld [vmem:[%s29007_s9 + $0x200] sm:$0xff] }
 0x2e2   : > { %25591 = vmatpush3.bf16.xpose.msra.mxu1 %v29837_v25  ;;  %25448 = vmatprep.subr.bf16.mxu0 %v39685_v34  ;;  %v494_v25 = vld [vmem:[%s29007_s9 + $0x208] sm:$0xff] }
 0x2e3   : > { %25592 = vmatprep.subr.bf16.mxu1 %v39685_v34  ;;  %20624 = vmatprep.mubr.msk.f32.mxu0 %vm28907_vm0, %v39694_v24 }
 0x2e4   : > { %20834 = vmatprep.mubr.msk.f32.mxu1 %vm28907_vm0, %v39694_v24 }
 0x2e9   : > { %25450 = vmatpush3.bf16.xpose.msra.mxu0 %v29873_v14  ;;  %v509_v14 = vld [vmem:[%s29007_s9 + $0x280] sm:$0xff] }
 0x2ea   : > { %25594 = vmatpush3.bf16.xpose.msra.mxu1 %v29879_v36  ;;  %25451 = vmatprep.subr.bf16.mxu0 %v39685_v34  ;;  %v510_v36 = vld [vmem:[%s29007_s9 + $0x288] sm:$0xff] }
 0x2eb   : > { %25595 = vmatprep.subr.bf16.mxu1 %v39685_v34 }
 0x2f1   : > { %25453 = vmatpush3.bf16.xpose.msra.mxu0 %v29909_v41  ;;  %v30624_v41 = vsel %vm557_vm1, %v493_v28, 0  ;;  %v30771_v28 = vpack.c.bf16 %v39140_v11, %v39141_v55 }
 0x2f2   : > { %25597 = vmatpush3.bf16.xpose.msra.mxu1 %v29915_v31  ;;  %25454 = vmatprep.subr.bf16.mxu0 %v39685_v34  ;;  %v30627_v31 = vsel %vm557_vm1, %v494_v25, 0  ;;  %v30774_v25 = vsel %vm557_vm1, %v501_v22, 0  ;;  %v30813_v22 = vsel %vm557_vm1, %v504_v2, 0 }
 0x2f3   : > { %25598 = vmatprep.subr.bf16.mxu1 %v39685_v34  ;;  %v39139_v57 = vand.u32 4294901760, %v30774_v25 }
 0x2f9   : > { %25456 = vmatpush3.bf16.xpose.msra.mxu0 %v29945_v42  ;;  %v30633_v42 = vsel %vm557_vm1, %v510_v36, 0  ;;  %v30780_v36 = vsel %vm557_vm1, %v517_v47, 0  ;;  %v30819_v47 = vsel %vm557_vm1, %v520_v23, 0  ;;  %v521_v23 = vld [vmem:[%s29007_s9 + $0x2e0] sm:$0xff] }
 0x2fa   : > { %25600 = vmatpush3.bf16.xpose.msra.mxu1 %v29951_v20  ;;  %25457 = vmatprep.subr.bf16.mxu0 %v39685_v34  ;;  %v3366_v20 = vand.u32 4294901760, %v30624_v41  ;;  %v39137_v37 = vand.u32 4294901760, %v30780_v36  ;;  %v39146_v2 = vand.u32 4294901760, %v30819_v47  ;;  %v30852_v49 = vsel %vm557_vm1, %v521_v23, 0  ;;  %v507_v23 = vld [vmem:[%s29007_s9 + $0x270] sm:$0xff] }
 0x2fb   : > { %25601 = vmatprep.subr.bf16.mxu1 %v39685_v34 }
 0x2fc   : > { %v30807_v13 = vpack.c.bf16 %v39136_v63, %v39137_v37  ;;  %v39144_v63 = vand.u32 4294901760, %v30813_v22  ;;  %v506_v37 = vld [vmem:[%s29007_s9 + $0x268] sm:$0xff]  ;;  %v30872_v12 = vsub.f32 %v30624_v41, %v3366_v20 }
 0x2fd   : > { %v30849_v50 = vsel %vm557_vm1, %v506_v37, 0 }
 0x301   : > { %25459 = vmatpush3.bf16.xpose.msra.mxu0 %v29981_v27 }
 0x302   : > { %25603 = vmatpush3.bf16.xpose.msra.mxu1 %v29987_v10  ;;  %25460 = vmatprep.subr.bf16.mxu0 %v39685_v34  ;;  %v4058_v10 = vand.u32 4294901760, %v30633_v42 }
 0x303   : > { %25604 = vmatprep.subr.bf16.mxu1 %v39685_v34 }
 0x304   : > { %v30893_v41 = vsub.f32 %v30633_v42, %v4058_v10 }
 0x309   : > { %25462 = vmatpush3.bf16.xpose.msra.mxu0 %v30017_v29  ;;  %v3369_v29 = vand.u32 4294901760, %v30627_v31 }
 0x30a   : > { %25606 = vmatpush3.bf16.xpose.msra.mxu1 %v30023_v7  ;;  %25463 = vmatprep.subr.bf16.mxu0 %v39685_v34  ;;  %v30630_v7 = vsel %vm557_vm1, %v509_v14, 0  ;;  %v30777_v14 = vsel %vm557_vm1, %v502_v16, 0  ;;  %v30816_v16 = vsel %vm557_vm1, %v519_v58, 0  ;;  %v505_v58 = vld [vmem:[%s29007_s9 + $0x260] sm:$0xff] }
 0x30b   : > { %25607 = vmatprep.subr.bf16.mxu1 %v39685_v34  ;;  %v4055_v27 = vand.u32 4294901760, %v30630_v7  ;;  %v30651_v54 = vpack.c.bf16 %v3369_v29, %v3366_v20  ;;  %v39138_v9 = vand.u32 4294901760, %v30777_v14  ;;  %v39147_v62 = vand.u32 4294901760, %v30816_v16 }
 0x30c   : > { %v30846_v55 = vsel %vm557_vm1, %v505_v58, 0  ;;  %v39154_v58 = vand.u32 4294901760, %v30852_v49  ;;  %v30877_v38 = vsub.f32 %v30627_v31, %v3369_v29 }
 0x30d   : > { %v30657_v8 = vpack.c.bf16 %v4058_v10, %v4055_v27  ;;  %v30801_v56 = vpack.c.bf16 %v39138_v9, %v39139_v57  ;;  %v522_v9 = vld [vmem:[%s29007_s9 + $0x2e8] sm:$0xff]  ;;  %v30837_v57 = vpack.c.bf16 %v39144_v63, %v39145_v33  ;;  %v30843_v11 = vpack.c.bf16 %v39146_v2, %v39147_v62  ;;  %v508_v62 = vld [vmem:[%s29007_s9 + $0x278] sm:$0xff] }
 0x30e   : > { %v30855_v63 = vsel %vm557_vm1, %v522_v9, 0  ;;  %v39156_v33 = vand.u32 4294901760, %v30846_v55  ;;  %v39155_v2 = vand.u32 4294901760, %v30849_v50  ;;  %v523_v9 = vld [vmem:[%s29007_s9 + $0x2f0] sm:$0xff]  ;;  %v30882_v48 = vsub.f32 %v30630_v7, %v4055_v27 }
 0x30f   : > { %v39153_v37 = vand.u32 4294901760, %v30855_v63  ;;  %v30902_v7 = vsel %vm557_vm1, %v507_v23, 0  ;;  %v30905_v20 = vsel %vm557_vm1, %v508_v62, 0  ;;  %v30908_v29 = vsel %vm557_vm1, %v523_v9, 0 }
 0x310   : > { %v30911_v27 = vsel %vm557_vm1, %v524_v61, 0  ;;  %v39159_v42 = vand.u32 4294901760, %v30902_v7  ;;  %v39157_v10 = vand.u32 4294901760, %v30905_v20  ;;  %v39160_v23 = vand.u32 4294901760, %v30877_v38 }
 0x311   : > { %25465 = vmatpush3.bf16.xpose.msra.mxu0 %v39786_v6  ;;  %v3372_v6 = vand.u32 4294901760, %v30660_v18  ;;  %v30899_v31 = vpack.c.bf16 %v39153_v37, %v39154_v58  ;;  %v39158_v37 = vand.u32 4294901760, %v30872_v12  ;;  %v39162_v62 = vand.u32 4294901760, %v30908_v29 }
 0x312   : > { %25609 = vmatpush3.bf16.xpose.msra.mxu1 %v39787_v32  ;;  %25466 = vmatprep.subr.bf16.mxu0 %v39685_v34  ;;  %v3375_v32 = vand.u32 4294901760, %v30663_v17  ;;  %v39163_v61 = vand.u32 4294901760, %v30882_v48  ;;  %v30944_v58 = vpack.c.bf16 %v39157_v10, %v39159_v42 }
 0x313   : > { %25610 = vmatprep.subr.bf16.mxu1 %v39685_v34  ;;  %39821 = vst [vmem:[#allocation6_spill] sm:$0xff] %v30899_v31 }
 0x314   : > { %v30693_v40 = vpack.c.bf16 %v3375_v32, %v3372_v6  ;;  %39822 = vst [vmem:[#allocation7_spill] sm:$0xff] %v30944_v58  ;;  %v4149_v10 = vsub.f32 %v30882_v48, %v39163_v61 }
 0x319   : > { %25468 = vmatpush3.bf16.xpose.msra.mxu0 %v39788_v60  ;;  %v4061_v60 = vand.u32 4294901760, %v30666_v3 }
 0x31a   : > { %25612 = vmatpush3.bf16.xpose.msra.mxu1 %v39789_v15  ;;  %25613 = vmatprep.subr.bf16.mxu0 %v39685_v34  ;;  %v39152_v15 = vand.u32 4294901760, %v30669_v44 }
 0x31b   : > { %25757 = vmatprep.subr.bf16.mxu1 %v39685_v34  ;;  %v30938_v9 = vsub.f32 %v30666_v3, %v4061_v60  ;;  %v39824_v3 = vand.u32 4294901760, %v30911_v27 }
 0x31c   : > { %v30699_v30 = vpack.c.bf16 %v39152_v15, %v4061_v60  ;;  %v30888_v15 = vpack.c.bf16 %v39155_v2, %v39156_v33  ;;  %v30928_v2 = vsub.f32 %v30660_v18, %v3372_v6  ;;  %v30933_v33 = vsub.f32 %v30663_v17, %v3375_v32 }
 0x31d   : > { %v3460_v18 = vsub.f32 %v30872_v12, %v39158_v37  ;;  %v3467_v17 = vsub.f32 %v30877_v38, %v39160_v23  ;;  %v39823_v6 = vand.u32 4294901760, %v30669_v44  ;;  %v30961_v60 = vpack.c.bf16 %v39824_v3, %v39162_v62 }
 0x31e   : > { %39820 = vst [vmem:[#allocation5_spill] sm:$0xff] %v30888_v15  ;;  %v39826_v37 = vand.u32 4294901760, %v30893_v41  ;;  %v4150_v3 = vand.u32 4294901760, %v4149_v10 }
 0x31f   : > { %v30955_v32 = vsub.f32 %v30669_v44, %v39823_v6  ;;  %39825 = vst [vmem:[#allocation9_spill] sm:$0xff] %v30961_v60  ;;  %v3461_v23 = vand.u32 4294901760, %v3460_v18  ;;  %v3468_v4 = vand.u32 4294901760, %v3467_v17  ;;  %v39828_v17 = vand.u32 4294901760, %v30705_v45 }
 0x320   : > { %20625 = vmatmul.mubr.f32.vlgmr.msra.gmra.mrb[2].mxu0 %v29187_v43  ;;  %v4156_v42 = vsub.f32 %v30893_v41, %v39826_v37  ;;  %v39827_v37 = vand.u32 4294901760, %v30702_v0  ;;  %v39829_v44 = vand.u32 4294901760, %v30708_v51 }
 0x321   : > { %20835 = vmatmul.mubr.f32.vlgmr.msra.gmra.mrb[2].mxu1 %v29187_v43  ;;  %25615 = vmatpush3.bf16.xpose.msra.mxu0 %v30651_v54  ;;  %v30985_v6 = vsub.f32 %v30705_v45, %v39828_v17  ;;  %v25638_v10 = vpack.c.bf16 %v3468_v4, %v3461_v23  ;;  %v39833_v17 = vand.u32 4294901760, %v30938_v9  ;;  %v39834_v4 = vand.u32 4294901760, %v30955_v32 }
 0x322   : > { %25759 = vmatpush3.bf16.xpose.msra.mxu1 %v30657_v8  ;;  %25616 = vmatprep.subr.bf16.mxu0 %v39685_v34  ;;  %v4157_v62 = vand.u32 4294901760, %v4156_v42  ;;  %v30980_v18 = vsub.f32 %v30702_v0, %v39827_v37  ;;  %v30990_v42 = vsub.f32 %v30708_v51, %v39829_v44  ;;  %v39832_v37 = vand.u32 4294901760, %v30711_v35  ;;  %v39835_v44 = vld [vmem:[#allocation10_spill] sm:$0xff] }
 0x323   : > { %25760 = vmatprep.subr.bf16.mxu1 %v39685_v34  ;;  %20869 = vmatprep.mubr.msk.f32.mxu0 %vm28907_vm0, %v39694_v24  ;;  %v4163_v51 = vsub.f32 %v30938_v9, %v39833_v17  ;;  %v4170_v23 = vsub.f32 %v30955_v32, %v39834_v4 }
 0x324   : > { %21079 = vmatprep.mubr.msk.f32.mxu1 %vm28907_vm0, %v39694_v24  ;;  %v25782_v45 = vpack.c.bf16 %v4157_v62, %v4150_v3 }
 0x325   : > { %v4164_v62 = vand.u32 4294901760, %v4163_v51  ;;  %v4171_v3 = vand.u32 4294901760, %v4170_v23  ;;  %v39838_v51 = vand.u32 4294901760, %v30744_v19 }
 0x327   : > { %v31034_v4 = vsub.f32 %v30744_v19, %v39838_v51 }
 0x329   : > { %25618 = vmatpush3.bf16.xpose.msra.mxu0 %v30693_v40 }
 0x32a   : > { %25762 = vmatpush3.bf16.xpose.msra.mxu1 %v30699_v30  ;;  %25619 = vmatprep.subr.bf16.mxu0 %v39685_v34 }
 0x32b   : > { %25763 = vmatprep.subr.bf16.mxu1 %v39685_v34 }
 0x331   : > { %25621 = vmatpush3.bf16.xpose.msra.mxu0 %v30729_v52 }
 0x332   : > { %25765 = vmatpush3.bf16.xpose.msra.mxu1 %v30735_v26  ;;  %25622 = vmatprep.subr.bf16.mxu0 %v39685_v34 }
 0x333   : > { %25766 = vmatprep.subr.bf16.mxu1 %v39685_v34 }
 0x339   : > { %25624 = vmatpush3.bf16.xpose.msra.mxu0 %v30765_v39 }
 0x33a   : > { %25768 = vmatpush3.bf16.xpose.msra.mxu1 %v30771_v28  ;;  %25625 = vmatprep.subr.bf16.mxu0 %v39685_v34 }
 0x33b   : > { %25769 = vmatprep.subr.bf16.mxu1 %v39685_v34 }
 0x341   : > { %25627 = vmatpush3.bf16.xpose.msra.mxu0 %v30801_v56 }
 0x342   : > { %25771 = vmatpush3.bf16.xpose.msra.mxu1 %v30807_v13  ;;  %25628 = vmatprep.subr.bf16.mxu0 %v39685_v34 }
 0x343   : > { %25772 = vmatprep.subr.bf16.mxu1 %v39685_v34 }
 0x349   : > { %25630 = vmatpush3.bf16.xpose.msra.mxu0 %v30837_v57 }
 0x34a   : > { %25774 = vmatpush3.bf16.xpose.msra.mxu1 %v30843_v11  ;;  %25631 = vmatprep.subr.bf16.mxu0 %v39685_v34 }
 0x34b   : > { %25775 = vmatprep.subr.bf16.mxu1 %v39685_v34 }
 0x351   : > { %25633 = vmatpush3.bf16.xpose.msra.mxu0 %v30888_v15  ;;  %v39172_v15 = vand.u32 4294901760, %v30980_v18 }
 0x352   : > { %25777 = vmatpush3.bf16.xpose.msra.mxu1 %v30899_v31  ;;  %25634 = vmatprep.subr.bf16.mxu0 %v39685_v34  ;;  %v39830_v31 = vand.u32 4294901760, %v30928_v2 }
 0x353   : > { %25778 = vmatprep.subr.bf16.mxu1 %v39685_v34  ;;  %v3488_v17 = vsub.f32 %v30980_v18, %v39172_v15 }
 0x354   : > { %v3474_v61 = vsub.f32 %v30928_v2, %v39830_v31 }
 0x355   : > { %v3489_v51 = vand.u32 4294901760, %v3488_v17 }
 0x356   : > { %v3475_v31 = vand.u32 4294901760, %v3474_v61  ;;  %v39836_v61 = vand.u32 4294901760, %v30738_v21 }
 0x359   : > { %25636 = vmatpush3.bf16.xpose.msra.mxu0 %v30944_v58  ;;  %v31001_v58 = vsub.f32 %v30711_v35, %v39832_v37  ;;  %v39174_v35 = vand.u32 4294901760, %v30985_v6  ;;  %v39175_v37 = vand.u32 4294901760, %v30990_v42 }
 0x35a   : > { %25780 = vmatpush3.bf16.xpose.msra.mxu1 %v30961_v60  ;;  %25637 = vmatprep.subr.bf16.mxu0 %v39685_v34  ;;  %v39831_v60 = vand.u32 4294901760, %v30933_v33 }
 0x35b   : > { %25781 = vmatprep.subr.bf16.mxu1 %v39685_v34  ;;  %v4177_v19 = vsub.f32 %v30990_v42, %v39175_v37 }
 0x35c   : > { %v3481_v0 = vsub.f32 %v30933_v33, %v39831_v60 }
 0x35e   : > { %v3482_v60 = vand.u32 4294901760, %v3481_v0  ;;  %v39837_v0 = vand.u32 4294901760, %v30741_v5 }
 0x360   : > { %20870 = vmatmul.mubr.f32.vlgmr.msra.gmra.mrb[4].mxu0 %v39835_v44  ;;  %v25641_v23 = vpack.c.bf16 %v3482_v60, %v3475_v31  ;;  %v39840_v31 = vand.u32 4294901760, %v31001_v58 }
 0x361   : > { %25639 = vmatpush3.bf16.xpose.msra.mxu0 %v25638_v10  ;;  %21080 = vmatmul.mubr.f32.vlgmr.msra.gmra.mrb[4].mxu1 %v39835_v44  ;;  %v31022_v10 = vsub.f32 %v30738_v21, %v39836_v61  ;;  %v3495_v21 = vsub.f32 %v30985_v6, %v39174_v35 }
 0x362   : > { %25783 = vmatpush3.bf16.xpose.msra.mxu1 %v25782_v45  ;;  %25640 = vmatprep.subr.bf16.mxu0 %v39685_v34  ;;  %v31027_v45 = vsub.f32 %v30741_v5, %v39837_v0  ;;  %v39839_v5 = vand.u32 4294901760, %v30747_v46  ;;  %v25785_v0 = vpack.c.bf16 %v4171_v3, %v4164_v62  ;;  %v4184_v60 = vsub.f32 %v31001_v58, %v39840_v31 }
 0x363   : > { %25784 = vmatprep.subr.bf16.mxu1 %v39685_v34  ;;  %20904 = vmatprep.mubr.msk.f32.mxu0 %vm28907_vm0, %v39694_v24  ;;  %v3496_v15 = vand.u32 4294901760, %v3495_v21  ;;  %v39176_v44 = vand.u32 4294901760, %v31022_v10  ;;  %v39178_v3 = vand.u32 4294901760, %v31034_v4  ;;  %v39841_v31 = vand.u32 4294901760, %v30774_v25 }
 0x364   : > { %21114 = vmatprep.mubr.msk.f32.mxu1 %vm28907_vm0, %v39694_v24  ;;  %v31045_v61 = vsub.f32 %v30747_v46, %v39839_v5  ;;  %v39177_v35 = vand.u32 4294901760, %v31027_v45  ;;  %v4178_v46 = vand.u32 4294901760, %v4177_v19  ;;  %v4185_v62 = vand.u32 4294901760, %v4184_v60 }
 0x365   : > { %v31062_v17 = vsub.f32 %v30774_v25, %v39841_v31  ;;  %v25644_v60 = vpack.c.bf16 %v3496_v15, %v3489_v51  ;;  %v3502_v37 = vsub.f32 %v31022_v10, %v39176_v44  ;;  %v39844_v31 = vand.u32 4294901760, %v30783_v53 }
 0x366   : > { %v3509_v25 = vsub.f32 %v31027_v45, %v39177_v35  ;;  %v39845_v15 = vand.u32 4294901760, %v31045_v61 }
 0x367   : > { %v31083_v5 = vsub.f32 %v30783_v53, %v39844_v31  ;;  %v39179_v44 = vand.u32 4294901760, %v31062_v17 }
 0x368   : > { %v4198_v51 = vsub.f32 %v31045_v61, %v39845_v15  ;;  %v39846_v15 = vand.u32 4294901760, %v30810_v59 }
 0x369   : > { %25642 = vmatpush3.bf16.xpose.msra.mxu0 %v25641_v23  ;;  %v39842_v23 = vand.u32 4294901760, %v30777_v14 }
 0x36a   : > { %25786 = vmatpush3.bf16.xpose.msra.mxu1 %v25785_v0  ;;  %25643 = vmatprep.subr.bf16.mxu0 %v39685_v34  ;;  %v39843_v0 = vand.u32 4294901760, %v30780_v36 }
 0x36b   : > { %25787 = vmatprep.subr.bf16.mxu1 %v39685_v34  ;;  %v31067_v21 = vsub.f32 %v30777_v14, %v39842_v23  ;;  %v25788_v14 = vpack.c.bf16 %v4185_v62, %v4178_v46  ;;  %v3503_v23 = vand.u32 4294901760, %v3502_v37  ;;  %v4199_v46 = vand.u32 4294901760, %v4198_v51 }
 0x36c   : > { %v31072_v19 = vsub.f32 %v30780_v36, %v39843_v0  ;;  %v4191_v36 = vsub.f32 %v31034_v4, %v39178_v3  ;;  %v3510_v0 = vand.u32 4294901760, %v3509_v25  ;;  %v31100_v37 = vsub.f32 %v30810_v59, %v39846_v15 }
 0x36d   : > { %v39180_v35 = vand.u32 4294901760, %v31067_v21  ;;  %v3516_v3 = vsub.f32 %v31062_v17, %v39179_v44  ;;  %v39849_v15 = vand.u32 4294901760, %v30819_v47 }
 0x36e   : > { %v4192_v53 = vand.u32 4294901760, %v4191_v36  ;;  %v39181_v62 = vand.u32 4294901760, %v31072_v19  ;;  %v25647_v51 = vpack.c.bf16 %v3510_v0, %v3503_v23  ;;  %v39850_v23 = vand.u32 4294901760, %v31083_v5 }
 0x36f   : > { %v3523_v59 = vsub.f32 %v31067_v21, %v39180_v35  ;;  %v31121_v31 = vsub.f32 %v30819_v47, %v39849_v15  ;;  %v39182_v44 = vand.u32 4294901760, %v31100_v37 }
 0x370   : > { %v4212_v0 = vsub.f32 %v31083_v5, %v39850_v23  ;;  %v39851_v23 = vand.u32 4294901760, %v30846_v55 }
 0x371   : > { %25645 = vmatpush3.bf16.xpose.msra.mxu0 %v25644_v60  ;;  %v39847_v60 = vand.u32 4294901760, %v30813_v22 }
 0x372   : > { %25789 = vmatpush3.bf16.xpose.msra.mxu1 %v25788_v14  ;;  %25646 = vmatprep.subr.bf16.mxu0 %v39685_v34  ;;  %v39848_v14 = vand.u32 4294901760, %v30816_v16 }
 0x373   : > { %25790 = vmatprep.subr.bf16.mxu1 %v39685_v34  ;;  %v31105_v25 = vsub.f32 %v30813_v22, %v39847_v60  ;;  %v25791_v22 = vpack.c.bf16 %v4199_v46, %v4192_v53  ;;  %v3517_v60 = vand.u32 4294901760, %v3516_v3  ;;  %v4213_v53 = vand.u32 4294901760, %v4212_v0 }
 0x374   : > { %v31110_v36 = vsub.f32 %v30816_v16, %v39848_v14  ;;  %v4205_v16 = vsub.f32 %v31072_v19, %v39181_v62  ;;  %v3524_v14 = vand.u32 4294901760, %v3523_v59  ;;  %v31138_v3 = vsub.f32 %v30846_v55, %v39851_v23 }
 0x375   : > { %v39183_v35 = vand.u32 4294901760, %v31105_v25  ;;  %v3530_v62 = vsub.f32 %v31100_v37, %v39182_v44  ;;  %v39854_v23 = vand.u32 4294901760, %v30855_v63 }
 0x376   : > { %v4206_v47 = vand.u32 4294901760, %v4205_v16  ;;  %v39184_v46 = vand.u32 4294901760, %v31110_v36  ;;  %v25650_v0 = vpack.c.bf16 %v3524_v14, %v3517_v60  ;;  %v39855_v60 = vand.u32 4294901760, %v31121_v31 }
 0x377   : > { %v3537_v55 = vsub.f32 %v31105_v25, %v39183_v35  ;;  %v31159_v15 = vsub.f32 %v30855_v63, %v39854_v23  ;;  %v39185_v44 = vand.u32 4294901760, %v31138_v3 }
 0x378   : > { %v4226_v14 = vsub.f32 %v31121_v31, %v39855_v60  ;;  %v39856_v60 = vand.u32 4294901760, %v30902_v7 }
 0x379   : > { %25648 = vmatpush3.bf16.xpose.msra.mxu0 %v25647_v51  ;;  %v39852_v51 = vand.u32 4294901760, %v30849_v50 }
 0x37a   : > { %25792 = vmatpush3.bf16.xpose.msra.mxu1 %v25791_v22  ;;  %25649 = vmatprep.subr.bf16.mxu0 %v39685_v34  ;;  %v39853_v22 = vand.u32 4294901760, %v30852_v49 }
 0x37b   : > { %25793 = vmatprep.subr.bf16.mxu1 %v39685_v34  ;;  %v31143_v59 = vsub.f32 %v30849_v50, %v39852_v51  ;;  %v25794_v50 = vpack.c.bf16 %v4213_v53, %v4206_v47  ;;  %v3531_v51 = vand.u32 4294901760, %v3530_v62  ;;  %v4227_v47 = vand.u32 4294901760, %v4226_v14 }
 0x37c   : > { %v31148_v16 = vsub.f32 %v30852_v49, %v39853_v22  ;;  %v4219_v49 = vsub.f32 %v31110_v36, %v39184_v46  ;;  %v3538_v22 = vand.u32 4294901760, %v3537_v55  ;;  %v31176_v62 = vsub.f32 %v30902_v7, %v39856_v60 }
 0x37d   : > { %v39186_v35 = vand.u32 4294901760, %v31143_v59  ;;  %v3544_v46 = vsub.f32 %v31138_v3, %v39185_v44  ;;  %v39859_v60 = vand.u32 4294901760, %v30911_v27 }
 0x37e   : > { %v4220_v63 = vand.u32 4294901760, %v4219_v49  ;;  %v39187_v53 = vand.u32 4294901760, %v31148_v16  ;;  %v25653_v14 = vpack.c.bf16 %v3538_v22, %v3531_v51  ;;  %v39860_v51 = vand.u32 4294901760, %v31159_v15 }
 0x37f   : > { %v3551_v7 = vsub.f32 %v31143_v59, %v39186_v35  ;;  %v31197_v23 = vsub.f32 %v30911_v27, %v39859_v60  ;;  %v3557_v44 = vand.u32 4294901760, %v31176_v62 }
 0x380   : > { %v4240_v22 = vsub.f32 %v31159_v15, %v39860_v51 }
 0x381   : > { %25651 = vmatpush3.bf16.xpose.msra.mxu0 %v25650_v0  ;;  %v39857_v0 = vand.u32 4294901760, %v30905_v20  ;;  %v4253_v60 = vand.u32 4294901760, %v31197_v23 }
 0x382   : > { %25795 = vmatpush3.bf16.xpose.msra.mxu1 %v25794_v50  ;;  %25652 = vmatprep.subr.bf16.mxu0 %v39685_v34  ;;  %v39858_v50 = vand.u32 4294901760, %v30908_v29 }
 0x383   : > { %25796 = vmatprep.subr.bf16.mxu1 %v39685_v34  ;;  %v31181_v55 = vsub.f32 %v30905_v20, %v39857_v0  ;;  %v25797_v20 = vpack.c.bf16 %v4227_v47, %v4220_v63  ;;  %v3545_v0 = vand.u32 4294901760, %v3544_v46  ;;  %v4241_v63 = vand.u32 4294901760, %v4240_v22 }
 0x384   : > { %v31186_v49 = vsub.f32 %v30908_v29, %v39858_v50  ;;  %v4233_v29 = vsub.f32 %v31148_v16, %v39187_v53  ;;  %v3552_v50 = vand.u32 4294901760, %v3551_v7  ;;  %v3558_v46 = vsub.f32 %v31176_v62, %v3557_v44 }
 0x385   : > { %v39188_v35 = vand.u32 4294901760, %v31181_v55 }
 0x386   : > { %v4234_v27 = vand.u32 4294901760, %v4233_v29  ;;  %v4246_v47 = vand.u32 4294901760, %v31186_v49  ;;  %v25656_v53 = vpack.c.bf16 %v3552_v50, %v3545_v0  ;;  %v4254_v29 = vsub.f32 %v31197_v23, %v4253_v60 }
 0x387   : > { %v3559_v51 = vand.u32 4294901760, %v3558_v46  ;;  %v25809_v46 = vpack.c.bf16 %v30955_v32, %v30938_v9 }
 0x388   : > { %v25800_v7 = vpack.c.bf16 %v4241_v63, %v4234_v27  ;;  %v4255_v50 = vand.u32 4294901760, %v4254_v29  ;;  %v25806_v63 = vpack.c.bf16 %v30893_v41, %v30882_v48  ;;  %v25815_v29 = vpack.c.bf16 %v31045_v61, %v31034_v4 }
 0x389   : > { %25654 = vmatpush3.bf16.xpose.msra.mxu0 %v25653_v14  ;;  %v3565_v14 = vsub.f32 %v31181_v55, %v39188_v35 }
 0x38a   : > { %25798 = vmatpush3.bf16.xpose.msra.mxu1 %v25797_v20  ;;  %25655 = vmatprep.subr.bf16.mxu0 %v39685_v34  ;;  %v4247_v20 = vsub.f32 %v31186_v49, %v4246_v47 }
 0x38b   : > { %25799 = vmatprep.subr.bf16.mxu1 %v39685_v34  ;;  %v3566_v22 = vand.u32 4294901760, %v3565_v14  ;;  %v25668_v14 = vpack.c.bf16 %v30985_v6, %v30980_v18 }
 0x38c   : > { %v4248_v0 = vand.u32 4294901760, %v4247_v20  ;;  %v25671_v20 = vpack.c.bf16 %v31027_v45, %v31022_v10 }
 0x38d   : > { %v25659_v35 = vpack.c.bf16 %v3566_v22, %v3559_v51  ;;  %v25674_v51 = vpack.c.bf16 %v31067_v21, %v31062_v17  ;;  %v25818_v22 = vpack.c.bf16 %v31083_v5, %v31072_v19 }
 0x38e   : > { %v25803_v27 = vpack.c.bf16 %v4255_v50, %v4248_v0  ;;  %v25677_v0 = vpack.c.bf16 %v31105_v25, %v31100_v37  ;;  %v25821_v50 = vpack.c.bf16 %v31121_v31, %v31110_v36 }
 0x391   : > { %25657 = vmatpush3.bf16.xpose.msra.mxu0 %v25656_v53  ;;  %v25662_v53 = vpack.c.bf16 %v30877_v38, %v30872_v12 }
 0x392   : > { %25801 = vmatpush3.bf16.xpose.msra.mxu1 %v25800_v7  ;;  %25658 = vmatprep.subr.bf16.mxu0 %v39685_v34  ;;  %v25812_v7 = vpack.c.bf16 %v31001_v58, %v30990_v42 }
 0x393   : > { %25802 = vmatprep.subr.bf16.mxu1 %v39685_v34 }
 0x399   : > { %25660 = vmatpush3.bf16.xpose.msra.mxu0 %v25659_v35  ;;  %v25665_v35 = vpack.c.bf16 %v30933_v33, %v30928_v2 }
 0x39a   : > { %25804 = vmatpush3.bf16.xpose.msra.mxu1 %v25803_v27  ;;  %25661 = vmatprep.subr.bf16.mxu0 %v39685_v34  ;;  %v25680_v27 = vpack.c.bf16 %v31143_v59, %v31138_v3 }
 0x39b   : > { %25805 = vmatprep.subr.bf16.mxu1 %v39685_v34 }
 0x3a0   : > { %20905 = vmatmul.mubr.f32.vlgmr.msra.gmra.mrb[4].mxu0 %v29187_v43 }
 0x3a1   : > { %25663 = vmatpush3.bf16.xpose.msra.mxu0 %v25662_v53  ;;  %21115 = vmatmul.mubr.f32.vlgmr.msra.gmra.mrb[4].mxu1 %v29187_v43  ;;  %v25824_v53 = vpack.c.bf16 %v31159_v15, %v31148_v16 }
 0x3a2   : > { %25807 = vmatpush3.bf16.xpose.msra.mxu1 %v25806_v63  ;;  %25664 = vmatprep.subr.bf16.mxu0 %v39685_v34  ;;  %v25683_v63 = vpack.c.bf16 %v31181_v55, %v31176_v62 }
 0x3a3   : > { %25808 = vmatprep.subr.bf16.mxu1 %v39685_v34  ;;  %20939 = vmatprep.mubr.msk.f32.mxu0 %vm28907_vm0, %v39694_v24 }
 0x3a4   : > { %21149 = vmatprep.mubr.msk.f32.mxu1 %vm28907_vm0, %v39694_v24 }
 0x3a9   : > { %25666 = vmatpush3.bf16.xpose.msra.mxu0 %v25665_v35  ;;  %v25827_v35 = vpack.c.bf16 %v31197_v23, %v31186_v49 }
 0x3aa   : > { %25810 = vmatpush3.bf16.xpose.msra.mxu1 %v25809_v46  ;;  %25667 = vmatprep.subr.bf16.mxu0 %v39685_v34  ;;  %v39861_v46 = vld [vmem:[#allocation5_spill] sm:$0xff] }
 0x3ab   : > { %25811 = vmatprep.subr.bf16.mxu1 %v39685_v34 }
 0x3b1   : > { %25669 = vmatpush3.bf16.xpose.msra.mxu0 %v25668_v14  ;;  %v39862_v14 = vld [vmem:[#allocation6_spill] sm:$0xff] }
 0x3b2   : > { %25813 = vmatpush3.bf16.xpose.msra.mxu1 %v25812_v7  ;;  %25670 = vmatprep.subr.bf16.mxu0 %v39685_v34  ;;  %v39863_v7 = vld [vmem:[#allocation7_spill] sm:$0xff] }
 0x3b3   : > { %25814 = vmatprep.subr.bf16.mxu1 %v39685_v34 }
 0x3b9   : > { %25672 = vmatpush3.bf16.xpose.msra.mxu0 %v25671_v20  ;;  %v39864_v20 = vld [vmem:[#allocation9_spill] sm:$0xff] }
 0x3ba   : > { %25816 = vmatpush3.bf16.xpose.msra.mxu1 %v25815_v29  ;;  %25673 = vmatprep.subr.bf16.mxu0 %v39685_v34  ;;  %v39865_v29 = vand.u32 4294901760, %v30872_v12 }
 0x3bb   : > { %25817 = vmatprep.subr.bf16.mxu1 %v39685_v34 }
 0x3c1   : > { %25675 = vmatpush3.bf16.xpose.msra.mxu0 %v25674_v51  ;;  %v39866_v51 = vand.u32 4294901760, %v30877_v38  ;;  %v39871_v38 = vand.u32 4294901760, %v30933_v33  ;;  %v39877_v33 = vand.u32 4294901760, %v31001_v58  ;;  %v39882_v58 = vand.u32 4294901760, %v31062_v17 }
 0x3c2   : > { %25819 = vmatpush3.bf16.xpose.msra.mxu1 %v25818_v22  ;;  %25676 = vmatprep.subr.bf16.mxu0 %v39685_v34  ;;  %v39888_v17 = vand.u32 4294901760, %v31110_v36 }
 0x3c3   : > { %25820 = vmatprep.subr.bf16.mxu1 %v39685_v34  ;;  %v25710_v22 = vpack.c.bf16 %v39866_v51, %v39865_v29  ;;  %v39874_v29 = vand.u32 4294901760, %v30980_v18  ;;  %v39875_v51 = vand.u32 4294901760, %v30985_v6  ;;  %v39880_v18 = vand.u32 4294901760, %v31034_v4 }
 0x3c4   : > { %v39881_v6 = vand.u32 4294901760, %v31045_v61  ;;  %v39886_v4 = vand.u32 4294901760, %v31100_v37  ;;  %v39887_v61 = vand.u32 4294901760, %v31105_v25  ;;  %v39892_v37 = vand.u32 4294901760, %v31148_v16  ;;  %v544_v16 = vld [vmem:[%s29007_s9 + $0x398] sm:$0xff] }
 0x3c5   : > { %v39893_v25 = vand.u32 4294901760, %v31159_v15  ;;  %v528_v15 = vld [vmem:[%s29007_s9 + $0x318] sm:$0xff] }
 0x3c6   : > { %v31483_v49 = vsel %vm557_vm1, %v528_v15, 0 }
 0x3c9   : > { %25678 = vmatpush3.bf16.xpose.msra.mxu0 %v25677_v0  ;;  %v39867_v0 = vand.u32 4294901760, %v30882_v48  ;;  %v39870_v48 = vand.u32 4294901760, %v30928_v2  ;;  %v39876_v2 = vand.u32 4294901760, %v30990_v42  ;;  %v39883_v42 = vand.u32 4294901760, %v31067_v21 }
 0x3ca   : > { %25822 = vmatpush3.bf16.xpose.msra.mxu1 %v25821_v50  ;;  %25679 = vmatprep.subr.bf16.mxu0 %v39685_v34  ;;  %v39868_v50 = vand.u32 4294901760, %v30893_v41  ;;  %v39872_v41 = vand.u32 4294901760, %v30938_v9  ;;  %v39878_v9 = vand.u32 4294901760, %v31022_v10  ;;  %v39884_v10 = vand.u32 4294901760, %v31072_v19 }
 0x3cb   : > { %25823 = vmatprep.subr.bf16.mxu1 %v39685_v34  ;;  %v25713_v12 = vpack.c.bf16 %v39871_v38, %v39870_v48  ;;  %v25722_v48 = vpack.c.bf16 %v39883_v42, %v39882_v58  ;;  %v39889_v21 = vand.u32 4294901760, %v31121_v31  ;;  %v39891_v19 = vand.u32 4294901760, %v31143_v59  ;;  %v543_v59 = vld [vmem:[%s29007_s9 + $0x390] sm:$0xff] }
 0x3cc   : > { %v39894_v31 = vand.u32 4294901760, %v31181_v55 }
 0x3ce   : > { %v25731_v36 = vpack.c.bf16 %v39894_v31, %v3557_v44  ;;  %v527_v44 = vld [vmem:[%s29007_s9 + $0x310] sm:$0xff]  ;;  %v549_v31 = vld [vmem:[%s29007_s9 + $0x3c0] sm:$0xff] }
 0x3cf   : > { %v31480_v55 = vsel %vm557_vm1, %v527_v44, 0 }
 0x3d1   : > { %25681 = vmatpush3.bf16.xpose.msra.mxu0 %v25680_v27  ;;  %v25854_v27 = vpack.c.bf16 %v39868_v50, %v39867_v0  ;;  %v25860_v0 = vpack.c.bf16 %v39877_v33, %v39876_v2  ;;  %v546_v2 = vld [vmem:[%s29007_s9 + $0x3a8] sm:$0xff] }
 0x3d2   : > { %25825 = vmatpush3.bf16.xpose.msra.mxu1 %v25824_v53  ;;  %25682 = vmatprep.subr.bf16.mxu0 %v39685_v34  ;;  %v39869_v53 = vld [vmem:[#allocation8_spill] sm:$0xff] }
 0x3d3   : > { %25826 = vmatprep.subr.bf16.mxu1 %v39685_v34 }
 0x3d9   : > { %25684 = vmatpush3.bf16.xpose.msra.mxu0 %v25683_v63  ;;  %v39873_v63 = vand.u32 4294901760, %v30955_v32  ;;  %v39879_v32 = vand.u32 4294901760, %v31027_v45  ;;  %v39885_v45 = vand.u32 4294901760, %v31083_v5  ;;  %v39890_v5 = vand.u32 4294901760, %v31138_v3 }
 0x3da   : > { %25828 = vmatpush3.bf16.xpose.msra.mxu1 %v25827_v35  ;;  %25685 = vmatprep.subr.bf16.mxu0 %v39685_v34  ;;  %v25875_v3 = vpack.c.bf16 %v4253_v60, %v4246_v47  ;;  %v31486_v47 = vsel %vm557_vm1, %v543_v59, 0  ;;  %v31489_v60 = vsel %vm557_vm1, %v544_v16, 0 }
 0x3db   : > { %25829 = vmatprep.subr.bf16.mxu1 %v39685_v34  ;;  %v25857_v35 = vpack.c.bf16 %v39873_v63, %v39872_v41  ;;  %v25719_v50 = vpack.c.bf16 %v39879_v32, %v39878_v9  ;;  %v25866_v38 = vpack.c.bf16 %v39885_v45, %v39884_v10  ;;  %v25869_v41 = vpack.c.bf16 %v39889_v21, %v39888_v17  ;;  %v532_v10 = vld [vmem:[%s29007_s9 + $0x338] sm:$0xff]  ;;  %v547_v45 = vld [vmem:[%s29007_s9 + $0x3b0] sm:$0xff] }
 0x3dc   : > { %v25728_v63 = vpack.c.bf16 %v39891_v19, %v39890_v5  ;;  %v31561_v17 = vsel %vm557_vm1, %v532_v10, 0  ;;  %v31564_v21 = vsel %vm557_vm1, %v547_v45, 0 }
 0x3dd   : > { %v39195_v19 = vand.u32 4294901760, %v31561_v17 }
 0x3e0   : > { %20940 = vmatmul.mubr.f32.vlgmr.msra.gmra.mrb[4].mxu0 %v29208_v1 }
 0x3e1   : > { %25687 = vmatpush3.bf16.xpose.msra.mxu0 %v30651_v54  ;;  %21150 = vmatmul.mubr.f32.vlgmr.msra.gmra.mrb[4].mxu1 %v29208_v1 }
 0x3e2   : > { %25831 = vmatpush3.bf16.xpose.msra.mxu1 %v30657_v8  ;;  %25688 = vmatprep.subr.bf16.mxu0 %v39685_v34 }
 0x3e3   : > { %25832 = vmatprep.subr.bf16.mxu1 %v39685_v34  ;;  %20974 = vmatprep.mubr.msk.f32.mxu0 %vm28907_vm0, %v39694_v24 }
 0x3e4   : > { %21184 = vmatprep.mubr.msk.f32.mxu1 %vm28907_vm0, %v39694_v24 }
 0x3e9   : > { %25690 = vmatpush3.bf16.xpose.msra.mxu0 %v30693_v40 }
 0x3ea   : > { %25834 = vmatpush3.bf16.xpose.msra.mxu1 %v30699_v30  ;;  %25691 = vmatprep.subr.bf16.mxu0 %v39685_v34 }
 0x3eb   : > { %25835 = vmatprep.subr.bf16.mxu1 %v39685_v34 }
 0x3f1   : > { %25693 = vmatpush3.bf16.xpose.msra.mxu0 %v30729_v52 }
 0x3f2   : > { %25837 = vmatpush3.bf16.xpose.msra.mxu1 %v30735_v26  ;;  %25694 = vmatprep.subr.bf16.mxu0 %v39685_v34 }
 0x3f3   : > { %25838 = vmatprep.subr.bf16.mxu1 %v39685_v34 }
 0x3f9   : > { %25696 = vmatpush3.bf16.xpose.msra.mxu0 %v30765_v39 }
 0x3fa   : > { %25840 = vmatpush3.bf16.xpose.msra.mxu1 %v30771_v28  ;;  %25697 = vmatprep.subr.bf16.mxu0 %v39685_v34 }
 0x3fb   : > { %25841 = vmatprep.subr.bf16.mxu1 %v39685_v34 }
 0x401   : > { %25699 = vmatpush3.bf16.xpose.msra.mxu0 %v30801_v56 }
 0x402   : > { %25843 = vmatpush3.bf16.xpose.msra.mxu1 %v30807_v13  ;;  %25700 = vmatprep.subr.bf16.mxu0 %v39685_v34 }
 0x403   : > { %25844 = vmatprep.subr.bf16.mxu1 %v39685_v34 }
 0x409   : > { %25702 = vmatpush3.bf16.xpose.msra.mxu0 %v30837_v57 }
 0x40a   : > { %25846 = vmatpush3.bf16.xpose.msra.mxu1 %v30843_v11  ;;  %25703 = vmatprep.subr.bf16.mxu0 %v39685_v34 }
 0x40b   : > { %25847 = vmatprep.subr.bf16.mxu1 %v39685_v34 }
 0x411   : > { %25705 = vmatpush3.bf16.xpose.msra.mxu0 %v39861_v46 }
 0x412   : > { %25849 = vmatpush3.bf16.xpose.msra.mxu1 %v39862_v14  ;;  %25706 = vmatprep.subr.bf16.mxu0 %v39685_v34 }
 0x413   : > { %25850 = vmatprep.subr.bf16.mxu1 %v39685_v34 }
 0x419   : > { %25708 = vmatpush3.bf16.xpose.msra.mxu0 %v39863_v7 }
 0x41a   : > { %25852 = vmatpush3.bf16.xpose.msra.mxu1 %v39864_v20  ;;  %25709 = vmatprep.subr.bf16.mxu0 %v39685_v34 }
 0x41b   : > { %25853 = vmatprep.subr.bf16.mxu1 %v39685_v34 }
 0x420   : > { %20975 = vmatmul.mubr.f32.vlgmr.msra.gmra.mrb[4].mxu0 %v39869_v53 }
 0x421   : > { %25711 = vmatpush3.bf16.xpose.msra.mxu0 %v25710_v22  ;;  %21185 = vmatmul.mubr.f32.vlgmr.msra.gmra.mrb[4].mxu1 %v39869_v53  ;;  %v25716_v22 = vpack.c.bf16 %v39875_v51, %v39874_v29  ;;  %v529_v29 = vld [vmem:[%s29007_s9 + $0x320] sm:$0xff]  ;;  %v530_v51 = vld [vmem:[%s29007_s9 + $0x328] sm:$0xff] }
 0x422   : > { %25855 = vmatpush3.bf16.xpose.msra.mxu1 %v25854_v27  ;;  %25712 = vmatprep.subr.bf16.mxu0 %v39685_v34  ;;  %v25863_v27 = vpack.c.bf16 %v39881_v6, %v39880_v18  ;;  %v31522_v9 = vsel %vm557_vm1, %v529_v29, 0  ;;  %v31525_v32 = vsel %vm557_vm1, %v530_v51, 0  ;;  %v31531_v18 = vsel %vm557_vm1, %v546_v2, 0  ;;  %v535_v51 = vld [vmem:[%s29007_s9 + $0x350] sm:$0xff] }
 0x423   : > { %25856 = vmatprep.subr.bf16.mxu1 %v39685_v34  ;;  %21009 = vmatprep.mubr.msk.f32.mxu0 %vm28907_vm0, %v39694_v24  ;;  %v39204_v6 = vand.u32 4294901760, %v31522_v9  ;;  %v39201_v42 = vand.u32 4294901760, %v31531_v18  ;;  %v551_v2 = vld [vmem:[%s29007_s9 + $0x3d0] sm:$0xff] }
 0x424   : > { %21219 = vmatprep.mubr.msk.f32.mxu1 %vm28907_vm0, %v39694_v24 }
 0x429   : > { %25714 = vmatpush3.bf16.xpose.msra.mxu0 %v25713_v12  ;;  %v25725_v12 = vpack.c.bf16 %v39887_v61, %v39886_v4 }
 0x42a   : > { %25858 = vmatpush3.bf16.xpose.msra.mxu1 %v25857_v35  ;;  %25715 = vmatprep.subr.bf16.mxu0 %v39685_v34  ;;  %v25872_v35 = vpack.c.bf16 %v39893_v25, %v39892_v37  ;;  %v533_v25 = vld [vmem:[%s29007_s9 + $0x340] sm:$0xff] }
 0x42b   : > { %25859 = vmatprep.subr.bf16.mxu1 %v39685_v34 }
 0x431   : > { %25717 = vmatpush3.bf16.xpose.msra.mxu0 %v25716_v22  ;;  %v545_v22 = vld [vmem:[%s29007_s9 + $0x3a0] sm:$0xff] }
 0x432   : > { %25861 = vmatpush3.bf16.xpose.msra.mxu1 %v25860_v0  ;;  %25718 = vmatprep.subr.bf16.mxu0 %v39685_v34 }
 0x433   : > { %25862 = vmatprep.subr.bf16.mxu1 %v39685_v34 }
 0x439   : > { %25720 = vmatpush3.bf16.xpose.msra.mxu0 %v25719_v50  ;;  %v31528_v50 = vsel %vm557_vm1, %v545_v22, 0  ;;  %v536_v22 = vld [vmem:[%s29007_s9 + $0x358] sm:$0xff] }
 0x43a   : > { %25864 = vmatpush3.bf16.xpose.msra.mxu1 %v25863_v27  ;;  %25721 = vmatprep.subr.bf16.mxu0 %v39685_v34  ;;  %v39203_v27 = vand.u32 4294901760, %v31525_v32  ;;  %v39202_v58 = vand.u32 4294901760, %v31528_v50 }
 0x43b   : > { %25865 = vmatprep.subr.bf16.mxu1 %v39685_v34 }
 0x43c   : > { %v31549_v4 = vpack.c.bf16 %v39203_v27, %v39204_v6  ;;  %v31555_v61 = vpack.c.bf16 %v39201_v42, %v39202_v58  ;;  %v556_v42 = vld [vmem:[%s29007_s9 + $0x3f8] sm:$0xff] }
 0x441   : > { %25723 = vmatpush3.bf16.xpose.msra.mxu0 %v25722_v48  ;;  %v531_v48 = vld [vmem:[%s29007_s9 + $0x330] sm:$0xff] }
 0x442   : > { %25867 = vmatpush3.bf16.xpose.msra.mxu1 %v25866_v38  ;;  %25724 = vmatprep.subr.bf16.mxu0 %v39685_v34  ;;  %v548_v38 = vld [vmem:[%s29007_s9 + $0x3b8] sm:$0xff] }
 0x443   : > { %25868 = vmatprep.subr.bf16.mxu1 %v39685_v34 }
 0x449   : > { %25726 = vmatpush3.bf16.xpose.msra.mxu0 %v25725_v12  ;;  %v31558_v12 = vsel %vm557_vm1, %v531_v48, 0  ;;  %v552_v48 = vld [vmem:[%s29007_s9 + $0x3d8] sm:$0xff] }
 0x44a   : > { %25870 = vmatpush3.bf16.xpose.msra.mxu1 %v25869_v41  ;;  %25727 = vmatprep.subr.bf16.mxu0 %v39685_v34  ;;  %v31567_v41 = vsel %vm557_vm1, %v548_v38, 0  ;;  %v39196_v5 = vand.u32 4294901760, %v31558_v12  ;;  %v31630_v38 = vsel %vm557_vm1, %v535_v51, 0 }
 0x44b   : > { %25871 = vmatprep.subr.bf16.mxu1 %v39685_v34  ;;  %v39193_v37 = vand.u32 4294901760, %v31567_v41 }
 0x451   : > { %25729 = vmatpush3.bf16.xpose.msra.mxu0 %v25728_v63  ;;  %v39194_v63 = vand.u32 4294901760, %v31564_v21 }
 0x452   : > { %25873 = vmatpush3.bf16.xpose.msra.mxu1 %v25872_v35  ;;  %25730 = vmatprep.subr.bf16.mxu0 %v39685_v34  ;;  %v534_v35 = vld [vmem:[%s29007_s9 + $0x348] sm:$0xff] }
 0x453   : > { %25874 = vmatprep.subr.bf16.mxu1 %v39685_v34 }
 0x459   : > { %25732 = vmatpush3.bf16.xpose.msra.mxu0 %v25731_v36  ;;  %v550_v36 = vld [vmem:[%s29007_s9 + $0x3c8] sm:$0xff] }
 0x45a   : > { %25876 = vmatpush3.bf16.xpose.msra.mxu1 %v25875_v3  ;;  %25733 = vmatprep.subr.bf16.mxu0 %v39685_v34  ;;  %v31585_v3 = vpack.c.bf16 %v39195_v19, %v39196_v5  ;;  %v31603_v44 = vsel %vm557_vm1, %v550_v36, 0  ;;  %v39198_v36 = vand.u32 4294901760, %v31630_v38 }
 0x45b   : > { %25877 = vmatprep.subr.bf16.mxu1 %v39685_v34  ;;  %v39189_v29 = vand.u32 4294901760, %v31603_v44 }
 0x460   : > { %21010 = vmatmul.mubr.f32.vlgmr.msra.gmra.mrb[4].mxu0 %v29187_v43 }
 0x461   : > { %25735 = vmatpush3.bf16.xpose.msra.mxu0 %v30651_v54  ;;  %21220 = vmatmul.mubr.f32.vlgmr.msra.gmra.mrb[4].mxu1 %v29187_v43  ;;  %v525_v54 = vld [vmem:[%s29007_s9 + $0x300] sm:$0xff] }
 0x462   : > { %25879 = vmatpush3.bf16.xpose.msra.mxu1 %v30657_v8  ;;  %25736 = vmatprep.subr.bf16.mxu0 %v39685_v34  ;;  %v526_v8 = vld [vmem:[%s29007_s9 + $0x308] sm:$0xff] }
 0x463   : > { %25880 = vmatprep.subr.bf16.mxu1 %v39685_v34  ;;  %21044 = vmatprep.mubr.msk.f32.mxu0 %vm28907_vm0, %v39694_v24 }
 0x464   : > { %21254 = vmatprep.mubr.msk.f32.mxu1 %vm28907_vm0, %v39694_v24 }
 0x469   : > { %25738 = vmatpush3.bf16.xpose.msra.mxu0 %v30693_v40  ;;  %v541_v40 = vld [vmem:[%s29007_s9 + $0x380] sm:$0xff] }
 0x46a   : > { %25882 = vmatpush3.bf16.xpose.msra.mxu1 %v30699_v30  ;;  %25739 = vmatprep.subr.bf16.mxu0 %v39685_v34  ;;  %v542_v30 = vld [vmem:[%s29007_s9 + $0x388] sm:$0xff] }
 0x46b   : > { %25883 = vmatprep.subr.bf16.mxu1 %v39685_v34 }
 0x471   : > { %25741 = vmatpush3.bf16.xpose.msra.mxu0 %v30729_v52  ;;  %v31444_v52 = vsel %vm557_vm1, %v525_v54, 0  ;;  %v31591_v54 = vpack.c.bf16 %v39193_v37, %v39194_v63 }
 0x472   : > { %25885 = vmatpush3.bf16.xpose.msra.mxu1 %v30735_v26  ;;  %25742 = vmatprep.subr.bf16.mxu0 %v39685_v34  ;;  %v31447_v26 = vsel %vm557_vm1, %v526_v8, 0  ;;  %v31594_v8 = vsel %vm557_vm1, %v533_v25, 0  ;;  %v31633_v25 = vsel %vm557_vm1, %v536_v22, 0 }
 0x473   : > { %25886 = vmatprep.subr.bf16.mxu1 %v39685_v34  ;;  %v39192_v15 = vand.u32 4294901760, %v31594_v8 }
 0x479   : > { %25744 = vmatpush3.bf16.xpose.msra.mxu0 %v30765_v39  ;;  %v31453_v39 = vsel %vm557_vm1, %v542_v30, 0  ;;  %v31600_v30 = vsel %vm557_vm1, %v549_v31, 0  ;;  %v31639_v31 = vsel %vm557_vm1, %v552_v48, 0  ;;  %v553_v48 = vld [vmem:[%s29007_s9 + $0x3e0] sm:$0xff] }
 0x47a   : > { %25888 = vmatpush3.bf16.xpose.msra.mxu1 %v30771_v28  ;;  %25745 = vmatprep.subr.bf16.mxu0 %v39685_v34  ;;  %v4744_v28 = vand.u32 4294901760, %v31444_v52  ;;  %v39190_v16 = vand.u32 4294901760, %v31600_v30  ;;  %v39199_v22 = vand.u32 4294901760, %v31639_v31  ;;  %v31672_v5 = vsel %vm557_vm1, %v553_v48, 0  ;;  %v539_v48 = vld [vmem:[%s29007_s9 + $0x370] sm:$0xff] }
 0x47b   : > { %25889 = vmatprep.subr.bf16.mxu1 %v39685_v34 }
 0x47c   : > { %v31627_v45 = vpack.c.bf16 %v39189_v29, %v39190_v16  ;;  %v39197_v29 = vand.u32 4294901760, %v31633_v25  ;;  %v538_v16 = vld [vmem:[%s29007_s9 + $0x368] sm:$0xff]  ;;  %v31692_v58 = vsub.f32 %v31444_v52, %v4744_v28 }
 0x47d   : > { %v31669_v19 = vsel %vm557_vm1, %v538_v16, 0 }
 0x481   : > { %25747 = vmatpush3.bf16.xpose.msra.mxu0 %v30801_v56 }
 0x482   : > { %25891 = vmatpush3.bf16.xpose.msra.mxu1 %v30807_v13  ;;  %25748 = vmatprep.subr.bf16.mxu0 %v39685_v34  ;;  %v5436_v13 = vand.u32 4294901760, %v31453_v39 }
 0x483   : > { %25892 = vmatprep.subr.bf16.mxu1 %v39685_v34 }
 0x484   : > { %v31713_v52 = vsub.f32 %v31453_v39, %v5436_v13 }
 0x489   : > { %25750 = vmatpush3.bf16.xpose.msra.mxu0 %v30837_v57  ;;  %v4747_v57 = vand.u32 4294901760, %v31447_v26 }
 0x48a   : > { %25894 = vmatpush3.bf16.xpose.msra.mxu1 %v30843_v11  ;;  %25751 = vmatprep.subr.bf16.mxu0 %v39685_v34  ;;  %v31450_v11 = vsel %vm557_vm1, %v541_v40, 0  ;;  %v31597_v40 = vsel %vm557_vm1, %v534_v35, 0  ;;  %v31636_v35 = vsel %vm557_vm1, %v551_v2, 0  ;;  %v537_v2 = vld [vmem:[%s29007_s9 + $0x360] sm:$0xff] }
 0x48b   : > { %25895 = vmatprep.subr.bf16.mxu1 %v39685_v34  ;;  %v5433_v56 = vand.u32 4294901760, %v31450_v11  ;;  %v31471_v23 = vpack.c.bf16 %v4747_v57, %v4744_v28  ;;  %v39191_v59 = vand.u32 4294901760, %v31597_v40  ;;  %v39200_v51 = vand.u32 4294901760, %v31636_v35 }
 0x48c   : > { %v31666_v63 = vsel %vm557_vm1, %v537_v2, 0  ;;  %v39207_v2 = vand.u32 4294901760, %v31672_v5  ;;  %v31697_v27 = vsub.f32 %v31447_v26, %v4747_v57 }
 0x48d   : > { %v31477_v62 = vpack.c.bf16 %v5436_v13, %v5433_v56  ;;  %v31621_v10 = vpack.c.bf16 %v39191_v59, %v39192_v15  ;;  %v554_v59 = vld [vmem:[%s29007_s9 + $0x3e8] sm:$0xff]  ;;  %v31657_v15 = vpack.c.bf16 %v39197_v29, %v39198_v36  ;;  %v31663_v37 = vpack.c.bf16 %v39199_v22, %v39200_v51  ;;  %v540_v51 = vld [vmem:[%s29007_s9 + $0x378] sm:$0xff] }
 0x48e   : > { %v31675_v29 = vsel %vm557_vm1, %v554_v59, 0  ;;  %v39209_v36 = vand.u32 4294901760, %v31666_v63  ;;  %v39208_v22 = vand.u32 4294901760, %v31669_v19  ;;  %v555_v59 = vld [vmem:[%s29007_s9 + $0x3f0] sm:$0xff]  ;;  %v31702_v6 = vsub.f32 %v31450_v11, %v5433_v56  ;;  %s37072_s9 = scalar_lea.vmem %s39028_s3, %s40609_s30  ;;  %s268_s30 = sand.u32 1, %s28896_s19  }
 0x48f   : > { %v39206_v16 = vand.u32 4294901760, %v31675_v29  ;;  %v31722_v11 = vsel %vm557_vm1, %v539_v48, 0  ;;  %v31725_v28 = vsel %vm557_vm1, %v540_v51, 0  ;;  %v31728_v57 = vsel %vm557_vm1, %v555_v59, 0  ;;  %s17529_s10 = sshll.u32 %s268_s30, 4  ;;  %s38984_s22 = scalar_lea.sflag [#allocation3], %s268_s30 }
 0x490   : > { %v31731_v56 = vsel %vm557_vm1, %v556_v42, 0  ;;  %v39212_v39 = vand.u32 4294901760, %v31722_v11  ;;  %v39210_v13 = vand.u32 4294901760, %v31725_v28  ;;  %v39213_v48 = vand.u32 4294901760, %v31697_v27  ;;  %s270_s11 = scalar_lea.vmem [#allocation2], %s17529_s10 }
 0x491   : > { %25753 = vmatpush3.bf16.xpose.msra.mxu0 %v39861_v46  ;;  %v4750_v46 = vand.u32 4294901760, %v31480_v55  ;;  %v31719_v26 = vpack.c.bf16 %v39206_v16, %v39207_v2  ;;  %v39211_v16 = vand.u32 4294901760, %v31692_v58  ;;  %v39215_v51 = vand.u32 4294901760, %v31728_v57  ;;  %s17430_s13 = sshll.u32 %s270_s11, 4  ;;  %s38979_s13 = int_to_ptr.vmem [resolvable:$true] %s17430_s13 }
 0x492   : > { %25897 = vmatpush3.bf16.xpose.msra.mxu1 %v39862_v14  ;;  %25754 = vmatprep.subr.bf16.mxu0 %v39685_v34  ;;  %v4753_v14 = vand.u32 4294901760, %v31483_v49  ;;  %v39216_v42 = vand.u32 4294901760, %v31702_v6  ;;  %v31764_v2 = vpack.c.bf16 %v39210_v13, %v39212_v39  ;;  %s28842_s17 = scalar_lea.vmem %s38979_s13, 256 }
 0x493   : > { %25898 = vmatprep.subr.bf16.mxu1 %v39685_v34  ;;  %39896 = vst [vmem:[#allocation6_spill] sm:$0xff] %v31719_v26  ;;  %p28843_p11 = scmp.ne.s32.totalorder %s38979_s13, %s28842_s17 }
 0x494   : > { %v31513_v33 = vpack.c.bf16 %v4753_v14, %v4750_v46  ;;  %39897 = vst [vmem:[#allocation7_spill] sm:$0xff] %v31764_v2  ;;  %v5527_v13 = vsub.f32 %v31702_v6, %v39216_v42 }
 0x495   : > { %p28844_p12 = pnand %p28843_p11, %p28981_p5 }
 0x497   : > { %p28845_p13 = pneg %p28844_p12 }
 0x499   : > { %25756 = vmatpush3.bf16.xpose.msra.mxu0 %v39863_v7  ;;  %v5439_v7 = vand.u32 4294901760, %v31486_v47 }
 0x49a   : > { %25900 = vmatpush3.bf16.xpose.msra.mxu1 %v39864_v20  ;;  %25901 = vmatprep.subr.bf16.mxu0 %v39685_v34  ;;  %v39205_v20 = vand.u32 4294901760, %v31489_v60 }
 0x49b   : > { %26045 = vmatprep.subr.bf16.mxu1 %v39685_v34  ;;  %v31758_v59 = vsub.f32 %v31486_v47, %v5439_v7  ;;  %v39899_v47 = vand.u32 4294901760, %v31731_v56 }
 0x49c   : > { %v31519_v0 = vpack.c.bf16 %v39205_v20, %v5439_v7  ;;  %v31708_v20 = vpack.c.bf16 %v39208_v22, %v39209_v36  ;;  %v31748_v22 = vsub.f32 %v31480_v55, %v4750_v46  ;;  %v31753_v36 = vsub.f32 %v31483_v49, %v4753_v14 }
 0x49d   : > { %v4838_v55 = vsub.f32 %v31692_v58, %v39211_v16  ;;  %v4845_v49 = vsub.f32 %v31697_v27, %v39213_v48  ;;  %v39898_v46 = vand.u32 4294901760, %v31489_v60  ;;  %v31781_v7 = vpack.c.bf16 %v39899_v47, %v39215_v51 }
 0x49e   : > { %39895 = vst [vmem:[#allocation5_spill] sm:$0xff] %v31708_v20  ;;  %v39901_v16 = vand.u32 4294901760, %v31713_v52  ;;  %v5528_v47 = vand.u32 4294901760, %v5527_v13 }
 0x49f   : > { %v31775_v14 = vsub.f32 %v31489_v60, %v39898_v46  ;;  %39900 = vst [vmem:[#allocation9_spill] sm:$0xff] %v31781_v7  ;;  %v4839_v48 = vand.u32 4294901760, %v4838_v55  ;;  %v4846_v53 = vand.u32 4294901760, %v4845_v49  ;;  %v39903_v49 = vand.u32 4294901760, %v31525_v32 }
 0x4a0   : > { %21045 = vmatmul.mubr.f32.vlgmr.msra.gmra.mrb[4].mxu0 %v29187_v43  ;;  %v5534_v39 = vsub.f32 %v31713_v52, %v39901_v16  ;;  %v39902_v16 = vand.u32 4294901760, %v31522_v9  ;;  %v39904_v60 = vand.u32 4294901760, %v31528_v50 }
 0x4a1   : > { %21255 = vmatmul.mubr.f32.vlgmr.msra.gmra.mrb[4].mxu1 %v29187_v43  ;;  %25903 = vmatpush3.bf16.xpose.msra.mxu0 %v31471_v23  ;;  %v31805_v46 = vsub.f32 %v31525_v32, %v39903_v49  ;;  %v25926_v13 = vpack.c.bf16 %v4846_v53, %v4839_v48  ;;  %v39908_v49 = vand.u32 4294901760, %v31758_v59  ;;  %v39909_v53 = vand.u32 4294901760, %v31775_v14 }
 0x4a2   : > { %26047 = vmatpush3.bf16.xpose.msra.mxu1 %v31477_v62  ;;  %25904 = vmatprep.subr.bf16.mxu0 %v39685_v34  ;;  %v5535_v51 = vand.u32 4294901760, %v5534_v39  ;;  %v31800_v55 = vsub.f32 %v31522_v9, %v39902_v16  ;;  %v31810_v39 = vsub.f32 %v31528_v50, %v39904_v60  ;;  %v39907_v16 = vand.u32 4294901760, %v31531_v18  ;;  %v39910_v60 = vld [vmem:[#allocation10_spill] sm:$0xff] }
 0x4a3   : > { %26048 = vmatprep.subr.bf16.mxu1 %v39685_v34  ;;  %21289 = vmatprep.mubr.msk.f32.mxu0 %vm28907_vm0, %v39694_v24  ;;  %v5541_v50 = vsub.f32 %v31758_v59, %v39908_v49  ;;  %v5548_v48 = vsub.f32 %v31775_v14, %v39909_v53 }
 0x4a4   : > { %21499 = vmatprep.mubr.msk.f32.mxu1 %vm28907_vm0, %v39694_v24  ;;  %v26070_v32 = vpack.c.bf16 %v5535_v51, %v5528_v47 }
 0x4a5   : > { %v5542_v51 = vand.u32 4294901760, %v5541_v50  ;;  %v5549_v47 = vand.u32 4294901760, %v5548_v48  ;;  %v39913_v50 = vand.u32 4294901760, %v31564_v21 }
 0x4a7   : > { %v31854_v53 = vsub.f32 %v31564_v21, %v39913_v50 }
 0x4a9   : > { %25906 = vmatpush3.bf16.xpose.msra.mxu0 %v31513_v33 }
 0x4aa   : > { %26050 = vmatpush3.bf16.xpose.msra.mxu1 %v31519_v0  ;;  %25907 = vmatprep.subr.bf16.mxu0 %v39685_v34 }
 0x4ab   : > { %26051 = vmatprep.subr.bf16.mxu1 %v39685_v34 }
 0x4b1   : > { %25909 = vmatpush3.bf16.xpose.msra.mxu0 %v31549_v4 }
 0x4b2   : > { %26053 = vmatpush3.bf16.xpose.msra.mxu1 %v31555_v61  ;;  %25910 = vmatprep.subr.bf16.mxu0 %v39685_v34 }
 0x4b3   : > { %26054 = vmatprep.subr.bf16.mxu1 %v39685_v34 }
 0x4b9   : > { %25912 = vmatpush3.bf16.xpose.msra.mxu0 %v31585_v3 }
 0x4ba   : > { %26056 = vmatpush3.bf16.xpose.msra.mxu1 %v31591_v54  ;;  %25913 = vmatprep.subr.bf16.mxu0 %v39685_v34 }
 0x4bb   : > { %26057 = vmatprep.subr.bf16.mxu1 %v39685_v34 }
 0x4c1   : > { %25915 = vmatpush3.bf16.xpose.msra.mxu0 %v31621_v10 }
 0x4c2   : > { %26059 = vmatpush3.bf16.xpose.msra.mxu1 %v31627_v45  ;;  %25916 = vmatprep.subr.bf16.mxu0 %v39685_v34 }
 0x4c3   : > { %26060 = vmatprep.subr.bf16.mxu1 %v39685_v34 }
 0x4c9   : > { %25918 = vmatpush3.bf16.xpose.msra.mxu0 %v31657_v15 }
 0x4ca   : > { %26062 = vmatpush3.bf16.xpose.msra.mxu1 %v31663_v37  ;;  %25919 = vmatprep.subr.bf16.mxu0 %v39685_v34 }
 0x4cb   : > { %26063 = vmatprep.subr.bf16.mxu1 %v39685_v34 }
 0x4d1   : > { %25921 = vmatpush3.bf16.xpose.msra.mxu0 %v31708_v20  ;;  %v39225_v20 = vand.u32 4294901760, %v31800_v55 }
 0x4d2   : > { %26065 = vmatpush3.bf16.xpose.msra.mxu1 %v31719_v26  ;;  %25922 = vmatprep.subr.bf16.mxu0 %v39685_v34  ;;  %v39905_v26 = vand.u32 4294901760, %v31748_v22 }
 0x4d3   : > { %26066 = vmatprep.subr.bf16.mxu1 %v39685_v34 }
 0x4d4   : > { %v4852_v42 = vsub.f32 %v31748_v22, %v39905_v26 }
 0x4d6   : > { %v4853_v26 = vand.u32 4294901760, %v4852_v42  ;;  %v39911_v42 = vand.u32 4294901760, %v31558_v12 }
 0x4d9   : > { %25924 = vmatpush3.bf16.xpose.msra.mxu0 %v31764_v2  ;;  %v31821_v2 = vsub.f32 %v31531_v18, %v39907_v16  ;;  %v39226_v18 = vand.u32 4294901760, %v31805_v46  ;;  %v39228_v16 = vand.u32 4294901760, %v31810_v39 }
 0x4da   : > { %26068 = vmatpush3.bf16.xpose.msra.mxu1 %v31781_v7  ;;  %25925 = vmatprep.subr.bf16.mxu0 %v39685_v34  ;;  %v39906_v7 = vand.u32 4294901760, %v31753_v36 }
 0x4db   : > { %26069 = vmatprep.subr.bf16.mxu1 %v39685_v34  ;;  %v39227_v49 = vand.u32 4294901760, %v31821_v2  ;;  %v5555_v21 = vsub.f32 %v31810_v39, %v39228_v16 }
 0x4dc   : > { %v4859_v9 = vsub.f32 %v31753_v36, %v39906_v7 }
 0x4de   : > { %v4860_v7 = vand.u32 4294901760, %v4859_v9  ;;  %v39912_v9 = vand.u32 4294901760, %v31561_v17 }
 0x4e0   : > { %21290 = vmatmul.mubr.f32.vlgmr.msra.gmra.mrb[6].mxu0 %v39910_v60  ;;  %v25929_v48 = vpack.c.bf16 %v4860_v7, %v4853_v26  ;;  %v5562_v26 = vsub.f32 %v31821_v2, %v39227_v49  ;;  %v39915_v49 = vand.u32 4294901760, %v31594_v8 }
 0x4e1   : > { %25927 = vmatpush3.bf16.xpose.msra.mxu0 %v25926_v13  ;;  %21500 = vmatmul.mubr.f32.vlgmr.msra.gmra.mrb[6].mxu1 %v39910_v60  ;;  %v31842_v13 = vsub.f32 %v31558_v12, %v39911_v42  ;;  %v4866_v60 = vsub.f32 %v31800_v55, %v39225_v20  ;;  %v4873_v12 = vsub.f32 %v31805_v46, %v39226_v18 }
 0x4e2   : > { %26071 = vmatpush3.bf16.xpose.msra.mxu1 %v26070_v32  ;;  %25928 = vmatprep.subr.bf16.mxu0 %v39685_v34  ;;  %v31847_v32 = vsub.f32 %v31561_v17, %v39912_v9  ;;  %v39914_v17 = vand.u32 4294901760, %v31567_v41  ;;  %v26073_v9 = vpack.c.bf16 %v5549_v47, %v5542_v51  ;;  %v5563_v51 = vand.u32 4294901760, %v5562_v26 }
 0x4e3   : > { %26072 = vmatprep.subr.bf16.mxu1 %v39685_v34  ;;  %21324 = vmatprep.mubr.msk.f32.mxu0 %vm28907_vm0, %v39694_v24  ;;  %v4867_v7 = vand.u32 4294901760, %v4866_v60  ;;  %v4874_v50 = vand.u32 4294901760, %v4873_v12  ;;  %v39229_v20 = vand.u32 4294901760, %v31842_v13  ;;  %v39231_v47 = vand.u32 4294901760, %v31854_v53 }
 0x4e4   : > { %21534 = vmatprep.mubr.msk.f32.mxu1 %vm28907_vm0, %v39694_v24  ;;  %v31865_v42 = vsub.f32 %v31567_v41, %v39914_v17  ;;  %v39230_v18 = vand.u32 4294901760, %v31847_v32  ;;  %v5556_v41 = vand.u32 4294901760, %v5555_v21  ;;  %v39916_v60 = vand.u32 4294901760, %v31597_v40 }
 0x4e5   : > { %v25932_v26 = vpack.c.bf16 %v4874_v50, %v4867_v7  ;;  %v4880_v16 = vsub.f32 %v31842_v13, %v39229_v20 }
 0x4e6   : > { %v31887_v12 = vsub.f32 %v31597_v40, %v39916_v60  ;;  %v26076_v40 = vpack.c.bf16 %v5563_v51, %v5556_v41  ;;  %v39919_v7 = vand.u32 4294901760, %v31865_v42 }
 0x4e7   : > { %v4881_v60 = vand.u32 4294901760, %v4880_v16 }
 0x4e8   : > { %v5576_v50 = vsub.f32 %v31865_v42, %v39919_v7  ;;  %v39920_v7 = vand.u32 4294901760, %v31630_v38 }
 0x4e9   : > { %25930 = vmatpush3.bf16.xpose.msra.mxu0 %v25929_v48  ;;  %v31882_v48 = vsub.f32 %v31594_v8, %v39915_v49  ;;  %v4887_v8 = vsub.f32 %v31847_v32, %v39230_v18  ;;  %v39918_v49 = vand.u32 4294901760, %v31603_v44  ;;  %v39233_v18 = vand.u32 4294901760, %v31887_v12 }
 0x4ea   : > { %26074 = vmatpush3.bf16.xpose.msra.mxu1 %v26073_v9  ;;  %25931 = vmatprep.subr.bf16.mxu0 %v39685_v34  ;;  %v39917_v9 = vand.u32 4294901760, %v31600_v30  ;;  %v5577_v41 = vand.u32 4294901760, %v5576_v50  ;;  %v31920_v16 = vsub.f32 %v31630_v38, %v39920_v7  ;;  %v39923_v7 = vand.u32 4294901760, %v31639_v31 }
 0x4eb   : > { %26075 = vmatprep.subr.bf16.mxu1 %v39685_v34  ;;  %v31903_v17 = vsub.f32 %v31603_v44, %v39918_v49  ;;  %v39232_v20 = vand.u32 4294901760, %v31882_v48  ;;  %v4901_v38 = vsub.f32 %v31887_v12, %v39233_v18 }
 0x4ec   : > { %v31892_v21 = vsub.f32 %v31600_v30, %v39917_v9  ;;  %v5569_v30 = vsub.f32 %v31854_v53, %v39231_v47  ;;  %v4888_v9 = vand.u32 4294901760, %v4887_v8  ;;  %v31941_v49 = vsub.f32 %v31639_v31, %v39923_v7 }
 0x4ed   : > { %v4894_v47 = vsub.f32 %v31882_v48, %v39232_v20  ;;  %v39235_v20 = vand.u32 4294901760, %v31920_v16 }
 0x4ee   : > { %v5570_v44 = vand.u32 4294901760, %v5569_v30  ;;  %v39234_v51 = vand.u32 4294901760, %v31892_v21  ;;  %v25935_v50 = vpack.c.bf16 %v4888_v9, %v4881_v60  ;;  %v39924_v60 = vand.u32 4294901760, %v31903_v17 }
 0x4f0   : > { %v5590_v9 = vsub.f32 %v31903_v17, %v39924_v60  ;;  %v39925_v60 = vand.u32 4294901760, %v31666_v63 }
 0x4f1   : > { %25933 = vmatpush3.bf16.xpose.msra.mxu0 %v25932_v26  ;;  %v39921_v26 = vand.u32 4294901760, %v31633_v25 }
 0x4f2   : > { %26077 = vmatpush3.bf16.xpose.msra.mxu1 %v26076_v40  ;;  %25934 = vmatprep.subr.bf16.mxu0 %v39685_v34  ;;  %v39922_v40 = vand.u32 4294901760, %v31636_v35 }
 0x4f3   : > { %26078 = vmatprep.subr.bf16.mxu1 %v39685_v34  ;;  %v31925_v8 = vsub.f32 %v31633_v25, %v39921_v26  ;;  %v26079_v25 = vpack.c.bf16 %v5577_v41, %v5570_v44  ;;  %v4895_v26 = vand.u32 4294901760, %v4894_v47  ;;  %v5591_v44 = vand.u32 4294901760, %v5590_v9 }
 0x4f4   : > { %v31930_v30 = vsub.f32 %v31636_v35, %v39922_v40  ;;  %v5583_v35 = vsub.f32 %v31892_v21, %v39234_v51  ;;  %v4902_v40 = vand.u32 4294901760, %v4901_v38  ;;  %v31958_v47 = vsub.f32 %v31666_v63, %v39925_v60 }
 0x4f5   : > { %v39236_v18 = vand.u32 4294901760, %v31925_v8  ;;  %v4908_v51 = vsub.f32 %v31920_v16, %v39235_v20  ;;  %v39928_v60 = vand.u32 4294901760, %v31675_v29 }
 0x4f6   : > { %v5584_v31 = vand.u32 4294901760, %v5583_v35  ;;  %v39237_v41 = vand.u32 4294901760, %v31930_v30  ;;  %v25938_v9 = vpack.c.bf16 %v4902_v40, %v4895_v26  ;;  %v39929_v26 = vand.u32 4294901760, %v31941_v49 }
 0x4f7   : > { %v4915_v63 = vsub.f32 %v31925_v8, %v39236_v18  ;;  %v31979_v7 = vsub.f32 %v31675_v29, %v39928_v60  ;;  %v39238_v20 = vand.u32 4294901760, %v31958_v47 }
 0x4f8   : > { %v5604_v40 = vsub.f32 %v31941_v49, %v39929_v26  ;;  %v39930_v26 = vand.u32 4294901760, %v31722_v11 }
 0x4f9   : > { %25936 = vmatpush3.bf16.xpose.msra.mxu0 %v25935_v50  ;;  %v39926_v50 = vand.u32 4294901760, %v31669_v19 }
 0x4fa   : > { %26080 = vmatpush3.bf16.xpose.msra.mxu1 %v26079_v25  ;;  %25937 = vmatprep.subr.bf16.mxu0 %v39685_v34  ;;  %v39927_v25 = vand.u32 4294901760, %v31672_v5 }
 0x4fb   : > { %26081 = vmatprep.subr.bf16.mxu1 %v39685_v34  ;;  %v31963_v38 = vsub.f32 %v31669_v19, %v39926_v50  ;;  %v26082_v19 = vpack.c.bf16 %v5591_v44, %v5584_v31  ;;  %v4909_v50 = vand.u32 4294901760, %v4908_v51  ;;  %v5605_v31 = vand.u32 4294901760, %v5604_v40 }
 0x4fc   : > { %v31968_v35 = vsub.f32 %v31672_v5, %v39927_v25  ;;  %v5597_v5 = vsub.f32 %v31930_v30, %v39237_v41  ;;  %v4916_v25 = vand.u32 4294901760, %v4915_v63  ;;  %v31996_v51 = vsub.f32 %v31722_v11, %v39930_v26 }
 0x4fd   : > { %v39239_v18 = vand.u32 4294901760, %v31963_v38  ;;  %v4922_v41 = vsub.f32 %v31958_v47, %v39238_v20  ;;  %v39933_v26 = vand.u32 4294901760, %v31731_v56 }
 0x4fe   : > { %v5598_v29 = vand.u32 4294901760, %v5597_v5  ;;  %v39240_v44 = vand.u32 4294901760, %v31968_v35  ;;  %v25941_v40 = vpack.c.bf16 %v4916_v25, %v4909_v50  ;;  %v39934_v50 = vand.u32 4294901760, %v31979_v7 }
 0x4ff   : > { %v4929_v11 = vsub.f32 %v31963_v38, %v39239_v18  ;;  %v32017_v60 = vsub.f32 %v31731_v56, %v39933_v26  ;;  %v4935_v20 = vand.u32 4294901760, %v31996_v51 }
 0x500   : > { %v5618_v25 = vsub.f32 %v31979_v7, %v39934_v50 }
 0x501   : > { %25939 = vmatpush3.bf16.xpose.msra.mxu0 %v25938_v9  ;;  %v39931_v9 = vand.u32 4294901760, %v31725_v28  ;;  %v5631_v26 = vand.u32 4294901760, %v32017_v60 }
 0x502   : > { %26083 = vmatpush3.bf16.xpose.msra.mxu1 %v26082_v19  ;;  %25940 = vmatprep.subr.bf16.mxu0 %v39685_v34  ;;  %v39932_v19 = vand.u32 4294901760, %v31728_v57 }
 0x503   : > { %26084 = vmatprep.subr.bf16.mxu1 %v39685_v34  ;;  %v32001_v63 = vsub.f32 %v31725_v28, %v39931_v9  ;;  %v26085_v28 = vpack.c.bf16 %v5605_v31, %v5598_v29  ;;  %v4923_v9 = vand.u32 4294901760, %v4922_v41  ;;  %v5619_v29 = vand.u32 4294901760, %v5618_v25 }
 0x504   : > { %v32006_v5 = vsub.f32 %v31728_v57, %v39932_v19  ;;  %v5611_v57 = vsub.f32 %v31968_v35, %v39240_v44  ;;  %v4930_v19 = vand.u32 4294901760, %v4929_v11  ;;  %v4936_v41 = vsub.f32 %v31996_v51, %v4935_v20 }
 0x505   : > { %v39241_v18 = vand.u32 4294901760, %v32001_v63 }
 0x506   : > { %v5612_v56 = vand.u32 4294901760, %v5611_v57  ;;  %v5624_v31 = vand.u32 4294901760, %v32006_v5  ;;  %v25944_v44 = vpack.c.bf16 %v4930_v19, %v4923_v9  ;;  %v5632_v57 = vsub.f32 %v32017_v60, %v5631_v26 }
 0x507   : > { %v4937_v50 = vand.u32 4294901760, %v4936_v41  ;;  %v26097_v41 = vpack.c.bf16 %v31775_v14, %v31758_v59 }
 0x508   : > { %v26088_v11 = vpack.c.bf16 %v5619_v29, %v5612_v56  ;;  %v5633_v19 = vand.u32 4294901760, %v5632_v57  ;;  %v26094_v29 = vpack.c.bf16 %v31713_v52, %v31702_v6  ;;  %v26103_v57 = vpack.c.bf16 %v31865_v42, %v31854_v53 }
 0x509   : > { %25942 = vmatpush3.bf16.xpose.msra.mxu0 %v25941_v40  ;;  %v4943_v40 = vsub.f32 %v32001_v63, %v39241_v18 }
 0x50a   : > { %26086 = vmatpush3.bf16.xpose.msra.mxu1 %v26085_v28  ;;  %25943 = vmatprep.subr.bf16.mxu0 %v39685_v34  ;;  %v5625_v28 = vsub.f32 %v32006_v5, %v5624_v31 }
 0x50b   : > { %26087 = vmatprep.subr.bf16.mxu1 %v39685_v34  ;;  %v4944_v25 = vand.u32 4294901760, %v4943_v40  ;;  %v25956_v40 = vpack.c.bf16 %v31805_v46, %v31800_v55 }
 0x50c   : > { %v5626_v9 = vand.u32 4294901760, %v5625_v28  ;;  %v25959_v28 = vpack.c.bf16 %v31847_v32, %v31842_v13 }
 0x50d   : > { %v25947_v18 = vpack.c.bf16 %v4944_v25, %v4937_v50  ;;  %v25962_v50 = vpack.c.bf16 %v31887_v12, %v31882_v48  ;;  %v26106_v25 = vpack.c.bf16 %v31903_v17, %v31892_v21 }
 0x50e   : > { %v26091_v56 = vpack.c.bf16 %v5633_v19, %v5626_v9  ;;  %v25965_v9 = vpack.c.bf16 %v31925_v8, %v31920_v16  ;;  %v26109_v19 = vpack.c.bf16 %v31941_v49, %v31930_v30 }
 0x511   : > { %25945 = vmatpush3.bf16.xpose.msra.mxu0 %v25944_v44  ;;  %v25950_v44 = vpack.c.bf16 %v31697_v27, %v31692_v58 }
 0x512   : > { %26089 = vmatpush3.bf16.xpose.msra.mxu1 %v26088_v11  ;;  %25946 = vmatprep.subr.bf16.mxu0 %v39685_v34  ;;  %v26100_v11 = vpack.c.bf16 %v31821_v2, %v31810_v39 }
 0x513   : > { %26090 = vmatprep.subr.bf16.mxu1 %v39685_v34 }
 0x519   : > { %25948 = vmatpush3.bf16.xpose.msra.mxu0 %v25947_v18  ;;  %v25953_v18 = vpack.c.bf16 %v31753_v36, %v31748_v22 }
 0x51a   : > { %26092 = vmatpush3.bf16.xpose.msra.mxu1 %v26091_v56  ;;  %25949 = vmatprep.subr.bf16.mxu0 %v39685_v34  ;;  %v25968_v56 = vpack.c.bf16 %v31963_v38, %v31958_v47 }
 0x51b   : > { %26093 = vmatprep.subr.bf16.mxu1 %v39685_v34 }
 0x520   : > { %21325 = vmatmul.mubr.f32.vlgmr.msra.gmra.mrb[6].mxu0 %v29187_v43 }
 0x521   : > { %25951 = vmatpush3.bf16.xpose.msra.mxu0 %v25950_v44  ;;  %21535 = vmatmul.mubr.f32.vlgmr.msra.gmra.mrb[6].mxu1 %v29187_v43  ;;  %v26112_v44 = vpack.c.bf16 %v31979_v7, %v31968_v35 }
 0x522   : > { %26095 = vmatpush3.bf16.xpose.msra.mxu1 %v26094_v29  ;;  %25952 = vmatprep.subr.bf16.mxu0 %v39685_v34  ;;  %v25971_v29 = vpack.c.bf16 %v32001_v63, %v31996_v51 }
 0x523   : > { %26096 = vmatprep.subr.bf16.mxu1 %v39685_v34  ;;  %21359 = vmatprep.mubr.msk.f32.mxu0 %vm28907_vm0, %v39694_v24 }
 0x524   : > { %21569 = vmatprep.mubr.msk.f32.mxu1 %vm28907_vm0, %v39694_v24 }
 0x529   : > { %25954 = vmatpush3.bf16.xpose.msra.mxu0 %v25953_v18  ;;  %v26115_v18 = vpack.c.bf16 %v32017_v60, %v32006_v5 }
 0x52a   : > { %26098 = vmatpush3.bf16.xpose.msra.mxu1 %v26097_v41  ;;  %25955 = vmatprep.subr.bf16.mxu0 %v39685_v34  ;;  %v39936_v41 = vld [vmem:[#allocation6_spill] sm:$0xff] }
 0x52b   : > { %26099 = vmatprep.subr.bf16.mxu1 %v39685_v34 }
 0x531   : > { %25957 = vmatpush3.bf16.xpose.msra.mxu0 %v25956_v40  ;;  %v39937_v40 = vld [vmem:[#allocation7_spill] sm:$0xff] }
 0x532   : > { %26101 = vmatpush3.bf16.xpose.msra.mxu1 %v26100_v11  ;;  %25958 = vmatprep.subr.bf16.mxu0 %v39685_v34  ;;  %v39938_v11 = vld [vmem:[#allocation9_spill] sm:$0xff] }
 0x533   : > { %26102 = vmatprep.subr.bf16.mxu1 %v39685_v34 }
 0x539   : > { %25960 = vmatpush3.bf16.xpose.msra.mxu0 %v25959_v28  ;;  %v39939_v28 = vand.u32 4294901760, %v31692_v58 }
 0x53a   : > { %26104 = vmatpush3.bf16.xpose.msra.mxu1 %v26103_v57  ;;  %25961 = vmatprep.subr.bf16.mxu0 %v39685_v34  ;;  %v39940_v57 = vand.u32 4294901760, %v31697_v27  ;;  %v39945_v27 = vand.u32 4294901760, %v31753_v36  ;;  %v39951_v36 = vand.u32 4294901760, %v31821_v2  ;;  %v39956_v2 = vand.u32 4294901760, %v31882_v48 }
 0x53b   : > { %26105 = vmatprep.subr.bf16.mxu1 %v39685_v34  ;;  %v39962_v48 = vand.u32 4294901760, %v31930_v30 }
 0x541   : > { %25963 = vmatpush3.bf16.xpose.msra.mxu0 %v25962_v50  ;;  %v25998_v50 = vpack.c.bf16 %v39940_v57, %v39939_v28  ;;  %v39949_v28 = vand.u32 4294901760, %v31805_v46  ;;  %v39955_v46 = vand.u32 4294901760, %v31865_v42  ;;  %v39961_v42 = vand.u32 4294901760, %v31925_v8 }
 0x542   : > { %26107 = vmatpush3.bf16.xpose.msra.mxu1 %v26106_v25  ;;  %25964 = vmatprep.subr.bf16.mxu0 %v39685_v34  ;;  %v39941_v25 = vand.u32 4294901760, %v31702_v6  ;;  %v39944_v6 = vand.u32 4294901760, %v31748_v22  ;;  %v39950_v22 = vand.u32 4294901760, %v31810_v39  ;;  %v39957_v39 = vand.u32 4294901760, %v31887_v12 }
 0x543   : > { %26108 = vmatprep.subr.bf16.mxu1 %v39685_v34  ;;  %v39963_v12 = vand.u32 4294901760, %v31941_v49  ;;  %v39967_v8 = vand.u32 4294901760, %v31979_v7  ;;  %v39968_v49 = vand.u32 4294901760, %v32001_v63  ;;  %v304_v7 = vld [vmem:[%s32259_s14 + $0x18] sm:$0xff] }
 0x544   : > { %v26001_v58 = vpack.c.bf16 %v39945_v27, %v39944_v6  ;;  %v32309_v5 = vsel %vm557_vm1, %v304_v7, 0 }
 0x545   : > { %v26157_v27 = vpack.c.bf16 %v39963_v12, %v39962_v48  ;;  %v26019_v30 = vpack.c.bf16 %v39968_v49, %v4935_v20  ;;  %v317_v20 = vld [vmem:[%s32259_s14 + $0x80] sm:$0xff] }
 0x549   : > { %25966 = vmatpush3.bf16.xpose.msra.mxu0 %v25965_v9  ;;  %v39942_v9 = vand.u32 4294901760, %v31713_v52  ;;  %v39946_v52 = vand.u32 4294901760, %v31758_v59  ;;  %v39952_v59 = vand.u32 4294901760, %v31842_v13  ;;  %v39958_v13 = vand.u32 4294901760, %v31892_v21 }
 0x54a   : > { %26110 = vmatpush3.bf16.xpose.msra.mxu1 %v26109_v19  ;;  %25967 = vmatprep.subr.bf16.mxu0 %v39685_v34  ;;  %v39965_v21 = vand.u32 4294901760, %v31963_v38  ;;  %v319_v38 = vld [vmem:[%s32259_s14 + $0x90] sm:$0xff] }
 0x54b   : > { %26111 = vmatprep.subr.bf16.mxu1 %v39685_v34  ;;  %v26142_v19 = vpack.c.bf16 %v39942_v9, %v39941_v25 }
 0x551   : > { %25969 = vmatpush3.bf16.xpose.msra.mxu0 %v25968_v56  ;;  %v39943_v56 = vld [vmem:[#allocation8_spill] sm:$0xff] }
 0x552   : > { %26113 = vmatpush3.bf16.xpose.msra.mxu1 %v26112_v44  ;;  %25970 = vmatprep.subr.bf16.mxu0 %v39685_v34  ;;  %v39947_v44 = vand.u32 4294901760, %v31775_v14  ;;  %v39953_v14 = vand.u32 4294901760, %v31847_v32  ;;  %v39959_v32 = vand.u32 4294901760, %v31903_v17  ;;  %v39964_v17 = vand.u32 4294901760, %v31958_v47 }
 0x553   : > { %26114 = vmatprep.subr.bf16.mxu1 %v39685_v34  ;;  %v26163_v47 = vpack.c.bf16 %v5631_v26, %v5624_v31  ;;  %v32312_v31 = vsel %vm557_vm1, %v319_v38, 0  ;;  %v311_v38 = vld [vmem:[%s32259_s14 + $0x50] sm:$0xff] }
 0x554   : > { %v26007_v25 = vpack.c.bf16 %v39953_v14, %v39952_v59 }
 0x559   : > { %25972 = vmatpush3.bf16.xpose.msra.mxu0 %v25971_v29  ;;  %v26145_v29 = vpack.c.bf16 %v39947_v44, %v39946_v52  ;;  %v305_v44 = vld [vmem:[%s32259_s14 + $0x20] sm:$0xff] }
 0x55a   : > { %26116 = vmatpush3.bf16.xpose.msra.mxu1 %v26115_v18  ;;  %25973 = vmatprep.subr.bf16.mxu0 %v39685_v34  ;;  %v39948_v18 = vand.u32 4294901760, %v31800_v55  ;;  %v39954_v55 = vand.u32 4294901760, %v31854_v53  ;;  %v39960_v53 = vand.u32 4294901760, %v31920_v16  ;;  %v39966_v16 = vand.u32 4294901760, %v31968_v35  ;;  %v320_v35 = vld [vmem:[%s32259_s14 + $0x98] sm:$0xff] }
 0x55b   : > { %26117 = vmatprep.subr.bf16.mxu1 %v39685_v34  ;;  %v32315_v26 = vsel %vm557_vm1, %v320_v35, 0  ;;  %v312_v35 = vld [vmem:[%s32259_s14 + $0x58] sm:$0xff] }
 0x55c   : > { %v26004_v57 = vpack.c.bf16 %v39949_v28, %v39948_v18  ;;  %v26151_v9 = vpack.c.bf16 %v39955_v46, %v39954_v55  ;;  %v26013_v6 = vpack.c.bf16 %v39961_v42, %v39960_v53  ;;  %v26160_v52 = vpack.c.bf16 %v39967_v8, %v39966_v16  ;;  %v322_v18 = vld [vmem:[%s32259_s14 + $0xa8] sm:$0xff]  ;;  %v325_v16 = vld [vmem:[%s32259_s14 + $0xc0] sm:$0xff] }
 0x55d   : > { %v32357_v59 = vsel %vm557_vm1, %v322_v18, 0  ;;  %v326_v8 = vld [vmem:[%s32259_s14 + $0xc8] sm:$0xff] }
 0x55e   : > { %v39254_v46 = vand.u32 4294901760, %v32357_v59 }
 0x560   : > { %21360 = vmatmul.mubr.f32.vlgmr.msra.gmra.mrb[6].mxu0 %v29208_v1 }
 0x561   : > { %25975 = vmatpush3.bf16.xpose.msra.mxu0 %v31471_v23  ;;  %21570 = vmatmul.mubr.f32.vlgmr.msra.gmra.mrb[6].mxu1 %v29208_v1  ;;  %v39935_v1 = vld [vmem:[#allocation5_spill] sm:$0xff] }
 0x562   : > { %26119 = vmatpush3.bf16.xpose.msra.mxu1 %v31477_v62  ;;  %25976 = vmatprep.subr.bf16.mxu0 %v39685_v34 }
 0x563   : > { %26120 = vmatprep.subr.bf16.mxu1 %v39685_v34  ;;  %21394 = vmatprep.mubr.msk.f32.mxu0 %vm28907_vm0, %v39694_v24 }
 0x564   : > { %21604 = vmatprep.mubr.msk.f32.mxu1 %vm28907_vm0, %v39694_v24 }
 0x569   : > { %25978 = vmatpush3.bf16.xpose.msra.mxu0 %v31513_v33 }
 0x56a   : > { %26122 = vmatpush3.bf16.xpose.msra.mxu1 %v31519_v0  ;;  %25979 = vmatprep.subr.bf16.mxu0 %v39685_v34 }
 0x56b   : > { %26123 = vmatprep.subr.bf16.mxu1 %v39685_v34 }
 0x571   : > { %25981 = vmatpush3.bf16.xpose.msra.mxu0 %v31549_v4 }
 0x572   : > { %26125 = vmatpush3.bf16.xpose.msra.mxu1 %v31555_v61  ;;  %25982 = vmatprep.subr.bf16.mxu0 %v39685_v34 }
 0x573   : > { %26126 = vmatprep.subr.bf16.mxu1 %v39685_v34 }
 0x579   : > { %25984 = vmatpush3.bf16.xpose.msra.mxu0 %v31585_v3 }
 0x57a   : > { %26128 = vmatpush3.bf16.xpose.msra.mxu1 %v31591_v54  ;;  %25985 = vmatprep.subr.bf16.mxu0 %v39685_v34 }
 0x57b   : > { %26129 = vmatprep.subr.bf16.mxu1 %v39685_v34 }
 0x581   : > { %25987 = vmatpush3.bf16.xpose.msra.mxu0 %v31621_v10 }
 0x582   : > { %26131 = vmatpush3.bf16.xpose.msra.mxu1 %v31627_v45  ;;  %25988 = vmatprep.subr.bf16.mxu0 %v39685_v34 }
 0x583   : > { %26132 = vmatprep.subr.bf16.mxu1 %v39685_v34 }
 0x589   : > { %25990 = vmatpush3.bf16.xpose.msra.mxu0 %v31657_v15 }
 0x58a   : > { %26134 = vmatpush3.bf16.xpose.msra.mxu1 %v31663_v37  ;;  %25991 = vmatprep.subr.bf16.mxu0 %v39685_v34 }
 0x58b   : > { %26135 = vmatprep.subr.bf16.mxu1 %v39685_v34 }
 0x591   : > { %25993 = vmatpush3.bf16.xpose.msra.mxu0 %v39935_v1 }
 0x592   : > { %26137 = vmatpush3.bf16.xpose.msra.mxu1 %v39936_v41  ;;  %25994 = vmatprep.subr.bf16.mxu0 %v39685_v34 }
 0x593   : > { %26138 = vmatprep.subr.bf16.mxu1 %v39685_v34 }
 0x599   : > { %25996 = vmatpush3.bf16.xpose.msra.mxu0 %v39937_v40 }
 0x59a   : > { %26140 = vmatpush3.bf16.xpose.msra.mxu1 %v39938_v11  ;;  %25997 = vmatprep.subr.bf16.mxu0 %v39685_v34 }
 0x59b   : > { %26141 = vmatprep.subr.bf16.mxu1 %v39685_v34 }
 0x5a0   : > { %21395 = vmatmul.mubr.f32.vlgmr.msra.gmra.mrb[6].mxu0 %v39943_v56 }
 0x5a1   : > { %25999 = vmatpush3.bf16.xpose.msra.mxu0 %v25998_v50  ;;  %21605 = vmatmul.mubr.f32.vlgmr.msra.gmra.mrb[6].mxu1 %v39943_v56  ;;  %v26148_v50 = vpack.c.bf16 %v39951_v36, %v39950_v22  ;;  %v26154_v56 = vpack.c.bf16 %v39959_v32, %v39958_v13  ;;  %v32348_v22 = vsel %vm557_vm1, %v305_v44, 0  ;;  %v327_v44 = vld [vmem:[%s32259_s14 + $0xd0] sm:$0xff] }
 0x5a2   : > { %26143 = vmatpush3.bf16.xpose.msra.mxu1 %v26142_v19  ;;  %26000 = vmatprep.subr.bf16.mxu0 %v39685_v34  ;;  %v26010_v19 = vpack.c.bf16 %v39957_v39, %v39956_v2  ;;  %v39257_v14 = vand.u32 4294901760, %v32348_v22  ;;  %v308_v2 = vld [vmem:[%s32259_s14 + $0x38] sm:$0xff]  ;;  %v323_v39 = vld [vmem:[%s32259_s14 + $0xb0] sm:$0xff] }
 0x5a3   : > { %26144 = vmatprep.subr.bf16.mxu1 %v39685_v34  ;;  %21429 = vmatprep.mubr.msk.f32.mxu0 %vm28907_vm0, %v39694_v24  ;;  %v32387_v53 = vsel %vm557_vm1, %v308_v2, 0  ;;  %v32390_v42 = vsel %vm557_vm1, %v323_v39, 0  ;;  %v32459_v2 = vsel %vm557_vm1, %v312_v35, 0  ;;  %v32462_v39 = vsel %vm557_vm1, %v327_v44, 0  ;;  %v314_v35 = vld [vmem:[%s32259_s14 + $0x68] sm:$0xff]  ;;  %v329_v44 = vld [vmem:[%s32259_s14 + $0xe0] sm:$0xff] }
 0x5a4   : > { %21639 = vmatprep.mubr.msk.f32.mxu1 %vm28907_vm0, %v39694_v24  ;;  %v39252_v12 = vand.u32 4294901760, %v32387_v53 }
 0x5a9   : > { %26002 = vmatpush3.bf16.xpose.msra.mxu0 %v26001_v58  ;;  %v26016_v58 = vpack.c.bf16 %v39965_v21, %v39964_v17  ;;  %v309_v21 = vld [vmem:[%s32259_s14 + $0x40] sm:$0xff] }
 0x5aa   : > { %26146 = vmatpush3.bf16.xpose.msra.mxu1 %v26145_v29  ;;  %26003 = vmatprep.subr.bf16.mxu0 %v39685_v34  ;;  %v306_v29 = vld [vmem:[%s32259_s14 + $0x28] sm:$0xff] }
 0x5ab   : > { %26147 = vmatprep.subr.bf16.mxu1 %v39685_v34  ;;  %v32351_v36 = vsel %vm557_vm1, %v306_v29, 0  ;;  %v328_v29 = vld [vmem:[%s32259_s14 + $0xd8] sm:$0xff] }
 0x5b1   : > { %26005 = vmatpush3.bf16.xpose.msra.mxu0 %v26004_v57 }
 0x5b2   : > { %26149 = vmatpush3.bf16.xpose.msra.mxu1 %v26148_v50  ;;  %26006 = vmatprep.subr.bf16.mxu0 %v39685_v34 }
 0x5b3   : > { %26150 = vmatprep.subr.bf16.mxu1 %v39685_v34 }
 0x5b9   : > { %26008 = vmatpush3.bf16.xpose.msra.mxu0 %v26007_v25  ;;  %v39256_v25 = vand.u32 4294901760, %v32351_v36 }
 0x5ba   : > { %26152 = vmatpush3.bf16.xpose.msra.mxu1 %v26151_v9  ;;  %26009 = vmatprep.subr.bf16.mxu0 %v39685_v34  ;;  %v307_v9 = vld [vmem:[%s32259_s14 + $0x30] sm:$0xff] }
 0x5bb   : > { %26153 = vmatprep.subr.bf16.mxu1 %v39685_v34  ;;  %v32375_v13 = vpack.c.bf16 %v39256_v25, %v39257_v14 }
 0x5c1   : > { %26011 = vmatpush3.bf16.xpose.msra.mxu0 %v26010_v19  ;;  %v324_v19 = vld [vmem:[%s32259_s14 + $0xb8] sm:$0xff] }
 0x5c2   : > { %26155 = vmatpush3.bf16.xpose.msra.mxu1 %v26154_v56  ;;  %26012 = vmatprep.subr.bf16.mxu0 %v39685_v34  ;;  %v32384_v56 = vsel %vm557_vm1, %v307_v9, 0  ;;  %v32456_v9 = vsel %vm557_vm1, %v311_v38, 0  ;;  %v313_v38 = vld [vmem:[%s32259_s14 + $0x60] sm:$0xff] }
 0x5c3   : > { %26156 = vmatprep.subr.bf16.mxu1 %v39685_v34  ;;  %v39253_v48 = vand.u32 4294901760, %v32384_v56 }
 0x5c9   : > { %26014 = vmatpush3.bf16.xpose.msra.mxu0 %v26013_v6  ;;  %v32393_v6 = vsel %vm557_vm1, %v324_v19, 0  ;;  %v32465_v19 = vsel %vm557_vm1, %v328_v29, 0  ;;  %v330_v29 = vld [vmem:[%s32259_s14 + $0xe8] sm:$0xff] }
 0x5ca   : > { %26158 = vmatpush3.bf16.xpose.msra.mxu1 %v26157_v27  ;;  %26015 = vmatprep.subr.bf16.mxu0 %v39685_v34  ;;  %v39251_v27 = vand.u32 4294901760, %v32390_v42  ;;  %v39248_v17 = vand.u32 4294901760, %v32393_v6 }
 0x5cb   : > { %26159 = vmatprep.subr.bf16.mxu1 %v39685_v34 }
 0x5cc   : > { %v32417_v49 = vpack.c.bf16 %v39248_v17, %v39251_v27  ;;  %v32504_v17 = vsel %vm557_vm1, %v330_v29, 0  ;;  %v315_v29 = vld [vmem:[%s32259_s14 + $0x70] sm:$0xff]  ;;  %v316_v27 = vld [vmem:[%s32259_s14 + $0x78] sm:$0xff] }
 0x5d1   : > { %26017 = vmatpush3.bf16.xpose.msra.mxu0 %v26016_v58  ;;  %v310_v58 = vld [vmem:[%s32259_s14 + $0x48] sm:$0xff] }
 0x5d2   : > { %26161 = vmatpush3.bf16.xpose.msra.mxu1 %v26160_v52  ;;  %26018 = vmatprep.subr.bf16.mxu0 %v39685_v34  ;;  %v32411_v52 = vpack.c.bf16 %v39252_v12, %v39253_v48  ;;  %v331_v12 = vld [vmem:[%s32259_s14 + $0xf0] sm:$0xff]  ;;  %v332_v48 = vld [vmem:[%s32259_s14 + $0xf8] sm:$0xff] }
 0x5d3   : > { %26162 = vmatprep.subr.bf16.mxu1 %v39685_v34 }
 0x5d9   : > { %26020 = vmatpush3.bf16.xpose.msra.mxu0 %v26019_v30  ;;  %v32420_v30 = vsel %vm557_vm1, %v309_v21, 0  ;;  %v39247_v21 = vand.u32 4294901760, %v32456_v9 }
 0x5da   : > { %26164 = vmatpush3.bf16.xpose.msra.mxu1 %v26163_v47  ;;  %26021 = vmatprep.subr.bf16.mxu0 %v39685_v34  ;;  %v32423_v47 = vsel %vm557_vm1, %v310_v58, 0  ;;  %v39246_v58 = vand.u32 4294901760, %v32459_v2 }
 0x5db   : > { %26165 = vmatprep.subr.bf16.mxu1 %v39685_v34 }
 0x5e0   : > { %21430 = vmatmul.mubr.f32.vlgmr.msra.gmra.mrb[6].mxu0 %v29187_v43 }
 0x5e1   : > { %26023 = vmatpush3.bf16.xpose.msra.mxu0 %v31471_v23  ;;  %21640 = vmatmul.mubr.f32.vlgmr.msra.gmra.mrb[6].mxu1 %v29187_v43  ;;  %v301_v23 = vld [vmem:[%s32259_s14] sm:$0xff] }
 0x5e2   : > { %26167 = vmatpush3.bf16.xpose.msra.mxu1 %v31477_v62  ;;  %26024 = vmatprep.subr.bf16.mxu0 %v39685_v34  ;;  %v302_v62 = vld [vmem:[%s32259_s14 + $0x8] sm:$0xff] }
 0x5e3   : > { %26168 = vmatprep.subr.bf16.mxu1 %v39685_v34  ;;  %21464 = vmatprep.mubr.msk.f32.mxu0 %vm28907_vm0, %v39694_v24 }
 0x5e4   : > { %21674 = vmatprep.mubr.msk.f32.mxu1 %vm28907_vm0, %v39694_v24 }
 0x5e9   : > { %26026 = vmatpush3.bf16.xpose.msra.mxu0 %v31513_v33  ;;  %v318_v33 = vld [vmem:[%s32259_s14 + $0x88] sm:$0xff] }
 0x5ea   : > { %26170 = vmatpush3.bf16.xpose.msra.mxu1 %v31519_v0  ;;  %26027 = vmatprep.subr.bf16.mxu0 %v39685_v34  ;;  %v32270_v0 = vsel %vm557_vm1, %v301_v23, 0  ;;  %v32426_v23 = vsel %vm557_vm1, %v325_v16, 0  ;;  %v39250_v16 = vand.u32 4294901760, %v32462_v39 }
 0x5eb   : > { %26171 = vmatprep.subr.bf16.mxu1 %v39685_v34 }
 0x5f1   : > { %26029 = vmatpush3.bf16.xpose.msra.mxu0 %v31549_v4  ;;  %v32273_v4 = vsel %vm557_vm1, %v302_v62, 0  ;;  %v32429_v62 = vsel %vm557_vm1, %v326_v8, 0  ;;  %v39249_v8 = vand.u32 4294901760, %v32465_v19 }
 0x5f2   : > { %26173 = vmatpush3.bf16.xpose.msra.mxu1 %v31555_v61  ;;  %26030 = vmatprep.subr.bf16.mxu0 %v39685_v34  ;;  %v32276_v61 = vsel %vm557_vm1, %v317_v20, 0  ;;  %v39245_v20 = vand.u32 4294901760, %v32420_v30  ;;  %v39242_v7 = vand.u32 4294901760, %v32429_v62 }
 0x5f3   : > { %26174 = vmatprep.subr.bf16.mxu1 %v39685_v34 }
 0x5f9   : > { %26032 = vmatpush3.bf16.xpose.msra.mxu0 %v31585_v3  ;;  %v6125_v3 = vand.u32 4294901760, %v32270_v0 }
 0x5fa   : > { %26176 = vmatpush3.bf16.xpose.msra.mxu1 %v31591_v54  ;;  %26033 = vmatprep.subr.bf16.mxu0 %v39685_v34  ;;  %v6128_v54 = vand.u32 4294901760, %v32273_v4 }
 0x5fb   : > { %26177 = vmatprep.subr.bf16.mxu1 %v39685_v34 }
 0x5fc   : > { %v32297_v60 = vpack.c.bf16 %v6128_v54, %v6125_v3 }
 0x601   : > { %26035 = vmatpush3.bf16.xpose.msra.mxu0 %v31621_v10 }
 0x602   : > { %26179 = vmatpush3.bf16.xpose.msra.mxu1 %v31627_v45  ;;  %26036 = vmatprep.subr.bf16.mxu0 %v39685_v34  ;;  %v303_v45 = vld [vmem:[%s32259_s14 + $0x10] sm:$0xff] }
 0x603   : > { %26180 = vmatprep.subr.bf16.mxu1 %v39685_v34  ;;  %v32306_v63 = vsel %vm557_vm1, %v303_v45, 0  ;;  %v39243_v45 = vand.u32 4294901760, %v32426_v23 }
 0x605   : > { %v32453_v18 = vpack.c.bf16 %v39242_v7, %v39243_v45  ;;  %v32483_v7 = vpack.c.bf16 %v39246_v58, %v39247_v21  ;;  %v32489_v45 = vpack.c.bf16 %v39249_v8, %v39250_v16  ;;  %v298_v58 = vld [vmem:[%s39029_s4] sm:$0x3]  ;;  %v32501_v21 = vsel %vm557_vm1, %v329_v44, 0 }
 0x606   : > { %v39259_v16 = vand.u32 4294901760, %v32501_v21  ;;  %v39258_v44 = vand.u32 4294901760, %v32504_v17 }
 0x609   : > { %26038 = vmatpush3.bf16.xpose.msra.mxu0 %v31657_v15  ;;  %v6814_v15 = vand.u32 4294901760, %v32276_v61 }
 0x60a   : > { %26182 = vmatpush3.bf16.xpose.msra.mxu1 %v31663_v37  ;;  %26039 = vmatprep.subr.bf16.mxu0 %v39685_v34  ;;  %v32279_v37 = vsel %vm557_vm1, %v318_v33, 0  ;;  %v39244_v33 = vand.u32 4294901760, %v32423_v47 }
 0x60b   : > { %26183 = vmatprep.subr.bf16.mxu1 %v39685_v34  ;;  %v6817_v10 = vand.u32 4294901760, %v32279_v37  ;;  %v32534_v25 = vsub.f32 %v32276_v61, %v6814_v15  ;;  %v32554_v61 = vsel %vm557_vm1, %v315_v29, 0 }
 0x60d   : > { %v32303_v51 = vpack.c.bf16 %v6817_v10, %v6814_v15  ;;  %v32563_v15 = vsel %vm557_vm1, %v332_v48, 0 }
 0x611   : > { %26041 = vmatpush3.bf16.xpose.msra.mxu0 %v39935_v1  ;;  %v6131_v1 = vand.u32 4294901760, %v32306_v63 }
 0x612   : > { %26185 = vmatpush3.bf16.xpose.msra.mxu1 %v39936_v41  ;;  %26042 = vmatprep.subr.bf16.mxu0 %v39685_v34  ;;  %v6134_v41 = vand.u32 4294901760, %v32309_v5 }
 0x613   : > { %26186 = vmatprep.subr.bf16.mxu1 %v39685_v34 }
 0x614   : > { %v32339_v28 = vpack.c.bf16 %v6134_v41, %v6131_v1 }
 0x619   : > { %26044 = vmatpush3.bf16.xpose.msra.mxu0 %v39937_v40  ;;  %v6820_v40 = vand.u32 4294901760, %v32312_v31 }
 0x61a   : > { %26188 = vmatpush3.bf16.xpose.msra.mxu1 %v39938_v11  ;;  %26189 = vmatprep.subr.bf16.mxu0 %v39685_v34  ;;  %v6823_v11 = vand.u32 4294901760, %v32315_v26 }
 0x61b   : > { %26333 = vmatprep.subr.bf16.mxu1 %v39685_v34 }
 0x61c   : > { %v32345_v57 = vpack.c.bf16 %v6823_v11, %v6820_v40 }
 0x620   : > { %21465 = vmatmul.mubr.f32.vlgmr.msra.gmra.mrb[6].mxu0 %v29187_v43 }
 0x621   : > { %21675 = vmatmul.mubr.f32.vlgmr.msra.gmra.mrb[6].mxu1 %v29187_v43  ;;  %26191 = vmatpush3.bf16.xpose.msra.mxu0 %v32297_v60  ;;  %v321_v43 = vld [vmem:[%s32259_s14 + $0xa0] sm:$0xff] }
 0x622   : > { %26335 = vmatpush3.bf16.xpose.msra.mxu1 %v32303_v51  ;;  %26192 = vmatprep.subr.bf16.mxu0 %v39685_v34  ;;  %v32354_v50 = vsel %vm557_vm1, %v321_v43, 0  ;;  %v32447_v43 = vpack.c.bf16 %v39244_v33, %v39245_v20  ;;  %v32492_v33 = vsel %vm557_vm1, %v313_v38, 0  ;;  %v32495_v20 = vsel %vm557_vm1, %v314_v35, 0 }
 0x623   : > { %26336 = vmatprep.subr.bf16.mxu1 %v39685_v34  ;;  %21709 = vmatprep.mubr.msk.f32.mxu0 %vm28907_vm0, %v39694_v24  ;;  %v39255_v55 = vand.u32 4294901760, %v32354_v50  ;;  %v39261_v38 = vand.u32 4294901760, %v32492_v33  ;;  %v39260_v8 = vand.u32 4294901760, %v32495_v20  ;;  %v6074_v35 = vsel %vm557_vm1, %v298_v58, 0 }
 0x624   : > { %21919 = vmatprep.mubr.msk.f32.mxu1 %vm28907_vm0, %v39694_v24  ;;  %v32524_v58 = vsub.f32 %v32270_v0, %v6125_v3  ;;  %v32545_v0 = vsub.f32 %v32279_v37, %v6817_v10  ;;  %v32557_v3 = vsel %vm557_vm1, %v316_v27, 0  ;;  %v39264_v10 = vand.u32 4294901760, %v32554_v61 }
 0x625   : > { %v32381_v32 = vpack.c.bf16 %v39254_v46, %v39255_v55  ;;  %v32519_v46 = vand.u32 4294901760, %v6074_v35  ;;  %v32529_v55 = vsub.f32 %v32273_v4, %v6128_v54  ;;  %v32540_v14 = vpack.c.bf16 %v39260_v8, %v39261_v38 }
 0x626   : > { %v32551_v4 = vpack.c.bf16 %v39258_v44, %v39259_v16  ;;  %v32560_v54 = vsel %vm557_vm1, %v331_v12, 0  ;;  %v39262_v44 = vand.u32 4294901760, %v32557_v3  ;;  %v39263_v29 = vand.u32 4294901760, %v32524_v58 }
 0x627   : > { %39969 = vst [vmem:[#allocation10_spill] sm:$0xff] %v32540_v14  ;;  %v32566_v37 = vsub.f32 %v6074_v35, %v32519_v46  ;;  %v39265_v27 = vand.u32 4294901760, %v32529_v55  ;;  %v39268_v12 = vand.u32 4294901760, %v32563_v15  ;;  %v32583_v8 = vsub.f32 %v32306_v63, %v6131_v1 }
 0x628   : > { %39970 = vst [vmem:[#allocation5_spill] sm:$0xff] %v32551_v4  ;;  %v32588_v38 = vsub.f32 %v32309_v5, %v6134_v41  ;;  %v32596_v35 = vsub.f32 %v32312_v31, %v6820_v40  ;;  %v32602_v16 = vpack.c.bf16 %v39262_v44, %v39264_v10  ;;  %v6219_v63 = vsub.f32 %v32524_v58, %v39263_v29 }
 0x629   : > { %26194 = vmatpush3.bf16.xpose.msra.mxu0 %v32339_v28  ;;  %v32591_v48 = vand.u32 4294901760, %v32566_v37  ;;  %v6226_v5 = vsub.f32 %v32529_v55, %v39265_v27  ;;  %v32613_v1 = vsub.f32 %v32315_v26, %v6823_v11  ;;  %v39973_v31 = vand.u32 4294901760, %v32560_v54 }
 0x62a   : > { %26338 = vmatpush3.bf16.xpose.msra.mxu1 %v32345_v57  ;;  %26195 = vmatprep.subr.bf16.mxu0 %v39685_v34  ;;  %39972 = vst [vmem:[#allocation7_spill] sm:$0xff] %v32602_v16  ;;  %v39975_v40 = vand.u32 4294901760, %v32534_v25  ;;  %v39976_v29 = vand.u32 4294901760, %v32545_v0  ;;  %v6220_v26 = vand.u32 4294901760, %v6219_v63 }
 0x62b   : > { %26339 = vmatprep.subr.bf16.mxu1 %v39685_v34  ;;  %39971 = vst [vmem:[#allocation6_spill] sm:$0xff] %v32591_v48  ;;  %v32619_v41 = vpack.c.bf16 %v39268_v12, %v39973_v31  ;;  %v6208_v27 = vsub.f32 %v32566_v37, %v32591_v48  ;;  %v6227_v11 = vand.u32 4294901760, %v6226_v5  ;;  %v39977_v48 = vand.u32 4294901760, %v32348_v22 }
 0x62c   : > { %v6908_v44 = vsub.f32 %v32534_v25, %v39975_v40  ;;  %v6915_v10 = vsub.f32 %v32545_v0, %v39976_v29  ;;  %v39978_v5 = vand.u32 4294901760, %v32351_v36 }
 0x62d   : > { %39974 = vst [vmem:[#allocation9_spill] sm:$0xff] %v32619_v41  ;;  %v32640_v63 = vsub.f32 %v32348_v22, %v39977_v48  ;;  %v26214_v29 = vpack.c.bf16 %v6227_v11, %v6220_v26  ;;  %v39982_v22 = vand.u32 4294901760, %v32588_v38  ;;  %v39985_v26 = vand.u32 4294901760, %v32613_v1 }
 0x62e   : > { %v6909_v40 = vand.u32 4294901760, %v6908_v44  ;;  %v6916_v12 = vand.u32 4294901760, %v6915_v10  ;;  %v32645_v31 = vsub.f32 %v32351_v36, %v39978_v5  ;;  %v39980_v44 = vand.u32 4294901760, %v32354_v50 }
 0x62f   : > { %v6240_v48 = vsub.f32 %v32588_v38, %v39982_v22  ;;  %v39984_v5 = vand.u32 4294901760, %v32596_v35  ;;  %v6929_v11 = vsub.f32 %v32613_v1, %v39985_v26  ;;  %v39277_v22 = vand.u32 4294901760, %v32640_v63 }
 0x630   : > { %v32652_v10 = vsub.f32 %v32354_v50, %v39980_v44 }
 0x631   : > { %26197 = vmatpush3.bf16.xpose.msra.mxu0 %v32375_v13  ;;  %v6922_v50 = vsub.f32 %v32596_v35, %v39984_v5  ;;  %v6241_v44 = vand.u32 4294901760, %v6240_v48  ;;  %v39987_v48 = vand.u32 4294901760, %v32387_v53  ;;  %v6247_v5 = vsub.f32 %v32640_v63, %v39277_v22 }
 0x632   : > { %26341 = vmatpush3.bf16.xpose.msra.mxu1 %v32381_v32  ;;  %26198 = vmatprep.subr.bf16.mxu0 %v39685_v34 }
 0x633   : > { %26342 = vmatprep.subr.bf16.mxu1 %v39685_v34 }
 0x639   : > { %26200 = vmatpush3.bf16.xpose.msra.mxu0 %v32411_v52 }
 0x63a   : > { %26344 = vmatpush3.bf16.xpose.msra.mxu1 %v32417_v49  ;;  %26201 = vmatprep.subr.bf16.mxu0 %v39685_v34 }
 0x63b   : > { %26345 = vmatprep.subr.bf16.mxu1 %v39685_v34 }
 0x641   : > { %26203 = vmatpush3.bf16.xpose.msra.mxu0 %v32447_v43 }
 0x642   : > { %26347 = vmatpush3.bf16.xpose.msra.mxu1 %v32453_v18  ;;  %26204 = vmatprep.subr.bf16.mxu0 %v39685_v34 }
 0x643   : > { %26348 = vmatprep.subr.bf16.mxu1 %v39685_v34 }
 0x649   : > { %26206 = vmatpush3.bf16.xpose.msra.mxu0 %v32483_v7 }
 0x64a   : > { %26350 = vmatpush3.bf16.xpose.msra.mxu1 %v32489_v45  ;;  %26207 = vmatprep.subr.bf16.mxu0 %v39685_v34 }
 0x64b   : > { %26351 = vmatprep.subr.bf16.mxu1 %v39685_v34 }
 0x651   : > { %26209 = vmatpush3.bf16.xpose.msra.mxu0 %v32540_v14  ;;  %v39981_v14 = vand.u32 4294901760, %v32583_v8 }
 0x652   : > { %26353 = vmatpush3.bf16.xpose.msra.mxu1 %v32551_v4  ;;  %26210 = vmatprep.subr.bf16.mxu0 %v39685_v34  ;;  %v32647_v4 = vand.u32 4294901760, %v6208_v27  ;;  %v26358_v27 = vpack.c.bf16 %v6916_v12, %v6909_v40  ;;  %v6930_v12 = vand.u32 4294901760, %v6929_v11  ;;  %v39281_v40 = vand.u32 4294901760, %v32652_v10 }
 0x653   : > { %26354 = vmatprep.subr.bf16.mxu1 %v39685_v34 }
 0x654   : > { %39979 = vst [vmem:[#allocation8_spill] sm:$0xff] %v32647_v4 }
 0x659   : > { %26212 = vmatpush3.bf16.xpose.msra.mxu0 %v32602_v16  ;;  %v39983_v16 = vand.u32 4294901760, %v32357_v59 }
 0x65a   : > { %26356 = vmatpush3.bf16.xpose.msra.mxu1 %v32619_v41  ;;  %26213 = vmatprep.subr.bf16.mxu0 %v39685_v34  ;;  %v6233_v41 = vsub.f32 %v32583_v8, %v39981_v14 }
 0x65b   : > { %26357 = vmatprep.subr.bf16.mxu1 %v39685_v34  ;;  %v32663_v36 = vsub.f32 %v32357_v59, %v39983_v16  ;;  %v39280_v59 = vand.u32 4294901760, %v32645_v31  ;;  %v6923_v16 = vand.u32 4294901760, %v6922_v50  ;;  %v39988_v50 = vand.u32 4294901760, %v32390_v42 }
 0x65c   : > { %v6234_v14 = vand.u32 4294901760, %v6233_v41  ;;  %v39986_v41 = vand.u32 4294901760, %v32384_v56 }
 0x65d   : > { %v32696_v26 = vsub.f32 %v32390_v42, %v39988_v50  ;;  %v6936_v42 = vsub.f32 %v32652_v10, %v39281_v40  ;;  %v6248_v50 = vand.u32 4294901760, %v6247_v5 }
 0x65e   : > { %v26217_v11 = vpack.c.bf16 %v6241_v44, %v6234_v14  ;;  %v39990_v14 = vand.u32 4294901760, %v32663_v36 }
 0x660   : > { %21710 = vmatmul.mubr.f32.vlgmr.msra.gmra.mrb[0].mxu0 %v32647_v4  ;;  %v6943_v44 = vsub.f32 %v32663_v36, %v39990_v14  ;;  %v39991_v14 = vand.u32 4294901760, %v32420_v30 }
 0x661   : > { %26215 = vmatpush3.bf16.xpose.msra.mxu0 %v26214_v29  ;;  %21920 = vmatmul.mubr.f32.vlgmr.msra.gmra.mrb[0].mxu1 %v32647_v4  ;;  %v32684_v29 = vsub.f32 %v32384_v56, %v39986_v41  ;;  %v6254_v56 = vsub.f32 %v32645_v31, %v39280_v59 }
 0x662   : > { %26359 = vmatpush3.bf16.xpose.msra.mxu1 %v26358_v27  ;;  %26216 = vmatprep.subr.bf16.mxu0 %v39685_v34  ;;  %v32689_v27 = vsub.f32 %v32387_v53, %v39987_v48  ;;  %v39989_v53 = vand.u32 4294901760, %v32393_v6  ;;  %v26361_v48 = vpack.c.bf16 %v6930_v12, %v6923_v16  ;;  %v6944_v16 = vand.u32 4294901760, %v6943_v44 }
 0x663   : > { %26360 = vmatprep.subr.bf16.mxu1 %v39685_v34  ;;  %21744 = vmatprep.mubr.msk.f32.mxu0 %vm28907_vm0, %v39694_v24  ;;  %v6255_v22 = vand.u32 4294901760, %v6254_v56  ;;  %v39282_v4 = vand.u32 4294901760, %v32684_v29  ;;  %v39284_v12 = vand.u32 4294901760, %v32696_v26  ;;  %v32724_v5 = vsub.f32 %v32420_v30, %v39991_v14 }
 0x664   : > { %21954 = vmatprep.mubr.msk.f32.mxu1 %vm28907_vm0, %v39694_v24  ;;  %v32707_v41 = vsub.f32 %v32393_v6, %v39989_v53  ;;  %v39283_v59 = vand.u32 4294901760, %v32689_v27  ;;  %v6937_v6 = vand.u32 4294901760, %v6936_v42  ;;  %v39994_v14 = vand.u32 4294901760, %v32429_v62 }
 0x665   : > { %v26220_v44 = vpack.c.bf16 %v6255_v22, %v6248_v50  ;;  %v6261_v40 = vsub.f32 %v32684_v29, %v39282_v4  ;;  %v39285_v4 = vand.u32 4294901760, %v32724_v5 }
 0x666   : > { %v6268_v30 = vsub.f32 %v32689_v27, %v39283_v59  ;;  %v32745_v53 = vsub.f32 %v32429_v62, %v39994_v14  ;;  %v39995_v22 = vand.u32 4294901760, %v32707_v41 }
 0x668   : > { %v6957_v50 = vsub.f32 %v32707_v41, %v39995_v22  ;;  %v39996_v22 = vand.u32 4294901760, %v32456_v9 }
 0x669   : > { %26218 = vmatpush3.bf16.xpose.msra.mxu0 %v26217_v11  ;;  %v39992_v11 = vand.u32 4294901760, %v32423_v47 }
 0x66a   : > { %26362 = vmatpush3.bf16.xpose.msra.mxu1 %v26361_v48  ;;  %26219 = vmatprep.subr.bf16.mxu0 %v39685_v34  ;;  %v39993_v48 = vand.u32 4294901760, %v32426_v23 }
 0x66b   : > { %26363 = vmatprep.subr.bf16.mxu1 %v39685_v34  ;;  %v32729_v56 = vsub.f32 %v32423_v47, %v39992_v11  ;;  %v26364_v47 = vpack.c.bf16 %v6944_v16, %v6937_v6  ;;  %v6262_v11 = vand.u32 4294901760, %v6261_v40  ;;  %v6958_v6 = vand.u32 4294901760, %v6957_v50 }
 0x66c   : > { %v32734_v42 = vsub.f32 %v32426_v23, %v39993_v48  ;;  %v6950_v23 = vsub.f32 %v32696_v26, %v39284_v12  ;;  %v6269_v48 = vand.u32 4294901760, %v6268_v30  ;;  %v32762_v40 = vsub.f32 %v32456_v9, %v39996_v22 }
 0x66d   : > { %v39286_v59 = vand.u32 4294901760, %v32729_v56  ;;  %v6275_v12 = vsub.f32 %v32724_v5, %v39285_v4  ;;  %v39999_v22 = vand.u32 4294901760, %v32465_v19 }
 0x66e   : > { %v6951_v62 = vand.u32 4294901760, %v6950_v23  ;;  %v39287_v16 = vand.u32 4294901760, %v32734_v42  ;;  %v26223_v50 = vpack.c.bf16 %v6269_v48, %v6262_v11  ;;  %v40000_v11 = vand.u32 4294901760, %v32745_v53 }
 0x66f   : > { %v6282_v9 = vsub.f32 %v32729_v56, %v39286_v59  ;;  %v32783_v14 = vsub.f32 %v32465_v19, %v39999_v22  ;;  %v39288_v4 = vand.u32 4294901760, %v32762_v40 }
 0x670   : > { %v6971_v48 = vsub.f32 %v32745_v53, %v40000_v11  ;;  %v40001_v11 = vand.u32 4294901760, %v32492_v33 }
 0x671   : > { %26221 = vmatpush3.bf16.xpose.msra.mxu0 %v26220_v44  ;;  %v39997_v44 = vand.u32 4294901760, %v32459_v2 }
 0x672   : > { %26365 = vmatpush3.bf16.xpose.msra.mxu1 %v26364_v47  ;;  %26222 = vmatprep.subr.bf16.mxu0 %v39685_v34  ;;  %v39998_v47 = vand.u32 4294901760, %v32462_v39 }
 0x673   : > { %26366 = vmatprep.subr.bf16.mxu1 %v39685_v34  ;;  %v32767_v30 = vsub.f32 %v32459_v2, %v39997_v44  ;;  %v26367_v2 = vpack.c.bf16 %v6958_v6, %v6951_v62  ;;  %v6276_v44 = vand.u32 4294901760, %v6275_v12  ;;  %v6972_v62 = vand.u32 4294901760, %v6971_v48 }
 0x674   : > { %v32772_v23 = vsub.f32 %v32462_v39, %v39998_v47  ;;  %v6964_v39 = vsub.f32 %v32734_v42, %v39287_v16  ;;  %v6283_v47 = vand.u32 4294901760, %v6282_v9  ;;  %v32800_v12 = vsub.f32 %v32492_v33, %v40001_v11 }
 0x675   : > { %v39289_v59 = vand.u32 4294901760, %v32767_v30  ;;  %v6289_v16 = vsub.f32 %v32762_v40, %v39288_v4  ;;  %v40004_v11 = vand.u32 4294901760, %v32504_v17 }
 0x676   : > { %v6965_v19 = vand.u32 4294901760, %v6964_v39  ;;  %v39290_v6 = vand.u32 4294901760, %v32772_v23  ;;  %v26226_v48 = vpack.c.bf16 %v6283_v47, %v6276_v44  ;;  %v40005_v44 = vand.u32 4294901760, %v32783_v14 }
 0x677   : > { %v6296_v33 = vsub.f32 %v32767_v30, %v39289_v59  ;;  %v32821_v22 = vsub.f32 %v32504_v17, %v40004_v11  ;;  %v39291_v4 = vand.u32 4294901760, %v32800_v12 }
 0x678   : > { %v6985_v47 = vsub.f32 %v32783_v14, %v40005_v44  ;;  %v40006_v44 = vand.u32 4294901760, %v32554_v61 }
 0x679   : > { %26224 = vmatpush3.bf16.xpose.msra.mxu0 %v26223_v50  ;;  %v40002_v50 = vand.u32 4294901760, %v32495_v20 }
 0x67a   : > { %26368 = vmatpush3.bf16.xpose.msra.mxu1 %v26367_v2  ;;  %26225 = vmatprep.subr.bf16.mxu0 %v39685_v34  ;;  %v40003_v2 = vand.u32 4294901760, %v32501_v21 }
 0x67b   : > { %26369 = vmatprep.subr.bf16.mxu1 %v39685_v34  ;;  %v32805_v9 = vsub.f32 %v32495_v20, %v40002_v50  ;;  %v26370_v20 = vpack.c.bf16 %v6972_v62, %v6965_v19  ;;  %v6290_v50 = vand.u32 4294901760, %v6289_v16  ;;  %v6986_v19 = vand.u32 4294901760, %v6985_v47 }
 0x67c   : > { %v32810_v39 = vsub.f32 %v32501_v21, %v40003_v2  ;;  %v6978_v21 = vsub.f32 %v32772_v23, %v39290_v6  ;;  %v6297_v2 = vand.u32 4294901760, %v6296_v33  ;;  %v32838_v16 = vsub.f32 %v32554_v61, %v40006_v44 }
 0x67d   : > { %v39292_v59 = vand.u32 4294901760, %v32805_v9  ;;  %v6303_v6 = vsub.f32 %v32800_v12, %v39291_v4  ;;  %v40009_v44 = vand.u32 4294901760, %v32563_v15 }
 0x67e   : > { %v6979_v17 = vand.u32 4294901760, %v6978_v21  ;;  %v39293_v62 = vand.u32 4294901760, %v32810_v39  ;;  %v26229_v47 = vpack.c.bf16 %v6297_v2, %v6290_v50  ;;  %v40010_v50 = vand.u32 4294901760, %v32821_v22 }
 0x67f   : > { %v6310_v61 = vsub.f32 %v32805_v9, %v39292_v59  ;;  %v32859_v11 = vsub.f32 %v32563_v15, %v40009_v44  ;;  %v6316_v4 = vand.u32 4294901760, %v32838_v16 }
 0x680   : > { %v6999_v2 = vsub.f32 %v32821_v22, %v40010_v50 }
 0x681   : > { %26227 = vmatpush3.bf16.xpose.msra.mxu0 %v26226_v48  ;;  %v40007_v48 = vand.u32 4294901760, %v32557_v3  ;;  %v7012_v44 = vand.u32 4294901760, %v32859_v11 }
 0x682   : > { %26371 = vmatpush3.bf16.xpose.msra.mxu1 %v26370_v20  ;;  %26228 = vmatprep.subr.bf16.mxu0 %v39685_v34  ;;  %v40008_v20 = vand.u32 4294901760, %v32560_v54 }
 0x683   : > { %26372 = vmatprep.subr.bf16.mxu1 %v39685_v34  ;;  %v32843_v33 = vsub.f32 %v32557_v3, %v40007_v48  ;;  %v26373_v3 = vpack.c.bf16 %v6986_v19, %v6979_v17  ;;  %v6304_v48 = vand.u32 4294901760, %v6303_v6  ;;  %v7000_v17 = vand.u32 4294901760, %v6999_v2 }
 0x684   : > { %v32848_v21 = vsub.f32 %v32560_v54, %v40008_v20  ;;  %v6992_v54 = vsub.f32 %v32810_v39, %v39293_v62  ;;  %v6311_v20 = vand.u32 4294901760, %v6310_v61  ;;  %v6317_v6 = vsub.f32 %v32838_v16, %v6316_v4 }
 0x685   : > { %v39294_v59 = vand.u32 4294901760, %v32843_v33 }
 0x686   : > { %v6993_v15 = vand.u32 4294901760, %v6992_v54  ;;  %v7005_v19 = vand.u32 4294901760, %v32848_v21  ;;  %v26232_v62 = vpack.c.bf16 %v6311_v20, %v6304_v48  ;;  %v7013_v54 = vsub.f32 %v32859_v11, %v7012_v44 }
 0x687   : > { %v6318_v50 = vand.u32 4294901760, %v6317_v6  ;;  %v26385_v6 = vpack.c.bf16 %v32613_v1, %v32596_v35 }
 0x688   : > { %v26376_v61 = vpack.c.bf16 %v7000_v17, %v6993_v15  ;;  %v7014_v20 = vand.u32 4294901760, %v7013_v54  ;;  %v26382_v17 = vpack.c.bf16 %v32545_v0, %v32534_v25  ;;  %v26391_v54 = vpack.c.bf16 %v32707_v41, %v32696_v26 }
 0x689   : > { %26230 = vmatpush3.bf16.xpose.msra.mxu0 %v26229_v47  ;;  %v6324_v47 = vsub.f32 %v32843_v33, %v39294_v59 }
 0x68a   : > { %26374 = vmatpush3.bf16.xpose.msra.mxu1 %v26373_v3  ;;  %26231 = vmatprep.subr.bf16.mxu0 %v39685_v34  ;;  %v7006_v3 = vsub.f32 %v32848_v21, %v7005_v19 }
 0x68b   : > { %26375 = vmatprep.subr.bf16.mxu1 %v39685_v34  ;;  %v6325_v2 = vand.u32 4294901760, %v6324_v47  ;;  %v26244_v47 = vpack.c.bf16 %v32645_v31, %v32640_v63 }
 0x68c   : > { %v7007_v48 = vand.u32 4294901760, %v7006_v3  ;;  %v26247_v3 = vpack.c.bf16 %v32689_v27, %v32684_v29 }
 0x68d   : > { %v26235_v59 = vpack.c.bf16 %v6325_v2, %v6318_v50  ;;  %v26250_v50 = vpack.c.bf16 %v32729_v56, %v32724_v5  ;;  %v26394_v2 = vpack.c.bf16 %v32745_v53, %v32734_v42 }
 0x68e   : > { %v26379_v15 = vpack.c.bf16 %v7014_v20, %v7007_v48  ;;  %v26253_v48 = vpack.c.bf16 %v32767_v30, %v32762_v40  ;;  %v26397_v20 = vpack.c.bf16 %v32783_v14, %v32772_v23 }
 0x691   : > { %26233 = vmatpush3.bf16.xpose.msra.mxu0 %v26232_v62  ;;  %v26238_v62 = vpack.c.bf16 %v32529_v55, %v32524_v58 }
 0x692   : > { %26377 = vmatpush3.bf16.xpose.msra.mxu1 %v26376_v61  ;;  %26234 = vmatprep.subr.bf16.mxu0 %v39685_v34  ;;  %v26388_v61 = vpack.c.bf16 %v32663_v36, %v32652_v10 }
 0x693   : > { %26378 = vmatprep.subr.bf16.mxu1 %v39685_v34 }
 0x699   : > { %26236 = vmatpush3.bf16.xpose.msra.mxu0 %v26235_v59  ;;  %v26241_v59 = vpack.c.bf16 %v32588_v38, %v32583_v8 }
 0x69a   : > { %26380 = vmatpush3.bf16.xpose.msra.mxu1 %v26379_v15  ;;  %26237 = vmatprep.subr.bf16.mxu0 %v39685_v34  ;;  %v26256_v15 = vpack.c.bf16 %v32805_v9, %v32800_v12 }
 0x69b   : > { %26381 = vmatprep.subr.bf16.mxu1 %v39685_v34 }
 0x6a0   : > { %21745 = vmatmul.mubr.f32.vlgmr.msra.gmra.mrb[0].mxu0 %v32519_v46 }
 0x6a1   : > { %26239 = vmatpush3.bf16.xpose.msra.mxu0 %v26238_v62  ;;  %21955 = vmatmul.mubr.f32.vlgmr.msra.gmra.mrb[0].mxu1 %v32519_v46  ;;  %v26400_v62 = vpack.c.bf16 %v32821_v22, %v32810_v39 }
 0x6a2   : > { %26383 = vmatpush3.bf16.xpose.msra.mxu1 %v26382_v17  ;;  %26240 = vmatprep.subr.bf16.mxu0 %v39685_v34  ;;  %v26259_v17 = vpack.c.bf16 %v32843_v33, %v32838_v16 }
 0x6a3   : > { %26384 = vmatprep.subr.bf16.mxu1 %v39685_v34  ;;  %21779 = vmatprep.mubr.msk.f32.mxu0 %vm28907_vm0, %v39694_v24 }
 0x6a4   : > { %21989 = vmatprep.mubr.msk.f32.mxu1 %vm28907_vm0, %v39694_v24 }
 0x6a9   : > { %26242 = vmatpush3.bf16.xpose.msra.mxu0 %v26241_v59  ;;  %v26403_v59 = vpack.c.bf16 %v32859_v11, %v32848_v21 }
 0x6aa   : > { %26386 = vmatpush3.bf16.xpose.msra.mxu1 %v26385_v6  ;;  %26243 = vmatprep.subr.bf16.mxu0 %v39685_v34  ;;  %v40011_v6 = vld [vmem:[#allocation10_spill] sm:$0xff] }
 0x6ab   : > { %26387 = vmatprep.subr.bf16.mxu1 %v39685_v34 }
 0x6b1   : > { %26245 = vmatpush3.bf16.xpose.msra.mxu0 %v26244_v47  ;;  %v40012_v47 = vld [vmem:[#allocation5_spill] sm:$0xff] }
 0x6b2   : > { %26389 = vmatpush3.bf16.xpose.msra.mxu1 %v26388_v61  ;;  %26246 = vmatprep.subr.bf16.mxu0 %v39685_v34  ;;  %v40013_v61 = vld [vmem:[#allocation7_spill] sm:$0xff] }
 0x6b3   : > { %26390 = vmatprep.subr.bf16.mxu1 %v39685_v34 }
 0x6b9   : > { %26248 = vmatpush3.bf16.xpose.msra.mxu0 %v26247_v3  ;;  %v40014_v3 = vld [vmem:[#allocation9_spill] sm:$0xff] }
 0x6ba   : > { %26392 = vmatpush3.bf16.xpose.msra.mxu1 %v26391_v54  ;;  %26249 = vmatprep.subr.bf16.mxu0 %v39685_v34  ;;  %v40015_v54 = vand.u32 4294901760, %v32524_v58 }
 0x6bb   : > { %26393 = vmatprep.subr.bf16.mxu1 %v39685_v34 }
 0x6c1   : > { %26251 = vmatpush3.bf16.xpose.msra.mxu0 %v26250_v50  ;;  %v40016_v50 = vand.u32 4294901760, %v32529_v55  ;;  %v40021_v55 = vand.u32 4294901760, %v32588_v38  ;;  %v40027_v38 = vand.u32 4294901760, %v32663_v36  ;;  %v40033_v36 = vand.u32 4294901760, %v32729_v56 }
 0x6c2   : > { %26395 = vmatpush3.bf16.xpose.msra.mxu1 %v26394_v2  ;;  %26252 = vmatprep.subr.bf16.mxu0 %v39685_v34  ;;  %v40039_v56 = vand.u32 4294901760, %v32783_v14  ;;  %v40044_v14 = vand.u32 4294901760, %v32843_v33 }
 0x6c3   : > { %26396 = vmatprep.subr.bf16.mxu1 %v39685_v34  ;;  %v26286_v2 = vpack.c.bf16 %v40016_v50, %v40015_v54  ;;  %v40024_v54 = vand.u32 4294901760, %v32640_v63  ;;  %v40025_v50 = vand.u32 4294901760, %v32645_v31  ;;  %v40030_v63 = vand.u32 4294901760, %v32696_v26 }
 0x6c4   : > { %v40031_v31 = vand.u32 4294901760, %v32707_v41  ;;  %v40036_v26 = vand.u32 4294901760, %v32762_v40  ;;  %v40037_v41 = vand.u32 4294901760, %v32767_v30  ;;  %v40042_v40 = vand.u32 4294901760, %v32810_v39  ;;  %v352_v39 = vld [vmem:[%s32259_s14 + $0x198] sm:$0xff] }
 0x6c5   : > { %v40043_v30 = vand.u32 4294901760, %v32821_v22  ;;  %v336_v22 = vld [vmem:[%s32259_s14 + $0x118] sm:$0xff] }
 0x6c6   : > { %v33145_v21 = vsel %vm557_vm1, %v336_v22, 0 }
 0x6c9   : > { %26254 = vmatpush3.bf16.xpose.msra.mxu0 %v26253_v48  ;;  %v40017_v48 = vand.u32 4294901760, %v32534_v25  ;;  %v40020_v25 = vand.u32 4294901760, %v32583_v8  ;;  %v40026_v8 = vand.u32 4294901760, %v32652_v10  ;;  %v40032_v10 = vand.u32 4294901760, %v32724_v5 }
 0x6ca   : > { %26398 = vmatpush3.bf16.xpose.msra.mxu1 %v26397_v20  ;;  %26255 = vmatprep.subr.bf16.mxu0 %v39685_v34  ;;  %v40018_v20 = vand.u32 4294901760, %v32545_v0  ;;  %v40022_v0 = vand.u32 4294901760, %v32596_v35  ;;  %v40028_v35 = vand.u32 4294901760, %v32684_v29  ;;  %v40034_v29 = vand.u32 4294901760, %v32734_v42 }
 0x6cb   : > { %26399 = vmatprep.subr.bf16.mxu1 %v39685_v34  ;;  %v26289_v58 = vpack.c.bf16 %v40021_v55, %v40020_v25  ;;  %v26298_v25 = vpack.c.bf16 %v40033_v36, %v40032_v10  ;;  %v40038_v5 = vand.u32 4294901760, %v32772_v23  ;;  %v40041_v42 = vand.u32 4294901760, %v32805_v9  ;;  %v351_v9 = vld [vmem:[%s32259_s14 + $0x190] sm:$0xff] }
 0x6cc   : > { %v26307_v23 = vpack.c.bf16 %v40044_v14, %v6316_v4  ;;  %v335_v4 = vld [vmem:[%s32259_s14 + $0x110] sm:$0xff]  ;;  %v357_v14 = vld [vmem:[%s32259_s14 + $0x1c0] sm:$0xff] }
 0x6cd   : > { %v33142_v33 = vsel %vm557_vm1, %v335_v4, 0 }
 0x6d1   : > { %26257 = vmatpush3.bf16.xpose.msra.mxu0 %v26256_v15  ;;  %v26430_v15 = vpack.c.bf16 %v40018_v20, %v40017_v48  ;;  %v26436_v48 = vpack.c.bf16 %v40027_v38, %v40026_v8  ;;  %v354_v8 = vld [vmem:[%s32259_s14 + $0x1a8] sm:$0xff] }
 0x6d2   : > { %26401 = vmatpush3.bf16.xpose.msra.mxu1 %v26400_v62  ;;  %26258 = vmatprep.subr.bf16.mxu0 %v39685_v34  ;;  %v40019_v62 = vld [vmem:[#allocation6_spill] sm:$0xff] }
 0x6d3   : > { %26402 = vmatprep.subr.bf16.mxu1 %v39685_v34 }
 0x6d9   : > { %26260 = vmatpush3.bf16.xpose.msra.mxu0 %v26259_v17  ;;  %v40023_v17 = vand.u32 4294901760, %v32613_v1  ;;  %v40029_v1 = vand.u32 4294901760, %v32689_v27  ;;  %v40035_v27 = vand.u32 4294901760, %v32745_v53  ;;  %v40040_v53 = vand.u32 4294901760, %v32800_v12 }
 0x6da   : > { %26404 = vmatpush3.bf16.xpose.msra.mxu1 %v26403_v59  ;;  %26261 = vmatprep.subr.bf16.mxu0 %v39685_v34  ;;  %v26451_v12 = vpack.c.bf16 %v7012_v44, %v7005_v19  ;;  %v33148_v19 = vsel %vm557_vm1, %v351_v9, 0  ;;  %v33151_v44 = vsel %vm557_vm1, %v352_v39, 0 }
 0x6db   : > { %26405 = vmatprep.subr.bf16.mxu1 %v39685_v34  ;;  %v26433_v59 = vpack.c.bf16 %v40023_v17, %v40022_v0  ;;  %v26295_v20 = vpack.c.bf16 %v40029_v1, %v40028_v35  ;;  %v26442_v55 = vpack.c.bf16 %v40035_v27, %v40034_v29  ;;  %v26445_v0 = vpack.c.bf16 %v40039_v56, %v40038_v5  ;;  %v340_v29 = vld [vmem:[%s32259_s14 + $0x138] sm:$0xff]  ;;  %v355_v27 = vld [vmem:[%s32259_s14 + $0x1b0] sm:$0xff] }
 0x6dc   : > { %v26304_v17 = vpack.c.bf16 %v40041_v42, %v40040_v53  ;;  %v33223_v5 = vsel %vm557_vm1, %v340_v29, 0  ;;  %v33226_v56 = vsel %vm557_vm1, %v355_v27, 0 }
 0x6dd   : > { %v39301_v42 = vand.u32 4294901760, %v33223_v5 }
 0x6e0   : > { %21780 = vmatmul.mubr.f32.vlgmr.msra.gmra.mrb[0].mxu0 %v32566_v37 }
 0x6e1   : > { %26263 = vmatpush3.bf16.xpose.msra.mxu0 %v32297_v60  ;;  %21990 = vmatmul.mubr.f32.vlgmr.msra.gmra.mrb[0].mxu1 %v32566_v37 }
 0x6e2   : > { %26407 = vmatpush3.bf16.xpose.msra.mxu1 %v32303_v51  ;;  %26264 = vmatprep.subr.bf16.mxu0 %v39685_v34 }
 0x6e3   : > { %26408 = vmatprep.subr.bf16.mxu1 %v39685_v34  ;;  %21814 = vmatprep.mubr.msk.f32.mxu0 %vm28907_vm0, %v39694_v24 }
 0x6e4   : > { %22024 = vmatprep.mubr.msk.f32.mxu1 %vm28907_vm0, %v39694_v24 }
 0x6e9   : > { %26266 = vmatpush3.bf16.xpose.msra.mxu0 %v32339_v28 }
 0x6ea   : > { %26410 = vmatpush3.bf16.xpose.msra.mxu1 %v32345_v57  ;;  %26267 = vmatprep.subr.bf16.mxu0 %v39685_v34 }
 0x6eb   : > { %26411 = vmatprep.subr.bf16.mxu1 %v39685_v34 }
 0x6f1   : > { %26269 = vmatpush3.bf16.xpose.msra.mxu0 %v32375_v13 }
 0x6f2   : > { %26413 = vmatpush3.bf16.xpose.msra.mxu1 %v32381_v32  ;;  %26270 = vmatprep.subr.bf16.mxu0 %v39685_v34 }
 0x6f3   : > { %26414 = vmatprep.subr.bf16.mxu1 %v39685_v34 }
 0x6f9   : > { %26272 = vmatpush3.bf16.xpose.msra.mxu0 %v32411_v52 }
 0x6fa   : > { %26416 = vmatpush3.bf16.xpose.msra.mxu1 %v32417_v49  ;;  %26273 = vmatprep.subr.bf16.mxu0 %v39685_v34 }
 0x6fb   : > { %26417 = vmatprep.subr.bf16.mxu1 %v39685_v34 }
 0x701   : > { %26275 = vmatpush3.bf16.xpose.msra.mxu0 %v32447_v43 }
 0x702   : > { %26419 = vmatpush3.bf16.xpose.msra.mxu1 %v32453_v18  ;;  %26276 = vmatprep.subr.bf16.mxu0 %v39685_v34 }
 0x703   : > { %26420 = vmatprep.subr.bf16.mxu1 %v39685_v34 }
 0x709   : > { %26278 = vmatpush3.bf16.xpose.msra.mxu0 %v32483_v7 }
 0x70a   : > { %26422 = vmatpush3.bf16.xpose.msra.mxu1 %v32489_v45  ;;  %26279 = vmatprep.subr.bf16.mxu0 %v39685_v34 }
 0x70b   : > { %26423 = vmatprep.subr.bf16.mxu1 %v39685_v34 }
 0x711   : > { %26281 = vmatpush3.bf16.xpose.msra.mxu0 %v40011_v6 }
 0x712   : > { %26425 = vmatpush3.bf16.xpose.msra.mxu1 %v40012_v47  ;;  %26282 = vmatprep.subr.bf16.mxu0 %v39685_v34 }
 0x713   : > { %26426 = vmatprep.subr.bf16.mxu1 %v39685_v34 }
 0x719   : > { %26284 = vmatpush3.bf16.xpose.msra.mxu0 %v40013_v61 }
 0x71a   : > { %26428 = vmatpush3.bf16.xpose.msra.mxu1 %v40014_v3  ;;  %26285 = vmatprep.subr.bf16.mxu0 %v39685_v34 }
 0x71b   : > { %26429 = vmatprep.subr.bf16.mxu1 %v39685_v34 }
 0x720   : > { %21815 = vmatmul.mubr.f32.vlgmr.msra.gmra.mrb[0].mxu0 %v40019_v62 }
 0x721   : > { %26287 = vmatpush3.bf16.xpose.msra.mxu0 %v26286_v2  ;;  %22025 = vmatmul.mubr.f32.vlgmr.msra.gmra.mrb[0].mxu1 %v40019_v62  ;;  %v26292_v2 = vpack.c.bf16 %v40025_v50, %v40024_v54  ;;  %v337_v54 = vld [vmem:[%s32259_s14 + $0x120] sm:$0xff]  ;;  %v338_v50 = vld [vmem:[%s32259_s14 + $0x128] sm:$0xff] }
 0x722   : > { %26431 = vmatpush3.bf16.xpose.msra.mxu1 %v26430_v15  ;;  %26288 = vmatprep.subr.bf16.mxu0 %v39685_v34  ;;  %v26439_v15 = vpack.c.bf16 %v40031_v31, %v40030_v63  ;;  %v33184_v35 = vsel %vm557_vm1, %v337_v54, 0  ;;  %v33187_v1 = vsel %vm557_vm1, %v338_v50, 0  ;;  %v33193_v63 = vsel %vm557_vm1, %v354_v8, 0  ;;  %v343_v50 = vld [vmem:[%s32259_s14 + $0x150] sm:$0xff] }
 0x723   : > { %26432 = vmatprep.subr.bf16.mxu1 %v39685_v34  ;;  %21849 = vmatprep.mubr.msk.f32.mxu0 %vm28907_vm0, %v39694_v24  ;;  %v39310_v31 = vand.u32 4294901760, %v33184_v35  ;;  %v39307_v36 = vand.u32 4294901760, %v33193_v63  ;;  %v359_v8 = vld [vmem:[%s32259_s14 + $0x1d0] sm:$0xff] }
 0x724   : > { %22059 = vmatprep.mubr.msk.f32.mxu1 %vm28907_vm0, %v39694_v24 }
 0x729   : > { %26290 = vmatpush3.bf16.xpose.msra.mxu0 %v26289_v58  ;;  %v26301_v58 = vpack.c.bf16 %v40037_v41, %v40036_v26 }
 0x72a   : > { %26434 = vmatpush3.bf16.xpose.msra.mxu1 %v26433_v59  ;;  %26291 = vmatprep.subr.bf16.mxu0 %v39685_v34  ;;  %v26448_v59 = vpack.c.bf16 %v40043_v30, %v40042_v40  ;;  %v341_v30 = vld [vmem:[%s32259_s14 + $0x140] sm:$0xff] }
 0x72b   : > { %26435 = vmatprep.subr.bf16.mxu1 %v39685_v34 }
 0x731   : > { %26293 = vmatpush3.bf16.xpose.msra.mxu0 %v26292_v2  ;;  %v353_v2 = vld [vmem:[%s32259_s14 + $0x1a0] sm:$0xff] }
 0x732   : > { %26437 = vmatpush3.bf16.xpose.msra.mxu1 %v26436_v48  ;;  %26294 = vmatprep.subr.bf16.mxu0 %v39685_v34 }
 0x733   : > { %26438 = vmatprep.subr.bf16.mxu1 %v39685_v34 }
 0x739   : > { %26296 = vmatpush3.bf16.xpose.msra.mxu0 %v26295_v20  ;;  %v33190_v20 = vsel %vm557_vm1, %v353_v2, 0  ;;  %v344_v2 = vld [vmem:[%s32259_s14 + $0x158] sm:$0xff] }
 0x73a   : > { %26440 = vmatpush3.bf16.xpose.msra.mxu1 %v26439_v15  ;;  %26297 = vmatprep.subr.bf16.mxu0 %v39685_v34  ;;  %v39309_v15 = vand.u32 4294901760, %v33187_v1  ;;  %v39308_v10 = vand.u32 4294901760, %v33190_v20 }
 0x73b   : > { %26441 = vmatprep.subr.bf16.mxu1 %v39685_v34 }
 0x73c   : > { %v33211_v26 = vpack.c.bf16 %v39309_v15, %v39310_v31  ;;  %v33217_v41 = vpack.c.bf16 %v39307_v36, %v39308_v10  ;;  %v364_v36 = vld [vmem:[%s32259_s14 + $0x1f8] sm:$0xff] }
 0x741   : > { %26299 = vmatpush3.bf16.xpose.msra.mxu0 %v26298_v25  ;;  %v339_v25 = vld [vmem:[%s32259_s14 + $0x130] sm:$0xff] }
 0x742   : > { %26443 = vmatpush3.bf16.xpose.msra.mxu1 %v26442_v55  ;;  %26300 = vmatprep.subr.bf16.mxu0 %v39685_v34  ;;  %v356_v55 = vld [vmem:[%s32259_s14 + $0x1b8] sm:$0xff] }
 0x743   : > { %26444 = vmatprep.subr.bf16.mxu1 %v39685_v34 }
 0x749   : > { %26302 = vmatpush3.bf16.xpose.msra.mxu0 %v26301_v58  ;;  %v33220_v58 = vsel %vm557_vm1, %v339_v25, 0  ;;  %v360_v25 = vld [vmem:[%s32259_s14 + $0x1d8] sm:$0xff] }
 0x74a   : > { %26446 = vmatpush3.bf16.xpose.msra.mxu1 %v26445_v0  ;;  %26303 = vmatprep.subr.bf16.mxu0 %v39685_v34  ;;  %v33229_v0 = vsel %vm557_vm1, %v356_v55, 0  ;;  %v39302_v53 = vand.u32 4294901760, %v33220_v58  ;;  %v33292_v55 = vsel %vm557_vm1, %v343_v50, 0 }
 0x74b   : > { %26447 = vmatprep.subr.bf16.mxu1 %v39685_v34  ;;  %v39299_v40 = vand.u32 4294901760, %v33229_v0 }
 0x751   : > { %26305 = vmatpush3.bf16.xpose.msra.mxu0 %v26304_v17  ;;  %v39300_v17 = vand.u32 4294901760, %v33226_v56 }
 0x752   : > { %26449 = vmatpush3.bf16.xpose.msra.mxu1 %v26448_v59  ;;  %26306 = vmatprep.subr.bf16.mxu0 %v39685_v34  ;;  %v342_v59 = vld [vmem:[%s32259_s14 + $0x148] sm:$0xff] }
 0x753   : > { %26450 = vmatprep.subr.bf16.mxu1 %v39685_v34 }
 0x759   : > { %26308 = vmatpush3.bf16.xpose.msra.mxu0 %v26307_v23  ;;  %v358_v23 = vld [vmem:[%s32259_s14 + $0x1c8] sm:$0xff] }
 0x75a   : > { %26452 = vmatpush3.bf16.xpose.msra.mxu1 %v26451_v12  ;;  %26309 = vmatprep.subr.bf16.mxu0 %v39685_v34  ;;  %v33247_v12 = vpack.c.bf16 %v39301_v42, %v39302_v53  ;;  %v33265_v4 = vsel %vm557_vm1, %v358_v23, 0  ;;  %v39304_v23 = vand.u32 4294901760, %v33292_v55 }
 0x75b   : > { %26453 = vmatprep.subr.bf16.mxu1 %v39685_v34  ;;  %v39295_v54 = vand.u32 4294901760, %v33265_v4 }
 0x760   : > { %21850 = vmatmul.mubr.f32.vlgmr.msra.gmra.mrb[0].mxu0 %v32519_v46 }
 0x761   : > { %26311 = vmatpush3.bf16.xpose.msra.mxu0 %v32297_v60  ;;  %22060 = vmatmul.mubr.f32.vlgmr.msra.gmra.mrb[0].mxu1 %v32519_v46  ;;  %v333_v60 = vld [vmem:[%s32259_s14 + $0x100] sm:$0xff] }
 0x762   : > { %26455 = vmatpush3.bf16.xpose.msra.mxu1 %v32303_v51  ;;  %26312 = vmatprep.subr.bf16.mxu0 %v39685_v34  ;;  %v334_v51 = vld [vmem:[%s32259_s14 + $0x108] sm:$0xff] }
 0x763   : > { %26456 = vmatprep.subr.bf16.mxu1 %v39685_v34  ;;  %21884 = vmatprep.mubr.msk.f32.mxu0 %vm28907_vm0, %v39694_v24 }
 0x764   : > { %22094 = vmatprep.mubr.msk.f32.mxu1 %vm28907_vm0, %v39694_v24 }
 0x769   : > { %26314 = vmatpush3.bf16.xpose.msra.mxu0 %v32339_v28  ;;  %v349_v28 = vld [vmem:[%s32259_s14 + $0x180] sm:$0xff] }
 0x76a   : > { %26458 = vmatpush3.bf16.xpose.msra.mxu1 %v32345_v57  ;;  %26315 = vmatprep.subr.bf16.mxu0 %v39685_v34  ;;  %v350_v57 = vld [vmem:[%s32259_s14 + $0x188] sm:$0xff] }
 0x76b   : > { %26459 = vmatprep.subr.bf16.mxu1 %v39685_v34 }
 0x771   : > { %26317 = vmatpush3.bf16.xpose.msra.mxu0 %v32375_v13  ;;  %v33106_v13 = vsel %vm557_vm1, %v333_v60, 0  ;;  %v33253_v60 = vpack.c.bf16 %v39299_v40, %v39300_v17 }
 0x772   : > { %26461 = vmatpush3.bf16.xpose.msra.mxu1 %v32381_v32  ;;  %26318 = vmatprep.subr.bf16.mxu0 %v39685_v34  ;;  %v33109_v32 = vsel %vm557_vm1, %v334_v51, 0  ;;  %v33256_v51 = vsel %vm557_vm1, %v341_v30, 0  ;;  %v33295_v30 = vsel %vm557_vm1, %v344_v2, 0 }
 0x773   : > { %26462 = vmatprep.subr.bf16.mxu1 %v39685_v34  ;;  %v39298_v22 = vand.u32 4294901760, %v33256_v51 }
 0x779   : > { %26320 = vmatpush3.bf16.xpose.msra.mxu0 %v32411_v52  ;;  %v33112_v52 = vsel %vm557_vm1, %v349_v28, 0  ;;  %v33259_v28 = vsel %vm557_vm1, %v342_v59, 0  ;;  %v33298_v59 = vsel %vm557_vm1, %v359_v8, 0  ;;  %v345_v8 = vld [vmem:[%s32259_s14 + $0x160] sm:$0xff] }
 0x77a   : > { %26464 = vmatpush3.bf16.xpose.msra.mxu1 %v32417_v49  ;;  %26321 = vmatprep.subr.bf16.mxu0 %v39685_v34  ;;  %v33115_v49 = vsel %vm557_vm1, %v350_v57, 0  ;;  %v33262_v57 = vsel %vm557_vm1, %v357_v14, 0  ;;  %v39297_v9 = vand.u32 4294901760, %v33259_v28  ;;  %v33301_v14 = vsel %vm557_vm1, %v360_v25, 0  ;;  %v361_v25 = vld [vmem:[%s32259_s14 + $0x1e0] sm:$0xff] }
 0x77b   : > { %26465 = vmatprep.subr.bf16.mxu1 %v39685_v34  ;;  %v39296_v39 = vand.u32 4294901760, %v33262_v57  ;;  %v39306_v50 = vand.u32 4294901760, %v33298_v59  ;;  %v39305_v2 = vand.u32 4294901760, %v33301_v14  ;;  %v33328_v17 = vsel %vm557_vm1, %v345_v8, 0 }
 0x77c   : > { %v33283_v29 = vpack.c.bf16 %v39297_v9, %v39298_v22  ;;  %v362_v9 = vld [vmem:[%s32259_s14 + $0x1e8] sm:$0xff]  ;;  %v33334_v53 = vsel %vm557_vm1, %v361_v25, 0  ;;  %v347_v25 = vld [vmem:[%s32259_s14 + $0x170] sm:$0xff] }
 0x77d   : > { %v33289_v27 = vpack.c.bf16 %v39295_v54, %v39296_v39  ;;  %v39303_v54 = vand.u32 4294901760, %v33295_v30  ;;  %v346_v39 = vld [vmem:[%s32259_s14 + $0x168] sm:$0xff]  ;;  %v33325_v40 = vpack.c.bf16 %v39305_v2, %v39306_v50  ;;  %v39313_v8 = vand.u32 4294901760, %v33334_v53  ;;  %v348_v50 = vld [vmem:[%s32259_s14 + $0x178] sm:$0xff] }
 0x77e   : > { %v33331_v42 = vsel %vm557_vm1, %v346_v39, 0 }
 0x77f   : > { %v33319_v22 = vpack.c.bf16 %v39303_v54, %v39304_v23  ;;  %v33337_v54 = vsel %vm557_vm1, %v362_v9, 0  ;;  %v39315_v23 = vand.u32 4294901760, %v33328_v17  ;;  %v39314_v2 = vand.u32 4294901760, %v33331_v42  ;;  %v363_v9 = vld [vmem:[%s32259_s14 + $0x1f0] sm:$0xff] }
 0x780   : > { %v39312_v39 = vand.u32 4294901760, %v33337_v54 }
 0x781   : > { %26323 = vmatpush3.bf16.xpose.msra.mxu0 %v32447_v43  ;;  %v8192_v43 = vand.u32 4294901760, %v33112_v52 }
 0x782   : > { %26467 = vmatpush3.bf16.xpose.msra.mxu1 %v32453_v18  ;;  %26324 = vmatprep.subr.bf16.mxu0 %v39685_v34  ;;  %v8195_v18 = vand.u32 4294901760, %v33115_v49 }
 0x783   : > { %26468 = vmatprep.subr.bf16.mxu1 %v39685_v34  ;;  %v33364_v31 = vsub.f32 %v33112_v52, %v8192_v43  ;;  %v33384_v52 = vsel %vm557_vm1, %v347_v25, 0 }
 0x784   : > { %v33139_v16 = vpack.c.bf16 %v8195_v18, %v8192_v43  ;;  %v33393_v43 = vsel %vm557_vm1, %v364_v36, 0 }
 0x785   : > { %v39322_v36 = vand.u32 4294901760, %v33364_v31 }
 0x789   : > { %26326 = vmatpush3.bf16.xpose.msra.mxu0 %v32483_v7  ;;  %v7506_v7 = vand.u32 4294901760, %v33109_v32 }
 0x78a   : > { %26470 = vmatpush3.bf16.xpose.msra.mxu1 %v32489_v45  ;;  %26327 = vmatprep.subr.bf16.mxu0 %v39685_v34  ;;  %v7503_v45 = vand.u32 4294901760, %v33106_v13 }
 0x78b   : > { %26471 = vmatprep.subr.bf16.mxu1 %v39685_v34  ;;  %v33359_v15 = vsub.f32 %v33109_v32, %v7506_v7  ;;  %v33381_v32 = vpack.c.bf16 %v39312_v39, %v39313_v8 }
 0x78c   : > { %v33133_v11 = vpack.c.bf16 %v7506_v7, %v7503_v45  ;;  %v33354_v10 = vsub.f32 %v33106_v13, %v7503_v45  ;;  %v33375_v13 = vsub.f32 %v33115_v49, %v8195_v18  ;;  %v33387_v45 = vsel %vm557_vm1, %v348_v50, 0 }
 0x78d   : > { %40046 = vst [vmem:[#allocation5_spill] sm:$0xff] %v33381_v32  ;;  %v33390_v7 = vsel %vm557_vm1, %v363_v9, 0  ;;  %v39318_v49 = vand.u32 4294901760, %v33384_v52  ;;  %v39316_v18 = vand.u32 4294901760, %v33387_v45  ;;  %v39319_v25 = vand.u32 4294901760, %v33359_v15 }
 0x78e   : > { %v39317_v39 = vand.u32 4294901760, %v33354_v10  ;;  %v39321_v50 = vand.u32 4294901760, %v33390_v7 }
 0x78f   : > { %v33426_v8 = vpack.c.bf16 %v39316_v18, %v39318_v49  ;;  %v8286_v18 = vsub.f32 %v33364_v31, %v39322_v36 }
 0x791   : > { %26329 = vmatpush3.bf16.xpose.msra.mxu0 %v40011_v6  ;;  %v7509_v6 = vand.u32 4294901760, %v33142_v33  ;;  %40047 = vst [vmem:[#allocation7_spill] sm:$0xff] %v33426_v8 }
 0x792   : > { %26473 = vmatpush3.bf16.xpose.msra.mxu1 %v40012_v47  ;;  %26330 = vmatprep.subr.bf16.mxu0 %v39685_v34  ;;  %v7512_v47 = vand.u32 4294901760, %v33145_v21 }
 0x793   : > { %26474 = vmatprep.subr.bf16.mxu1 %v39685_v34 }
 0x794   : > { %v33175_v38 = vpack.c.bf16 %v7512_v47, %v7509_v6 }
 0x799   : > { %26332 = vmatpush3.bf16.xpose.msra.mxu0 %v40013_v61  ;;  %v8198_v61 = vand.u32 4294901760, %v33148_v19 }
 0x79a   : > { %26476 = vmatpush3.bf16.xpose.msra.mxu1 %v40014_v3  ;;  %26477 = vmatprep.subr.bf16.mxu0 %v39685_v34  ;;  %v39311_v3 = vand.u32 4294901760, %v33151_v44 }
 0x79b   : > { %26621 = vmatprep.subr.bf16.mxu1 %v39685_v34  ;;  %v33420_v9 = vsub.f32 %v33148_v19, %v8198_v61  ;;  %v40049_v19 = vand.u32 4294901760, %v33393_v43 }
 0x79c   : > { %v33181_v48 = vpack.c.bf16 %v39311_v3, %v8198_v61  ;;  %v33370_v3 = vpack.c.bf16 %v39314_v2, %v39315_v23  ;;  %v33410_v2 = vsub.f32 %v33142_v33, %v7509_v6  ;;  %v33415_v23 = vsub.f32 %v33145_v21, %v7512_v47 }
 0x79d   : > { %v7597_v33 = vsub.f32 %v33354_v10, %v39317_v39  ;;  %v7604_v21 = vsub.f32 %v33359_v15, %v39319_v25  ;;  %v40048_v6 = vand.u32 4294901760, %v33151_v44  ;;  %v33443_v61 = vpack.c.bf16 %v40049_v19, %v39321_v50 }
 0x79e   : > { %40045 = vst [vmem:[#allocation10_spill] sm:$0xff] %v33370_v3  ;;  %v40051_v39 = vand.u32 4294901760, %v33375_v13  ;;  %v8287_v19 = vand.u32 4294901760, %v8286_v18 }
 0x79f   : > { %v33437_v47 = vsub.f32 %v33151_v44, %v40048_v6  ;;  %40050 = vst [vmem:[#allocation9_spill] sm:$0xff] %v33443_v61  ;;  %v7598_v25 = vand.u32 4294901760, %v7597_v33  ;;  %v7605_v62 = vand.u32 4294901760, %v7604_v21  ;;  %v40053_v21 = vand.u32 4294901760, %v33187_v1 }
 0x7a0   : > { %21885 = vmatmul.mubr.f32.vlgmr.msra.gmra.mrb[0].mxu0 %v32519_v46  ;;  %v8293_v49 = vsub.f32 %v33375_v13, %v40051_v39  ;;  %v40052_v39 = vand.u32 4294901760, %v33184_v35  ;;  %v40054_v44 = vand.u32 4294901760, %v33190_v20 }
 0x7a1   : > { %22095 = vmatmul.mubr.f32.vlgmr.msra.gmra.mrb[0].mxu1 %v32519_v46  ;;  %26479 = vmatpush3.bf16.xpose.msra.mxu0 %v33133_v11  ;;  %v33467_v6 = vsub.f32 %v33187_v1, %v40053_v21  ;;  %v26502_v18 = vpack.c.bf16 %v7605_v62, %v7598_v25  ;;  %v40058_v21 = vand.u32 4294901760, %v33420_v9  ;;  %v40059_v62 = vand.u32 4294901760, %v33437_v47 }
 0x7a2   : > { %26623 = vmatpush3.bf16.xpose.msra.mxu1 %v33139_v16  ;;  %26480 = vmatprep.subr.bf16.mxu0 %v39685_v34  ;;  %v8294_v50 = vand.u32 4294901760, %v8293_v49  ;;  %v33462_v33 = vsub.f32 %v33184_v35, %v40052_v39  ;;  %v33472_v49 = vsub.f32 %v33190_v20, %v40054_v44  ;;  %v40057_v39 = vand.u32 4294901760, %v33193_v63  ;;  %v40060_v44 = vld [vmem:[#allocation8_spill] sm:$0xff] }
 0x7a3   : > { %26624 = vmatprep.subr.bf16.mxu1 %v39685_v34  ;;  %22129 = vmatprep.mubr.msk.f32.mxu0 %vm28907_vm0, %v39694_v24  ;;  %v8300_v20 = vsub.f32 %v33420_v9, %v40058_v21  ;;  %v8307_v25 = vsub.f32 %v33437_v47, %v40059_v62 }
 0x7a4   : > { %22339 = vmatprep.mubr.msk.f32.mxu1 %vm28907_vm0, %v39694_v24  ;;  %v26646_v1 = vpack.c.bf16 %v8294_v50, %v8287_v19 }
 0x7a5   : > { %v8301_v50 = vand.u32 4294901760, %v8300_v20  ;;  %v8308_v19 = vand.u32 4294901760, %v8307_v25  ;;  %v40063_v20 = vand.u32 4294901760, %v33226_v56 }
 0x7a7   : > { %v33516_v62 = vsub.f32 %v33226_v56, %v40063_v20 }
 0x7a9   : > { %26482 = vmatpush3.bf16.xpose.msra.mxu0 %v33175_v38 }
 0x7aa   : > { %26626 = vmatpush3.bf16.xpose.msra.mxu1 %v33181_v48  ;;  %26483 = vmatprep.subr.bf16.mxu0 %v39685_v34 }
 0x7ab   : > { %26627 = vmatprep.subr.bf16.mxu1 %v39685_v34 }
 0x7b1   : > { %26485 = vmatpush3.bf16.xpose.msra.mxu0 %v33211_v26 }
 0x7b2   : > { %26629 = vmatpush3.bf16.xpose.msra.mxu1 %v33217_v41  ;;  %26486 = vmatprep.subr.bf16.mxu0 %v39685_v34 }
 0x7b3   : > { %26630 = vmatprep.subr.bf16.mxu1 %v39685_v34 }
 0x7b9   : > { %26488 = vmatpush3.bf16.xpose.msra.mxu0 %v33247_v12 }
 0x7ba   : > { %26632 = vmatpush3.bf16.xpose.msra.mxu1 %v33253_v60  ;;  %26489 = vmatprep.subr.bf16.mxu0 %v39685_v34 }
 0x7bb   : > { %26633 = vmatprep.subr.bf16.mxu1 %v39685_v34 }
 0x7c1   : > { %26491 = vmatpush3.bf16.xpose.msra.mxu0 %v33283_v29 }
 0x7c2   : > { %26635 = vmatpush3.bf16.xpose.msra.mxu1 %v33289_v27  ;;  %26492 = vmatprep.subr.bf16.mxu0 %v39685_v34 }
 0x7c3   : > { %26636 = vmatprep.subr.bf16.mxu1 %v39685_v34 }
 0x7c9   : > { %26494 = vmatpush3.bf16.xpose.msra.mxu0 %v33319_v22 }
 0x7ca   : > { %26638 = vmatpush3.bf16.xpose.msra.mxu1 %v33325_v40  ;;  %26495 = vmatprep.subr.bf16.mxu0 %v39685_v34 }
 0x7cb   : > { %26639 = vmatprep.subr.bf16.mxu1 %v39685_v34 }
 0x7d1   : > { %26497 = vmatpush3.bf16.xpose.msra.mxu0 %v33370_v3  ;;  %v39331_v3 = vand.u32 4294901760, %v33462_v33 }
 0x7d2   : > { %26641 = vmatpush3.bf16.xpose.msra.mxu1 %v33381_v32  ;;  %26498 = vmatprep.subr.bf16.mxu0 %v39685_v34  ;;  %v40055_v32 = vand.u32 4294901760, %v33410_v2 }
 0x7d3   : > { %26642 = vmatprep.subr.bf16.mxu1 %v39685_v34  ;;  %v7625_v21 = vsub.f32 %v33462_v33, %v39331_v3 }
 0x7d4   : > { %v7611_v36 = vsub.f32 %v33410_v2, %v40055_v32 }
 0x7d5   : > { %v7626_v20 = vand.u32 4294901760, %v7625_v21 }
 0x7d6   : > { %v7612_v32 = vand.u32 4294901760, %v7611_v36  ;;  %v40061_v36 = vand.u32 4294901760, %v33220_v58 }
 0x7d9   : > { %26500 = vmatpush3.bf16.xpose.msra.mxu0 %v33426_v8  ;;  %v33483_v8 = vsub.f32 %v33193_v63, %v40057_v39  ;;  %v39333_v63 = vand.u32 4294901760, %v33467_v6  ;;  %v39334_v39 = vand.u32 4294901760, %v33472_v49 }
 0x7da   : > { %26644 = vmatpush3.bf16.xpose.msra.mxu1 %v33443_v61  ;;  %26501 = vmatprep.subr.bf16.mxu0 %v39685_v34  ;;  %v40056_v61 = vand.u32 4294901760, %v33415_v23 }
 0x7db   : > { %26645 = vmatprep.subr.bf16.mxu1 %v39685_v34  ;;  %v8314_v56 = vsub.f32 %v33472_v49, %v39334_v39 }
 0x7dc   : > { %v7618_v35 = vsub.f32 %v33415_v23, %v40056_v61 }
 0x7de   : > { %v7619_v61 = vand.u32 4294901760, %v7618_v35  ;;  %v40062_v35 = vand.u32 4294901760, %v33223_v5 }
 0x7e0   : > { %22130 = vmatmul.mubr.f32.vlgmr.msra.gmra.mrb[2].mxu0 %v40060_v44  ;;  %v26505_v25 = vpack.c.bf16 %v7619_v61, %v7612_v32  ;;  %v40065_v32 = vand.u32 4294901760, %v33483_v8 }
 0x7e1   : > { %26503 = vmatpush3.bf16.xpose.msra.mxu0 %v26502_v18  ;;  %22340 = vmatmul.mubr.f32.vlgmr.msra.gmra.mrb[2].mxu1 %v40060_v44  ;;  %v33504_v18 = vsub.f32 %v33220_v58, %v40061_v36  ;;  %v7632_v58 = vsub.f32 %v33467_v6, %v39333_v63 }
 0x7e2   : > { %26647 = vmatpush3.bf16.xpose.msra.mxu1 %v26646_v1  ;;  %26504 = vmatprep.subr.bf16.mxu0 %v39685_v34  ;;  %v33509_v1 = vsub.f32 %v33223_v5, %v40062_v35  ;;  %v40064_v5 = vand.u32 4294901760, %v33229_v0  ;;  %v26649_v35 = vpack.c.bf16 %v8308_v19, %v8301_v50  ;;  %v8321_v61 = vsub.f32 %v33483_v8, %v40065_v32 }
 0x7e3   : > { %26648 = vmatprep.subr.bf16.mxu1 %v39685_v34  ;;  %22164 = vmatprep.mubr.msk.f32.mxu0 %vm28907_vm0, %v39694_v24  ;;  %v7633_v3 = vand.u32 4294901760, %v7632_v58  ;;  %v39335_v44 = vand.u32 4294901760, %v33504_v18  ;;  %v39337_v19 = vand.u32 4294901760, %v33516_v62  ;;  %v40066_v32 = vand.u32 4294901760, %v33256_v51 }
 0x7e4   : > { %22374 = vmatprep.mubr.msk.f32.mxu1 %vm28907_vm0, %v39694_v24  ;;  %v33527_v36 = vsub.f32 %v33229_v0, %v40064_v5  ;;  %v39336_v63 = vand.u32 4294901760, %v33509_v1  ;;  %v8315_v0 = vand.u32 4294901760, %v8314_v56  ;;  %v8322_v50 = vand.u32 4294901760, %v8321_v61 }
 0x7e5   : > { %v33544_v21 = vsub.f32 %v33256_v51, %v40066_v32  ;;  %v26508_v61 = vpack.c.bf16 %v7633_v3, %v7626_v20  ;;  %v7639_v39 = vsub.f32 %v33504_v18, %v39335_v44  ;;  %v40069_v32 = vand.u32 4294901760, %v33265_v4 }
 0x7e6   : > { %v7646_v51 = vsub.f32 %v33509_v1, %v39336_v63  ;;  %v40070_v3 = vand.u32 4294901760, %v33527_v36 }
 0x7e7   : > { %v33565_v5 = vsub.f32 %v33265_v4, %v40069_v32  ;;  %v39338_v44 = vand.u32 4294901760, %v33544_v21 }
 0x7e8   : > { %v8335_v20 = vsub.f32 %v33527_v36, %v40070_v3  ;;  %v40071_v3 = vand.u32 4294901760, %v33292_v55 }
 0x7e9   : > { %26506 = vmatpush3.bf16.xpose.msra.mxu0 %v26505_v25  ;;  %v40067_v25 = vand.u32 4294901760, %v33259_v28 }
 0x7ea   : > { %26650 = vmatpush3.bf16.xpose.msra.mxu1 %v26649_v35  ;;  %26507 = vmatprep.subr.bf16.mxu0 %v39685_v34  ;;  %v40068_v35 = vand.u32 4294901760, %v33262_v57 }
 0x7eb   : > { %26651 = vmatprep.subr.bf16.mxu1 %v39685_v34  ;;  %v33549_v58 = vsub.f32 %v33259_v28, %v40067_v25  ;;  %v26652_v28 = vpack.c.bf16 %v8322_v50, %v8315_v0  ;;  %v7640_v25 = vand.u32 4294901760, %v7639_v39  ;;  %v8336_v0 = vand.u32 4294901760, %v8335_v20 }
 0x7ec   : > { %v33554_v56 = vsub.f32 %v33262_v57, %v40068_v35  ;;  %v8328_v57 = vsub.f32 %v33516_v62, %v39337_v19  ;;  %v7647_v35 = vand.u32 4294901760, %v7646_v51  ;;  %v33582_v39 = vsub.f32 %v33292_v55, %v40071_v3 }
 0x7ed   : > { %v39339_v63 = vand.u32 4294901760, %v33549_v58  ;;  %v7653_v19 = vsub.f32 %v33544_v21, %v39338_v44  ;;  %v40074_v3 = vand.u32 4294901760, %v33301_v14 }
 0x7ee   : > { %v8329_v4 = vand.u32 4294901760, %v8328_v57  ;;  %v39340_v50 = vand.u32 4294901760, %v33554_v56  ;;  %v26511_v20 = vpack.c.bf16 %v7647_v35, %v7640_v25  ;;  %v40075_v25 = vand.u32 4294901760, %v33565_v5 }
 0x7ef   : > { %v7660_v55 = vsub.f32 %v33549_v58, %v39339_v63  ;;  %v33603_v32 = vsub.f32 %v33301_v14, %v40074_v3  ;;  %v39341_v44 = vand.u32 4294901760, %v33582_v39 }
 0x7f0   : > { %v8349_v35 = vsub.f32 %v33565_v5, %v40075_v25  ;;  %v40076_v25 = vand.u32 4294901760, %v33328_v17 }
 0x7f1   : > { %26509 = vmatpush3.bf16.xpose.msra.mxu0 %v26508_v61  ;;  %v40072_v61 = vand.u32 4294901760, %v33295_v30 }
 0x7f2   : > { %26653 = vmatpush3.bf16.xpose.msra.mxu1 %v26652_v28  ;;  %26510 = vmatprep.subr.bf16.mxu0 %v39685_v34  ;;  %v40073_v28 = vand.u32 4294901760, %v33298_v59 }
 0x7f3   : > { %26654 = vmatprep.subr.bf16.mxu1 %v39685_v34  ;;  %v33587_v51 = vsub.f32 %v33295_v30, %v40072_v61  ;;  %v26655_v30 = vpack.c.bf16 %v8336_v0, %v8329_v4  ;;  %v7654_v61 = vand.u32 4294901760, %v7653_v19  ;;  %v8350_v4 = vand.u32 4294901760, %v8349_v35 }
 0x7f4   : > { %v33592_v57 = vsub.f32 %v33298_v59, %v40073_v28  ;;  %v8342_v59 = vsub.f32 %v33554_v56, %v39340_v50  ;;  %v7661_v28 = vand.u32 4294901760, %v7660_v55  ;;  %v33620_v19 = vsub.f32 %v33328_v17, %v40076_v25 }
 0x7f5   : > { %v39342_v63 = vand.u32 4294901760, %v33587_v51  ;;  %v7667_v50 = vsub.f32 %v33582_v39, %v39341_v44  ;;  %v40079_v25 = vand.u32 4294901760, %v33337_v54 }
 0x7f6   : > { %v8343_v14 = vand.u32 4294901760, %v8342_v59  ;;  %v39343_v0 = vand.u32 4294901760, %v33592_v57  ;;  %v26514_v35 = vpack.c.bf16 %v7661_v28, %v7654_v61  ;;  %v40080_v61 = vand.u32 4294901760, %v33603_v32 }
 0x7f7   : > { %v7674_v17 = vsub.f32 %v33587_v51, %v39342_v63  ;;  %v33641_v3 = vsub.f32 %v33337_v54, %v40079_v25  ;;  %v39344_v44 = vand.u32 4294901760, %v33620_v19 }
 0x7f8   : > { %v8363_v28 = vsub.f32 %v33603_v32, %v40080_v61  ;;  %v40081_v61 = vand.u32 4294901760, %v33384_v52 }
 0x7f9   : > { %26512 = vmatpush3.bf16.xpose.msra.mxu0 %v26511_v20  ;;  %v40077_v20 = vand.u32 4294901760, %v33331_v42 }
 0x7fa   : > { %26656 = vmatpush3.bf16.xpose.msra.mxu1 %v26655_v30  ;;  %26513 = vmatprep.subr.bf16.mxu0 %v39685_v34  ;;  %v40078_v30 = vand.u32 4294901760, %v33334_v53 }
 0x7fb   : > { %26657 = vmatprep.subr.bf16.mxu1 %v39685_v34  ;;  %v33625_v55 = vsub.f32 %v33331_v42, %v40077_v20  ;;  %v26658_v42 = vpack.c.bf16 %v8350_v4, %v8343_v14  ;;  %v7668_v20 = vand.u32 4294901760, %v7667_v50  ;;  %v8364_v14 = vand.u32 4294901760, %v8363_v28 }
 0x7fc   : > { %v33630_v59 = vsub.f32 %v33334_v53, %v40078_v30  ;;  %v8356_v53 = vsub.f32 %v33592_v57, %v39343_v0  ;;  %v7675_v30 = vand.u32 4294901760, %v7674_v17  ;;  %v33658_v50 = vsub.f32 %v33384_v52, %v40081_v61 }
 0x7fd   : > { %v39345_v63 = vand.u32 4294901760, %v33625_v55  ;;  %v7681_v0 = vsub.f32 %v33620_v19, %v39344_v44  ;;  %v40084_v61 = vand.u32 4294901760, %v33393_v43 }
 0x7fe   : > { %v8357_v54 = vand.u32 4294901760, %v8356_v53  ;;  %v39346_v4 = vand.u32 4294901760, %v33630_v59  ;;  %v26517_v28 = vpack.c.bf16 %v7675_v30, %v7668_v20  ;;  %v40085_v20 = vand.u32 4294901760, %v33641_v3 }
 0x7ff   : > { %v7688_v52 = vsub.f32 %v33625_v55, %v39345_v63  ;;  %v33679_v25 = vsub.f32 %v33393_v43, %v40084_v61  ;;  %v7694_v44 = vand.u32 4294901760, %v33658_v50 }
 0x800   : > { %v8377_v30 = vsub.f32 %v33641_v3, %v40085_v20 }
 0x801   : > { %26515 = vmatpush3.bf16.xpose.msra.mxu0 %v26514_v35  ;;  %v40082_v35 = vand.u32 4294901760, %v33387_v45  ;;  %v8390_v61 = vand.u32 4294901760, %v33679_v25 }
 0x802   : > { %26659 = vmatpush3.bf16.xpose.msra.mxu1 %v26658_v42  ;;  %26516 = vmatprep.subr.bf16.mxu0 %v39685_v34  ;;  %v40083_v42 = vand.u32 4294901760, %v33390_v7 }
 0x803   : > { %26660 = vmatprep.subr.bf16.mxu1 %v39685_v34  ;;  %v33663_v17 = vsub.f32 %v33387_v45, %v40082_v35  ;;  %v26661_v45 = vpack.c.bf16 %v8364_v14, %v8357_v54  ;;  %v7682_v35 = vand.u32 4294901760, %v7681_v0  ;;  %v8378_v54 = vand.u32 4294901760, %v8377_v30 }
 0x804   : > { %v33668_v53 = vsub.f32 %v33390_v7, %v40083_v42  ;;  %v8370_v7 = vsub.f32 %v33630_v59, %v39346_v4  ;;  %v7689_v42 = vand.u32 4294901760, %v7688_v52  ;;  %v7695_v0 = vsub.f32 %v33658_v50, %v7694_v44 }
 0x805   : > { %v39347_v63 = vand.u32 4294901760, %v33663_v17 }
 0x806   : > { %v8371_v43 = vand.u32 4294901760, %v8370_v7  ;;  %v8383_v14 = vand.u32 4294901760, %v33668_v53  ;;  %v26520_v4 = vpack.c.bf16 %v7689_v42, %v7682_v35  ;;  %v8391_v7 = vsub.f32 %v33679_v25, %v8390_v61 }
 0x807   : > { %v7696_v20 = vand.u32 4294901760, %v7695_v0  ;;  %v26673_v0 = vpack.c.bf16 %v33437_v47, %v33420_v9 }
 0x808   : > { %v26664_v52 = vpack.c.bf16 %v8378_v54, %v8371_v43  ;;  %v8392_v42 = vand.u32 4294901760, %v8391_v7  ;;  %v26670_v54 = vpack.c.bf16 %v33375_v13, %v33364_v31  ;;  %v26679_v7 = vpack.c.bf16 %v33527_v36, %v33516_v62 }
 0x809   : > { %26518 = vmatpush3.bf16.xpose.msra.mxu0 %v26517_v28  ;;  %v7702_v28 = vsub.f32 %v33663_v17, %v39347_v63 }
 0x80a   : > { %26662 = vmatpush3.bf16.xpose.msra.mxu1 %v26661_v45  ;;  %26519 = vmatprep.subr.bf16.mxu0 %v39685_v34  ;;  %v8384_v45 = vsub.f32 %v33668_v53, %v8383_v14 }
 0x80b   : > { %26663 = vmatprep.subr.bf16.mxu1 %v39685_v34  ;;  %v7703_v30 = vand.u32 4294901760, %v7702_v28  ;;  %v26532_v28 = vpack.c.bf16 %v33467_v6, %v33462_v33 }
 0x80c   : > { %v8385_v35 = vand.u32 4294901760, %v8384_v45  ;;  %v26535_v45 = vpack.c.bf16 %v33509_v1, %v33504_v18 }
 0x80d   : > { %v26523_v63 = vpack.c.bf16 %v7703_v30, %v7696_v20  ;;  %v26538_v20 = vpack.c.bf16 %v33549_v58, %v33544_v21  ;;  %v26682_v30 = vpack.c.bf16 %v33565_v5, %v33554_v56 }
 0x80e   : > { %v26667_v43 = vpack.c.bf16 %v8392_v42, %v8385_v35  ;;  %v26541_v35 = vpack.c.bf16 %v33587_v51, %v33582_v39  ;;  %v26685_v42 = vpack.c.bf16 %v33603_v32, %v33592_v57 }
 0x811   : > { %26521 = vmatpush3.bf16.xpose.msra.mxu0 %v26520_v4  ;;  %v26526_v4 = vpack.c.bf16 %v33359_v15, %v33354_v10 }
 0x812   : > { %26665 = vmatpush3.bf16.xpose.msra.mxu1 %v26664_v52  ;;  %26522 = vmatprep.subr.bf16.mxu0 %v39685_v34  ;;  %v26676_v52 = vpack.c.bf16 %v33483_v8, %v33472_v49 }
 0x813   : > { %26666 = vmatprep.subr.bf16.mxu1 %v39685_v34 }
 0x819   : > { %26524 = vmatpush3.bf16.xpose.msra.mxu0 %v26523_v63  ;;  %v26529_v63 = vpack.c.bf16 %v33415_v23, %v33410_v2 }
 0x81a   : > { %26668 = vmatpush3.bf16.xpose.msra.mxu1 %v26667_v43  ;;  %26525 = vmatprep.subr.bf16.mxu0 %v39685_v34  ;;  %v26544_v43 = vpack.c.bf16 %v33625_v55, %v33620_v19 }
 0x81b   : > { %26669 = vmatprep.subr.bf16.mxu1 %v39685_v34 }
 0x820   : > { %22165 = vmatmul.mubr.f32.vlgmr.msra.gmra.mrb[2].mxu0 %v32519_v46 }
 0x821   : > { %26527 = vmatpush3.bf16.xpose.msra.mxu0 %v26526_v4  ;;  %22375 = vmatmul.mubr.f32.vlgmr.msra.gmra.mrb[2].mxu1 %v32519_v46  ;;  %v26688_v4 = vpack.c.bf16 %v33641_v3, %v33630_v59 }
 0x822   : > { %26671 = vmatpush3.bf16.xpose.msra.mxu1 %v26670_v54  ;;  %26528 = vmatprep.subr.bf16.mxu0 %v39685_v34  ;;  %v26547_v54 = vpack.c.bf16 %v33663_v17, %v33658_v50 }
 0x823   : > { %26672 = vmatprep.subr.bf16.mxu1 %v39685_v34  ;;  %22199 = vmatprep.mubr.msk.f32.mxu0 %vm28907_vm0, %v39694_v24 }
 0x824   : > { %22409 = vmatprep.mubr.msk.f32.mxu1 %vm28907_vm0, %v39694_v24 }
 0x829   : > { %26530 = vmatpush3.bf16.xpose.msra.mxu0 %v26529_v63  ;;  %v26691_v63 = vpack.c.bf16 %v33679_v25, %v33668_v53 }
 0x82a   : > { %26674 = vmatpush3.bf16.xpose.msra.mxu1 %v26673_v0  ;;  %26531 = vmatprep.subr.bf16.mxu0 %v39685_v34  ;;  %v40086_v0 = vld [vmem:[#allocation10_spill] sm:$0xff] }
 0x82b   : > { %26675 = vmatprep.subr.bf16.mxu1 %v39685_v34 }
 0x831   : > { %26533 = vmatpush3.bf16.xpose.msra.mxu0 %v26532_v28  ;;  %v40087_v28 = vld [vmem:[#allocation5_spill] sm:$0xff] }
 0x832   : > { %26677 = vmatpush3.bf16.xpose.msra.mxu1 %v26676_v52  ;;  %26534 = vmatprep.subr.bf16.mxu0 %v39685_v34  ;;  %v40088_v52 = vld [vmem:[#allocation7_spill] sm:$0xff] }
 0x833   : > { %26678 = vmatprep.subr.bf16.mxu1 %v39685_v34 }
 0x839   : > { %26536 = vmatpush3.bf16.xpose.msra.mxu0 %v26535_v45  ;;  %v40089_v45 = vld [vmem:[#allocation9_spill] sm:$0xff] }
 0x83a   : > { %26680 = vmatpush3.bf16.xpose.msra.mxu1 %v26679_v7  ;;  %26537 = vmatprep.subr.bf16.mxu0 %v39685_v34  ;;  %v40090_v7 = vand.u32 4294901760, %v33354_v10 }
 0x83b   : > { %26681 = vmatprep.subr.bf16.mxu1 %v39685_v34 }
 0x841   : > { %26539 = vmatpush3.bf16.xpose.msra.mxu0 %v26538_v20  ;;  %v40091_v20 = vand.u32 4294901760, %v33359_v15  ;;  %v40096_v15 = vand.u32 4294901760, %v33415_v23  ;;  %v40102_v23 = vand.u32 4294901760, %v33483_v8  ;;  %v40107_v8 = vand.u32 4294901760, %v33544_v21 }
 0x842   : > { %26683 = vmatpush3.bf16.xpose.msra.mxu1 %v26682_v30  ;;  %26540 = vmatprep.subr.bf16.mxu0 %v39685_v34  ;;  %v40113_v21 = vand.u32 4294901760, %v33592_v57 }
 0x843   : > { %26684 = vmatprep.subr.bf16.mxu1 %v39685_v34  ;;  %v26574_v30 = vpack.c.bf16 %v40091_v20, %v40090_v7  ;;  %v40099_v7 = vand.u32 4294901760, %v33462_v33  ;;  %v40100_v20 = vand.u32 4294901760, %v33467_v6  ;;  %v40105_v33 = vand.u32 4294901760, %v33516_v62 }
 0x844   : > { %v40106_v6 = vand.u32 4294901760, %v33527_v36  ;;  %v40111_v62 = vand.u32 4294901760, %v33582_v39  ;;  %v40112_v36 = vand.u32 4294901760, %v33587_v51  ;;  %v40117_v39 = vand.u32 4294901760, %v33630_v59  ;;  %v384_v59 = vld [vmem:[%s32259_s14 + $0x298] sm:$0xff] }
 0x845   : > { %v40118_v51 = vand.u32 4294901760, %v33641_v3  ;;  %v368_v3 = vld [vmem:[%s32259_s14 + $0x218] sm:$0xff] }
 0x846   : > { %v33965_v53 = vsel %vm557_vm1, %v368_v3, 0 }
 0x849   : > { %26542 = vmatpush3.bf16.xpose.msra.mxu0 %v26541_v35  ;;  %v40092_v35 = vand.u32 4294901760, %v33364_v31  ;;  %v40095_v31 = vand.u32 4294901760, %v33410_v2  ;;  %v40101_v2 = vand.u32 4294901760, %v33472_v49  ;;  %v40108_v49 = vand.u32 4294901760, %v33549_v58 }
 0x84a   : > { %26686 = vmatpush3.bf16.xpose.msra.mxu1 %v26685_v42  ;;  %26543 = vmatprep.subr.bf16.mxu0 %v39685_v34  ;;  %v40093_v42 = vand.u32 4294901760, %v33375_v13  ;;  %v40097_v13 = vand.u32 4294901760, %v33420_v9  ;;  %v40103_v9 = vand.u32 4294901760, %v33504_v18  ;;  %v40109_v18 = vand.u32 4294901760, %v33554_v56 }
 0x84b   : > { %26687 = vmatprep.subr.bf16.mxu1 %v39685_v34  ;;  %v26577_v10 = vpack.c.bf16 %v40096_v15, %v40095_v31  ;;  %v26586_v31 = vpack.c.bf16 %v40108_v49, %v40107_v8  ;;  %v40114_v58 = vand.u32 4294901760, %v33603_v32  ;;  %v40116_v56 = vand.u32 4294901760, %v33625_v55  ;;  %v383_v55 = vld [vmem:[%s32259_s14 + $0x290] sm:$0xff] }
 0x84c   : > { %v40119_v32 = vand.u32 4294901760, %v33663_v17 }
 0x84e   : > { %v26595_v57 = vpack.c.bf16 %v40119_v32, %v7694_v44  ;;  %v367_v44 = vld [vmem:[%s32259_s14 + $0x210] sm:$0xff]  ;;  %v389_v32 = vld [vmem:[%s32259_s14 + $0x2c0] sm:$0xff] }
 0x84f   : > { %v33962_v17 = vsel %vm557_vm1, %v367_v44, 0 }
 0x851   : > { %26545 = vmatpush3.bf16.xpose.msra.mxu0 %v26544_v43  ;;  %v26718_v43 = vpack.c.bf16 %v40093_v42, %v40092_v35  ;;  %v26724_v35 = vpack.c.bf16 %v40102_v23, %v40101_v2  ;;  %v386_v2 = vld [vmem:[%s32259_s14 + $0x2a8] sm:$0xff] }
 0x852   : > { %26689 = vmatpush3.bf16.xpose.msra.mxu1 %v26688_v4  ;;  %26546 = vmatprep.subr.bf16.mxu0 %v39685_v34  ;;  %v40094_v4 = vld [vmem:[#allocation6_spill] sm:$0xff] }
 0x853   : > { %26690 = vmatprep.subr.bf16.mxu1 %v39685_v34 }
 0x859   : > { %26548 = vmatpush3.bf16.xpose.msra.mxu0 %v26547_v54  ;;  %v40098_v54 = vand.u32 4294901760, %v33437_v47  ;;  %v40104_v47 = vand.u32 4294901760, %v33509_v1  ;;  %v40110_v1 = vand.u32 4294901760, %v33565_v5  ;;  %v40115_v5 = vand.u32 4294901760, %v33620_v19 }
 0x85a   : > { %26692 = vmatpush3.bf16.xpose.msra.mxu1 %v26691_v63  ;;  %26549 = vmatprep.subr.bf16.mxu0 %v39685_v34  ;;  %v26739_v19 = vpack.c.bf16 %v8390_v61, %v8383_v14  ;;  %v33968_v14 = vsel %vm557_vm1, %v383_v55, 0  ;;  %v33971_v61 = vsel %vm557_vm1, %v384_v59, 0 }
 0x85b   : > { %26693 = vmatprep.subr.bf16.mxu1 %v39685_v34  ;;  %v26721_v63 = vpack.c.bf16 %v40098_v54, %v40097_v13  ;;  %v26583_v42 = vpack.c.bf16 %v40104_v47, %v40103_v9  ;;  %v26730_v15 = vpack.c.bf16 %v40110_v1, %v40109_v18  ;;  %v26733_v13 = vpack.c.bf16 %v40114_v58, %v40113_v21  ;;  %v372_v18 = vld [vmem:[%s32259_s14 + $0x238] sm:$0xff]  ;;  %v387_v1 = vld [vmem:[%s32259_s14 + $0x2b0] sm:$0xff] }
 0x85c   : > { %v26592_v54 = vpack.c.bf16 %v40116_v56, %v40115_v5  ;;  %v34043_v21 = vsel %vm557_vm1, %v372_v18, 0  ;;  %v34046_v58 = vsel %vm557_vm1, %v387_v1, 0 }
 0x85d   : > { %v39354_v56 = vand.u32 4294901760, %v34043_v21 }
 0x860   : > { %22200 = vmatmul.mubr.f32.vlgmr.msra.gmra.mrb[2].mxu0 %v32566_v37 }
 0x861   : > { %26551 = vmatpush3.bf16.xpose.msra.mxu0 %v33133_v11  ;;  %22410 = vmatmul.mubr.f32.vlgmr.msra.gmra.mrb[2].mxu1 %v32566_v37 }
 0x862   : > { %26695 = vmatpush3.bf16.xpose.msra.mxu1 %v33139_v16  ;;  %26552 = vmatprep.subr.bf16.mxu0 %v39685_v34 }
 0x863   : > { %26696 = vmatprep.subr.bf16.mxu1 %v39685_v34  ;;  %22234 = vmatprep.mubr.msk.f32.mxu0 %vm28907_vm0, %v39694_v24 }
 0x864   : > { %22444 = vmatprep.mubr.msk.f32.mxu1 %vm28907_vm0, %v39694_v24 }
 0x869   : > { %26554 = vmatpush3.bf16.xpose.msra.mxu0 %v33175_v38 }
 0x86a   : > { %26698 = vmatpush3.bf16.xpose.msra.mxu1 %v33181_v48  ;;  %26555 = vmatprep.subr.bf16.mxu0 %v39685_v34 }
 0x86b   : > { %26699 = vmatprep.subr.bf16.mxu1 %v39685_v34 }
 0x871   : > { %26557 = vmatpush3.bf16.xpose.msra.mxu0 %v33211_v26 }
 0x872   : > { %26701 = vmatpush3.bf16.xpose.msra.mxu1 %v33217_v41  ;;  %26558 = vmatprep.subr.bf16.mxu0 %v39685_v34 }
 0x873   : > { %26702 = vmatprep.subr.bf16.mxu1 %v39685_v34 }
 0x879   : > { %26560 = vmatpush3.bf16.xpose.msra.mxu0 %v33247_v12 }
 0x87a   : > { %26704 = vmatpush3.bf16.xpose.msra.mxu1 %v33253_v60  ;;  %26561 = vmatprep.subr.bf16.mxu0 %v39685_v34 }
 0x87b   : > { %26705 = vmatprep.subr.bf16.mxu1 %v39685_v34 }
 0x881   : > { %26563 = vmatpush3.bf16.xpose.msra.mxu0 %v33283_v29 }
 0x882   : > { %26707 = vmatpush3.bf16.xpose.msra.mxu1 %v33289_v27  ;;  %26564 = vmatprep.subr.bf16.mxu0 %v39685_v34 }
 0x883   : > { %26708 = vmatprep.subr.bf16.mxu1 %v39685_v34 }
 0x889   : > { %26566 = vmatpush3.bf16.xpose.msra.mxu0 %v33319_v22 }
 0x88a   : > { %26710 = vmatpush3.bf16.xpose.msra.mxu1 %v33325_v40  ;;  %26567 = vmatprep.subr.bf16.mxu0 %v39685_v34 }
 0x88b   : > { %26711 = vmatprep.subr.bf16.mxu1 %v39685_v34 }
 0x891   : > { %26569 = vmatpush3.bf16.xpose.msra.mxu0 %v40086_v0 }
 0x892   : > { %26713 = vmatpush3.bf16.xpose.msra.mxu1 %v40087_v28  ;;  %26570 = vmatprep.subr.bf16.mxu0 %v39685_v34 }
 0x893   : > { %26714 = vmatprep.subr.bf16.mxu1 %v39685_v34 }
 0x899   : > { %26572 = vmatpush3.bf16.xpose.msra.mxu0 %v40088_v52 }
 0x89a   : > { %26716 = vmatpush3.bf16.xpose.msra.mxu1 %v40089_v45  ;;  %26573 = vmatprep.subr.bf16.mxu0 %v39685_v34 }
 0x89b   : > { %26717 = vmatprep.subr.bf16.mxu1 %v39685_v34 }
 0x8a0   : > { %22235 = vmatmul.mubr.f32.vlgmr.msra.gmra.mrb[2].mxu0 %v40094_v4 }
 0x8a1   : > { %26575 = vmatpush3.bf16.xpose.msra.mxu0 %v26574_v30  ;;  %22445 = vmatmul.mubr.f32.vlgmr.msra.gmra.mrb[2].mxu1 %v40094_v4  ;;  %v26580_v30 = vpack.c.bf16 %v40100_v20, %v40099_v7  ;;  %v369_v7 = vld [vmem:[%s32259_s14 + $0x220] sm:$0xff]  ;;  %v370_v20 = vld [vmem:[%s32259_s14 + $0x228] sm:$0xff] }
 0x8a2   : > { %26719 = vmatpush3.bf16.xpose.msra.mxu1 %v26718_v43  ;;  %26576 = vmatprep.subr.bf16.mxu0 %v39685_v34  ;;  %v26727_v43 = vpack.c.bf16 %v40106_v6, %v40105_v33  ;;  %v34004_v9 = vsel %vm557_vm1, %v369_v7, 0  ;;  %v34007_v47 = vsel %vm557_vm1, %v370_v20, 0  ;;  %v34013_v33 = vsel %vm557_vm1, %v386_v2, 0  ;;  %v375_v20 = vld [vmem:[%s32259_s14 + $0x250] sm:$0xff] }
 0x8a3   : > { %26720 = vmatprep.subr.bf16.mxu1 %v39685_v34  ;;  %22269 = vmatprep.mubr.msk.f32.mxu0 %vm28907_vm0, %v39694_v24  ;;  %v39363_v6 = vand.u32 4294901760, %v34004_v9  ;;  %v39360_v49 = vand.u32 4294901760, %v34013_v33  ;;  %v391_v2 = vld [vmem:[%s32259_s14 + $0x2d0] sm:$0xff] }
 0x8a4   : > { %22479 = vmatprep.mubr.msk.f32.mxu1 %vm28907_vm0, %v39694_v24 }
 0x8a9   : > { %26578 = vmatpush3.bf16.xpose.msra.mxu0 %v26577_v10  ;;  %v26589_v10 = vpack.c.bf16 %v40112_v36, %v40111_v62 }
 0x8aa   : > { %26722 = vmatpush3.bf16.xpose.msra.mxu1 %v26721_v63  ;;  %26579 = vmatprep.subr.bf16.mxu0 %v39685_v34  ;;  %v26736_v63 = vpack.c.bf16 %v40118_v51, %v40117_v39  ;;  %v373_v51 = vld [vmem:[%s32259_s14 + $0x240] sm:$0xff] }
 0x8ab   : > { %26723 = vmatprep.subr.bf16.mxu1 %v39685_v34 }
 0x8b1   : > { %26581 = vmatpush3.bf16.xpose.msra.mxu0 %v26580_v30  ;;  %v385_v30 = vld [vmem:[%s32259_s14 + $0x2a0] sm:$0xff] }
 0x8b2   : > { %26725 = vmatpush3.bf16.xpose.msra.mxu1 %v26724_v35  ;;  %26582 = vmatprep.subr.bf16.mxu0 %v39685_v34 }
 0x8b3   : > { %26726 = vmatprep.subr.bf16.mxu1 %v39685_v34 }
 0x8b9   : > { %26584 = vmatpush3.bf16.xpose.msra.mxu0 %v26583_v42  ;;  %v34010_v42 = vsel %vm557_vm1, %v385_v30, 0  ;;  %v376_v30 = vld [vmem:[%s32259_s14 + $0x258] sm:$0xff] }
 0x8ba   : > { %26728 = vmatpush3.bf16.xpose.msra.mxu1 %v26727_v43  ;;  %26585 = vmatprep.subr.bf16.mxu0 %v39685_v34  ;;  %v39362_v43 = vand.u32 4294901760, %v34007_v47  ;;  %v39361_v8 = vand.u32 4294901760, %v34010_v42 }
 0x8bb   : > { %26729 = vmatprep.subr.bf16.mxu1 %v39685_v34 }
 0x8bc   : > { %v34031_v62 = vpack.c.bf16 %v39362_v43, %v39363_v6  ;;  %v34037_v36 = vpack.c.bf16 %v39360_v49, %v39361_v8  ;;  %v396_v49 = vld [vmem:[%s32259_s14 + $0x2f8] sm:$0xff] }
 0x8c1   : > { %26587 = vmatpush3.bf16.xpose.msra.mxu0 %v26586_v31  ;;  %v371_v31 = vld [vmem:[%s32259_s14 + $0x230] sm:$0xff] }
 0x8c2   : > { %26731 = vmatpush3.bf16.xpose.msra.mxu1 %v26730_v15  ;;  %26588 = vmatprep.subr.bf16.mxu0 %v39685_v34  ;;  %v388_v15 = vld [vmem:[%s32259_s14 + $0x2b8] sm:$0xff] }
 0x8c3   : > { %26732 = vmatprep.subr.bf16.mxu1 %v39685_v34 }
 0x8c9   : > { %26590 = vmatpush3.bf16.xpose.msra.mxu0 %v26589_v10  ;;  %v34040_v10 = vsel %vm557_vm1, %v371_v31, 0  ;;  %v392_v31 = vld [vmem:[%s32259_s14 + $0x2d8] sm:$0xff] }
 0x8ca   : > { %26734 = vmatpush3.bf16.xpose.msra.mxu1 %v26733_v13  ;;  %26591 = vmatprep.subr.bf16.mxu0 %v39685_v34  ;;  %v34049_v13 = vsel %vm557_vm1, %v388_v15, 0  ;;  %v39355_v5 = vand.u32 4294901760, %v34040_v10  ;;  %v34112_v15 = vsel %vm557_vm1, %v375_v20, 0 }
 0x8cb   : > { %26735 = vmatprep.subr.bf16.mxu1 %v39685_v34  ;;  %v39352_v39 = vand.u32 4294901760, %v34049_v13 }
 0x8d1   : > { %26593 = vmatpush3.bf16.xpose.msra.mxu0 %v26592_v54  ;;  %v39353_v54 = vand.u32 4294901760, %v34046_v58 }
 0x8d2   : > { %26737 = vmatpush3.bf16.xpose.msra.mxu1 %v26736_v63  ;;  %26594 = vmatprep.subr.bf16.mxu0 %v39685_v34  ;;  %v374_v63 = vld [vmem:[%s32259_s14 + $0x248] sm:$0xff] }
 0x8d3   : > { %26738 = vmatprep.subr.bf16.mxu1 %v39685_v34 }
 0x8d9   : > { %26596 = vmatpush3.bf16.xpose.msra.mxu0 %v26595_v57  ;;  %v390_v57 = vld [vmem:[%s32259_s14 + $0x2c8] sm:$0xff] }
 0x8da   : > { %26740 = vmatpush3.bf16.xpose.msra.mxu1 %v26739_v19  ;;  %26597 = vmatprep.subr.bf16.mxu0 %v39685_v34  ;;  %v34067_v19 = vpack.c.bf16 %v39354_v56, %v39355_v5  ;;  %v34085_v44 = vsel %vm557_vm1, %v390_v57, 0  ;;  %v39357_v57 = vand.u32 4294901760, %v34112_v15 }
 0x8db   : > { %26741 = vmatprep.subr.bf16.mxu1 %v39685_v34  ;;  %v39348_v7 = vand.u32 4294901760, %v34085_v44 }
 0x8e0   : > { %22270 = vmatmul.mubr.f32.vlgmr.msra.gmra.mrb[2].mxu0 %v32519_v46 }
 0x8e1   : > { %26599 = vmatpush3.bf16.xpose.msra.mxu0 %v33133_v11  ;;  %22480 = vmatmul.mubr.f32.vlgmr.msra.gmra.mrb[2].mxu1 %v32519_v46  ;;  %v365_v11 = vld [vmem:[%s32259_s14 + $0x200] sm:$0xff] }
 0x8e2   : > { %26743 = vmatpush3.bf16.xpose.msra.mxu1 %v33139_v16  ;;  %26600 = vmatprep.subr.bf16.mxu0 %v39685_v34  ;;  %v366_v16 = vld [vmem:[%s32259_s14 + $0x208] sm:$0xff] }
 0x8e3   : > { %26744 = vmatprep.subr.bf16.mxu1 %v39685_v34  ;;  %22304 = vmatprep.mubr.msk.f32.mxu0 %vm28907_vm0, %v39694_v24 }
 0x8e4   : > { %22514 = vmatprep.mubr.msk.f32.mxu1 %vm28907_vm0, %v39694_v24 }
 0x8e9   : > { %26602 = vmatpush3.bf16.xpose.msra.mxu0 %v33175_v38  ;;  %v381_v38 = vld [vmem:[%s32259_s14 + $0x280] sm:$0xff] }
 0x8ea   : > { %26746 = vmatpush3.bf16.xpose.msra.mxu1 %v33181_v48  ;;  %26603 = vmatprep.subr.bf16.mxu0 %v39685_v34  ;;  %v382_v48 = vld [vmem:[%s32259_s14 + $0x288] sm:$0xff] }
 0x8eb   : > { %26747 = vmatprep.subr.bf16.mxu1 %v39685_v34 }
 0x8f1   : > { %26605 = vmatpush3.bf16.xpose.msra.mxu0 %v33211_v26  ;;  %v33926_v26 = vsel %vm557_vm1, %v365_v11, 0  ;;  %v34073_v11 = vpack.c.bf16 %v39352_v39, %v39353_v54 }
 0x8f2   : > { %26749 = vmatpush3.bf16.xpose.msra.mxu1 %v33217_v41  ;;  %26606 = vmatprep.subr.bf16.mxu0 %v39685_v34  ;;  %v33929_v41 = vsel %vm557_vm1, %v366_v16, 0  ;;  %v34076_v16 = vsel %vm557_vm1, %v373_v51, 0  ;;  %v34115_v51 = vsel %vm557_vm1, %v376_v30, 0 }
 0x8f3   : > { %26750 = vmatprep.subr.bf16.mxu1 %v39685_v34  ;;  %v39351_v3 = vand.u32 4294901760, %v34076_v16 }
 0x8f9   : > { %26608 = vmatpush3.bf16.xpose.msra.mxu0 %v33247_v12  ;;  %v33935_v12 = vsel %vm557_vm1, %v382_v48, 0  ;;  %v34082_v48 = vsel %vm557_vm1, %v389_v32, 0  ;;  %v34121_v32 = vsel %vm557_vm1, %v392_v31, 0  ;;  %v393_v31 = vld [vmem:[%s32259_s14 + $0x2e0] sm:$0xff] }
 0x8fa   : > { %26752 = vmatpush3.bf16.xpose.msra.mxu1 %v33253_v60  ;;  %26609 = vmatprep.subr.bf16.mxu0 %v39685_v34  ;;  %v8881_v60 = vand.u32 4294901760, %v33926_v26  ;;  %v39349_v59 = vand.u32 4294901760, %v34082_v48  ;;  %v39358_v30 = vand.u32 4294901760, %v34121_v32  ;;  %v34154_v5 = vsel %vm557_vm1, %v393_v31, 0  ;;  %v379_v31 = vld [vmem:[%s32259_s14 + $0x270] sm:$0xff] }
 0x8fb   : > { %26753 = vmatprep.subr.bf16.mxu1 %v39685_v34 }
 0x8fc   : > { %v34109_v1 = vpack.c.bf16 %v39348_v7, %v39349_v59  ;;  %v39356_v7 = vand.u32 4294901760, %v34115_v51  ;;  %v378_v59 = vld [vmem:[%s32259_s14 + $0x268] sm:$0xff]  ;;  %v34174_v8 = vsub.f32 %v33926_v26, %v8881_v60 }
 0x8fd   : > { %v34151_v56 = vsel %vm557_vm1, %v378_v59, 0 }
 0x901   : > { %26611 = vmatpush3.bf16.xpose.msra.mxu0 %v33283_v29 }
 0x902   : > { %26755 = vmatpush3.bf16.xpose.msra.mxu1 %v33289_v27  ;;  %26612 = vmatprep.subr.bf16.mxu0 %v39685_v34  ;;  %v9573_v27 = vand.u32 4294901760, %v33935_v12 }
 0x903   : > { %26756 = vmatprep.subr.bf16.mxu1 %v39685_v34 }
 0x904   : > { %v34195_v26 = vsub.f32 %v33935_v12, %v9573_v27 }
 0x909   : > { %26614 = vmatpush3.bf16.xpose.msra.mxu0 %v33319_v22  ;;  %v8884_v22 = vand.u32 4294901760, %v33929_v41 }
 0x90a   : > { %26758 = vmatpush3.bf16.xpose.msra.mxu1 %v33325_v40  ;;  %26615 = vmatprep.subr.bf16.mxu0 %v39685_v34  ;;  %v33932_v40 = vsel %vm557_vm1, %v381_v38, 0  ;;  %v34079_v38 = vsel %vm557_vm1, %v374_v63, 0  ;;  %v34118_v63 = vsel %vm557_vm1, %v391_v2, 0  ;;  %v377_v2 = vld [vmem:[%s32259_s14 + $0x260] sm:$0xff] }
 0x90b   : > { %26759 = vmatprep.subr.bf16.mxu1 %v39685_v34  ;;  %v9570_v29 = vand.u32 4294901760, %v33932_v40  ;;  %v33953_v25 = vpack.c.bf16 %v8884_v22, %v8881_v60  ;;  %v39350_v55 = vand.u32 4294901760, %v34079_v38  ;;  %v39359_v20 = vand.u32 4294901760, %v34118_v63 }
 0x90c   : > { %v34148_v54 = vsel %vm557_vm1, %v377_v2, 0  ;;  %v39366_v2 = vand.u32 4294901760, %v34154_v5  ;;  %v34179_v43 = vsub.f32 %v33929_v41, %v8884_v22 }
 0x90d   : > { %v33959_v50 = vpack.c.bf16 %v9573_v27, %v9570_v29  ;;  %v34103_v18 = vpack.c.bf16 %v39350_v55, %v39351_v3  ;;  %v394_v55 = vld [vmem:[%s32259_s14 + $0x2e8] sm:$0xff]  ;;  %v34139_v3 = vpack.c.bf16 %v39356_v7, %v39357_v57  ;;  %v34145_v39 = vpack.c.bf16 %v39358_v30, %v39359_v20  ;;  %v380_v20 = vld [vmem:[%s32259_s14 + $0x278] sm:$0xff] }
 0x90e   : > { %v34157_v7 = vsel %vm557_vm1, %v394_v55, 0  ;;  %v39368_v57 = vand.u32 4294901760, %v34148_v54  ;;  %v39367_v30 = vand.u32 4294901760, %v34151_v56  ;;  %v395_v55 = vld [vmem:[%s32259_s14 + $0x2f0] sm:$0xff]  ;;  %v34184_v6 = vsub.f32 %v33932_v40, %v9570_v29 }
 0x90f   : > { %v39365_v59 = vand.u32 4294901760, %v34157_v7  ;;  %v34204_v40 = vsel %vm557_vm1, %v379_v31, 0  ;;  %v34207_v60 = vsel %vm557_vm1, %v380_v20, 0  ;;  %v34210_v22 = vsel %vm557_vm1, %v395_v55, 0 }
 0x910   : > { %v34213_v29 = vsel %vm557_vm1, %v396_v49, 0  ;;  %v39371_v12 = vand.u32 4294901760, %v34204_v40  ;;  %v39369_v27 = vand.u32 4294901760, %v34207_v60  ;;  %v39372_v31 = vand.u32 4294901760, %v34179_v43 }
 0x911   : > { %26617 = vmatpush3.bf16.xpose.msra.mxu0 %v40086_v0  ;;  %v8887_v0 = vand.u32 4294901760, %v33962_v17  ;;  %v34201_v41 = vpack.c.bf16 %v39365_v59, %v39366_v2  ;;  %v39370_v59 = vand.u32 4294901760, %v34174_v8  ;;  %v39374_v20 = vand.u32 4294901760, %v34210_v22 }
 0x912   : > { %26761 = vmatpush3.bf16.xpose.msra.mxu1 %v40087_v28  ;;  %26618 = vmatprep.subr.bf16.mxu0 %v39685_v34  ;;  %v8890_v28 = vand.u32 4294901760, %v33965_v53  ;;  %v39375_v49 = vand.u32 4294901760, %v34184_v6  ;;  %v34246_v2 = vpack.c.bf16 %v39369_v27, %v39371_v12 }
 0x913   : > { %26762 = vmatprep.subr.bf16.mxu1 %v39685_v34  ;;  %40121 = vst [vmem:[#allocation5_spill] sm:$0xff] %v34201_v41 }
 0x914   : > { %v33995_v23 = vpack.c.bf16 %v8890_v28, %v8887_v0  ;;  %40122 = vst [vmem:[#allocation7_spill] sm:$0xff] %v34246_v2  ;;  %v9664_v27 = vsub.f32 %v34184_v6, %v39375_v49 }
 0x919   : > { %26620 = vmatpush3.bf16.xpose.msra.mxu0 %v40088_v52  ;;  %v9576_v52 = vand.u32 4294901760, %v33968_v14 }
 0x91a   : > { %26764 = vmatpush3.bf16.xpose.msra.mxu1 %v40089_v45  ;;  %26765 = vmatprep.subr.bf16.mxu0 %v39685_v34  ;;  %v39364_v45 = vand.u32 4294901760, %v33971_v61 }
 0x91b   : > { %26909 = vmatprep.subr.bf16.mxu1 %v39685_v34  ;;  %v34240_v55 = vsub.f32 %v33968_v14, %v9576_v52  ;;  %v40124_v14 = vand.u32 4294901760, %v34213_v29 }
 0x91c   : > { %v34001_v35 = vpack.c.bf16 %v39364_v45, %v9576_v52  ;;  %v34190_v45 = vpack.c.bf16 %v39367_v30, %v39368_v57  ;;  %v34230_v30 = vsub.f32 %v33962_v17, %v8887_v0  ;;  %v34235_v57 = vsub.f32 %v33965_v53, %v8890_v28 }
 0x91d   : > { %v8975_v17 = vsub.f32 %v34174_v8, %v39370_v59  ;;  %v8982_v53 = vsub.f32 %v34179_v43, %v39372_v31  ;;  %v40123_v0 = vand.u32 4294901760, %v33971_v61  ;;  %v34263_v52 = vpack.c.bf16 %v40124_v14, %v39374_v20 }
 0x91e   : > { %40120 = vst [vmem:[#allocation10_spill] sm:$0xff] %v34190_v45  ;;  %v40126_v59 = vand.u32 4294901760, %v34195_v26  ;;  %v9665_v14 = vand.u32 4294901760, %v9664_v27 }
 0x91f   : > { %v34257_v28 = vsub.f32 %v33971_v61, %v40123_v0  ;;  %40125 = vst [vmem:[#allocation9_spill] sm:$0xff] %v34263_v52  ;;  %v8976_v31 = vand.u32 4294901760, %v8975_v17  ;;  %v8983_v4 = vand.u32 4294901760, %v8982_v53  ;;  %v40128_v53 = vand.u32 4294901760, %v34007_v47 }
 0x920   : > { %22305 = vmatmul.mubr.f32.vlgmr.msra.gmra.mrb[2].mxu0 %v32519_v46  ;;  %v9671_v12 = vsub.f32 %v34195_v26, %v40126_v59  ;;  %v40127_v59 = vand.u32 4294901760, %v34004_v9  ;;  %v40129_v61 = vand.u32 4294901760, %v34010_v42 }
 0x921   : > { %22515 = vmatmul.mubr.f32.vlgmr.msra.gmra.mrb[2].mxu1 %v32519_v46  ;;  %26767 = vmatpush3.bf16.xpose.msra.mxu0 %v33953_v25  ;;  %v34287_v0 = vsub.f32 %v34007_v47, %v40128_v53  ;;  %v26790_v27 = vpack.c.bf16 %v8983_v4, %v8976_v31  ;;  %v40133_v53 = vand.u32 4294901760, %v34240_v55  ;;  %v40134_v4 = vand.u32 4294901760, %v34257_v28 }
 0x922   : > { %26911 = vmatpush3.bf16.xpose.msra.mxu1 %v33959_v50  ;;  %26768 = vmatprep.subr.bf16.mxu0 %v39685_v34  ;;  %v9672_v20 = vand.u32 4294901760, %v9671_v12  ;;  %v34282_v17 = vsub.f32 %v34004_v9, %v40127_v59  ;;  %v34292_v12 = vsub.f32 %v34010_v42, %v40129_v61  ;;  %v40132_v59 = vand.u32 4294901760, %v34013_v33  ;;  %v40135_v61 = vld [vmem:[#allocation8_spill] sm:$0xff] }
 0x923   : > { %26912 = vmatprep.subr.bf16.mxu1 %v39685_v34  ;;  %22549 = vmatprep.mubr.msk.f32.mxu0 %vm28907_vm0, %v39694_v24  ;;  %v9678_v42 = vsub.f32 %v34240_v55, %v40133_v53  ;;  %v9685_v31 = vsub.f32 %v34257_v28, %v40134_v4 }
 0x924   : > { %22759 = vmatprep.mubr.msk.f32.mxu1 %vm28907_vm0, %v39694_v24  ;;  %v26934_v47 = vpack.c.bf16 %v9672_v20, %v9665_v14 }
 0x925   : > { %v9679_v20 = vand.u32 4294901760, %v9678_v42  ;;  %v9686_v14 = vand.u32 4294901760, %v9685_v31  ;;  %v40138_v42 = vand.u32 4294901760, %v34046_v58 }
 0x927   : > { %v34336_v4 = vsub.f32 %v34046_v58, %v40138_v42 }
 0x929   : > { %26770 = vmatpush3.bf16.xpose.msra.mxu0 %v33995_v23 }
 0x92a   : > { %26914 = vmatpush3.bf16.xpose.msra.mxu1 %v34001_v35  ;;  %26771 = vmatprep.subr.bf16.mxu0 %v39685_v34 }
 0x92b   : > { %26915 = vmatprep.subr.bf16.mxu1 %v39685_v34 }
 0x931   : > { %26773 = vmatpush3.bf16.xpose.msra.mxu0 %v34031_v62 }
 0x932   : > { %26917 = vmatpush3.bf16.xpose.msra.mxu1 %v34037_v36  ;;  %26774 = vmatprep.subr.bf16.mxu0 %v39685_v34 }
 0x933   : > { %26918 = vmatprep.subr.bf16.mxu1 %v39685_v34 }
 0x939   : > { %26776 = vmatpush3.bf16.xpose.msra.mxu0 %v34067_v19 }
 0x93a   : > { %26920 = vmatpush3.bf16.xpose.msra.mxu1 %v34073_v11  ;;  %26777 = vmatprep.subr.bf16.mxu0 %v39685_v34 }
 0x93b   : > { %26921 = vmatprep.subr.bf16.mxu1 %v39685_v34 }
 0x941   : > { %26779 = vmatpush3.bf16.xpose.msra.mxu0 %v34103_v18 }
 0x942   : > { %26923 = vmatpush3.bf16.xpose.msra.mxu1 %v34109_v1  ;;  %26780 = vmatprep.subr.bf16.mxu0 %v39685_v34 }
 0x943   : > { %26924 = vmatprep.subr.bf16.mxu1 %v39685_v34 }
 0x949   : > { %26782 = vmatpush3.bf16.xpose.msra.mxu0 %v34139_v3 }
 0x94a   : > { %26926 = vmatpush3.bf16.xpose.msra.mxu1 %v34145_v39  ;;  %26783 = vmatprep.subr.bf16.mxu0 %v39685_v34 }
 0x94b   : > { %26927 = vmatprep.subr.bf16.mxu1 %v39685_v34 }
 0x951   : > { %26785 = vmatpush3.bf16.xpose.msra.mxu0 %v34190_v45  ;;  %v39384_v45 = vand.u32 4294901760, %v34282_v17 }
 0x952   : > { %26929 = vmatpush3.bf16.xpose.msra.mxu1 %v34201_v41  ;;  %26786 = vmatprep.subr.bf16.mxu0 %v39685_v34  ;;  %v40130_v41 = vand.u32 4294901760, %v34230_v30 }
 0x953   : > { %26930 = vmatprep.subr.bf16.mxu1 %v39685_v34  ;;  %v9003_v53 = vsub.f32 %v34282_v17, %v39384_v45 }
 0x954   : > { %v8989_v49 = vsub.f32 %v34230_v30, %v40130_v41 }
 0x955   : > { %v9004_v42 = vand.u32 4294901760, %v9003_v53 }
 0x956   : > { %v8990_v41 = vand.u32 4294901760, %v8989_v49  ;;  %v40136_v49 = vand.u32 4294901760, %v34040_v10 }
 0x959   : > { %26788 = vmatpush3.bf16.xpose.msra.mxu0 %v34246_v2  ;;  %v34303_v2 = vsub.f32 %v34013_v33, %v40132_v59  ;;  %v39386_v33 = vand.u32 4294901760, %v34287_v0  ;;  %v39387_v59 = vand.u32 4294901760, %v34292_v12 }
 0x95a   : > { %26932 = vmatpush3.bf16.xpose.msra.mxu1 %v34263_v52  ;;  %26789 = vmatprep.subr.bf16.mxu0 %v39685_v34  ;;  %v40131_v52 = vand.u32 4294901760, %v34235_v57 }
 0x95b   : > { %26933 = vmatprep.subr.bf16.mxu1 %v39685_v34  ;;  %v9692_v58 = vsub.f32 %v34292_v12, %v39387_v59 }
 0x95c   : > { %v8996_v9 = vsub.f32 %v34235_v57, %v40131_v52 }
 0x95e   : > { %v8997_v52 = vand.u32 4294901760, %v8996_v9  ;;  %v40137_v9 = vand.u32 4294901760, %v34043_v21 }
 0x960   : > { %22550 = vmatmul.mubr.f32.vlgmr.msra.gmra.mrb[4].mxu0 %v40135_v61  ;;  %v26793_v31 = vpack.c.bf16 %v8997_v52, %v8990_v41  ;;  %v40140_v41 = vand.u32 4294901760, %v34303_v2 }
 0x961   : > { %26791 = vmatpush3.bf16.xpose.msra.mxu0 %v26790_v27  ;;  %22760 = vmatmul.mubr.f32.vlgmr.msra.gmra.mrb[4].mxu1 %v40135_v61  ;;  %v34324_v27 = vsub.f32 %v34040_v10, %v40136_v49  ;;  %v9010_v10 = vsub.f32 %v34287_v0, %v39386_v33 }
 0x962   : > { %26935 = vmatpush3.bf16.xpose.msra.mxu1 %v26934_v47  ;;  %26792 = vmatprep.subr.bf16.mxu0 %v39685_v34  ;;  %v34329_v47 = vsub.f32 %v34043_v21, %v40137_v9  ;;  %v40139_v21 = vand.u32 4294901760, %v34049_v13  ;;  %v26937_v9 = vpack.c.bf16 %v9686_v14, %v9679_v20  ;;  %v9699_v52 = vsub.f32 %v34303_v2, %v40140_v41 }
 0x963   : > { %26936 = vmatprep.subr.bf16.mxu1 %v39685_v34  ;;  %22584 = vmatprep.mubr.msk.f32.mxu0 %vm28907_vm0, %v39694_v24  ;;  %v9011_v45 = vand.u32 4294901760, %v9010_v10  ;;  %v39388_v61 = vand.u32 4294901760, %v34324_v27  ;;  %v39390_v14 = vand.u32 4294901760, %v34336_v4  ;;  %v40141_v41 = vand.u32 4294901760, %v34076_v16 }
 0x964   : > { %22794 = vmatprep.mubr.msk.f32.mxu1 %vm28907_vm0, %v39694_v24  ;;  %v34347_v49 = vsub.f32 %v34049_v13, %v40139_v21  ;;  %v39389_v33 = vand.u32 4294901760, %v34329_v47  ;;  %v9693_v13 = vand.u32 4294901760, %v9692_v58  ;;  %v9700_v20 = vand.u32 4294901760, %v9699_v52 }
 0x965   : > { %v34364_v53 = vsub.f32 %v34076_v16, %v40141_v41  ;;  %v26796_v52 = vpack.c.bf16 %v9011_v45, %v9004_v42  ;;  %v9017_v59 = vsub.f32 %v34324_v27, %v39388_v61  ;;  %v40144_v41 = vand.u32 4294901760, %v34085_v44 }
 0x966   : > { %v9024_v16 = vsub.f32 %v34329_v47, %v39389_v33  ;;  %v40145_v45 = vand.u32 4294901760, %v34347_v49 }
 0x967   : > { %v34385_v21 = vsub.f32 %v34085_v44, %v40144_v41  ;;  %v39391_v61 = vand.u32 4294901760, %v34364_v53 }
 0x968   : > { %v9713_v42 = vsub.f32 %v34347_v49, %v40145_v45  ;;  %v40146_v45 = vand.u32 4294901760, %v34112_v15 }
 0x969   : > { %26794 = vmatpush3.bf16.xpose.msra.mxu0 %v26793_v31  ;;  %v40142_v31 = vand.u32 4294901760, %v34079_v38 }
 0x96a   : > { %26938 = vmatpush3.bf16.xpose.msra.mxu1 %v26937_v9  ;;  %26795 = vmatprep.subr.bf16.mxu0 %v39685_v34  ;;  %v40143_v9 = vand.u32 4294901760, %v34082_v48 }
 0x96b   : > { %26939 = vmatprep.subr.bf16.mxu1 %v39685_v34  ;;  %v34369_v10 = vsub.f32 %v34079_v38, %v40142_v31  ;;  %v26940_v38 = vpack.c.bf16 %v9700_v20, %v9693_v13  ;;  %v9018_v31 = vand.u32 4294901760, %v9017_v59  ;;  %v9714_v13 = vand.u32 4294901760, %v9713_v42 }
 0x96c   : > { %v34374_v58 = vsub.f32 %v34082_v48, %v40143_v9  ;;  %v9706_v48 = vsub.f32 %v34336_v4, %v39390_v14  ;;  %v9025_v9 = vand.u32 4294901760, %v9024_v16  ;;  %v34402_v59 = vsub.f32 %v34112_v15, %v40146_v45 }
 0x96d   : > { %v39392_v33 = vand.u32 4294901760, %v34369_v10  ;;  %v9031_v14 = vsub.f32 %v34364_v53, %v39391_v61  ;;  %v40149_v45 = vand.u32 4294901760, %v34121_v32 }
 0x96e   : > { %v9707_v44 = vand.u32 4294901760, %v9706_v48  ;;  %v39393_v20 = vand.u32 4294901760, %v34374_v58  ;;  %v26799_v42 = vpack.c.bf16 %v9025_v9, %v9018_v31  ;;  %v40150_v31 = vand.u32 4294901760, %v34385_v21 }
 0x96f   : > { %v9038_v15 = vsub.f32 %v34369_v10, %v39392_v33  ;;  %v34423_v41 = vsub.f32 %v34121_v32, %v40149_v45  ;;  %v39394_v61 = vand.u32 4294901760, %v34402_v59 }
 0x970   : > { %v9727_v9 = vsub.f32 %v34385_v21, %v40150_v31  ;;  %v40151_v31 = vand.u32 4294901760, %v34148_v54 }
 0x971   : > { %26797 = vmatpush3.bf16.xpose.msra.mxu0 %v26796_v52  ;;  %v40147_v52 = vand.u32 4294901760, %v34115_v51 }
 0x972   : > { %26941 = vmatpush3.bf16.xpose.msra.mxu1 %v26940_v38  ;;  %26798 = vmatprep.subr.bf16.mxu0 %v39685_v34  ;;  %v40148_v38 = vand.u32 4294901760, %v34118_v63 }
 0x973   : > { %26942 = vmatprep.subr.bf16.mxu1 %v39685_v34  ;;  %v34407_v16 = vsub.f32 %v34115_v51, %v40147_v52  ;;  %v26943_v51 = vpack.c.bf16 %v9714_v13, %v9707_v44  ;;  %v9032_v52 = vand.u32 4294901760, %v9031_v14  ;;  %v9728_v44 = vand.u32 4294901760, %v9727_v9 }
 0x974   : > { %v34412_v48 = vsub.f32 %v34118_v63, %v40148_v38  ;;  %v9720_v63 = vsub.f32 %v34374_v58, %v39393_v20  ;;  %v9039_v38 = vand.u32 4294901760, %v9038_v15  ;;  %v34440_v14 = vsub.f32 %v34148_v54, %v40151_v31 }
 0x975   : > { %v39395_v33 = vand.u32 4294901760, %v34407_v16  ;;  %v9045_v20 = vsub.f32 %v34402_v59, %v39394_v61  ;;  %v40154_v31 = vand.u32 4294901760, %v34157_v7 }
 0x976   : > { %v9721_v32 = vand.u32 4294901760, %v9720_v63  ;;  %v39396_v13 = vand.u32 4294901760, %v34412_v48  ;;  %v26802_v9 = vpack.c.bf16 %v9039_v38, %v9032_v52  ;;  %v40155_v52 = vand.u32 4294901760, %v34423_v41 }
 0x977   : > { %v9052_v54 = vsub.f32 %v34407_v16, %v39395_v33  ;;  %v34461_v45 = vsub.f32 %v34157_v7, %v40154_v31  ;;  %v39397_v61 = vand.u32 4294901760, %v34440_v14 }
 0x978   : > { %v9741_v38 = vsub.f32 %v34423_v41, %v40155_v52  ;;  %v40156_v52 = vand.u32 4294901760, %v34204_v40 }
 0x979   : > { %26800 = vmatpush3.bf16.xpose.msra.mxu0 %v26799_v42  ;;  %v40152_v42 = vand.u32 4294901760, %v34151_v56 }
 0x97a   : > { %26944 = vmatpush3.bf16.xpose.msra.mxu1 %v26943_v51  ;;  %26801 = vmatprep.subr.bf16.mxu0 %v39685_v34  ;;  %v40153_v51 = vand.u32 4294901760, %v34154_v5 }
 0x97b   : > { %26945 = vmatprep.subr.bf16.mxu1 %v39685_v34  ;;  %v34445_v15 = vsub.f32 %v34151_v56, %v40152_v42  ;;  %v26946_v56 = vpack.c.bf16 %v9728_v44, %v9721_v32  ;;  %v9046_v42 = vand.u32 4294901760, %v9045_v20  ;;  %v9742_v32 = vand.u32 4294901760, %v9741_v38 }
 0x97c   : > { %v34450_v63 = vsub.f32 %v34154_v5, %v40153_v51  ;;  %v9734_v5 = vsub.f32 %v34412_v48, %v39396_v13  ;;  %v9053_v51 = vand.u32 4294901760, %v9052_v54  ;;  %v34478_v20 = vsub.f32 %v34204_v40, %v40156_v52 }
 0x97d   : > { %v39398_v33 = vand.u32 4294901760, %v34445_v15  ;;  %v9059_v13 = vsub.f32 %v34440_v14, %v39397_v61  ;;  %v40159_v52 = vand.u32 4294901760, %v34213_v29 }
 0x97e   : > { %v9735_v7 = vand.u32 4294901760, %v9734_v5  ;;  %v39399_v44 = vand.u32 4294901760, %v34450_v63  ;;  %v26805_v38 = vpack.c.bf16 %v9053_v51, %v9046_v42  ;;  %v40160_v42 = vand.u32 4294901760, %v34461_v45 }
 0x97f   : > { %v9066_v40 = vsub.f32 %v34445_v15, %v39398_v33  ;;  %v34499_v31 = vsub.f32 %v34213_v29, %v40159_v52  ;;  %v9072_v61 = vand.u32 4294901760, %v34478_v20 }
 0x980   : > { %v9755_v51 = vsub.f32 %v34461_v45, %v40160_v42 }
 0x981   : > { %26803 = vmatpush3.bf16.xpose.msra.mxu0 %v26802_v9  ;;  %v40157_v9 = vand.u32 4294901760, %v34207_v60  ;;  %v9768_v52 = vand.u32 4294901760, %v34499_v31 }
 0x982   : > { %26947 = vmatpush3.bf16.xpose.msra.mxu1 %v26946_v56  ;;  %26804 = vmatprep.subr.bf16.mxu0 %v39685_v34  ;;  %v40158_v56 = vand.u32 4294901760, %v34210_v22 }
 0x983   : > { %26948 = vmatprep.subr.bf16.mxu1 %v39685_v34  ;;  %v34483_v54 = vsub.f32 %v34207_v60, %v40157_v9  ;;  %v26949_v60 = vpack.c.bf16 %v9742_v32, %v9735_v7  ;;  %v9060_v9 = vand.u32 4294901760, %v9059_v13  ;;  %v9756_v7 = vand.u32 4294901760, %v9755_v51 }
 0x984   : > { %v34488_v5 = vsub.f32 %v34210_v22, %v40158_v56  ;;  %v9748_v22 = vsub.f32 %v34450_v63, %v39399_v44  ;;  %v9067_v56 = vand.u32 4294901760, %v9066_v40  ;;  %v9073_v13 = vsub.f32 %v34478_v20, %v9072_v61 }
 0x985   : > { %v39400_v33 = vand.u32 4294901760, %v34483_v54 }
 0x986   : > { %v9749_v29 = vand.u32 4294901760, %v9748_v22  ;;  %v9761_v32 = vand.u32 4294901760, %v34488_v5  ;;  %v26808_v44 = vpack.c.bf16 %v9067_v56, %v9060_v9  ;;  %v9769_v22 = vsub.f32 %v34499_v31, %v9768_v52 }
 0x987   : > { %v9074_v42 = vand.u32 4294901760, %v9073_v13  ;;  %v26961_v13 = vpack.c.bf16 %v34257_v28, %v34240_v55 }
 0x988   : > { %v26952_v40 = vpack.c.bf16 %v9756_v7, %v9749_v29  ;;  %v9770_v56 = vand.u32 4294901760, %v9769_v22  ;;  %v26958_v7 = vpack.c.bf16 %v34195_v26, %v34184_v6  ;;  %v26967_v22 = vpack.c.bf16 %v34347_v49, %v34336_v4 }
 0x989   : > { %26806 = vmatpush3.bf16.xpose.msra.mxu0 %v26805_v38  ;;  %v9080_v38 = vsub.f32 %v34483_v54, %v39400_v33 }
 0x98a   : > { %26950 = vmatpush3.bf16.xpose.msra.mxu1 %v26949_v60  ;;  %26807 = vmatprep.subr.bf16.mxu0 %v39685_v34  ;;  %v9762_v60 = vsub.f32 %v34488_v5, %v9761_v32 }
 0x98b   : > { %26951 = vmatprep.subr.bf16.mxu1 %v39685_v34  ;;  %v9081_v51 = vand.u32 4294901760, %v9080_v38  ;;  %v26820_v38 = vpack.c.bf16 %v34287_v0, %v34282_v17 }
 0x98c   : > { %v9763_v9 = vand.u32 4294901760, %v9762_v60  ;;  %v26823_v60 = vpack.c.bf16 %v34329_v47, %v34324_v27 }
 0x98d   : > { %v26811_v33 = vpack.c.bf16 %v9081_v51, %v9074_v42  ;;  %v26826_v42 = vpack.c.bf16 %v34369_v10, %v34364_v53  ;;  %v26970_v51 = vpack.c.bf16 %v34385_v21, %v34374_v58 }
 0x98e   : > { %v26955_v29 = vpack.c.bf16 %v9770_v56, %v9763_v9  ;;  %v26829_v9 = vpack.c.bf16 %v34407_v16, %v34402_v59  ;;  %v26973_v56 = vpack.c.bf16 %v34423_v41, %v34412_v48 }
 0x991   : > { %26809 = vmatpush3.bf16.xpose.msra.mxu0 %v26808_v44  ;;  %v26814_v44 = vpack.c.bf16 %v34179_v43, %v34174_v8 }
 0x992   : > { %26953 = vmatpush3.bf16.xpose.msra.mxu1 %v26952_v40  ;;  %26810 = vmatprep.subr.bf16.mxu0 %v39685_v34  ;;  %v26964_v40 = vpack.c.bf16 %v34303_v2, %v34292_v12 }
 0x993   : > { %26954 = vmatprep.subr.bf16.mxu1 %v39685_v34 }
 0x999   : > { %26812 = vmatpush3.bf16.xpose.msra.mxu0 %v26811_v33  ;;  %v26817_v33 = vpack.c.bf16 %v34235_v57, %v34230_v30 }
 0x99a   : > { %26956 = vmatpush3.bf16.xpose.msra.mxu1 %v26955_v29  ;;  %26813 = vmatprep.subr.bf16.mxu0 %v39685_v34  ;;  %v26832_v29 = vpack.c.bf16 %v34445_v15, %v34440_v14 }
 0x99b   : > { %26957 = vmatprep.subr.bf16.mxu1 %v39685_v34 }
 0x9a0   : > { %22585 = vmatmul.mubr.f32.vlgmr.msra.gmra.mrb[4].mxu0 %v32519_v46 }
 0x9a1   : > { %26815 = vmatpush3.bf16.xpose.msra.mxu0 %v26814_v44  ;;  %22795 = vmatmul.mubr.f32.vlgmr.msra.gmra.mrb[4].mxu1 %v32519_v46  ;;  %v26976_v44 = vpack.c.bf16 %v34461_v45, %v34450_v63 }
 0x9a2   : > { %26959 = vmatpush3.bf16.xpose.msra.mxu1 %v26958_v7  ;;  %26816 = vmatprep.subr.bf16.mxu0 %v39685_v34  ;;  %v26835_v7 = vpack.c.bf16 %v34483_v54, %v34478_v20 }
 0x9a3   : > { %26960 = vmatprep.subr.bf16.mxu1 %v39685_v34  ;;  %22619 = vmatprep.mubr.msk.f32.mxu0 %vm28907_vm0, %v39694_v24 }
 0x9a4   : > { %22829 = vmatprep.mubr.msk.f32.mxu1 %vm28907_vm0, %v39694_v24 }
 0x9a9   : > { %26818 = vmatpush3.bf16.xpose.msra.mxu0 %v26817_v33  ;;  %v26979_v33 = vpack.c.bf16 %v34499_v31, %v34488_v5 }
 0x9aa   : > { %26962 = vmatpush3.bf16.xpose.msra.mxu1 %v26961_v13  ;;  %26819 = vmatprep.subr.bf16.mxu0 %v39685_v34  ;;  %v40161_v13 = vld [vmem:[#allocation10_spill] sm:$0xff] }
 0x9ab   : > { %26963 = vmatprep.subr.bf16.mxu1 %v39685_v34 }
 0x9b1   : > { %26821 = vmatpush3.bf16.xpose.msra.mxu0 %v26820_v38  ;;  %v40162_v38 = vld [vmem:[#allocation5_spill] sm:$0xff] }
 0x9b2   : > { %26965 = vmatpush3.bf16.xpose.msra.mxu1 %v26964_v40  ;;  %26822 = vmatprep.subr.bf16.mxu0 %v39685_v34  ;;  %v40163_v40 = vld [vmem:[#allocation7_spill] sm:$0xff] }
 0x9b3   : > { %26966 = vmatprep.subr.bf16.mxu1 %v39685_v34 }
 0x9b9   : > { %26824 = vmatpush3.bf16.xpose.msra.mxu0 %v26823_v60  ;;  %v40164_v60 = vld [vmem:[#allocation9_spill] sm:$0xff] }
 0x9ba   : > { %26968 = vmatpush3.bf16.xpose.msra.mxu1 %v26967_v22  ;;  %26825 = vmatprep.subr.bf16.mxu0 %v39685_v34  ;;  %v40165_v22 = vand.u32 4294901760, %v34174_v8 }
 0x9bb   : > { %26969 = vmatprep.subr.bf16.mxu1 %v39685_v34 }
 0x9c1   : > { %26827 = vmatpush3.bf16.xpose.msra.mxu0 %v26826_v42  ;;  %v40166_v42 = vand.u32 4294901760, %v34179_v43  ;;  %v40171_v43 = vand.u32 4294901760, %v34235_v57  ;;  %v40177_v57 = vand.u32 4294901760, %v34303_v2  ;;  %v40182_v2 = vand.u32 4294901760, %v34364_v53 }
 0x9c2   : > { %26971 = vmatpush3.bf16.xpose.msra.mxu1 %v26970_v51  ;;  %26828 = vmatprep.subr.bf16.mxu0 %v39685_v34  ;;  %v40188_v53 = vand.u32 4294901760, %v34412_v48 }
 0x9c3   : > { %26972 = vmatprep.subr.bf16.mxu1 %v39685_v34  ;;  %v26862_v51 = vpack.c.bf16 %v40166_v42, %v40165_v22  ;;  %v40174_v22 = vand.u32 4294901760, %v34282_v17  ;;  %v40175_v42 = vand.u32 4294901760, %v34287_v0  ;;  %v40180_v17 = vand.u32 4294901760, %v34336_v4 }
 0x9c4   : > { %v40181_v0 = vand.u32 4294901760, %v34347_v49  ;;  %v40186_v4 = vand.u32 4294901760, %v34402_v59  ;;  %v40187_v49 = vand.u32 4294901760, %v34407_v16  ;;  %v40192_v59 = vand.u32 4294901760, %v34450_v63  ;;  %v416_v63 = vld [vmem:[%s32259_s14 + $0x398] sm:$0xff] }
 0x9c5   : > { %v40193_v16 = vand.u32 4294901760, %v34461_v45  ;;  %v400_v45 = vld [vmem:[%s32259_s14 + $0x318] sm:$0xff] }
 0x9c6   : > { %v34785_v5 = vsel %vm557_vm1, %v400_v45, 0 }
 0x9c9   : > { %26830 = vmatpush3.bf16.xpose.msra.mxu0 %v26829_v9  ;;  %v40167_v9 = vand.u32 4294901760, %v34184_v6  ;;  %v40170_v6 = vand.u32 4294901760, %v34230_v30  ;;  %v40176_v30 = vand.u32 4294901760, %v34292_v12  ;;  %v40183_v12 = vand.u32 4294901760, %v34369_v10 }
 0x9ca   : > { %26974 = vmatpush3.bf16.xpose.msra.mxu1 %v26973_v56  ;;  %26831 = vmatprep.subr.bf16.mxu0 %v39685_v34  ;;  %v40168_v56 = vand.u32 4294901760, %v34195_v26  ;;  %v40172_v26 = vand.u32 4294901760, %v34240_v55  ;;  %v40178_v55 = vand.u32 4294901760, %v34324_v27  ;;  %v40184_v27 = vand.u32 4294901760, %v34374_v58 }
 0x9cb   : > { %26975 = vmatprep.subr.bf16.mxu1 %v39685_v34  ;;  %v26865_v8 = vpack.c.bf16 %v40171_v43, %v40170_v6  ;;  %v26874_v6 = vpack.c.bf16 %v40183_v12, %v40182_v2  ;;  %v40189_v10 = vand.u32 4294901760, %v34423_v41  ;;  %v40191_v58 = vand.u32 4294901760, %v34445_v15  ;;  %v415_v15 = vld [vmem:[%s32259_s14 + $0x390] sm:$0xff] }
 0x9cc   : > { %v40194_v41 = vand.u32 4294901760, %v34483_v54 }
 0x9ce   : > { %v26883_v48 = vpack.c.bf16 %v40194_v41, %v9072_v61  ;;  %v399_v61 = vld [vmem:[%s32259_s14 + $0x310] sm:$0xff]  ;;  %v421_v41 = vld [vmem:[%s32259_s14 + $0x3c0] sm:$0xff] }
 0x9cf   : > { %v34782_v54 = vsel %vm557_vm1, %v399_v61, 0 }
 0x9d1   : > { %26833 = vmatpush3.bf16.xpose.msra.mxu0 %v26832_v29  ;;  %v27006_v29 = vpack.c.bf16 %v40168_v56, %v40167_v9  ;;  %v27012_v9 = vpack.c.bf16 %v40177_v57, %v40176_v30  ;;  %v418_v30 = vld [vmem:[%s32259_s14 + $0x3a8] sm:$0xff] }
 0x9d2   : > { %26977 = vmatpush3.bf16.xpose.msra.mxu1 %v26976_v44  ;;  %26834 = vmatprep.subr.bf16.mxu0 %v39685_v34  ;;  %v40169_v44 = vld [vmem:[#allocation6_spill] sm:$0xff] }
 0x9d3   : > { %26978 = vmatprep.subr.bf16.mxu1 %v39685_v34 }
 0x9d9   : > { %26836 = vmatpush3.bf16.xpose.msra.mxu0 %v26835_v7  ;;  %v40173_v7 = vand.u32 4294901760, %v34257_v28  ;;  %v40179_v28 = vand.u32 4294901760, %v34329_v47  ;;  %v40185_v47 = vand.u32 4294901760, %v34385_v21  ;;  %v40190_v21 = vand.u32 4294901760, %v34440_v14 }
 0x9da   : > { %26980 = vmatpush3.bf16.xpose.msra.mxu1 %v26979_v33  ;;  %26837 = vmatprep.subr.bf16.mxu0 %v39685_v34  ;;  %v27027_v14 = vpack.c.bf16 %v9768_v52, %v9761_v32  ;;  %v34788_v32 = vsel %vm557_vm1, %v415_v15, 0  ;;  %v34791_v52 = vsel %vm557_vm1, %v416_v63, 0 }
 0x9db   : > { %26981 = vmatprep.subr.bf16.mxu1 %v39685_v34  ;;  %v27009_v33 = vpack.c.bf16 %v40173_v7, %v40172_v26  ;;  %v26871_v56 = vpack.c.bf16 %v40179_v28, %v40178_v55  ;;  %v27018_v43 = vpack.c.bf16 %v40185_v47, %v40184_v27  ;;  %v27021_v26 = vpack.c.bf16 %v40189_v10, %v40188_v53  ;;  %v404_v27 = vld [vmem:[%s32259_s14 + $0x338] sm:$0xff]  ;;  %v419_v47 = vld [vmem:[%s32259_s14 + $0x3b0] sm:$0xff] }
 0x9dc   : > { %v26880_v7 = vpack.c.bf16 %v40191_v58, %v40190_v21  ;;  %v34863_v53 = vsel %vm557_vm1, %v404_v27, 0  ;;  %v34866_v10 = vsel %vm557_vm1, %v419_v47, 0 }
 0x9dd   : > { %v39407_v58 = vand.u32 4294901760, %v34863_v53 }
 0x9e0   : > { %22620 = vmatmul.mubr.f32.vlgmr.msra.gmra.mrb[4].mxu0 %v32566_v37 }
 0x9e1   : > { %26839 = vmatpush3.bf16.xpose.msra.mxu0 %v33953_v25  ;;  %22830 = vmatmul.mubr.f32.vlgmr.msra.gmra.mrb[4].mxu1 %v32566_v37 }
 0x9e2   : > { %26983 = vmatpush3.bf16.xpose.msra.mxu1 %v33959_v50  ;;  %26840 = vmatprep.subr.bf16.mxu0 %v39685_v34 }
 0x9e3   : > { %26984 = vmatprep.subr.bf16.mxu1 %v39685_v34  ;;  %22654 = vmatprep.mubr.msk.f32.mxu0 %vm28907_vm0, %v39694_v24 }
 0x9e4   : > { %22864 = vmatprep.mubr.msk.f32.mxu1 %vm28907_vm0, %v39694_v24 }
 0x9e9   : > { %26842 = vmatpush3.bf16.xpose.msra.mxu0 %v33995_v23 }
 0x9ea   : > { %26986 = vmatpush3.bf16.xpose.msra.mxu1 %v34001_v35  ;;  %26843 = vmatprep.subr.bf16.mxu0 %v39685_v34 }
 0x9eb   : > { %26987 = vmatprep.subr.bf16.mxu1 %v39685_v34 }
 0x9f1   : > { %26845 = vmatpush3.bf16.xpose.msra.mxu0 %v34031_v62 }
 0x9f2   : > { %26989 = vmatpush3.bf16.xpose.msra.mxu1 %v34037_v36  ;;  %26846 = vmatprep.subr.bf16.mxu0 %v39685_v34 }
 0x9f3   : > { %26990 = vmatprep.subr.bf16.mxu1 %v39685_v34 }
 0x9f9   : > { %26848 = vmatpush3.bf16.xpose.msra.mxu0 %v34067_v19 }
 0x9fa   : > { %26992 = vmatpush3.bf16.xpose.msra.mxu1 %v34073_v11  ;;  %26849 = vmatprep.subr.bf16.mxu0 %v39685_v34 }
 0x9fb   : > { %26993 = vmatprep.subr.bf16.mxu1 %v39685_v34 }
 0xa01   : > { %26851 = vmatpush3.bf16.xpose.msra.mxu0 %v34103_v18 }
 0xa02   : > { %26995 = vmatpush3.bf16.xpose.msra.mxu1 %v34109_v1  ;;  %26852 = vmatprep.subr.bf16.mxu0 %v39685_v34 }
 0xa03   : > { %26996 = vmatprep.subr.bf16.mxu1 %v39685_v34 }
 0xa09   : > { %26854 = vmatpush3.bf16.xpose.msra.mxu0 %v34139_v3 }
 0xa0a   : > { %26998 = vmatpush3.bf16.xpose.msra.mxu1 %v34145_v39  ;;  %26855 = vmatprep.subr.bf16.mxu0 %v39685_v34 }
 0xa0b   : > { %26999 = vmatprep.subr.bf16.mxu1 %v39685_v34 }
 0xa11   : > { %26857 = vmatpush3.bf16.xpose.msra.mxu0 %v40161_v13 }
 0xa12   : > { %27001 = vmatpush3.bf16.xpose.msra.mxu1 %v40162_v38  ;;  %26858 = vmatprep.subr.bf16.mxu0 %v39685_v34 }
 0xa13   : > { %27002 = vmatprep.subr.bf16.mxu1 %v39685_v34 }
 0xa19   : > { %26860 = vmatpush3.bf16.xpose.msra.mxu0 %v40163_v40 }
 0xa1a   : > { %27004 = vmatpush3.bf16.xpose.msra.mxu1 %v40164_v60  ;;  %26861 = vmatprep.subr.bf16.mxu0 %v39685_v34 }
 0xa1b   : > { %27005 = vmatprep.subr.bf16.mxu1 %v39685_v34 }
 0xa20   : > { %22655 = vmatmul.mubr.f32.vlgmr.msra.gmra.mrb[4].mxu0 %v40169_v44 }
 0xa21   : > { %26863 = vmatpush3.bf16.xpose.msra.mxu0 %v26862_v51  ;;  %22865 = vmatmul.mubr.f32.vlgmr.msra.gmra.mrb[4].mxu1 %v40169_v44  ;;  %v26868_v51 = vpack.c.bf16 %v40175_v42, %v40174_v22  ;;  %v401_v22 = vld [vmem:[%s32259_s14 + $0x320] sm:$0xff]  ;;  %v402_v42 = vld [vmem:[%s32259_s14 + $0x328] sm:$0xff] }
 0xa22   : > { %27007 = vmatpush3.bf16.xpose.msra.mxu1 %v27006_v29  ;;  %26864 = vmatprep.subr.bf16.mxu0 %v39685_v34  ;;  %v27015_v29 = vpack.c.bf16 %v40181_v0, %v40180_v17  ;;  %v34824_v55 = vsel %vm557_vm1, %v401_v22, 0  ;;  %v34827_v28 = vsel %vm557_vm1, %v402_v42, 0  ;;  %v34833_v17 = vsel %vm557_vm1, %v418_v30, 0  ;;  %v407_v42 = vld [vmem:[%s32259_s14 + $0x350] sm:$0xff] }
 0xa23   : > { %27008 = vmatprep.subr.bf16.mxu1 %v39685_v34  ;;  %22689 = vmatprep.mubr.msk.f32.mxu0 %vm28907_vm0, %v39694_v24  ;;  %v39416_v0 = vand.u32 4294901760, %v34824_v55  ;;  %v39413_v12 = vand.u32 4294901760, %v34833_v17  ;;  %v423_v30 = vld [vmem:[%s32259_s14 + $0x3d0] sm:$0xff] }
 0xa24   : > { %22899 = vmatprep.mubr.msk.f32.mxu1 %vm28907_vm0, %v39694_v24 }
 0xa29   : > { %26866 = vmatpush3.bf16.xpose.msra.mxu0 %v26865_v8  ;;  %v26877_v8 = vpack.c.bf16 %v40187_v49, %v40186_v4 }
 0xa2a   : > { %27010 = vmatpush3.bf16.xpose.msra.mxu1 %v27009_v33  ;;  %26867 = vmatprep.subr.bf16.mxu0 %v39685_v34  ;;  %v27024_v33 = vpack.c.bf16 %v40193_v16, %v40192_v59  ;;  %v405_v16 = vld [vmem:[%s32259_s14 + $0x340] sm:$0xff] }
 0xa2b   : > { %27011 = vmatprep.subr.bf16.mxu1 %v39685_v34 }
 0xa31   : > { %26869 = vmatpush3.bf16.xpose.msra.mxu0 %v26868_v51  ;;  %v417_v51 = vld [vmem:[%s32259_s14 + $0x3a0] sm:$0xff] }
 0xa32   : > { %27013 = vmatpush3.bf16.xpose.msra.mxu1 %v27012_v9  ;;  %26870 = vmatprep.subr.bf16.mxu0 %v39685_v34 }
 0xa33   : > { %27014 = vmatprep.subr.bf16.mxu1 %v39685_v34 }
 0xa39   : > { %26872 = vmatpush3.bf16.xpose.msra.mxu0 %v26871_v56  ;;  %v34830_v56 = vsel %vm557_vm1, %v417_v51, 0  ;;  %v408_v51 = vld [vmem:[%s32259_s14 + $0x358] sm:$0xff] }
 0xa3a   : > { %27016 = vmatpush3.bf16.xpose.msra.mxu1 %v27015_v29  ;;  %26873 = vmatprep.subr.bf16.mxu0 %v39685_v34  ;;  %v39415_v29 = vand.u32 4294901760, %v34827_v28  ;;  %v39414_v2 = vand.u32 4294901760, %v34830_v56 }
 0xa3b   : > { %27017 = vmatprep.subr.bf16.mxu1 %v39685_v34 }
 0xa3c   : > { %v34851_v4 = vpack.c.bf16 %v39415_v29, %v39416_v0  ;;  %v34857_v49 = vpack.c.bf16 %v39413_v12, %v39414_v2  ;;  %v428_v12 = vld [vmem:[%s32259_s14 + $0x3f8] sm:$0xff] }
 0xa41   : > { %26875 = vmatpush3.bf16.xpose.msra.mxu0 %v26874_v6  ;;  %v403_v6 = vld [vmem:[%s32259_s14 + $0x330] sm:$0xff] }
 0xa42   : > { %27019 = vmatpush3.bf16.xpose.msra.mxu1 %v27018_v43  ;;  %26876 = vmatprep.subr.bf16.mxu0 %v39685_v34  ;;  %v420_v43 = vld [vmem:[%s32259_s14 + $0x3b8] sm:$0xff] }
 0xa43   : > { %27020 = vmatprep.subr.bf16.mxu1 %v39685_v34 }
 0xa49   : > { %26878 = vmatpush3.bf16.xpose.msra.mxu0 %v26877_v8  ;;  %v34860_v8 = vsel %vm557_vm1, %v403_v6, 0  ;;  %v424_v6 = vld [vmem:[%s32259_s14 + $0x3d8] sm:$0xff] }
 0xa4a   : > { %27022 = vmatpush3.bf16.xpose.msra.mxu1 %v27021_v26  ;;  %26879 = vmatprep.subr.bf16.mxu0 %v39685_v34  ;;  %v34869_v26 = vsel %vm557_vm1, %v420_v43, 0  ;;  %v39408_v21 = vand.u32 4294901760, %v34860_v8  ;;  %v34932_v43 = vsel %vm557_vm1, %v407_v42, 0 }
 0xa4b   : > { %27023 = vmatprep.subr.bf16.mxu1 %v39685_v34  ;;  %v39405_v59 = vand.u32 4294901760, %v34869_v26 }
 0xa51   : > { %26881 = vmatpush3.bf16.xpose.msra.mxu0 %v26880_v7  ;;  %v39406_v7 = vand.u32 4294901760, %v34866_v10 }
 0xa52   : > { %27025 = vmatpush3.bf16.xpose.msra.mxu1 %v27024_v33  ;;  %26882 = vmatprep.subr.bf16.mxu0 %v39685_v34  ;;  %v406_v33 = vld [vmem:[%s32259_s14 + $0x348] sm:$0xff] }
 0xa53   : > { %27026 = vmatprep.subr.bf16.mxu1 %v39685_v34 }
 0xa59   : > { %26884 = vmatpush3.bf16.xpose.msra.mxu0 %v26883_v48  ;;  %v422_v48 = vld [vmem:[%s32259_s14 + $0x3c8] sm:$0xff] }
 0xa5a   : > { %27028 = vmatpush3.bf16.xpose.msra.mxu1 %v27027_v14  ;;  %26885 = vmatprep.subr.bf16.mxu0 %v39685_v34  ;;  %v34887_v14 = vpack.c.bf16 %v39407_v58, %v39408_v21  ;;  %v34905_v61 = vsel %vm557_vm1, %v422_v48, 0  ;;  %v39410_v48 = vand.u32 4294901760, %v34932_v43 }
 0xa5b   : > { %27029 = vmatprep.subr.bf16.mxu1 %v39685_v34  ;;  %v39401_v22 = vand.u32 4294901760, %v34905_v61 }
 0xa60   : > { %22690 = vmatmul.mubr.f32.vlgmr.msra.gmra.mrb[4].mxu0 %v32519_v46 }
 0xa61   : > { %26887 = vmatpush3.bf16.xpose.msra.mxu0 %v33953_v25  ;;  %22900 = vmatmul.mubr.f32.vlgmr.msra.gmra.mrb[4].mxu1 %v32519_v46  ;;  %v397_v25 = vld [vmem:[%s32259_s14 + $0x300] sm:$0xff] }
 0xa62   : > { %27031 = vmatpush3.bf16.xpose.msra.mxu1 %v33959_v50  ;;  %26888 = vmatprep.subr.bf16.mxu0 %v39685_v34  ;;  %v398_v50 = vld [vmem:[%s32259_s14 + $0x308] sm:$0xff] }
 0xa63   : > { %27032 = vmatprep.subr.bf16.mxu1 %v39685_v34  ;;  %22724 = vmatprep.mubr.msk.f32.mxu0 %vm28907_vm0, %v39694_v24 }
 0xa64   : > { %22934 = vmatprep.mubr.msk.f32.mxu1 %vm28907_vm0, %v39694_v24 }
 0xa69   : > { %26890 = vmatpush3.bf16.xpose.msra.mxu0 %v33995_v23  ;;  %v413_v23 = vld [vmem:[%s32259_s14 + $0x380] sm:$0xff] }
 0xa6a   : > { %27034 = vmatpush3.bf16.xpose.msra.mxu1 %v34001_v35  ;;  %26891 = vmatprep.subr.bf16.mxu0 %v39685_v34  ;;  %v414_v35 = vld [vmem:[%s32259_s14 + $0x388] sm:$0xff] }
 0xa6b   : > { %27035 = vmatprep.subr.bf16.mxu1 %v39685_v34 }
 0xa71   : > { %26893 = vmatpush3.bf16.xpose.msra.mxu0 %v34031_v62  ;;  %v34746_v62 = vsel %vm557_vm1, %v397_v25, 0  ;;  %v34893_v25 = vpack.c.bf16 %v39405_v59, %v39406_v7 }
 0xa72   : > { %27037 = vmatpush3.bf16.xpose.msra.mxu1 %v34037_v36  ;;  %26894 = vmatprep.subr.bf16.mxu0 %v39685_v34  ;;  %v34749_v36 = vsel %vm557_vm1, %v398_v50, 0  ;;  %v34896_v50 = vsel %vm557_vm1, %v405_v16, 0  ;;  %v34935_v16 = vsel %vm557_vm1, %v408_v51, 0 }
 0xa73   : > { %27038 = vmatprep.subr.bf16.mxu1 %v39685_v34  ;;  %v39404_v45 = vand.u32 4294901760, %v34896_v50 }
 0xa79   : > { %26896 = vmatpush3.bf16.xpose.msra.mxu0 %v34067_v19  ;;  %v34755_v19 = vsel %vm557_vm1, %v414_v35, 0  ;;  %v34902_v35 = vsel %vm557_vm1, %v421_v41, 0  ;;  %v34941_v41 = vsel %vm557_vm1, %v424_v6, 0  ;;  %v425_v6 = vld [vmem:[%s32259_s14 + $0x3e0] sm:$0xff] }
 0xa7a   : > { %27040 = vmatpush3.bf16.xpose.msra.mxu1 %v34073_v11  ;;  %26897 = vmatprep.subr.bf16.mxu0 %v39685_v34  ;;  %v10259_v11 = vand.u32 4294901760, %v34746_v62  ;;  %v39402_v63 = vand.u32 4294901760, %v34902_v35  ;;  %v39411_v51 = vand.u32 4294901760, %v34941_v41  ;;  %v34974_v21 = vsel %vm557_vm1, %v425_v6, 0  ;;  %v411_v6 = vld [vmem:[%s32259_s14 + $0x370] sm:$0xff] }
 0xa7b   : > { %27041 = vmatprep.subr.bf16.mxu1 %v39685_v34 }
 0xa7c   : > { %v34929_v47 = vpack.c.bf16 %v39401_v22, %v39402_v63  ;;  %v39409_v22 = vand.u32 4294901760, %v34935_v16  ;;  %v410_v63 = vld [vmem:[%s32259_s14 + $0x368] sm:$0xff]  ;;  %v34994_v2 = vsub.f32 %v34746_v62, %v10259_v11 }
 0xa7d   : > { %v34971_v58 = vsel %vm557_vm1, %v410_v63, 0 }
 0xa81   : > { %26899 = vmatpush3.bf16.xpose.msra.mxu0 %v34103_v18 }
 0xa82   : > { %27043 = vmatpush3.bf16.xpose.msra.mxu1 %v34109_v1  ;;  %26900 = vmatprep.subr.bf16.mxu0 %v39685_v34  ;;  %v10951_v1 = vand.u32 4294901760, %v34755_v19 }
 0xa83   : > { %27044 = vmatprep.subr.bf16.mxu1 %v39685_v34 }
 0xa84   : > { %v35015_v62 = vsub.f32 %v34755_v19, %v10951_v1 }
 0xa89   : > { %26902 = vmatpush3.bf16.xpose.msra.mxu0 %v34139_v3  ;;  %v10262_v3 = vand.u32 4294901760, %v34749_v36 }
 0xa8a   : > { %27046 = vmatpush3.bf16.xpose.msra.mxu1 %v34145_v39  ;;  %26903 = vmatprep.subr.bf16.mxu0 %v39685_v34  ;;  %v34752_v39 = vsel %vm557_vm1, %v413_v23, 0  ;;  %v34899_v23 = vsel %vm557_vm1, %v406_v33, 0  ;;  %v34938_v33 = vsel %vm557_vm1, %v423_v30, 0  ;;  %v409_v30 = vld [vmem:[%s32259_s14 + $0x360] sm:$0xff] }
 0xa8b   : > { %27047 = vmatprep.subr.bf16.mxu1 %v39685_v34  ;;  %v10948_v18 = vand.u32 4294901760, %v34752_v39  ;;  %v34773_v31 = vpack.c.bf16 %v10262_v3, %v10259_v11  ;;  %v39403_v15 = vand.u32 4294901760, %v34899_v23  ;;  %v39412_v42 = vand.u32 4294901760, %v34938_v33 }
 0xa8c   : > { %v34968_v7 = vsel %vm557_vm1, %v409_v30, 0  ;;  %v39419_v30 = vand.u32 4294901760, %v34974_v21  ;;  %v34999_v29 = vsub.f32 %v34749_v36, %v10262_v3 }
 0xa8d   : > { %v34779_v20 = vpack.c.bf16 %v10951_v1, %v10948_v18  ;;  %v34923_v27 = vpack.c.bf16 %v39403_v15, %v39404_v45  ;;  %v426_v15 = vld [vmem:[%s32259_s14 + $0x3e8] sm:$0xff]  ;;  %v34959_v45 = vpack.c.bf16 %v39409_v22, %v39410_v48  ;;  %v34965_v59 = vpack.c.bf16 %v39411_v51, %v39412_v42  ;;  %v412_v42 = vld [vmem:[%s32259_s14 + $0x378] sm:$0xff] }
 0xa8e   : > { %v34977_v22 = vsel %vm557_vm1, %v426_v15, 0  ;;  %v39421_v48 = vand.u32 4294901760, %v34968_v7  ;;  %v39420_v51 = vand.u32 4294901760, %v34971_v58  ;;  %v427_v15 = vld [vmem:[%s32259_s14 + $0x3f0] sm:$0xff]  ;;  %v35004_v0 = vsub.f32 %v34752_v39, %v10948_v18 }
 0xa8f   : > { %v39418_v63 = vand.u32 4294901760, %v34977_v22  ;;  %v35024_v39 = vsel %vm557_vm1, %v411_v6, 0  ;;  %v35027_v11 = vsel %vm557_vm1, %v412_v42, 0  ;;  %v35030_v3 = vsel %vm557_vm1, %v427_v15, 0 }
 0xa90   : > { %v35033_v18 = vsel %vm557_vm1, %v428_v12, 0  ;;  %v39424_v19 = vand.u32 4294901760, %v35024_v39  ;;  %v39422_v1 = vand.u32 4294901760, %v35027_v11  ;;  %v39425_v6 = vand.u32 4294901760, %v34999_v29 }
 0xa91   : > { %26905 = vmatpush3.bf16.xpose.msra.mxu0 %v40161_v13  ;;  %v10265_v13 = vand.u32 4294901760, %v34782_v54  ;;  %v35021_v36 = vpack.c.bf16 %v39418_v63, %v39419_v30  ;;  %v39423_v63 = vand.u32 4294901760, %v34994_v2  ;;  %v39427_v42 = vand.u32 4294901760, %v35030_v3 }
 0xa92   : > { %27049 = vmatpush3.bf16.xpose.msra.mxu1 %v40162_v38  ;;  %26906 = vmatprep.subr.bf16.mxu0 %v39685_v34  ;;  %v10268_v38 = vand.u32 4294901760, %v34785_v5  ;;  %v39428_v12 = vand.u32 4294901760, %v35004_v0  ;;  %v35066_v30 = vpack.c.bf16 %v39422_v1, %v39424_v19 }
 0xa93   : > { %27050 = vmatprep.subr.bf16.mxu1 %v39685_v34  ;;  %40196 = vst [vmem:[#allocation5_spill] sm:$0xff] %v35021_v36 }
 0xa94   : > { %v34815_v57 = vpack.c.bf16 %v10268_v38, %v10265_v13  ;;  %40197 = vst [vmem:[#allocation7_spill] sm:$0xff] %v35066_v30  ;;  %v11042_v1 = vsub.f32 %v35004_v0, %v39428_v12 }
 0xa99   : > { %26908 = vmatpush3.bf16.xpose.msra.mxu0 %v40163_v40  ;;  %v10954_v40 = vand.u32 4294901760, %v34788_v32 }
 0xa9a   : > { %27052 = vmatpush3.bf16.xpose.msra.mxu1 %v40164_v60  ;;  %27053 = vmatprep.subr.bf16.mxu0 %v39685_v34  ;;  %v39417_v60 = vand.u32 4294901760, %v34791_v52 }
 0xa9b   : > { %27197 = vmatprep.subr.bf16.mxu1 %v39685_v34  ;;  %v35060_v15 = vsub.f32 %v34788_v32, %v10954_v40  ;;  %v40199_v32 = vand.u32 4294901760, %v35033_v18 }
 0xa9c   : > { %v34821_v9 = vpack.c.bf16 %v39417_v60, %v10954_v40  ;;  %v35010_v60 = vpack.c.bf16 %v39420_v51, %v39421_v48  ;;  %v35050_v51 = vsub.f32 %v34782_v54, %v10265_v13  ;;  %v35055_v48 = vsub.f32 %v34785_v5, %v10268_v38 }
 0xa9d   : > { %v10353_v54 = vsub.f32 %v34994_v2, %v39423_v63  ;;  %v10360_v5 = vsub.f32 %v34999_v29, %v39425_v6  ;;  %v40198_v13 = vand.u32 4294901760, %v34791_v52  ;;  %v35083_v40 = vpack.c.bf16 %v40199_v32, %v39427_v42 }
 0xa9e   : > { %40195 = vst [vmem:[#allocation10_spill] sm:$0xff] %v35010_v60  ;;  %v40201_v63 = vand.u32 4294901760, %v35015_v62  ;;  %v11043_v32 = vand.u32 4294901760, %v11042_v1 }
 0xa9f   : > { %v35077_v38 = vsub.f32 %v34791_v52, %v40198_v13  ;;  %40200 = vst [vmem:[#allocation9_spill] sm:$0xff] %v35083_v40  ;;  %v10354_v6 = vand.u32 4294901760, %v10353_v54  ;;  %v10361_v44 = vand.u32 4294901760, %v10360_v5  ;;  %v40203_v5 = vand.u32 4294901760, %v34827_v28 }
 0xaa0   : > { %22725 = vmatmul.mubr.f32.vlgmr.msra.gmra.mrb[4].mxu0 %v32519_v46  ;;  %v11049_v19 = vsub.f32 %v35015_v62, %v40201_v63  ;;  %v40202_v63 = vand.u32 4294901760, %v34824_v55  ;;  %v40204_v52 = vand.u32 4294901760, %v34830_v56 }
 0xaa1   : > { %22935 = vmatmul.mubr.f32.vlgmr.msra.gmra.mrb[4].mxu1 %v32519_v46  ;;  %27055 = vmatpush3.bf16.xpose.msra.mxu0 %v34773_v31  ;;  %v35107_v13 = vsub.f32 %v34827_v28, %v40203_v5  ;;  %v27078_v1 = vpack.c.bf16 %v10361_v44, %v10354_v6  ;;  %v40208_v5 = vand.u32 4294901760, %v35060_v15  ;;  %v40209_v44 = vand.u32 4294901760, %v35077_v38 }
 0xaa2   : > { %27199 = vmatpush3.bf16.xpose.msra.mxu1 %v34779_v20  ;;  %27056 = vmatprep.subr.bf16.mxu0 %v39685_v34  ;;  %v11050_v42 = vand.u32 4294901760, %v11049_v19  ;;  %v35102_v54 = vsub.f32 %v34824_v55, %v40202_v63  ;;  %v35112_v19 = vsub.f32 %v34830_v56, %v40204_v52  ;;  %v40207_v63 = vand.u32 4294901760, %v34833_v17  ;;  %v40210_v52 = vld [vmem:[#allocation8_spill] sm:$0xff] }
 0xaa3   : > { %27200 = vmatprep.subr.bf16.mxu1 %v39685_v34  ;;  %22969 = vmatprep.mubr.msk.f32.mxu0 %vm28907_vm0, %v39694_v24  ;;  %v11056_v56 = vsub.f32 %v35060_v15, %v40208_v5  ;;  %v11063_v6 = vsub.f32 %v35077_v38, %v40209_v44 }
 0xaa4   : > { %23179 = vmatprep.mubr.msk.f32.mxu1 %vm28907_vm0, %v39694_v24  ;;  %v27222_v28 = vpack.c.bf16 %v11050_v42, %v11043_v32 }
 0xaa5   : > { %v11057_v42 = vand.u32 4294901760, %v11056_v56  ;;  %v11064_v32 = vand.u32 4294901760, %v11063_v6  ;;  %v40213_v56 = vand.u32 4294901760, %v34866_v10 }
 0xaa7   : > { %v35156_v44 = vsub.f32 %v34866_v10, %v40213_v56 }
 0xaa9   : > { %27058 = vmatpush3.bf16.xpose.msra.mxu0 %v34815_v57 }
 0xaaa   : > { %27202 = vmatpush3.bf16.xpose.msra.mxu1 %v34821_v9  ;;  %27059 = vmatprep.subr.bf16.mxu0 %v39685_v34 }
 0xaab   : > { %27203 = vmatprep.subr.bf16.mxu1 %v39685_v34 }
 0xab1   : > { %27061 = vmatpush3.bf16.xpose.msra.mxu0 %v34851_v4 }
 0xab2   : > { %27205 = vmatpush3.bf16.xpose.msra.mxu1 %v34857_v49  ;;  %27062 = vmatprep.subr.bf16.mxu0 %v39685_v34 }
 0xab3   : > { %27206 = vmatprep.subr.bf16.mxu1 %v39685_v34 }
 0xab9   : > { %27064 = vmatpush3.bf16.xpose.msra.mxu0 %v34887_v14 }
 0xaba   : > { %27208 = vmatpush3.bf16.xpose.msra.mxu1 %v34893_v25  ;;  %27065 = vmatprep.subr.bf16.mxu0 %v39685_v34 }
 0xabb   : > { %27209 = vmatprep.subr.bf16.mxu1 %v39685_v34 }
 0xac1   : > { %27067 = vmatpush3.bf16.xpose.msra.mxu0 %v34923_v27 }
 0xac2   : > { %27211 = vmatpush3.bf16.xpose.msra.mxu1 %v34929_v47  ;;  %27068 = vmatprep.subr.bf16.mxu0 %v39685_v34 }
 0xac3   : > { %27212 = vmatprep.subr.bf16.mxu1 %v39685_v34 }
 0xac9   : > { %27070 = vmatpush3.bf16.xpose.msra.mxu0 %v34959_v45 }
 0xaca   : > { %27214 = vmatpush3.bf16.xpose.msra.mxu1 %v34965_v59  ;;  %27071 = vmatprep.subr.bf16.mxu0 %v39685_v34 }
 0xacb   : > { %27215 = vmatprep.subr.bf16.mxu1 %v39685_v34 }
 0xad1   : > { %27073 = vmatpush3.bf16.xpose.msra.mxu0 %v35010_v60  ;;  %v39437_v60 = vand.u32 4294901760, %v35102_v54 }
 0xad2   : > { %27217 = vmatpush3.bf16.xpose.msra.mxu1 %v35021_v36  ;;  %27074 = vmatprep.subr.bf16.mxu0 %v39685_v34  ;;  %v40205_v36 = vand.u32 4294901760, %v35050_v51 }
 0xad3   : > { %27218 = vmatprep.subr.bf16.mxu1 %v39685_v34 }
 0xad4   : > { %v10367_v12 = vsub.f32 %v35050_v51, %v40205_v36 }
 0xad6   : > { %v10368_v36 = vand.u32 4294901760, %v10367_v12  ;;  %v40211_v12 = vand.u32 4294901760, %v34860_v8 }
 0xad9   : > { %27076 = vmatpush3.bf16.xpose.msra.mxu0 %v35066_v30  ;;  %v35123_v30 = vsub.f32 %v34833_v17, %v40207_v63  ;;  %v39438_v17 = vand.u32 4294901760, %v35107_v13  ;;  %v39440_v63 = vand.u32 4294901760, %v35112_v19 }
 0xada   : > { %27220 = vmatpush3.bf16.xpose.msra.mxu1 %v35083_v40  ;;  %27077 = vmatprep.subr.bf16.mxu0 %v39685_v34  ;;  %v40206_v40 = vand.u32 4294901760, %v35055_v48 }
 0xadb   : > { %27221 = vmatprep.subr.bf16.mxu1 %v39685_v34  ;;  %v39439_v5 = vand.u32 4294901760, %v35123_v30  ;;  %v11070_v10 = vsub.f32 %v35112_v19, %v39440_v63 }
 0xadc   : > { %v10374_v55 = vsub.f32 %v35055_v48, %v40206_v40 }
 0xade   : > { %v10375_v40 = vand.u32 4294901760, %v10374_v55  ;;  %v40212_v55 = vand.u32 4294901760, %v34863_v53 }
 0xae0   : > { %22970 = vmatmul.mubr.f32.vlgmr.msra.gmra.mrb[6].mxu0 %v40210_v52  ;;  %v27081_v6 = vpack.c.bf16 %v10375_v40, %v10368_v36  ;;  %v11077_v36 = vsub.f32 %v35123_v30, %v39439_v5  ;;  %v40215_v5 = vand.u32 4294901760, %v34896_v50 }
 0xae1   : > { %27079 = vmatpush3.bf16.xpose.msra.mxu0 %v27078_v1  ;;  %23180 = vmatmul.mubr.f32.vlgmr.msra.gmra.mrb[6].mxu1 %v40210_v52  ;;  %v35144_v1 = vsub.f32 %v34860_v8, %v40211_v12  ;;  %v10381_v52 = vsub.f32 %v35102_v54, %v39437_v60  ;;  %v10388_v8 = vsub.f32 %v35107_v13, %v39438_v17 }
 0xae2   : > { %27223 = vmatpush3.bf16.xpose.msra.mxu1 %v27222_v28  ;;  %27080 = vmatprep.subr.bf16.mxu0 %v39685_v34  ;;  %v35149_v28 = vsub.f32 %v34863_v53, %v40212_v55  ;;  %v40214_v53 = vand.u32 4294901760, %v34869_v26  ;;  %v27225_v55 = vpack.c.bf16 %v11064_v32, %v11057_v42  ;;  %v11078_v42 = vand.u32 4294901760, %v11077_v36 }
 0xae3   : > { %27224 = vmatprep.subr.bf16.mxu1 %v39685_v34  ;;  %23004 = vmatprep.mubr.msk.f32.mxu0 %vm28907_vm0, %v39694_v24  ;;  %v10382_v40 = vand.u32 4294901760, %v10381_v52  ;;  %v10389_v56 = vand.u32 4294901760, %v10388_v8  ;;  %v39441_v60 = vand.u32 4294901760, %v35144_v1  ;;  %v39443_v32 = vand.u32 4294901760, %v35156_v44 }
 0xae4   : > { %23214 = vmatprep.mubr.msk.f32.mxu1 %vm28907_vm0, %v39694_v24  ;;  %v35167_v12 = vsub.f32 %v34869_v26, %v40214_v53  ;;  %v39442_v17 = vand.u32 4294901760, %v35149_v28  ;;  %v11071_v26 = vand.u32 4294901760, %v11070_v10  ;;  %v40216_v52 = vand.u32 4294901760, %v34899_v23 }
 0xae5   : > { %v27084_v36 = vpack.c.bf16 %v10389_v56, %v10382_v40  ;;  %v10395_v63 = vsub.f32 %v35144_v1, %v39441_v60 }
 0xae6   : > { %v35189_v8 = vsub.f32 %v34899_v23, %v40216_v52  ;;  %v27228_v23 = vpack.c.bf16 %v11078_v42, %v11071_v26  ;;  %v40219_v40 = vand.u32 4294901760, %v35167_v12 }
 0xae7   : > { %v10396_v52 = vand.u32 4294901760, %v10395_v63 }
 0xae8   : > { %v11091_v56 = vsub.f32 %v35167_v12, %v40219_v40  ;;  %v40220_v40 = vand.u32 4294901760, %v34932_v43 }
 0xae9   : > { %27082 = vmatpush3.bf16.xpose.msra.mxu0 %v27081_v6  ;;  %v35184_v6 = vsub.f32 %v34896_v50, %v40215_v5  ;;  %v10402_v50 = vsub.f32 %v35149_v28, %v39442_v17  ;;  %v40218_v5 = vand.u32 4294901760, %v34905_v61  ;;  %v39445_v17 = vand.u32 4294901760, %v35189_v8 }
 0xaea   : > { %27226 = vmatpush3.bf16.xpose.msra.mxu1 %v27225_v55  ;;  %27083 = vmatprep.subr.bf16.mxu0 %v39685_v34  ;;  %v40217_v55 = vand.u32 4294901760, %v34902_v35  ;;  %v11092_v26 = vand.u32 4294901760, %v11091_v56  ;;  %v35222_v63 = vsub.f32 %v34932_v43, %v40220_v40  ;;  %v40223_v40 = vand.u32 4294901760, %v34941_v41 }
 0xaeb   : > { %27227 = vmatprep.subr.bf16.mxu1 %v39685_v34  ;;  %v35205_v53 = vsub.f32 %v34905_v61, %v40218_v5  ;;  %v39444_v60 = vand.u32 4294901760, %v35184_v6  ;;  %v10416_v43 = vsub.f32 %v35189_v8, %v39445_v17 }
 0xaec   : > { %v35194_v10 = vsub.f32 %v34902_v35, %v40217_v55  ;;  %v11084_v35 = vsub.f32 %v35156_v44, %v39443_v32  ;;  %v10403_v55 = vand.u32 4294901760, %v10402_v50  ;;  %v35243_v5 = vsub.f32 %v34941_v41, %v40223_v40 }
 0xaed   : > { %v10409_v32 = vsub.f32 %v35184_v6, %v39444_v60  ;;  %v39447_v60 = vand.u32 4294901760, %v35222_v63 }
 0xaee   : > { %v11085_v61 = vand.u32 4294901760, %v11084_v35  ;;  %v39446_v42 = vand.u32 4294901760, %v35194_v10  ;;  %v27087_v56 = vpack.c.bf16 %v10403_v55, %v10396_v52  ;;  %v40224_v52 = vand.u32 4294901760, %v35205_v53 }
 0xaf0   : > { %v11105_v55 = vsub.f32 %v35205_v53, %v40224_v52  ;;  %v40225_v52 = vand.u32 4294901760, %v34968_v7 }
 0xaf1   : > { %27085 = vmatpush3.bf16.xpose.msra.mxu0 %v27084_v36  ;;  %v40221_v36 = vand.u32 4294901760, %v34935_v16 }
 0xaf2   : > { %27229 = vmatpush3.bf16.xpose.msra.mxu1 %v27228_v23  ;;  %27086 = vmatprep.subr.bf16.mxu0 %v39685_v34  ;;  %v40222_v23 = vand.u32 4294901760, %v34938_v33 }
 0xaf3   : > { %27230 = vmatprep.subr.bf16.mxu1 %v39685_v34  ;;  %v35227_v50 = vsub.f32 %v34935_v16, %v40221_v36  ;;  %v27231_v16 = vpack.c.bf16 %v11092_v26, %v11085_v61  ;;  %v10410_v36 = vand.u32 4294901760, %v10409_v32  ;;  %v11106_v61 = vand.u32 4294901760, %v11105_v55 }
 0xaf4   : > { %v35232_v35 = vsub.f32 %v34938_v33, %v40222_v23  ;;  %v11098_v33 = vsub.f32 %v35194_v10, %v39446_v42  ;;  %v10417_v23 = vand.u32 4294901760, %v10416_v43  ;;  %v35260_v32 = vsub.f32 %v34968_v7, %v40225_v52 }
 0xaf5   : > { %v39448_v17 = vand.u32 4294901760, %v35227_v50  ;;  %v10423_v42 = vsub.f32 %v35222_v63, %v39447_v60  ;;  %v40228_v52 = vand.u32 4294901760, %v34977_v22 }
 0xaf6   : > { %v11099_v41 = vand.u32 4294901760, %v11098_v33  ;;  %v39449_v26 = vand.u32 4294901760, %v35232_v35  ;;  %v27090_v55 = vpack.c.bf16 %v10417_v23, %v10410_v36  ;;  %v40229_v36 = vand.u32 4294901760, %v35243_v5 }
 0xaf7   : > { %v10430_v7 = vsub.f32 %v35227_v50, %v39448_v17  ;;  %v35281_v40 = vsub.f32 %v34977_v22, %v40228_v52  ;;  %v39450_v60 = vand.u32 4294901760, %v35260_v32 }
 0xaf8   : > { %v11119_v23 = vsub.f32 %v35243_v5, %v40229_v36  ;;  %v40230_v36 = vand.u32 4294901760, %v35024_v39 }
 0xaf9   : > { %27088 = vmatpush3.bf16.xpose.msra.mxu0 %v27087_v56  ;;  %v40226_v56 = vand.u32 4294901760, %v34971_v58 }
 0xafa   : > { %27232 = vmatpush3.bf16.xpose.msra.mxu1 %v27231_v16  ;;  %27089 = vmatprep.subr.bf16.mxu0 %v39685_v34  ;;  %v40227_v16 = vand.u32 4294901760, %v34974_v21 }
 0xafb   : > { %27233 = vmatprep.subr.bf16.mxu1 %v39685_v34  ;;  %v35265_v43 = vsub.f32 %v34971_v58, %v40226_v56  ;;  %v27234_v58 = vpack.c.bf16 %v11106_v61, %v11099_v41  ;;  %v10424_v56 = vand.u32 4294901760, %v10423_v42  ;;  %v11120_v41 = vand.u32 4294901760, %v11119_v23 }
 0xafc   : > { %v35270_v33 = vsub.f32 %v34974_v21, %v40227_v16  ;;  %v11112_v21 = vsub.f32 %v35232_v35, %v39449_v26  ;;  %v10431_v16 = vand.u32 4294901760, %v10430_v7  ;;  %v35298_v42 = vsub.f32 %v35024_v39, %v40230_v36 }
 0xafd   : > { %v39451_v17 = vand.u32 4294901760, %v35265_v43  ;;  %v10437_v26 = vsub.f32 %v35260_v32, %v39450_v60  ;;  %v40233_v36 = vand.u32 4294901760, %v35033_v18 }
 0xafe   : > { %v11113_v22 = vand.u32 4294901760, %v11112_v21  ;;  %v39452_v61 = vand.u32 4294901760, %v35270_v33  ;;  %v27093_v23 = vpack.c.bf16 %v10431_v16, %v10424_v56  ;;  %v40234_v56 = vand.u32 4294901760, %v35281_v40 }
 0xaff   : > { %v10444_v39 = vsub.f32 %v35265_v43, %v39451_v17  ;;  %v35319_v52 = vsub.f32 %v35033_v18, %v40233_v36  ;;  %v10450_v60 = vand.u32 4294901760, %v35298_v42 }
 0xb00   : > { %v11133_v16 = vsub.f32 %v35281_v40, %v40234_v56 }
 0xb01   : > { %27091 = vmatpush3.bf16.xpose.msra.mxu0 %v27090_v55  ;;  %v40231_v55 = vand.u32 4294901760, %v35027_v11  ;;  %v11146_v36 = vand.u32 4294901760, %v35319_v52 }
 0xb02   : > { %27235 = vmatpush3.bf16.xpose.msra.mxu1 %v27234_v58  ;;  %27092 = vmatprep.subr.bf16.mxu0 %v39685_v34  ;;  %v40232_v58 = vand.u32 4294901760, %v35030_v3 }
 0xb03   : > { %27236 = vmatprep.subr.bf16.mxu1 %v39685_v34  ;;  %v35303_v7 = vsub.f32 %v35027_v11, %v40231_v55  ;;  %v27237_v11 = vpack.c.bf16 %v11120_v41, %v11113_v22  ;;  %v10438_v55 = vand.u32 4294901760, %v10437_v26  ;;  %v11134_v22 = vand.u32 4294901760, %v11133_v16 }
 0xb04   : > { %v35308_v21 = vsub.f32 %v35030_v3, %v40232_v58  ;;  %v11126_v3 = vsub.f32 %v35270_v33, %v39452_v61  ;;  %v10445_v58 = vand.u32 4294901760, %v10444_v39  ;;  %v10451_v26 = vsub.f32 %v35298_v42, %v10450_v60 }
 0xb05   : > { %v39453_v17 = vand.u32 4294901760, %v35303_v7 }
 0xb06   : > { %v11127_v18 = vand.u32 4294901760, %v11126_v3  ;;  %v11139_v41 = vand.u32 4294901760, %v35308_v21  ;;  %v27096_v61 = vpack.c.bf16 %v10445_v58, %v10438_v55  ;;  %v11147_v3 = vsub.f32 %v35319_v52, %v11146_v36 }
 0xb07   : > { %v10452_v56 = vand.u32 4294901760, %v10451_v26  ;;  %v27249_v26 = vpack.c.bf16 %v35077_v38, %v35060_v15 }
 0xb08   : > { %v27240_v39 = vpack.c.bf16 %v11134_v22, %v11127_v18  ;;  %v11148_v58 = vand.u32 4294901760, %v11147_v3  ;;  %v27246_v22 = vpack.c.bf16 %v35015_v62, %v35004_v0  ;;  %v27255_v3 = vpack.c.bf16 %v35167_v12, %v35156_v44 }
 0xb09   : > { %27094 = vmatpush3.bf16.xpose.msra.mxu0 %v27093_v23  ;;  %v10458_v23 = vsub.f32 %v35303_v7, %v39453_v17 }
 0xb0a   : > { %27238 = vmatpush3.bf16.xpose.msra.mxu1 %v27237_v11  ;;  %27095 = vmatprep.subr.bf16.mxu0 %v39685_v34  ;;  %v11140_v11 = vsub.f32 %v35308_v21, %v11139_v41 }
 0xb0b   : > { %27239 = vmatprep.subr.bf16.mxu1 %v39685_v34  ;;  %v10459_v16 = vand.u32 4294901760, %v10458_v23  ;;  %v27108_v23 = vpack.c.bf16 %v35107_v13, %v35102_v54 }
 0xb0c   : > { %v11141_v55 = vand.u32 4294901760, %v11140_v11  ;;  %v27111_v11 = vpack.c.bf16 %v35149_v28, %v35144_v1 }
 0xb0d   : > { %v27099_v17 = vpack.c.bf16 %v10459_v16, %v10452_v56  ;;  %v27114_v56 = vpack.c.bf16 %v35189_v8, %v35184_v6  ;;  %v27258_v16 = vpack.c.bf16 %v35205_v53, %v35194_v10 }
 0xb0e   : > { %v27243_v18 = vpack.c.bf16 %v11148_v58, %v11141_v55  ;;  %v27117_v55 = vpack.c.bf16 %v35227_v50, %v35222_v63  ;;  %v27261_v58 = vpack.c.bf16 %v35243_v5, %v35232_v35 }
 0xb11   : > { %27097 = vmatpush3.bf16.xpose.msra.mxu0 %v27096_v61  ;;  %v27102_v61 = vpack.c.bf16 %v34999_v29, %v34994_v2 }
 0xb12   : > { %27241 = vmatpush3.bf16.xpose.msra.mxu1 %v27240_v39  ;;  %27098 = vmatprep.subr.bf16.mxu0 %v39685_v34  ;;  %v27252_v39 = vpack.c.bf16 %v35123_v30, %v35112_v19 }
 0xb13   : > { %27242 = vmatprep.subr.bf16.mxu1 %v39685_v34 }
 0xb19   : > { %27100 = vmatpush3.bf16.xpose.msra.mxu0 %v27099_v17  ;;  %v27105_v17 = vpack.c.bf16 %v35055_v48, %v35050_v51 }
 0xb1a   : > { %27244 = vmatpush3.bf16.xpose.msra.mxu1 %v27243_v18  ;;  %27101 = vmatprep.subr.bf16.mxu0 %v39685_v34  ;;  %v27120_v18 = vpack.c.bf16 %v35265_v43, %v35260_v32 }
 0xb1b   : > { %27245 = vmatprep.subr.bf16.mxu1 %v39685_v34 }
 0xb20   : > { %23005 = vmatmul.mubr.f32.vlgmr.msra.gmra.mrb[6].mxu0 %v32519_v46 }
 0xb21   : > { %27103 = vmatpush3.bf16.xpose.msra.mxu0 %v27102_v61  ;;  %23215 = vmatmul.mubr.f32.vlgmr.msra.gmra.mrb[6].mxu1 %v32519_v46  ;;  %v27264_v61 = vpack.c.bf16 %v35281_v40, %v35270_v33 }
 0xb22   : > { %27247 = vmatpush3.bf16.xpose.msra.mxu1 %v27246_v22  ;;  %27104 = vmatprep.subr.bf16.mxu0 %v39685_v34  ;;  %v27123_v22 = vpack.c.bf16 %v35303_v7, %v35298_v42 }
 0xb23   : > { %27248 = vmatprep.subr.bf16.mxu1 %v39685_v34  ;;  %23039 = vmatprep.mubr.msk.f32.mxu0 %vm28907_vm0, %v39694_v24 }
 0xb24   : > { %23249 = vmatprep.mubr.msk.f32.mxu1 %vm28907_vm0, %v39694_v24 }
 0xb29   : > { %27106 = vmatpush3.bf16.xpose.msra.mxu0 %v27105_v17  ;;  %v27267_v17 = vpack.c.bf16 %v35319_v52, %v35308_v21 }
 0xb2a   : > { %27250 = vmatpush3.bf16.xpose.msra.mxu1 %v27249_v26  ;;  %27107 = vmatprep.subr.bf16.mxu0 %v39685_v34  ;;  %v40236_v26 = vld [vmem:[#allocation5_spill] sm:$0xff] }
 0xb2b   : > { %27251 = vmatprep.subr.bf16.mxu1 %v39685_v34 }
 0xb31   : > { %27109 = vmatpush3.bf16.xpose.msra.mxu0 %v27108_v23  ;;  %v40237_v23 = vld [vmem:[#allocation7_spill] sm:$0xff] }
 0xb32   : > { %27253 = vmatpush3.bf16.xpose.msra.mxu1 %v27252_v39  ;;  %27110 = vmatprep.subr.bf16.mxu0 %v39685_v34  ;;  %v40238_v39 = vld [vmem:[#allocation9_spill] sm:$0xff] }
 0xb33   : > { %27254 = vmatprep.subr.bf16.mxu1 %v39685_v34 }
 0xb39   : > { %27112 = vmatpush3.bf16.xpose.msra.mxu0 %v27111_v11  ;;  %v40239_v11 = vand.u32 4294901760, %v34994_v2 }
 0xb3a   : > { %27256 = vmatpush3.bf16.xpose.msra.mxu1 %v27255_v3  ;;  %27113 = vmatprep.subr.bf16.mxu0 %v39685_v34  ;;  %v40240_v3 = vand.u32 4294901760, %v34999_v29  ;;  %v40245_v29 = vand.u32 4294901760, %v35055_v48  ;;  %v40251_v48 = vand.u32 4294901760, %v35123_v30  ;;  %v40256_v30 = vand.u32 4294901760, %v35184_v6 }
 0xb3b   : > { %27257 = vmatprep.subr.bf16.mxu1 %v39685_v34  ;;  %v40262_v6 = vand.u32 4294901760, %v35232_v35 }
 0xb41   : > { %27115 = vmatpush3.bf16.xpose.msra.mxu0 %v27114_v56  ;;  %v27150_v56 = vpack.c.bf16 %v40240_v3, %v40239_v11  ;;  %v40249_v11 = vand.u32 4294901760, %v35107_v13  ;;  %v40255_v13 = vand.u32 4294901760, %v35167_v12  ;;  %v40261_v12 = vand.u32 4294901760, %v35227_v50 }
 0xb42   : > { %27259 = vmatpush3.bf16.xpose.msra.mxu1 %v27258_v16  ;;  %27116 = vmatprep.subr.bf16.mxu0 %v39685_v34  ;;  %v40241_v16 = vand.u32 4294901760, %v35004_v0  ;;  %v40244_v0 = vand.u32 4294901760, %v35050_v51  ;;  %v40250_v51 = vand.u32 4294901760, %v35112_v19  ;;  %v40257_v19 = vand.u32 4294901760, %v35189_v8 }
 0xb43   : > { %27260 = vmatprep.subr.bf16.mxu1 %v39685_v34  ;;  %v40263_v8 = vand.u32 4294901760, %v35243_v5  ;;  %v40267_v50 = vand.u32 4294901760, %v35281_v40  ;;  %v40268_v5 = vand.u32 4294901760, %v35303_v7  ;;  %v11591_v40 = vld [vmem:[%s35561_s25 + $0x18] sm:$0xff] }
 0xb44   : > { %v27153_v2 = vpack.c.bf16 %v40245_v29, %v40244_v0  ;;  %v35611_v21 = vsel %vm557_vm1, %v11591_v40, 0 }
 0xb45   : > { %v27309_v29 = vpack.c.bf16 %v40263_v8, %v40262_v6  ;;  %v27171_v35 = vpack.c.bf16 %v40268_v5, %v10450_v60  ;;  %v11604_v60 = vld [vmem:[%s35561_s25 + $0x80] sm:$0xff] }
 0xb49   : > { %27118 = vmatpush3.bf16.xpose.msra.mxu0 %v27117_v55  ;;  %v40242_v55 = vand.u32 4294901760, %v35015_v62  ;;  %v40246_v62 = vand.u32 4294901760, %v35060_v15  ;;  %v40252_v15 = vand.u32 4294901760, %v35144_v1  ;;  %v40258_v1 = vand.u32 4294901760, %v35194_v10 }
 0xb4a   : > { %27262 = vmatpush3.bf16.xpose.msra.mxu1 %v27261_v58  ;;  %27119 = vmatprep.subr.bf16.mxu0 %v39685_v34  ;;  %v40265_v10 = vand.u32 4294901760, %v35265_v43  ;;  %v11606_v43 = vld [vmem:[%s35561_s25 + $0x90] sm:$0xff] }
 0xb4b   : > { %27263 = vmatprep.subr.bf16.mxu1 %v39685_v34  ;;  %v27294_v58 = vpack.c.bf16 %v40242_v55, %v40241_v16 }
 0xb51   : > { %27121 = vmatpush3.bf16.xpose.msra.mxu0 %v27120_v18  ;;  %v40243_v18 = vld [vmem:[#allocation6_spill] sm:$0xff] }
 0xb52   : > { %27265 = vmatpush3.bf16.xpose.msra.mxu1 %v27264_v61  ;;  %27122 = vmatprep.subr.bf16.mxu0 %v39685_v34  ;;  %v40247_v61 = vand.u32 4294901760, %v35077_v38  ;;  %v40253_v38 = vand.u32 4294901760, %v35149_v28  ;;  %v40259_v28 = vand.u32 4294901760, %v35205_v53  ;;  %v40264_v53 = vand.u32 4294901760, %v35260_v32 }
 0xb53   : > { %27266 = vmatprep.subr.bf16.mxu1 %v39685_v34  ;;  %v27315_v32 = vpack.c.bf16 %v11146_v36, %v11139_v41  ;;  %v35614_v41 = vsel %vm557_vm1, %v11606_v43, 0  ;;  %v11598_v43 = vld [vmem:[%s35561_s25 + $0x50] sm:$0xff] }
 0xb54   : > { %v27159_v16 = vpack.c.bf16 %v40253_v38, %v40252_v15 }
 0xb59   : > { %27124 = vmatpush3.bf16.xpose.msra.mxu0 %v27123_v22  ;;  %v27297_v22 = vpack.c.bf16 %v40247_v61, %v40246_v62  ;;  %v11592_v61 = vld [vmem:[%s35561_s25 + $0x20] sm:$0xff] }
 0xb5a   : > { %27268 = vmatpush3.bf16.xpose.msra.mxu1 %v27267_v17  ;;  %27125 = vmatprep.subr.bf16.mxu0 %v39685_v34  ;;  %v40248_v17 = vand.u32 4294901760, %v35102_v54  ;;  %v40254_v54 = vand.u32 4294901760, %v35156_v44  ;;  %v40260_v44 = vand.u32 4294901760, %v35222_v63  ;;  %v40266_v63 = vand.u32 4294901760, %v35270_v33  ;;  %v11607_v33 = vld [vmem:[%s35561_s25 + $0x98] sm:$0xff] }
 0xb5b   : > { %27269 = vmatprep.subr.bf16.mxu1 %v39685_v34  ;;  %v35617_v36 = vsel %vm557_vm1, %v11607_v33, 0  ;;  %v11599_v33 = vld [vmem:[%s35561_s25 + $0x58] sm:$0xff] }
 0xb5c   : > { %v27156_v3 = vpack.c.bf16 %v40249_v11, %v40248_v17  ;;  %v27303_v55 = vpack.c.bf16 %v40255_v13, %v40254_v54  ;;  %v27165_v0 = vpack.c.bf16 %v40261_v12, %v40260_v44  ;;  %v27312_v62 = vpack.c.bf16 %v40267_v50, %v40266_v63  ;;  %v11609_v17 = vld [vmem:[%s35561_s25 + $0xa8] sm:$0xff]  ;;  %v11612_v63 = vld [vmem:[%s35561_s25 + $0xc0] sm:$0xff] }
 0xb5d   : > { %v35659_v15 = vsel %vm557_vm1, %v11609_v17, 0  ;;  %v11613_v50 = vld [vmem:[%s35561_s25 + $0xc8] sm:$0xff] }
 0xb5e   : > { %v39466_v13 = vand.u32 4294901760, %v35659_v15 }
 0xb60   : > { %23040 = vmatmul.mubr.f32.vlgmr.msra.gmra.mrb[6].mxu0 %v32566_v37 }
 0xb61   : > { %27127 = vmatpush3.bf16.xpose.msra.mxu0 %v34773_v31  ;;  %23250 = vmatmul.mubr.f32.vlgmr.msra.gmra.mrb[6].mxu1 %v32566_v37  ;;  %v40235_v37 = vld [vmem:[#allocation10_spill] sm:$0xff] }
 0xb62   : > { %27271 = vmatpush3.bf16.xpose.msra.mxu1 %v34779_v20  ;;  %27128 = vmatprep.subr.bf16.mxu0 %v39685_v34 }
 0xb63   : > { %27272 = vmatprep.subr.bf16.mxu1 %v39685_v34  ;;  %23074 = vmatprep.mubr.msk.f32.mxu0 %vm28907_vm0, %v39694_v24 }
 0xb64   : > { %23284 = vmatprep.mubr.msk.f32.mxu1 %vm28907_vm0, %v39694_v24 }
 0xb69   : > { %27130 = vmatpush3.bf16.xpose.msra.mxu0 %v34815_v57 }
 0xb6a   : > { %27274 = vmatpush3.bf16.xpose.msra.mxu1 %v34821_v9  ;;  %27131 = vmatprep.subr.bf16.mxu0 %v39685_v34 }
 0xb6b   : > { %27275 = vmatprep.subr.bf16.mxu1 %v39685_v34 }
 0xb71   : > { %27133 = vmatpush3.bf16.xpose.msra.mxu0 %v34851_v4 }
 0xb72   : > { %27277 = vmatpush3.bf16.xpose.msra.mxu1 %v34857_v49  ;;  %27134 = vmatprep.subr.bf16.mxu0 %v39685_v34 }
 0xb73   : > { %27278 = vmatprep.subr.bf16.mxu1 %v39685_v34 }
 0xb79   : > { %27136 = vmatpush3.bf16.xpose.msra.mxu0 %v34887_v14 }
 0xb7a   : > { %27280 = vmatpush3.bf16.xpose.msra.mxu1 %v34893_v25  ;;  %27137 = vmatprep.subr.bf16.mxu0 %v39685_v34 }
 0xb7b   : > { %27281 = vmatprep.subr.bf16.mxu1 %v39685_v34 }
 0xb81   : > { %27139 = vmatpush3.bf16.xpose.msra.mxu0 %v34923_v27 }
 0xb82   : > { %27283 = vmatpush3.bf16.xpose.msra.mxu1 %v34929_v47  ;;  %27140 = vmatprep.subr.bf16.mxu0 %v39685_v34 }
 0xb83   : > { %27284 = vmatprep.subr.bf16.mxu1 %v39685_v34 }
 0xb89   : > { %27142 = vmatpush3.bf16.xpose.msra.mxu0 %v34959_v45 }
 0xb8a   : > { %27286 = vmatpush3.bf16.xpose.msra.mxu1 %v34965_v59  ;;  %27143 = vmatprep.subr.bf16.mxu0 %v39685_v34 }
 0xb8b   : > { %27287 = vmatprep.subr.bf16.mxu1 %v39685_v34 }
 0xb91   : > { %27145 = vmatpush3.bf16.xpose.msra.mxu0 %v40235_v37 }
 0xb92   : > { %27289 = vmatpush3.bf16.xpose.msra.mxu1 %v40236_v26  ;;  %27146 = vmatprep.subr.bf16.mxu0 %v39685_v34 }
 0xb93   : > { %27290 = vmatprep.subr.bf16.mxu1 %v39685_v34 }
 0xb99   : > { %27148 = vmatpush3.bf16.xpose.msra.mxu0 %v40237_v23 }
 0xb9a   : > { %27292 = vmatpush3.bf16.xpose.msra.mxu1 %v40238_v39  ;;  %27149 = vmatprep.subr.bf16.mxu0 %v39685_v34 }
 0xb9b   : > { %27293 = vmatprep.subr.bf16.mxu1 %v39685_v34 }
 0xba0   : > { %23075 = vmatmul.mubr.f32.vlgmr.msra.gmra.mrb[6].mxu0 %v40243_v18 }
 0xba1   : > { %27151 = vmatpush3.bf16.xpose.msra.mxu0 %v27150_v56  ;;  %23285 = vmatmul.mubr.f32.vlgmr.msra.gmra.mrb[6].mxu1 %v40243_v18  ;;  %v27300_v56 = vpack.c.bf16 %v40251_v48, %v40250_v51  ;;  %v27306_v18 = vpack.c.bf16 %v40259_v28, %v40258_v1  ;;  %v35650_v51 = vsel %vm557_vm1, %v11592_v61, 0  ;;  %v11614_v61 = vld [vmem:[%s35561_s25 + $0xd0] sm:$0xff] }
 0xba2   : > { %27295 = vmatpush3.bf16.xpose.msra.mxu1 %v27294_v58  ;;  %27152 = vmatprep.subr.bf16.mxu0 %v39685_v34  ;;  %v27162_v58 = vpack.c.bf16 %v40257_v19, %v40256_v30  ;;  %v39469_v38 = vand.u32 4294901760, %v35650_v51  ;;  %v11595_v30 = vld [vmem:[%s35561_s25 + $0x38] sm:$0xff]  ;;  %v11610_v19 = vld [vmem:[%s35561_s25 + $0xb0] sm:$0xff] }
 0xba3   : > { %27296 = vmatprep.subr.bf16.mxu1 %v39685_v34  ;;  %23109 = vmatprep.mubr.msk.f32.mxu0 %vm28907_vm0, %v39694_v24  ;;  %v35689_v44 = vsel %vm557_vm1, %v11595_v30, 0  ;;  %v35692_v12 = vsel %vm557_vm1, %v11610_v19, 0  ;;  %v35761_v30 = vsel %vm557_vm1, %v11599_v33, 0  ;;  %v35764_v19 = vsel %vm557_vm1, %v11614_v61, 0  ;;  %v11601_v33 = vld [vmem:[%s35561_s25 + $0x68] sm:$0xff]  ;;  %v11616_v61 = vld [vmem:[%s35561_s25 + $0xe0] sm:$0xff] }
 0xba4   : > { %23319 = vmatprep.mubr.msk.f32.mxu1 %vm28907_vm0, %v39694_v24  ;;  %v39464_v8 = vand.u32 4294901760, %v35689_v44 }
 0xba9   : > { %27154 = vmatpush3.bf16.xpose.msra.mxu0 %v27153_v2  ;;  %v27168_v2 = vpack.c.bf16 %v40265_v10, %v40264_v53  ;;  %v11596_v10 = vld [vmem:[%s35561_s25 + $0x40] sm:$0xff] }
 0xbaa   : > { %27298 = vmatpush3.bf16.xpose.msra.mxu1 %v27297_v22  ;;  %27155 = vmatprep.subr.bf16.mxu0 %v39685_v34  ;;  %v11593_v22 = vld [vmem:[%s35561_s25 + $0x28] sm:$0xff] }
 0xbab   : > { %27299 = vmatprep.subr.bf16.mxu1 %v39685_v34  ;;  %v35653_v48 = vsel %vm557_vm1, %v11593_v22, 0  ;;  %v11615_v22 = vld [vmem:[%s35561_s25 + $0xd8] sm:$0xff] }
 0xbb1   : > { %27157 = vmatpush3.bf16.xpose.msra.mxu0 %v27156_v3 }
 0xbb2   : > { %27301 = vmatpush3.bf16.xpose.msra.mxu1 %v27300_v56  ;;  %27158 = vmatprep.subr.bf16.mxu0 %v39685_v34 }
 0xbb3   : > { %27302 = vmatprep.subr.bf16.mxu1 %v39685_v34 }
 0xbb9   : > { %27160 = vmatpush3.bf16.xpose.msra.mxu0 %v27159_v16  ;;  %v39468_v16 = vand.u32 4294901760, %v35653_v48 }
 0xbba   : > { %27304 = vmatpush3.bf16.xpose.msra.mxu1 %v27303_v55  ;;  %27161 = vmatprep.subr.bf16.mxu0 %v39685_v34  ;;  %v11594_v55 = vld [vmem:[%s35561_s25 + $0x30] sm:$0xff] }
 0xbbb   : > { %27305 = vmatprep.subr.bf16.mxu1 %v39685_v34  ;;  %v35677_v1 = vpack.c.bf16 %v39468_v16, %v39469_v38 }
 0xbc1   : > { %27163 = vmatpush3.bf16.xpose.msra.mxu0 %v27162_v58  ;;  %v11611_v58 = vld [vmem:[%s35561_s25 + $0xb8] sm:$0xff] }
 0xbc2   : > { %27307 = vmatpush3.bf16.xpose.msra.mxu1 %v27306_v18  ;;  %27164 = vmatprep.subr.bf16.mxu0 %v39685_v34  ;;  %v35686_v18 = vsel %vm557_vm1, %v11594_v55, 0  ;;  %v35758_v55 = vsel %vm557_vm1, %v11598_v43, 0  ;;  %v11600_v43 = vld [vmem:[%s35561_s25 + $0x60] sm:$0xff] }
 0xbc3   : > { %27308 = vmatprep.subr.bf16.mxu1 %v39685_v34  ;;  %v39465_v6 = vand.u32 4294901760, %v35686_v18 }
 0xbc9   : > { %27166 = vmatpush3.bf16.xpose.msra.mxu0 %v27165_v0  ;;  %v35695_v0 = vsel %vm557_vm1, %v11611_v58, 0  ;;  %v35767_v58 = vsel %vm557_vm1, %v11615_v22, 0  ;;  %v11617_v22 = vld [vmem:[%s35561_s25 + $0xe8] sm:$0xff] }
 0xbca   : > { %27310 = vmatpush3.bf16.xpose.msra.mxu1 %v27309_v29  ;;  %27167 = vmatprep.subr.bf16.mxu0 %v39685_v34  ;;  %v39463_v29 = vand.u32 4294901760, %v35692_v12  ;;  %v39460_v53 = vand.u32 4294901760, %v35695_v0 }
 0xbcb   : > { %27311 = vmatprep.subr.bf16.mxu1 %v39685_v34 }
 0xbcc   : > { %v35719_v5 = vpack.c.bf16 %v39460_v53, %v39463_v29  ;;  %v35806_v53 = vsel %vm557_vm1, %v11617_v22, 0  ;;  %v11602_v22 = vld [vmem:[%s35561_s25 + $0x70] sm:$0xff]  ;;  %v11603_v29 = vld [vmem:[%s35561_s25 + $0x78] sm:$0xff] }
 0xbd1   : > { %27169 = vmatpush3.bf16.xpose.msra.mxu0 %v27168_v2  ;;  %v11597_v2 = vld [vmem:[%s35561_s25 + $0x48] sm:$0xff] }
 0xbd2   : > { %27313 = vmatpush3.bf16.xpose.msra.mxu1 %v27312_v62  ;;  %27170 = vmatprep.subr.bf16.mxu0 %v39685_v34  ;;  %v35713_v62 = vpack.c.bf16 %v39464_v8, %v39465_v6  ;;  %v11618_v8 = vld [vmem:[%s35561_s25 + $0xf0] sm:$0xff]  ;;  %v11619_v6 = vld [vmem:[%s35561_s25 + $0xf8] sm:$0xff] }
 0xbd3   : > { %27314 = vmatprep.subr.bf16.mxu1 %v39685_v34 }
 0xbd9   : > { %27172 = vmatpush3.bf16.xpose.msra.mxu0 %v27171_v35  ;;  %v35722_v35 = vsel %vm557_vm1, %v11596_v10, 0  ;;  %v39459_v10 = vand.u32 4294901760, %v35758_v55 }
 0xbda   : > { %27316 = vmatpush3.bf16.xpose.msra.mxu1 %v27315_v32  ;;  %27173 = vmatprep.subr.bf16.mxu0 %v39685_v34  ;;  %v35725_v32 = vsel %vm557_vm1, %v11597_v2, 0  ;;  %v39458_v2 = vand.u32 4294901760, %v35761_v30 }
 0xbdb   : > { %27317 = vmatprep.subr.bf16.mxu1 %v39685_v34 }
 0xbe0   : > { %23110 = vmatmul.mubr.f32.vlgmr.msra.gmra.mrb[6].mxu0 %v32519_v46 }
 0xbe1   : > { %27175 = vmatpush3.bf16.xpose.msra.mxu0 %v34773_v31  ;;  %23320 = vmatmul.mubr.f32.vlgmr.msra.gmra.mrb[6].mxu1 %v32519_v46  ;;  %v11588_v31 = vld [vmem:[%s35561_s25] sm:$0xff] }
 0xbe2   : > { %27319 = vmatpush3.bf16.xpose.msra.mxu1 %v34779_v20  ;;  %27176 = vmatprep.subr.bf16.mxu0 %v39685_v34  ;;  %v11589_v20 = vld [vmem:[%s35561_s25 + $0x8] sm:$0xff] }
 0xbe3   : > { %27320 = vmatprep.subr.bf16.mxu1 %v39685_v34  ;;  %23144 = vmatprep.mubr.msk.f32.mxu0 %vm28907_vm0, %v39694_v24 }
 0xbe4   : > { %23354 = vmatprep.mubr.msk.f32.mxu1 %vm28907_vm0, %v39694_v24 }
 0xbe9   : > { %27178 = vmatpush3.bf16.xpose.msra.mxu0 %v34815_v57  ;;  %v11605_v57 = vld [vmem:[%s35561_s25 + $0x88] sm:$0xff] }
 0xbea   : > { %27322 = vmatpush3.bf16.xpose.msra.mxu1 %v34821_v9  ;;  %27179 = vmatprep.subr.bf16.mxu0 %v39685_v34  ;;  %v35572_v9 = vsel %vm557_vm1, %v11588_v31, 0  ;;  %v35728_v31 = vsel %vm557_vm1, %v11612_v63, 0  ;;  %v39462_v63 = vand.u32 4294901760, %v35764_v19 }
 0xbeb   : > { %27323 = vmatprep.subr.bf16.mxu1 %v39685_v34 }
 0xbf1   : > { %27181 = vmatpush3.bf16.xpose.msra.mxu0 %v34851_v4  ;;  %v35575_v4 = vsel %vm557_vm1, %v11589_v20, 0  ;;  %v35731_v20 = vsel %vm557_vm1, %v11613_v50, 0  ;;  %v39461_v50 = vand.u32 4294901760, %v35767_v58 }
 0xbf2   : > { %27325 = vmatpush3.bf16.xpose.msra.mxu1 %v34857_v49  ;;  %27182 = vmatprep.subr.bf16.mxu0 %v39685_v34  ;;  %v35578_v49 = vsel %vm557_vm1, %v11604_v60, 0  ;;  %v39457_v60 = vand.u32 4294901760, %v35722_v35  ;;  %v39454_v40 = vand.u32 4294901760, %v35731_v20 }
 0xbf3   : > { %27326 = vmatprep.subr.bf16.mxu1 %v39685_v34 }
 0xbf9   : > { %27184 = vmatpush3.bf16.xpose.msra.mxu0 %v34887_v14  ;;  %v11768_v14 = vand.u32 4294901760, %v35572_v9 }
 0xbfa   : > { %27328 = vmatpush3.bf16.xpose.msra.mxu1 %v34893_v25  ;;  %27185 = vmatprep.subr.bf16.mxu0 %v39685_v34  ;;  %v11771_v25 = vand.u32 4294901760, %v35575_v4 }
 0xbfb   : > { %27329 = vmatprep.subr.bf16.mxu1 %v39685_v34 }
 0xbfc   : > { %v35599_v52 = vpack.c.bf16 %v11771_v25, %v11768_v14 }
 0xc01   : > { %27187 = vmatpush3.bf16.xpose.msra.mxu0 %v34923_v27 }
 0xc02   : > { %27331 = vmatpush3.bf16.xpose.msra.mxu1 %v34929_v47  ;;  %27188 = vmatprep.subr.bf16.mxu0 %v39685_v34  ;;  %v11590_v47 = vld [vmem:[%s35561_s25 + $0x10] sm:$0xff] }
 0xc03   : > { %27332 = vmatprep.subr.bf16.mxu1 %v39685_v34  ;;  %v35608_v7 = vsel %vm557_vm1, %v11590_v47, 0  ;;  %v39455_v47 = vand.u32 4294901760, %v35728_v31 }
 0xc05   : > { %v35755_v17 = vpack.c.bf16 %v39454_v40, %v39455_v47  ;;  %v35785_v40 = vpack.c.bf16 %v39458_v2, %v39459_v10  ;;  %v35791_v47 = vpack.c.bf16 %v39461_v50, %v39462_v63  ;;  %v300_v2 = vld [vmem:[%s39029_s4 + $0x4] sm:$0x3]  ;;  %v35803_v10 = vsel %vm557_vm1, %v11616_v61, 0 }
 0xc06   : > { %v39471_v63 = vand.u32 4294901760, %v35803_v10  ;;  %v39470_v61 = vand.u32 4294901760, %v35806_v53 }
 0xc09   : > { %27190 = vmatpush3.bf16.xpose.msra.mxu0 %v34959_v45  ;;  %v12457_v45 = vand.u32 4294901760, %v35578_v49 }
 0xc0a   : > { %27334 = vmatpush3.bf16.xpose.msra.mxu1 %v34965_v59  ;;  %27191 = vmatprep.subr.bf16.mxu0 %v39685_v34  ;;  %v35581_v59 = vsel %vm557_vm1, %v11605_v57, 0  ;;  %v39456_v57 = vand.u32 4294901760, %v35725_v32 }
 0xc0b   : > { %27335 = vmatprep.subr.bf16.mxu1 %v39685_v34  ;;  %v12460_v27 = vand.u32 4294901760, %v35581_v59  ;;  %v35836_v16 = vsub.f32 %v35578_v49, %v12457_v45  ;;  %v35856_v49 = vsel %vm557_vm1, %v11602_v22, 0 }
 0xc0d   : > { %v35605_v42 = vpack.c.bf16 %v12460_v27, %v12457_v45  ;;  %v35865_v45 = vsel %vm557_vm1, %v11619_v6, 0 }
 0xc11   : > { %27193 = vmatpush3.bf16.xpose.msra.mxu0 %v40235_v37  ;;  %v11774_v37 = vand.u32 4294901760, %v35608_v7 }
 0xc12   : > { %27337 = vmatpush3.bf16.xpose.msra.mxu1 %v40236_v26  ;;  %27194 = vmatprep.subr.bf16.mxu0 %v39685_v34  ;;  %v11777_v26 = vand.u32 4294901760, %v35611_v21 }
 0xc13   : > { %27338 = vmatprep.subr.bf16.mxu1 %v39685_v34 }
 0xc14   : > { %v35641_v11 = vpack.c.bf16 %v11777_v26, %v11774_v37 }
 0xc19   : > { %27196 = vmatpush3.bf16.xpose.msra.mxu0 %v40237_v23  ;;  %v12463_v23 = vand.u32 4294901760, %v35614_v41 }
 0xc1a   : > { %27340 = vmatpush3.bf16.xpose.msra.mxu1 %v40238_v39  ;;  %27341 = vmatprep.subr.bf16.mxu0 %v39685_v34  ;;  %v12466_v39 = vand.u32 4294901760, %v35617_v36 }
 0xc1b   : > { %27485 = vmatprep.subr.bf16.mxu1 %v39685_v34 }
 0xc1c   : > { %v35647_v3 = vpack.c.bf16 %v12466_v39, %v12463_v23 }
 0xc20   : > { %23145 = vmatmul.mubr.f32.vlgmr.msra.gmra.mrb[6].mxu0 %v32519_v46 }
 0xc21   : > { %23355 = vmatmul.mubr.f32.vlgmr.msra.gmra.mrb[6].mxu1 %v32519_v46  ;;  %27343 = vmatpush3.bf16.xpose.msra.mxu0 %v35599_v52  ;;  %v11608_v46 = vld [vmem:[%s35561_s25 + $0xa0] sm:$0xff] }
 0xc22   : > { %27487 = vmatpush3.bf16.xpose.msra.mxu1 %v35605_v42  ;;  %27344 = vmatprep.subr.bf16.mxu0 %v39685_v34  ;;  %v35656_v56 = vsel %vm557_vm1, %v11608_v46, 0  ;;  %v35749_v46 = vpack.c.bf16 %v39456_v57, %v39457_v60  ;;  %v35794_v57 = vsel %vm557_vm1, %v11600_v43, 0  ;;  %v35797_v60 = vsel %vm557_vm1, %v11601_v33, 0 }
 0xc23   : > { %27488 = vmatprep.subr.bf16.mxu1 %v39685_v34  ;;  %23389 = vmatprep.mubr.msk.f32.mxu0 %vm28907_vm0, %v39694_v24  ;;  %v39467_v54 = vand.u32 4294901760, %v35656_v56  ;;  %v39473_v43 = vand.u32 4294901760, %v35794_v57  ;;  %v39472_v50 = vand.u32 4294901760, %v35797_v60  ;;  %v11717_v33 = vsel %vm557_vm1, %v300_v2, 0 }
 0xc24   : > { %23599 = vmatprep.mubr.msk.f32.mxu1 %vm28907_vm0, %v39694_v24  ;;  %v35826_v2 = vsub.f32 %v35572_v9, %v11768_v14  ;;  %v35847_v9 = vsub.f32 %v35581_v59, %v12460_v27  ;;  %v35859_v14 = vsel %vm557_vm1, %v11603_v29, 0  ;;  %v39476_v27 = vand.u32 4294901760, %v35856_v49 }
 0xc25   : > { %v35683_v28 = vpack.c.bf16 %v39466_v13, %v39467_v54  ;;  %v35821_v13 = vand.u32 4294901760, %v11717_v33  ;;  %v35831_v54 = vsub.f32 %v35575_v4, %v11771_v25  ;;  %v35842_v38 = vpack.c.bf16 %v39472_v50, %v39473_v43 }
 0xc26   : > { %v35853_v4 = vpack.c.bf16 %v39470_v61, %v39471_v63  ;;  %v35862_v25 = vsel %vm557_vm1, %v11618_v8, 0  ;;  %v39474_v61 = vand.u32 4294901760, %v35859_v14  ;;  %v39475_v22 = vand.u32 4294901760, %v35826_v2 }
 0xc27   : > { %40269 = vst [vmem:[#allocation8_spill] sm:$0xff] %v35842_v38  ;;  %v35868_v59 = vsub.f32 %v11717_v33, %v35821_v13  ;;  %v39477_v29 = vand.u32 4294901760, %v35831_v54  ;;  %v39480_v8 = vand.u32 4294901760, %v35865_v45  ;;  %v35885_v50 = vsub.f32 %v35608_v7, %v11774_v37 }
 0xc28   : > { %40270 = vst [vmem:[#allocation10_spill] sm:$0xff] %v35853_v4  ;;  %v35890_v43 = vsub.f32 %v35611_v21, %v11777_v26  ;;  %v35898_v33 = vsub.f32 %v35614_v41, %v12463_v23  ;;  %v35904_v63 = vpack.c.bf16 %v39474_v61, %v39476_v27  ;;  %v11862_v7 = vsub.f32 %v35826_v2, %v39475_v22 }
 0xc29   : > { %27346 = vmatpush3.bf16.xpose.msra.mxu0 %v35641_v11  ;;  %v35893_v6 = vand.u32 4294901760, %v35868_v59  ;;  %v11869_v21 = vsub.f32 %v35831_v54, %v39477_v29  ;;  %v35915_v37 = vsub.f32 %v35617_v36, %v12466_v39  ;;  %v40273_v41 = vand.u32 4294901760, %v35862_v25 }
 0xc2a   : > { %27490 = vmatpush3.bf16.xpose.msra.mxu1 %v35647_v3  ;;  %27347 = vmatprep.subr.bf16.mxu0 %v39685_v34  ;;  %40272 = vst [vmem:[#allocation7_spill] sm:$0xff] %v35904_v63  ;;  %v40275_v23 = vand.u32 4294901760, %v35836_v16  ;;  %v40276_v22 = vand.u32 4294901760, %v35847_v9  ;;  %v11863_v36 = vand.u32 4294901760, %v11862_v7 }
 0xc2b   : > { %27491 = vmatprep.subr.bf16.mxu1 %v39685_v34  ;;  %40271 = vst [vmem:[#allocation5_spill] sm:$0xff] %v35893_v6  ;;  %v35921_v26 = vpack.c.bf16 %v39480_v8, %v40273_v41  ;;  %v11851_v29 = vsub.f32 %v35868_v59, %v35893_v6  ;;  %v11870_v39 = vand.u32 4294901760, %v11869_v21  ;;  %v40277_v6 = vand.u32 4294901760, %v35650_v51 }
 0xc2c   : > { %v12551_v61 = vsub.f32 %v35836_v16, %v40275_v23  ;;  %v12558_v27 = vsub.f32 %v35847_v9, %v40276_v22  ;;  %v40278_v21 = vand.u32 4294901760, %v35653_v48 }
 0xc2d   : > { %40274 = vst [vmem:[#allocation9_spill] sm:$0xff] %v35921_v26  ;;  %v35942_v7 = vsub.f32 %v35650_v51, %v40277_v6  ;;  %v27366_v22 = vpack.c.bf16 %v11870_v39, %v11863_v36  ;;  %v40282_v51 = vand.u32 4294901760, %v35890_v43  ;;  %v40285_v36 = vand.u32 4294901760, %v35915_v37 }
 0xc2e   : > { %v12552_v23 = vand.u32 4294901760, %v12551_v61  ;;  %v12559_v8 = vand.u32 4294901760, %v12558_v27  ;;  %v35947_v41 = vsub.f32 %v35653_v48, %v40278_v21  ;;  %v40280_v61 = vand.u32 4294901760, %v35656_v56 }
 0xc2f   : > { %v11883_v6 = vsub.f32 %v35890_v43, %v40282_v51  ;;  %v40284_v21 = vand.u32 4294901760, %v35898_v33  ;;  %v12572_v39 = vsub.f32 %v35915_v37, %v40285_v36  ;;  %v39489_v51 = vand.u32 4294901760, %v35942_v7 }
 0xc30   : > { %v35954_v27 = vsub.f32 %v35656_v56, %v40280_v61 }
 0xc31   : > { %27349 = vmatpush3.bf16.xpose.msra.mxu0 %v35677_v1  ;;  %v12565_v56 = vsub.f32 %v35898_v33, %v40284_v21  ;;  %v11884_v61 = vand.u32 4294901760, %v11883_v6  ;;  %v40287_v6 = vand.u32 4294901760, %v35689_v44  ;;  %v11890_v21 = vsub.f32 %v35942_v7, %v39489_v51 }
 0xc32   : > { %27493 = vmatpush3.bf16.xpose.msra.mxu1 %v35683_v28  ;;  %27350 = vmatprep.subr.bf16.mxu0 %v39685_v34 }
 0xc33   : > { %27494 = vmatprep.subr.bf16.mxu1 %v39685_v34 }
 0xc39   : > { %27352 = vmatpush3.bf16.xpose.msra.mxu0 %v35713_v62 }
 0xc3a   : > { %27496 = vmatpush3.bf16.xpose.msra.mxu1 %v35719_v5  ;;  %27353 = vmatprep.subr.bf16.mxu0 %v39685_v34 }
 0xc3b   : > { %27497 = vmatprep.subr.bf16.mxu1 %v39685_v34 }
 0xc41   : > { %27355 = vmatpush3.bf16.xpose.msra.mxu0 %v35749_v46 }
 0xc42   : > { %27499 = vmatpush3.bf16.xpose.msra.mxu1 %v35755_v17  ;;  %27356 = vmatprep.subr.bf16.mxu0 %v39685_v34 }
 0xc43   : > { %27500 = vmatprep.subr.bf16.mxu1 %v39685_v34 }
 0xc49   : > { %27358 = vmatpush3.bf16.xpose.msra.mxu0 %v35785_v40 }
 0xc4a   : > { %27502 = vmatpush3.bf16.xpose.msra.mxu1 %v35791_v47  ;;  %27359 = vmatprep.subr.bf16.mxu0 %v39685_v34 }
 0xc4b   : > { %27503 = vmatprep.subr.bf16.mxu1 %v39685_v34 }
 0xc51   : > { %27361 = vmatpush3.bf16.xpose.msra.mxu0 %v35842_v38  ;;  %v40281_v38 = vand.u32 4294901760, %v35885_v50 }
 0xc52   : > { %27505 = vmatpush3.bf16.xpose.msra.mxu1 %v35853_v4  ;;  %27362 = vmatprep.subr.bf16.mxu0 %v39685_v34  ;;  %v35949_v4 = vand.u32 4294901760, %v11851_v29  ;;  %v27510_v29 = vpack.c.bf16 %v12559_v8, %v12552_v23  ;;  %v12573_v8 = vand.u32 4294901760, %v12572_v39  ;;  %v39493_v23 = vand.u32 4294901760, %v35954_v27 }
 0xc53   : > { %27506 = vmatprep.subr.bf16.mxu1 %v39685_v34 }
 0xc54   : > { %40279 = vst [vmem:[#allocation6_spill] sm:$0xff] %v35949_v4 }
 0xc59   : > { %27364 = vmatpush3.bf16.xpose.msra.mxu0 %v35904_v63  ;;  %v40283_v63 = vand.u32 4294901760, %v35659_v15 }
 0xc5a   : > { %27508 = vmatpush3.bf16.xpose.msra.mxu1 %v35921_v26  ;;  %27365 = vmatprep.subr.bf16.mxu0 %v39685_v34  ;;  %v11876_v26 = vsub.f32 %v35885_v50, %v40281_v38 }
 0xc5b   : > { %27509 = vmatprep.subr.bf16.mxu1 %v39685_v34  ;;  %v35965_v48 = vsub.f32 %v35659_v15, %v40283_v63  ;;  %v39492_v15 = vand.u32 4294901760, %v35947_v41  ;;  %v12566_v63 = vand.u32 4294901760, %v12565_v56  ;;  %v40288_v56 = vand.u32 4294901760, %v35692_v12 }
 0xc5c   : > { %v11877_v38 = vand.u32 4294901760, %v11876_v26  ;;  %v40286_v26 = vand.u32 4294901760, %v35686_v18 }
 0xc5d   : > { %v35998_v36 = vsub.f32 %v35692_v12, %v40288_v56  ;;  %v12579_v12 = vsub.f32 %v35954_v27, %v39493_v23  ;;  %v11891_v56 = vand.u32 4294901760, %v11890_v21 }
 0xc5e   : > { %v27369_v39 = vpack.c.bf16 %v11884_v61, %v11877_v38  ;;  %v40290_v38 = vand.u32 4294901760, %v35965_v48 }
 0xc60   : > { %23390 = vmatmul.mubr.f32.vlgmr.msra.gmra.mrb[0].mxu0 %v35949_v4  ;;  %v12586_v61 = vsub.f32 %v35965_v48, %v40290_v38  ;;  %v40291_v38 = vand.u32 4294901760, %v35722_v35 }
 0xc61   : > { %27367 = vmatpush3.bf16.xpose.msra.mxu0 %v27366_v22  ;;  %23600 = vmatmul.mubr.f32.vlgmr.msra.gmra.mrb[0].mxu1 %v35949_v4  ;;  %v35986_v22 = vsub.f32 %v35686_v18, %v40286_v26  ;;  %v11897_v18 = vsub.f32 %v35947_v41, %v39492_v15 }
 0xc62   : > { %27511 = vmatpush3.bf16.xpose.msra.mxu1 %v27510_v29  ;;  %27368 = vmatprep.subr.bf16.mxu0 %v39685_v34  ;;  %v35991_v29 = vsub.f32 %v35689_v44, %v40287_v6  ;;  %v40289_v44 = vand.u32 4294901760, %v35695_v0  ;;  %v27513_v6 = vpack.c.bf16 %v12573_v8, %v12566_v63  ;;  %v12587_v63 = vand.u32 4294901760, %v12586_v61 }
 0xc63   : > { %27512 = vmatprep.subr.bf16.mxu1 %v39685_v34  ;;  %23424 = vmatprep.mubr.msk.f32.mxu0 %vm28907_vm0, %v39694_v24  ;;  %v11898_v51 = vand.u32 4294901760, %v11897_v18  ;;  %v39494_v4 = vand.u32 4294901760, %v35986_v22  ;;  %v39496_v8 = vand.u32 4294901760, %v35998_v36  ;;  %v36026_v21 = vsub.f32 %v35722_v35, %v40291_v38 }
 0xc64   : > { %23634 = vmatprep.mubr.msk.f32.mxu1 %vm28907_vm0, %v39694_v24  ;;  %v36009_v26 = vsub.f32 %v35695_v0, %v40289_v44  ;;  %v39495_v15 = vand.u32 4294901760, %v35991_v29  ;;  %v12580_v0 = vand.u32 4294901760, %v12579_v12  ;;  %v40294_v38 = vand.u32 4294901760, %v35731_v20 }
 0xc65   : > { %v27372_v61 = vpack.c.bf16 %v11898_v51, %v11891_v56  ;;  %v11904_v23 = vsub.f32 %v35986_v22, %v39494_v4  ;;  %v39497_v4 = vand.u32 4294901760, %v36026_v21 }
 0xc66   : > { %v11911_v35 = vsub.f32 %v35991_v29, %v39495_v15  ;;  %v36047_v44 = vsub.f32 %v35731_v20, %v40294_v38  ;;  %v40295_v51 = vand.u32 4294901760, %v36009_v26 }
 0xc68   : > { %v12600_v56 = vsub.f32 %v36009_v26, %v40295_v51  ;;  %v40296_v51 = vand.u32 4294901760, %v35758_v55 }
 0xc69   : > { %27370 = vmatpush3.bf16.xpose.msra.mxu0 %v27369_v39  ;;  %v40292_v39 = vand.u32 4294901760, %v35725_v32 }
 0xc6a   : > { %27514 = vmatpush3.bf16.xpose.msra.mxu1 %v27513_v6  ;;  %27371 = vmatprep.subr.bf16.mxu0 %v39685_v34  ;;  %v40293_v6 = vand.u32 4294901760, %v35728_v31 }
 0xc6b   : > { %27515 = vmatprep.subr.bf16.mxu1 %v39685_v34  ;;  %v36031_v18 = vsub.f32 %v35725_v32, %v40292_v39  ;;  %v27516_v32 = vpack.c.bf16 %v12587_v63, %v12580_v0  ;;  %v11905_v39 = vand.u32 4294901760, %v11904_v23  ;;  %v12601_v0 = vand.u32 4294901760, %v12600_v56 }
 0xc6c   : > { %v36036_v12 = vsub.f32 %v35728_v31, %v40293_v6  ;;  %v12593_v31 = vsub.f32 %v35998_v36, %v39496_v8  ;;  %v11912_v6 = vand.u32 4294901760, %v11911_v35  ;;  %v36064_v23 = vsub.f32 %v35758_v55, %v40296_v51 }
 0xc6d   : > { %v39498_v15 = vand.u32 4294901760, %v36031_v18  ;;  %v11918_v8 = vsub.f32 %v36026_v21, %v39497_v4  ;;  %v40299_v51 = vand.u32 4294901760, %v35767_v58 }
 0xc6e   : > { %v12594_v20 = vand.u32 4294901760, %v12593_v31  ;;  %v39499_v63 = vand.u32 4294901760, %v36036_v12  ;;  %v27375_v56 = vpack.c.bf16 %v11912_v6, %v11905_v39  ;;  %v40300_v39 = vand.u32 4294901760, %v36047_v44 }
 0xc6f   : > { %v11925_v55 = vsub.f32 %v36031_v18, %v39498_v15  ;;  %v36085_v38 = vsub.f32 %v35767_v58, %v40299_v51  ;;  %v39500_v4 = vand.u32 4294901760, %v36064_v23 }
 0xc70   : > { %v12614_v6 = vsub.f32 %v36047_v44, %v40300_v39  ;;  %v40301_v39 = vand.u32 4294901760, %v35794_v57 }
 0xc71   : > { %27373 = vmatpush3.bf16.xpose.msra.mxu0 %v27372_v61  ;;  %v40297_v61 = vand.u32 4294901760, %v35761_v30 }
 0xc72   : > { %27517 = vmatpush3.bf16.xpose.msra.mxu1 %v27516_v32  ;;  %27374 = vmatprep.subr.bf16.mxu0 %v39685_v34  ;;  %v40298_v32 = vand.u32 4294901760, %v35764_v19 }
 0xc73   : > { %27518 = vmatprep.subr.bf16.mxu1 %v39685_v34  ;;  %v36069_v35 = vsub.f32 %v35761_v30, %v40297_v61  ;;  %v27519_v30 = vpack.c.bf16 %v12601_v0, %v12594_v20  ;;  %v11919_v61 = vand.u32 4294901760, %v11918_v8  ;;  %v12615_v20 = vand.u32 4294901760, %v12614_v6 }
 0xc74   : > { %v36074_v31 = vsub.f32 %v35764_v19, %v40298_v32  ;;  %v12607_v19 = vsub.f32 %v36036_v12, %v39499_v63  ;;  %v11926_v32 = vand.u32 4294901760, %v11925_v55  ;;  %v36102_v8 = vsub.f32 %v35794_v57, %v40301_v39 }
 0xc75   : > { %v39501_v15 = vand.u32 4294901760, %v36069_v35  ;;  %v11932_v63 = vsub.f32 %v36064_v23, %v39500_v4  ;;  %v40304_v39 = vand.u32 4294901760, %v35806_v53 }
 0xc76   : > { %v12608_v58 = vand.u32 4294901760, %v12607_v19  ;;  %v39502_v0 = vand.u32 4294901760, %v36074_v31  ;;  %v27378_v6 = vpack.c.bf16 %v11926_v32, %v11919_v61  ;;  %v40305_v61 = vand.u32 4294901760, %v36085_v38 }
 0xc77   : > { %v11939_v57 = vsub.f32 %v36069_v35, %v39501_v15  ;;  %v36123_v51 = vsub.f32 %v35806_v53, %v40304_v39  ;;  %v39503_v4 = vand.u32 4294901760, %v36102_v8 }
 0xc78   : > { %v12628_v32 = vsub.f32 %v36085_v38, %v40305_v61  ;;  %v40306_v61 = vand.u32 4294901760, %v35856_v49 }
 0xc79   : > { %27376 = vmatpush3.bf16.xpose.msra.mxu0 %v27375_v56  ;;  %v40302_v56 = vand.u32 4294901760, %v35797_v60 }
 0xc7a   : > { %27520 = vmatpush3.bf16.xpose.msra.mxu1 %v27519_v30  ;;  %27377 = vmatprep.subr.bf16.mxu0 %v39685_v34  ;;  %v40303_v30 = vand.u32 4294901760, %v35803_v10 }
 0xc7b   : > { %27521 = vmatprep.subr.bf16.mxu1 %v39685_v34  ;;  %v36107_v55 = vsub.f32 %v35797_v60, %v40302_v56  ;;  %v27522_v60 = vpack.c.bf16 %v12615_v20, %v12608_v58  ;;  %v11933_v56 = vand.u32 4294901760, %v11932_v63  ;;  %v12629_v58 = vand.u32 4294901760, %v12628_v32 }
 0xc7c   : > { %v36112_v19 = vsub.f32 %v35803_v10, %v40303_v30  ;;  %v12621_v10 = vsub.f32 %v36074_v31, %v39502_v0  ;;  %v11940_v30 = vand.u32 4294901760, %v11939_v57  ;;  %v36140_v63 = vsub.f32 %v35856_v49, %v40306_v61 }
 0xc7d   : > { %v39504_v15 = vand.u32 4294901760, %v36107_v55  ;;  %v11946_v0 = vsub.f32 %v36102_v8, %v39503_v4  ;;  %v40309_v61 = vand.u32 4294901760, %v35865_v45 }
 0xc7e   : > { %v12622_v53 = vand.u32 4294901760, %v12621_v10  ;;  %v39505_v20 = vand.u32 4294901760, %v36112_v19  ;;  %v27381_v32 = vpack.c.bf16 %v11940_v30, %v11933_v56  ;;  %v40310_v56 = vand.u32 4294901760, %v36123_v51 }
 0xc7f   : > { %v11953_v49 = vsub.f32 %v36107_v55, %v39504_v15  ;;  %v36161_v39 = vsub.f32 %v35865_v45, %v40309_v61  ;;  %v11959_v4 = vand.u32 4294901760, %v36140_v63 }
 0xc80   : > { %v12642_v30 = vsub.f32 %v36123_v51, %v40310_v56 }
 0xc81   : > { %27379 = vmatpush3.bf16.xpose.msra.mxu0 %v27378_v6  ;;  %v40307_v6 = vand.u32 4294901760, %v35859_v14  ;;  %v12655_v61 = vand.u32 4294901760, %v36161_v39 }
 0xc82   : > { %27523 = vmatpush3.bf16.xpose.msra.mxu1 %v27522_v60  ;;  %27380 = vmatprep.subr.bf16.mxu0 %v39685_v34  ;;  %v40308_v60 = vand.u32 4294901760, %v35862_v25 }
 0xc83   : > { %27524 = vmatprep.subr.bf16.mxu1 %v39685_v34  ;;  %v36145_v57 = vsub.f32 %v35859_v14, %v40307_v6  ;;  %v27525_v14 = vpack.c.bf16 %v12629_v58, %v12622_v53  ;;  %v11947_v6 = vand.u32 4294901760, %v11946_v0  ;;  %v12643_v53 = vand.u32 4294901760, %v12642_v30 }
 0xc84   : > { %v36150_v10 = vsub.f32 %v35862_v25, %v40308_v60  ;;  %v12635_v25 = vsub.f32 %v36112_v19, %v39505_v20  ;;  %v11954_v60 = vand.u32 4294901760, %v11953_v49  ;;  %v11960_v0 = vsub.f32 %v36140_v63, %v11959_v4 }
 0xc85   : > { %v39506_v15 = vand.u32 4294901760, %v36145_v57 }
 0xc86   : > { %v12636_v45 = vand.u32 4294901760, %v12635_v25  ;;  %v12648_v58 = vand.u32 4294901760, %v36150_v10  ;;  %v27384_v20 = vpack.c.bf16 %v11954_v60, %v11947_v6  ;;  %v12656_v25 = vsub.f32 %v36161_v39, %v12655_v61 }
 0xc87   : > { %v11961_v56 = vand.u32 4294901760, %v11960_v0  ;;  %v27537_v0 = vpack.c.bf16 %v35915_v37, %v35898_v33 }
 0xc88   : > { %v27528_v49 = vpack.c.bf16 %v12643_v53, %v12636_v45  ;;  %v12657_v60 = vand.u32 4294901760, %v12656_v25  ;;  %v27534_v53 = vpack.c.bf16 %v35847_v9, %v35836_v16  ;;  %v27543_v25 = vpack.c.bf16 %v36009_v26, %v35998_v36 }
 0xc89   : > { %27382 = vmatpush3.bf16.xpose.msra.mxu0 %v27381_v32  ;;  %v11967_v32 = vsub.f32 %v36145_v57, %v39506_v15 }
 0xc8a   : > { %27526 = vmatpush3.bf16.xpose.msra.mxu1 %v27525_v14  ;;  %27383 = vmatprep.subr.bf16.mxu0 %v39685_v34  ;;  %v12649_v14 = vsub.f32 %v36150_v10, %v12648_v58 }
 0xc8b   : > { %27527 = vmatprep.subr.bf16.mxu1 %v39685_v34  ;;  %v11968_v30 = vand.u32 4294901760, %v11967_v32  ;;  %v27396_v32 = vpack.c.bf16 %v35947_v41, %v35942_v7 }
 0xc8c   : > { %v12650_v6 = vand.u32 4294901760, %v12649_v14  ;;  %v27399_v14 = vpack.c.bf16 %v35991_v29, %v35986_v22 }
 0xc8d   : > { %v27387_v15 = vpack.c.bf16 %v11968_v30, %v11961_v56  ;;  %v27402_v56 = vpack.c.bf16 %v36031_v18, %v36026_v21  ;;  %v27546_v30 = vpack.c.bf16 %v36047_v44, %v36036_v12 }
 0xc8e   : > { %v27531_v45 = vpack.c.bf16 %v12657_v60, %v12650_v6  ;;  %v27405_v6 = vpack.c.bf16 %v36069_v35, %v36064_v23  ;;  %v27549_v60 = vpack.c.bf16 %v36085_v38, %v36074_v31 }
 0xc91   : > { %27385 = vmatpush3.bf16.xpose.msra.mxu0 %v27384_v20  ;;  %v27390_v20 = vpack.c.bf16 %v35831_v54, %v35826_v2 }
 0xc92   : > { %27529 = vmatpush3.bf16.xpose.msra.mxu1 %v27528_v49  ;;  %27386 = vmatprep.subr.bf16.mxu0 %v39685_v34  ;;  %v27540_v49 = vpack.c.bf16 %v35965_v48, %v35954_v27 }
 0xc93   : > { %27530 = vmatprep.subr.bf16.mxu1 %v39685_v34 }
 0xc99   : > { %27388 = vmatpush3.bf16.xpose.msra.mxu0 %v27387_v15  ;;  %v27393_v15 = vpack.c.bf16 %v35890_v43, %v35885_v50 }
 0xc9a   : > { %27532 = vmatpush3.bf16.xpose.msra.mxu1 %v27531_v45  ;;  %27389 = vmatprep.subr.bf16.mxu0 %v39685_v34  ;;  %v27408_v45 = vpack.c.bf16 %v36107_v55, %v36102_v8 }
 0xc9b   : > { %27533 = vmatprep.subr.bf16.mxu1 %v39685_v34 }
 0xca0   : > { %23425 = vmatmul.mubr.f32.vlgmr.msra.gmra.mrb[0].mxu0 %v35821_v13 }
 0xca1   : > { %27391 = vmatpush3.bf16.xpose.msra.mxu0 %v27390_v20  ;;  %23635 = vmatmul.mubr.f32.vlgmr.msra.gmra.mrb[0].mxu1 %v35821_v13  ;;  %v27552_v20 = vpack.c.bf16 %v36123_v51, %v36112_v19 }
 0xca2   : > { %27535 = vmatpush3.bf16.xpose.msra.mxu1 %v27534_v53  ;;  %27392 = vmatprep.subr.bf16.mxu0 %v39685_v34  ;;  %v27411_v53 = vpack.c.bf16 %v36145_v57, %v36140_v63 }
 0xca3   : > { %27536 = vmatprep.subr.bf16.mxu1 %v39685_v34  ;;  %23459 = vmatprep.mubr.msk.f32.mxu0 %vm28907_vm0, %v39694_v24 }
 0xca4   : > { %23669 = vmatprep.mubr.msk.f32.mxu1 %vm28907_vm0, %v39694_v24 }
 0xca9   : > { %27394 = vmatpush3.bf16.xpose.msra.mxu0 %v27393_v15  ;;  %v27555_v15 = vpack.c.bf16 %v36161_v39, %v36150_v10 }
 0xcaa   : > { %27538 = vmatpush3.bf16.xpose.msra.mxu1 %v27537_v0  ;;  %27395 = vmatprep.subr.bf16.mxu0 %v39685_v34  ;;  %v40311_v0 = vld [vmem:[#allocation8_spill] sm:$0xff] }
 0xcab   : > { %27539 = vmatprep.subr.bf16.mxu1 %v39685_v34 }
 0xcb1   : > { %27397 = vmatpush3.bf16.xpose.msra.mxu0 %v27396_v32  ;;  %v40312_v32 = vld [vmem:[#allocation10_spill] sm:$0xff] }
 0xcb2   : > { %27541 = vmatpush3.bf16.xpose.msra.mxu1 %v27540_v49  ;;  %27398 = vmatprep.subr.bf16.mxu0 %v39685_v34  ;;  %v40313_v49 = vld [vmem:[#allocation7_spill] sm:$0xff] }
 0xcb3   : > { %27542 = vmatprep.subr.bf16.mxu1 %v39685_v34 }
 0xcb9   : > { %27400 = vmatpush3.bf16.xpose.msra.mxu0 %v27399_v14  ;;  %v40314_v14 = vld [vmem:[#allocation9_spill] sm:$0xff] }
 0xcba   : > { %27544 = vmatpush3.bf16.xpose.msra.mxu1 %v27543_v25  ;;  %27401 = vmatprep.subr.bf16.mxu0 %v39685_v34  ;;  %v40315_v25 = vand.u32 4294901760, %v35826_v2 }
 0xcbb   : > { %27545 = vmatprep.subr.bf16.mxu1 %v39685_v34 }
 0xcc1   : > { %27403 = vmatpush3.bf16.xpose.msra.mxu0 %v27402_v56  ;;  %v40316_v56 = vand.u32 4294901760, %v35831_v54  ;;  %v40321_v54 = vand.u32 4294901760, %v35890_v43  ;;  %v40327_v43 = vand.u32 4294901760, %v35965_v48  ;;  %v40333_v48 = vand.u32 4294901760, %v36031_v18 }
 0xcc2   : > { %27547 = vmatpush3.bf16.xpose.msra.mxu1 %v27546_v30  ;;  %27404 = vmatprep.subr.bf16.mxu0 %v39685_v34  ;;  %v40339_v18 = vand.u32 4294901760, %v36085_v38  ;;  %v40344_v38 = vand.u32 4294901760, %v36145_v57 }
 0xcc3   : > { %27548 = vmatprep.subr.bf16.mxu1 %v39685_v34  ;;  %v27438_v30 = vpack.c.bf16 %v40316_v56, %v40315_v25  ;;  %v40324_v25 = vand.u32 4294901760, %v35942_v7  ;;  %v40325_v56 = vand.u32 4294901760, %v35947_v41  ;;  %v40330_v7 = vand.u32 4294901760, %v35998_v36 }
 0xcc4   : > { %v40331_v41 = vand.u32 4294901760, %v36009_v26  ;;  %v40336_v36 = vand.u32 4294901760, %v36064_v23  ;;  %v40337_v26 = vand.u32 4294901760, %v36069_v35  ;;  %v40342_v23 = vand.u32 4294901760, %v36112_v19  ;;  %v11639_v19 = vld [vmem:[%s35561_s25 + $0x198] sm:$0xff] }
 0xcc5   : > { %v40343_v35 = vand.u32 4294901760, %v36123_v51  ;;  %v11623_v51 = vld [vmem:[%s35561_s25 + $0x118] sm:$0xff] }
 0xcc6   : > { %v36447_v10 = vsel %vm557_vm1, %v11623_v51, 0 }
 0xcc9   : > { %27406 = vmatpush3.bf16.xpose.msra.mxu0 %v27405_v6  ;;  %v40317_v6 = vand.u32 4294901760, %v35836_v16  ;;  %v40320_v16 = vand.u32 4294901760, %v35885_v50  ;;  %v40326_v50 = vand.u32 4294901760, %v35954_v27  ;;  %v40332_v27 = vand.u32 4294901760, %v36026_v21 }
 0xcca   : > { %27550 = vmatpush3.bf16.xpose.msra.mxu1 %v27549_v60  ;;  %27407 = vmatprep.subr.bf16.mxu0 %v39685_v34  ;;  %v40318_v60 = vand.u32 4294901760, %v35847_v9  ;;  %v40322_v9 = vand.u32 4294901760, %v35898_v33  ;;  %v40328_v33 = vand.u32 4294901760, %v35986_v22  ;;  %v40334_v22 = vand.u32 4294901760, %v36036_v12 }
 0xccb   : > { %27551 = vmatprep.subr.bf16.mxu1 %v39685_v34  ;;  %v27441_v2 = vpack.c.bf16 %v40321_v54, %v40320_v16  ;;  %v27450_v16 = vpack.c.bf16 %v40333_v48, %v40332_v27  ;;  %v40338_v21 = vand.u32 4294901760, %v36074_v31  ;;  %v40341_v12 = vand.u32 4294901760, %v36107_v55  ;;  %v11638_v55 = vld [vmem:[%s35561_s25 + $0x190] sm:$0xff] }
 0xccc   : > { %v27459_v31 = vpack.c.bf16 %v40344_v38, %v11959_v4  ;;  %v11622_v4 = vld [vmem:[%s35561_s25 + $0x110] sm:$0xff]  ;;  %v11644_v38 = vld [vmem:[%s35561_s25 + $0x1c0] sm:$0xff] }
 0xccd   : > { %v36444_v57 = vsel %vm557_vm1, %v11622_v4, 0 }
 0xcd1   : > { %27409 = vmatpush3.bf16.xpose.msra.mxu0 %v27408_v45  ;;  %v27582_v45 = vpack.c.bf16 %v40318_v60, %v40317_v6  ;;  %v27588_v6 = vpack.c.bf16 %v40327_v43, %v40326_v50  ;;  %v11641_v50 = vld [vmem:[%s35561_s25 + $0x1a8] sm:$0xff] }
 0xcd2   : > { %27553 = vmatpush3.bf16.xpose.msra.mxu1 %v27552_v20  ;;  %27410 = vmatprep.subr.bf16.mxu0 %v39685_v34  ;;  %v40319_v20 = vld [vmem:[#allocation5_spill] sm:$0xff] }
 0xcd3   : > { %27554 = vmatprep.subr.bf16.mxu1 %v39685_v34 }
 0xcd9   : > { %27412 = vmatpush3.bf16.xpose.msra.mxu0 %v27411_v53  ;;  %v40323_v53 = vand.u32 4294901760, %v35915_v37  ;;  %v40329_v37 = vand.u32 4294901760, %v35991_v29  ;;  %v40335_v29 = vand.u32 4294901760, %v36047_v44  ;;  %v40340_v44 = vand.u32 4294901760, %v36102_v8 }
 0xcda   : > { %27556 = vmatpush3.bf16.xpose.msra.mxu1 %v27555_v15  ;;  %27413 = vmatprep.subr.bf16.mxu0 %v39685_v34  ;;  %v27603_v8 = vpack.c.bf16 %v12655_v61, %v12648_v58  ;;  %v36450_v58 = vsel %vm557_vm1, %v11638_v55, 0  ;;  %v36453_v61 = vsel %vm557_vm1, %v11639_v19, 0 }
 0xcdb   : > { %27557 = vmatprep.subr.bf16.mxu1 %v39685_v34  ;;  %v27585_v15 = vpack.c.bf16 %v40323_v53, %v40322_v9  ;;  %v27447_v60 = vpack.c.bf16 %v40329_v37, %v40328_v33  ;;  %v27594_v54 = vpack.c.bf16 %v40335_v29, %v40334_v22  ;;  %v27597_v9 = vpack.c.bf16 %v40339_v18, %v40338_v21  ;;  %v11627_v22 = vld [vmem:[%s35561_s25 + $0x138] sm:$0xff]  ;;  %v11642_v29 = vld [vmem:[%s35561_s25 + $0x1b0] sm:$0xff] }
 0xcdc   : > { %v27456_v53 = vpack.c.bf16 %v40341_v12, %v40340_v44  ;;  %v36525_v21 = vsel %vm557_vm1, %v11627_v22, 0  ;;  %v36528_v18 = vsel %vm557_vm1, %v11642_v29, 0 }
 0xcdd   : > { %v39513_v12 = vand.u32 4294901760, %v36525_v21 }
 0xce0   : > { %23460 = vmatmul.mubr.f32.vlgmr.msra.gmra.mrb[0].mxu0 %v35868_v59 }
 0xce1   : > { %27415 = vmatpush3.bf16.xpose.msra.mxu0 %v35599_v52  ;;  %23670 = vmatmul.mubr.f32.vlgmr.msra.gmra.mrb[0].mxu1 %v35868_v59 }
 0xce2   : > { %27559 = vmatpush3.bf16.xpose.msra.mxu1 %v35605_v42  ;;  %27416 = vmatprep.subr.bf16.mxu0 %v39685_v34 }
 0xce3   : > { %27560 = vmatprep.subr.bf16.mxu1 %v39685_v34  ;;  %23494 = vmatprep.mubr.msk.f32.mxu0 %vm28907_vm0, %v39694_v24 }
 0xce4   : > { %23704 = vmatprep.mubr.msk.f32.mxu1 %vm28907_vm0, %v39694_v24 }
 0xce9   : > { %27418 = vmatpush3.bf16.xpose.msra.mxu0 %v35641_v11 }
 0xcea   : > { %27562 = vmatpush3.bf16.xpose.msra.mxu1 %v35647_v3  ;;  %27419 = vmatprep.subr.bf16.mxu0 %v39685_v34 }
 0xceb   : > { %27563 = vmatprep.subr.bf16.mxu1 %v39685_v34 }
 0xcf1   : > { %27421 = vmatpush3.bf16.xpose.msra.mxu0 %v35677_v1 }
 0xcf2   : > { %27565 = vmatpush3.bf16.xpose.msra.mxu1 %v35683_v28  ;;  %27422 = vmatprep.subr.bf16.mxu0 %v39685_v34 }
 0xcf3   : > { %27566 = vmatprep.subr.bf16.mxu1 %v39685_v34 }
 0xcf9   : > { %27424 = vmatpush3.bf16.xpose.msra.mxu0 %v35713_v62 }
 0xcfa   : > { %27568 = vmatpush3.bf16.xpose.msra.mxu1 %v35719_v5  ;;  %27425 = vmatprep.subr.bf16.mxu0 %v39685_v34 }
 0xcfb   : > { %27569 = vmatprep.subr.bf16.mxu1 %v39685_v34 }
 0xd01   : > { %27427 = vmatpush3.bf16.xpose.msra.mxu0 %v35749_v46 }
 0xd02   : > { %27571 = vmatpush3.bf16.xpose.msra.mxu1 %v35755_v17  ;;  %27428 = vmatprep.subr.bf16.mxu0 %v39685_v34 }
 0xd03   : > { %27572 = vmatprep.subr.bf16.mxu1 %v39685_v34 }
 0xd09   : > { %27430 = vmatpush3.bf16.xpose.msra.mxu0 %v35785_v40 }
 0xd0a   : > { %27574 = vmatpush3.bf16.xpose.msra.mxu1 %v35791_v47  ;;  %27431 = vmatprep.subr.bf16.mxu0 %v39685_v34 }
 0xd0b   : > { %27575 = vmatprep.subr.bf16.mxu1 %v39685_v34 }
 0xd11   : > { %27433 = vmatpush3.bf16.xpose.msra.mxu0 %v40311_v0 }
 0xd12   : > { %27577 = vmatpush3.bf16.xpose.msra.mxu1 %v40312_v32  ;;  %27434 = vmatprep.subr.bf16.mxu0 %v39685_v34 }
 0xd13   : > { %27578 = vmatprep.subr.bf16.mxu1 %v39685_v34 }
 0xd19   : > { %27436 = vmatpush3.bf16.xpose.msra.mxu0 %v40313_v49 }
 0xd1a   : > { %27580 = vmatpush3.bf16.xpose.msra.mxu1 %v40314_v14  ;;  %27437 = vmatprep.subr.bf16.mxu0 %v39685_v34 }
 0xd1b   : > { %27581 = vmatprep.subr.bf16.mxu1 %v39685_v34 }
 0xd20   : > { %23495 = vmatmul.mubr.f32.vlgmr.msra.gmra.mrb[0].mxu0 %v40319_v20 }
 0xd21   : > { %27439 = vmatpush3.bf16.xpose.msra.mxu0 %v27438_v30  ;;  %23705 = vmatmul.mubr.f32.vlgmr.msra.gmra.mrb[0].mxu1 %v40319_v20  ;;  %v27444_v30 = vpack.c.bf16 %v40325_v56, %v40324_v25  ;;  %v11624_v25 = vld [vmem:[%s35561_s25 + $0x120] sm:$0xff]  ;;  %v11625_v56 = vld [vmem:[%s35561_s25 + $0x128] sm:$0xff] }
 0xd22   : > { %27583 = vmatpush3.bf16.xpose.msra.mxu1 %v27582_v45  ;;  %27440 = vmatprep.subr.bf16.mxu0 %v39685_v34  ;;  %v27591_v45 = vpack.c.bf16 %v40331_v41, %v40330_v7  ;;  %v36486_v33 = vsel %vm557_vm1, %v11624_v25, 0  ;;  %v36489_v37 = vsel %vm557_vm1, %v11625_v56, 0  ;;  %v36495_v7 = vsel %vm557_vm1, %v11641_v50, 0  ;;  %v11630_v56 = vld [vmem:[%s35561_s25 + $0x150] sm:$0xff] }
 0xd23   : > { %27584 = vmatprep.subr.bf16.mxu1 %v39685_v34  ;;  %23529 = vmatprep.mubr.msk.f32.mxu0 %vm28907_vm0, %v39694_v24  ;;  %v39522_v41 = vand.u32 4294901760, %v36486_v33  ;;  %v39519_v48 = vand.u32 4294901760, %v36495_v7  ;;  %v11646_v50 = vld [vmem:[%s35561_s25 + $0x1d0] sm:$0xff] }
 0xd24   : > { %23739 = vmatprep.mubr.msk.f32.mxu1 %vm28907_vm0, %v39694_v24 }
 0xd29   : > { %27442 = vmatpush3.bf16.xpose.msra.mxu0 %v27441_v2  ;;  %v27453_v2 = vpack.c.bf16 %v40337_v26, %v40336_v36 }
 0xd2a   : > { %27586 = vmatpush3.bf16.xpose.msra.mxu1 %v27585_v15  ;;  %27443 = vmatprep.subr.bf16.mxu0 %v39685_v34  ;;  %v27600_v15 = vpack.c.bf16 %v40343_v35, %v40342_v23  ;;  %v11628_v35 = vld [vmem:[%s35561_s25 + $0x140] sm:$0xff] }
 0xd2b   : > { %27587 = vmatprep.subr.bf16.mxu1 %v39685_v34 }
 0xd31   : > { %27445 = vmatpush3.bf16.xpose.msra.mxu0 %v27444_v30  ;;  %v11640_v30 = vld [vmem:[%s35561_s25 + $0x1a0] sm:$0xff] }
 0xd32   : > { %27589 = vmatpush3.bf16.xpose.msra.mxu1 %v27588_v6  ;;  %27446 = vmatprep.subr.bf16.mxu0 %v39685_v34 }
 0xd33   : > { %27590 = vmatprep.subr.bf16.mxu1 %v39685_v34 }
 0xd39   : > { %27448 = vmatpush3.bf16.xpose.msra.mxu0 %v27447_v60  ;;  %v36492_v60 = vsel %vm557_vm1, %v11640_v30, 0  ;;  %v11631_v30 = vld [vmem:[%s35561_s25 + $0x158] sm:$0xff] }
 0xd3a   : > { %27592 = vmatpush3.bf16.xpose.msra.mxu1 %v27591_v45  ;;  %27449 = vmatprep.subr.bf16.mxu0 %v39685_v34  ;;  %v39521_v45 = vand.u32 4294901760, %v36489_v37  ;;  %v39520_v27 = vand.u32 4294901760, %v36492_v60 }
 0xd3b   : > { %27593 = vmatprep.subr.bf16.mxu1 %v39685_v34 }
 0xd3c   : > { %v36513_v36 = vpack.c.bf16 %v39521_v45, %v39522_v41  ;;  %v36519_v26 = vpack.c.bf16 %v39519_v48, %v39520_v27  ;;  %v11651_v48 = vld [vmem:[%s35561_s25 + $0x1f8] sm:$0xff] }
 0xd41   : > { %27451 = vmatpush3.bf16.xpose.msra.mxu0 %v27450_v16  ;;  %v11626_v16 = vld [vmem:[%s35561_s25 + $0x130] sm:$0xff] }
 0xd42   : > { %27595 = vmatpush3.bf16.xpose.msra.mxu1 %v27594_v54  ;;  %27452 = vmatprep.subr.bf16.mxu0 %v39685_v34  ;;  %v11643_v54 = vld [vmem:[%s35561_s25 + $0x1b8] sm:$0xff] }
 0xd43   : > { %27596 = vmatprep.subr.bf16.mxu1 %v39685_v34 }
 0xd49   : > { %27454 = vmatpush3.bf16.xpose.msra.mxu0 %v27453_v2  ;;  %v36522_v2 = vsel %vm557_vm1, %v11626_v16, 0  ;;  %v11647_v16 = vld [vmem:[%s35561_s25 + $0x1d8] sm:$0xff] }
 0xd4a   : > { %27598 = vmatpush3.bf16.xpose.msra.mxu1 %v27597_v9  ;;  %27455 = vmatprep.subr.bf16.mxu0 %v39685_v34  ;;  %v36531_v9 = vsel %vm557_vm1, %v11643_v54, 0  ;;  %v39514_v44 = vand.u32 4294901760, %v36522_v2  ;;  %v36594_v54 = vsel %vm557_vm1, %v11630_v56, 0 }
 0xd4b   : > { %27599 = vmatprep.subr.bf16.mxu1 %v39685_v34  ;;  %v39511_v23 = vand.u32 4294901760, %v36531_v9 }
 0xd51   : > { %27457 = vmatpush3.bf16.xpose.msra.mxu0 %v27456_v53  ;;  %v39512_v53 = vand.u32 4294901760, %v36528_v18 }
 0xd52   : > { %27601 = vmatpush3.bf16.xpose.msra.mxu1 %v27600_v15  ;;  %27458 = vmatprep.subr.bf16.mxu0 %v39685_v34  ;;  %v11629_v15 = vld [vmem:[%s35561_s25 + $0x148] sm:$0xff] }
 0xd53   : > { %27602 = vmatprep.subr.bf16.mxu1 %v39685_v34 }
 0xd59   : > { %27460 = vmatpush3.bf16.xpose.msra.mxu0 %v27459_v31  ;;  %v11645_v31 = vld [vmem:[%s35561_s25 + $0x1c8] sm:$0xff] }
 0xd5a   : > { %27604 = vmatpush3.bf16.xpose.msra.mxu1 %v27603_v8  ;;  %27461 = vmatprep.subr.bf16.mxu0 %v39685_v34  ;;  %v36549_v8 = vpack.c.bf16 %v39513_v12, %v39514_v44  ;;  %v36567_v4 = vsel %vm557_vm1, %v11645_v31, 0  ;;  %v39516_v31 = vand.u32 4294901760, %v36594_v54 }
 0xd5b   : > { %27605 = vmatprep.subr.bf16.mxu1 %v39685_v34  ;;  %v39507_v25 = vand.u32 4294901760, %v36567_v4 }
 0xd60   : > { %23530 = vmatmul.mubr.f32.vlgmr.msra.gmra.mrb[0].mxu0 %v35821_v13 }
 0xd61   : > { %27463 = vmatpush3.bf16.xpose.msra.mxu0 %v35599_v52  ;;  %23740 = vmatmul.mubr.f32.vlgmr.msra.gmra.mrb[0].mxu1 %v35821_v13  ;;  %v11620_v52 = vld [vmem:[%s35561_s25 + $0x100] sm:$0xff] }
 0xd62   : > { %27607 = vmatpush3.bf16.xpose.msra.mxu1 %v35605_v42  ;;  %27464 = vmatprep.subr.bf16.mxu0 %v39685_v34  ;;  %v11621_v42 = vld [vmem:[%s35561_s25 + $0x108] sm:$0xff] }
 0xd63   : > { %27608 = vmatprep.subr.bf16.mxu1 %v39685_v34  ;;  %23564 = vmatprep.mubr.msk.f32.mxu0 %vm28907_vm0, %v39694_v24 }
 0xd64   : > { %23774 = vmatprep.mubr.msk.f32.mxu1 %vm28907_vm0, %v39694_v24 }
 0xd69   : > { %27466 = vmatpush3.bf16.xpose.msra.mxu0 %v35641_v11  ;;  %v11636_v11 = vld [vmem:[%s35561_s25 + $0x180] sm:$0xff] }
 0xd6a   : > { %27610 = vmatpush3.bf16.xpose.msra.mxu1 %v35647_v3  ;;  %27467 = vmatprep.subr.bf16.mxu0 %v39685_v34  ;;  %v11637_v3 = vld [vmem:[%s35561_s25 + $0x188] sm:$0xff] }
 0xd6b   : > { %27611 = vmatprep.subr.bf16.mxu1 %v39685_v34 }
 0xd71   : > { %27469 = vmatpush3.bf16.xpose.msra.mxu0 %v35677_v1  ;;  %v36408_v1 = vsel %vm557_vm1, %v11620_v52, 0  ;;  %v36555_v52 = vpack.c.bf16 %v39511_v23, %v39512_v53 }
 0xd72   : > { %27613 = vmatpush3.bf16.xpose.msra.mxu1 %v35683_v28  ;;  %27470 = vmatprep.subr.bf16.mxu0 %v39685_v34  ;;  %v36411_v28 = vsel %vm557_vm1, %v11621_v42, 0  ;;  %v36558_v42 = vsel %vm557_vm1, %v11628_v35, 0  ;;  %v36597_v35 = vsel %vm557_vm1, %v11631_v30, 0 }
 0xd73   : > { %27614 = vmatprep.subr.bf16.mxu1 %v39685_v34  ;;  %v39510_v51 = vand.u32 4294901760, %v36558_v42 }
 0xd79   : > { %27472 = vmatpush3.bf16.xpose.msra.mxu0 %v35713_v62  ;;  %v36414_v62 = vsel %vm557_vm1, %v11636_v11, 0  ;;  %v36561_v11 = vsel %vm557_vm1, %v11629_v15, 0  ;;  %v36600_v15 = vsel %vm557_vm1, %v11646_v50, 0  ;;  %v11632_v50 = vld [vmem:[%s35561_s25 + $0x160] sm:$0xff] }
 0xd7a   : > { %27616 = vmatpush3.bf16.xpose.msra.mxu1 %v35719_v5  ;;  %27473 = vmatprep.subr.bf16.mxu0 %v39685_v34  ;;  %v36417_v5 = vsel %vm557_vm1, %v11637_v3, 0  ;;  %v36564_v3 = vsel %vm557_vm1, %v11644_v38, 0  ;;  %v39509_v55 = vand.u32 4294901760, %v36561_v11  ;;  %v36603_v38 = vsel %vm557_vm1, %v11647_v16, 0  ;;  %v11648_v16 = vld [vmem:[%s35561_s25 + $0x1e0] sm:$0xff] }
 0xd7b   : > { %27617 = vmatprep.subr.bf16.mxu1 %v39685_v34  ;;  %v39508_v19 = vand.u32 4294901760, %v36564_v3  ;;  %v39518_v56 = vand.u32 4294901760, %v36600_v15  ;;  %v39517_v30 = vand.u32 4294901760, %v36603_v38  ;;  %v36630_v53 = vsel %vm557_vm1, %v11632_v50, 0 }
 0xd7c   : > { %v36585_v22 = vpack.c.bf16 %v39509_v55, %v39510_v51  ;;  %v11649_v55 = vld [vmem:[%s35561_s25 + $0x1e8] sm:$0xff]  ;;  %v36636_v44 = vsel %vm557_vm1, %v11648_v16, 0  ;;  %v11634_v16 = vld [vmem:[%s35561_s25 + $0x170] sm:$0xff] }
 0xd7d   : > { %v36591_v29 = vpack.c.bf16 %v39507_v25, %v39508_v19  ;;  %v39515_v25 = vand.u32 4294901760, %v36597_v35  ;;  %v11633_v19 = vld [vmem:[%s35561_s25 + $0x168] sm:$0xff]  ;;  %v36627_v23 = vpack.c.bf16 %v39517_v30, %v39518_v56  ;;  %v39525_v50 = vand.u32 4294901760, %v36636_v44  ;;  %v11635_v56 = vld [vmem:[%s35561_s25 + $0x178] sm:$0xff] }
 0xd7e   : > { %v36633_v12 = vsel %vm557_vm1, %v11633_v19, 0 }
 0xd7f   : > { %v36621_v51 = vpack.c.bf16 %v39515_v25, %v39516_v31  ;;  %v36639_v25 = vsel %vm557_vm1, %v11649_v55, 0  ;;  %v39527_v31 = vand.u32 4294901760, %v36630_v53  ;;  %v39526_v30 = vand.u32 4294901760, %v36633_v12  ;;  %v11650_v55 = vld [vmem:[%s35561_s25 + $0x1f0] sm:$0xff] }
 0xd80   : > { %v39524_v19 = vand.u32 4294901760, %v36639_v25 }
 0xd81   : > { %27475 = vmatpush3.bf16.xpose.msra.mxu0 %v35749_v46  ;;  %v13835_v46 = vand.u32 4294901760, %v36414_v62 }
 0xd82   : > { %27619 = vmatpush3.bf16.xpose.msra.mxu1 %v35755_v17  ;;  %27476 = vmatprep.subr.bf16.mxu0 %v39685_v34  ;;  %v13838_v17 = vand.u32 4294901760, %v36417_v5 }
 0xd83   : > { %27620 = vmatprep.subr.bf16.mxu1 %v39685_v34  ;;  %v36666_v41 = vsub.f32 %v36414_v62, %v13835_v46  ;;  %v36686_v62 = vsel %vm557_vm1, %v11634_v16, 0 }
 0xd84   : > { %v36441_v63 = vpack.c.bf16 %v13838_v17, %v13835_v46  ;;  %v36695_v46 = vsel %vm557_vm1, %v11651_v48, 0 }
 0xd85   : > { %v39534_v48 = vand.u32 4294901760, %v36666_v41 }
 0xd89   : > { %27478 = vmatpush3.bf16.xpose.msra.mxu0 %v35785_v40  ;;  %v13149_v40 = vand.u32 4294901760, %v36411_v28 }
 0xd8a   : > { %27622 = vmatpush3.bf16.xpose.msra.mxu1 %v35791_v47  ;;  %27479 = vmatprep.subr.bf16.mxu0 %v39685_v34  ;;  %v13146_v47 = vand.u32 4294901760, %v36408_v1 }
 0xd8b   : > { %27623 = vmatprep.subr.bf16.mxu1 %v39685_v34  ;;  %v36661_v45 = vsub.f32 %v36411_v28, %v13149_v40  ;;  %v36683_v28 = vpack.c.bf16 %v39524_v19, %v39525_v50 }
 0xd8c   : > { %v36435_v39 = vpack.c.bf16 %v13149_v40, %v13146_v47  ;;  %v36656_v27 = vsub.f32 %v36408_v1, %v13146_v47  ;;  %v36677_v1 = vsub.f32 %v36417_v5, %v13838_v17  ;;  %v36689_v47 = vsel %vm557_vm1, %v11635_v56, 0 }
 0xd8d   : > { %40346 = vst [vmem:[#allocation10_spill] sm:$0xff] %v36683_v28  ;;  %v36692_v40 = vsel %vm557_vm1, %v11650_v55, 0  ;;  %v39530_v5 = vand.u32 4294901760, %v36686_v62  ;;  %v39528_v17 = vand.u32 4294901760, %v36689_v47  ;;  %v39531_v16 = vand.u32 4294901760, %v36661_v45 }
 0xd8e   : > { %v39529_v19 = vand.u32 4294901760, %v36656_v27  ;;  %v39533_v56 = vand.u32 4294901760, %v36692_v40 }
 0xd8f   : > { %v36728_v50 = vpack.c.bf16 %v39528_v17, %v39530_v5  ;;  %v13929_v17 = vsub.f32 %v36666_v41, %v39534_v48 }
 0xd91   : > { %27481 = vmatpush3.bf16.xpose.msra.mxu0 %v40311_v0  ;;  %v13152_v0 = vand.u32 4294901760, %v36444_v57  ;;  %40347 = vst [vmem:[#allocation7_spill] sm:$0xff] %v36728_v50 }
 0xd92   : > { %27625 = vmatpush3.bf16.xpose.msra.mxu1 %v40312_v32  ;;  %27482 = vmatprep.subr.bf16.mxu0 %v39685_v34  ;;  %v13155_v32 = vand.u32 4294901760, %v36447_v10 }
 0xd93   : > { %27626 = vmatprep.subr.bf16.mxu1 %v39685_v34 }
 0xd94   : > { %v36477_v43 = vpack.c.bf16 %v13155_v32, %v13152_v0 }
 0xd99   : > { %27484 = vmatpush3.bf16.xpose.msra.mxu0 %v40313_v49  ;;  %v13841_v49 = vand.u32 4294901760, %v36450_v58 }
 0xd9a   : > { %27628 = vmatpush3.bf16.xpose.msra.mxu1 %v40314_v14  ;;  %27629 = vmatprep.subr.bf16.mxu0 %v39685_v34  ;;  %v39523_v14 = vand.u32 4294901760, %v36453_v61 }
 0xd9b   : > { %27773 = vmatprep.subr.bf16.mxu1 %v39685_v34  ;;  %v36722_v55 = vsub.f32 %v36450_v58, %v13841_v49  ;;  %v40349_v58 = vand.u32 4294901760, %v36695_v46 }
 0xd9c   : > { %v36483_v6 = vpack.c.bf16 %v39523_v14, %v13841_v49  ;;  %v36672_v14 = vpack.c.bf16 %v39526_v30, %v39527_v31  ;;  %v36712_v30 = vsub.f32 %v36444_v57, %v13152_v0  ;;  %v36717_v31 = vsub.f32 %v36447_v10, %v13155_v32 }
 0xd9d   : > { %v13240_v57 = vsub.f32 %v36656_v27, %v39529_v19  ;;  %v13247_v10 = vsub.f32 %v36661_v45, %v39531_v16  ;;  %v40348_v0 = vand.u32 4294901760, %v36453_v61  ;;  %v36745_v49 = vpack.c.bf16 %v40349_v58, %v39533_v56 }
 0xd9e   : > { %40345 = vst [vmem:[#allocation8_spill] sm:$0xff] %v36672_v14  ;;  %v40351_v19 = vand.u32 4294901760, %v36677_v1  ;;  %v13930_v58 = vand.u32 4294901760, %v13929_v17 }
 0xd9f   : > { %v36739_v32 = vsub.f32 %v36453_v61, %v40348_v0  ;;  %40350 = vst [vmem:[#allocation9_spill] sm:$0xff] %v36745_v49  ;;  %v13241_v16 = vand.u32 4294901760, %v13240_v57  ;;  %v13248_v20 = vand.u32 4294901760, %v13247_v10  ;;  %v40353_v10 = vand.u32 4294901760, %v36489_v37 }
 0xda0   : > { %23565 = vmatmul.mubr.f32.vlgmr.msra.gmra.mrb[0].mxu0 %v35821_v13  ;;  %v13936_v5 = vsub.f32 %v36677_v1, %v40351_v19  ;;  %v40352_v19 = vand.u32 4294901760, %v36486_v33  ;;  %v40354_v61 = vand.u32 4294901760, %v36492_v60 }
 0xda1   : > { %23775 = vmatmul.mubr.f32.vlgmr.msra.gmra.mrb[0].mxu1 %v35821_v13  ;;  %27631 = vmatpush3.bf16.xpose.msra.mxu0 %v36435_v39  ;;  %v36769_v0 = vsub.f32 %v36489_v37, %v40353_v10  ;;  %v27654_v17 = vpack.c.bf16 %v13248_v20, %v13241_v16  ;;  %v40358_v10 = vand.u32 4294901760, %v36722_v55  ;;  %v40359_v20 = vand.u32 4294901760, %v36739_v32 }
 0xda2   : > { %27775 = vmatpush3.bf16.xpose.msra.mxu1 %v36441_v63  ;;  %27632 = vmatprep.subr.bf16.mxu0 %v39685_v34  ;;  %v13937_v56 = vand.u32 4294901760, %v13936_v5  ;;  %v36764_v57 = vsub.f32 %v36486_v33, %v40352_v19  ;;  %v36774_v5 = vsub.f32 %v36492_v60, %v40354_v61  ;;  %v40357_v19 = vand.u32 4294901760, %v36495_v7  ;;  %v40360_v61 = vld [vmem:[#allocation6_spill] sm:$0xff] }
 0xda3   : > { %27776 = vmatprep.subr.bf16.mxu1 %v39685_v34  ;;  %23809 = vmatprep.mubr.msk.f32.mxu0 %vm28907_vm0, %v39694_v24  ;;  %v13943_v60 = vsub.f32 %v36722_v55, %v40358_v10  ;;  %v13950_v16 = vsub.f32 %v36739_v32, %v40359_v20 }
 0xda4   : > { %24019 = vmatprep.mubr.msk.f32.mxu1 %vm28907_vm0, %v39694_v24  ;;  %v27798_v37 = vpack.c.bf16 %v13937_v56, %v13930_v58 }
 0xda5   : > { %v13944_v56 = vand.u32 4294901760, %v13943_v60  ;;  %v13951_v58 = vand.u32 4294901760, %v13950_v16  ;;  %v40363_v60 = vand.u32 4294901760, %v36528_v18 }
 0xda7   : > { %v36818_v20 = vsub.f32 %v36528_v18, %v40363_v60 }
 0xda9   : > { %27634 = vmatpush3.bf16.xpose.msra.mxu0 %v36477_v43 }
 0xdaa   : > { %27778 = vmatpush3.bf16.xpose.msra.mxu1 %v36483_v6  ;;  %27635 = vmatprep.subr.bf16.mxu0 %v39685_v34 }
 0xdab   : > { %27779 = vmatprep.subr.bf16.mxu1 %v39685_v34 }
 0xdb1   : > { %27637 = vmatpush3.bf16.xpose.msra.mxu0 %v36513_v36 }
 0xdb2   : > { %27781 = vmatpush3.bf16.xpose.msra.mxu1 %v36519_v26  ;;  %27638 = vmatprep.subr.bf16.mxu0 %v39685_v34 }
 0xdb3   : > { %27782 = vmatprep.subr.bf16.mxu1 %v39685_v34 }
 0xdb9   : > { %27640 = vmatpush3.bf16.xpose.msra.mxu0 %v36549_v8 }
 0xdba   : > { %27784 = vmatpush3.bf16.xpose.msra.mxu1 %v36555_v52  ;;  %27641 = vmatprep.subr.bf16.mxu0 %v39685_v34 }
 0xdbb   : > { %27785 = vmatprep.subr.bf16.mxu1 %v39685_v34 }
 0xdc1   : > { %27643 = vmatpush3.bf16.xpose.msra.mxu0 %v36585_v22 }
 0xdc2   : > { %27787 = vmatpush3.bf16.xpose.msra.mxu1 %v36591_v29  ;;  %27644 = vmatprep.subr.bf16.mxu0 %v39685_v34 }
 0xdc3   : > { %27788 = vmatprep.subr.bf16.mxu1 %v39685_v34 }
 0xdc9   : > { %27646 = vmatpush3.bf16.xpose.msra.mxu0 %v36621_v51 }
 0xdca   : > { %27790 = vmatpush3.bf16.xpose.msra.mxu1 %v36627_v23  ;;  %27647 = vmatprep.subr.bf16.mxu0 %v39685_v34 }
 0xdcb   : > { %27791 = vmatprep.subr.bf16.mxu1 %v39685_v34 }
 0xdd1   : > { %27649 = vmatpush3.bf16.xpose.msra.mxu0 %v36672_v14  ;;  %v39543_v14 = vand.u32 4294901760, %v36764_v57 }
 0xdd2   : > { %27793 = vmatpush3.bf16.xpose.msra.mxu1 %v36683_v28  ;;  %27650 = vmatprep.subr.bf16.mxu0 %v39685_v34  ;;  %v40355_v28 = vand.u32 4294901760, %v36712_v30 }
 0xdd3   : > { %27794 = vmatprep.subr.bf16.mxu1 %v39685_v34  ;;  %v13268_v10 = vsub.f32 %v36764_v57, %v39543_v14 }
 0xdd4   : > { %v13254_v48 = vsub.f32 %v36712_v30, %v40355_v28 }
 0xdd5   : > { %v13269_v60 = vand.u32 4294901760, %v13268_v10 }
 0xdd6   : > { %v13255_v28 = vand.u32 4294901760, %v13254_v48  ;;  %v40361_v48 = vand.u32 4294901760, %v36522_v2 }
 0xdd9   : > { %27652 = vmatpush3.bf16.xpose.msra.mxu0 %v36728_v50  ;;  %v36785_v50 = vsub.f32 %v36495_v7, %v40357_v19  ;;  %v39545_v7 = vand.u32 4294901760, %v36769_v0  ;;  %v39546_v19 = vand.u32 4294901760, %v36774_v5 }
 0xdda   : > { %27796 = vmatpush3.bf16.xpose.msra.mxu1 %v36745_v49  ;;  %27653 = vmatprep.subr.bf16.mxu0 %v39685_v34  ;;  %v40356_v49 = vand.u32 4294901760, %v36717_v31 }
 0xddb   : > { %27797 = vmatprep.subr.bf16.mxu1 %v39685_v34  ;;  %v13957_v18 = vsub.f32 %v36774_v5, %v39546_v19 }
 0xddc   : > { %v13261_v33 = vsub.f32 %v36717_v31, %v40356_v49 }
 0xdde   : > { %v13262_v49 = vand.u32 4294901760, %v13261_v33  ;;  %v40362_v33 = vand.u32 4294901760, %v36525_v21 }
 0xde0   : > { %23810 = vmatmul.mubr.f32.vlgmr.msra.gmra.mrb[2].mxu0 %v40360_v61  ;;  %v27657_v16 = vpack.c.bf16 %v13262_v49, %v13255_v28  ;;  %v40365_v28 = vand.u32 4294901760, %v36785_v50 }
 0xde1   : > { %27655 = vmatpush3.bf16.xpose.msra.mxu0 %v27654_v17  ;;  %24020 = vmatmul.mubr.f32.vlgmr.msra.gmra.mrb[2].mxu1 %v40360_v61  ;;  %v36806_v17 = vsub.f32 %v36522_v2, %v40361_v48  ;;  %v13275_v2 = vsub.f32 %v36769_v0, %v39545_v7 }
 0xde2   : > { %27799 = vmatpush3.bf16.xpose.msra.mxu1 %v27798_v37  ;;  %27656 = vmatprep.subr.bf16.mxu0 %v39685_v34  ;;  %v36811_v37 = vsub.f32 %v36525_v21, %v40362_v33  ;;  %v40364_v21 = vand.u32 4294901760, %v36531_v9  ;;  %v27801_v33 = vpack.c.bf16 %v13951_v58, %v13944_v56  ;;  %v13964_v49 = vsub.f32 %v36785_v50, %v40365_v28 }
 0xde3   : > { %27800 = vmatprep.subr.bf16.mxu1 %v39685_v34  ;;  %23844 = vmatprep.mubr.msk.f32.mxu0 %vm28907_vm0, %v39694_v24  ;;  %v13276_v14 = vand.u32 4294901760, %v13275_v2  ;;  %v39547_v61 = vand.u32 4294901760, %v36806_v17  ;;  %v39549_v58 = vand.u32 4294901760, %v36818_v20  ;;  %v40366_v28 = vand.u32 4294901760, %v36558_v42 }
 0xde4   : > { %24054 = vmatprep.mubr.msk.f32.mxu1 %vm28907_vm0, %v39694_v24  ;;  %v36829_v48 = vsub.f32 %v36531_v9, %v40364_v21  ;;  %v39548_v7 = vand.u32 4294901760, %v36811_v37  ;;  %v13958_v9 = vand.u32 4294901760, %v13957_v18  ;;  %v13965_v56 = vand.u32 4294901760, %v13964_v49 }
 0xde5   : > { %v36846_v10 = vsub.f32 %v36558_v42, %v40366_v28  ;;  %v27660_v49 = vpack.c.bf16 %v13276_v14, %v13269_v60  ;;  %v13282_v19 = vsub.f32 %v36806_v17, %v39547_v61  ;;  %v40369_v28 = vand.u32 4294901760, %v36567_v4 }
 0xde6   : > { %v13289_v42 = vsub.f32 %v36811_v37, %v39548_v7  ;;  %v40370_v14 = vand.u32 4294901760, %v36829_v48 }
 0xde7   : > { %v36867_v21 = vsub.f32 %v36567_v4, %v40369_v28  ;;  %v39550_v61 = vand.u32 4294901760, %v36846_v10 }
 0xde8   : > { %v13978_v60 = vsub.f32 %v36829_v48, %v40370_v14  ;;  %v40371_v14 = vand.u32 4294901760, %v36594_v54 }
 0xde9   : > { %27658 = vmatpush3.bf16.xpose.msra.mxu0 %v27657_v16  ;;  %v40367_v16 = vand.u32 4294901760, %v36561_v11 }
 0xdea   : > { %27802 = vmatpush3.bf16.xpose.msra.mxu1 %v27801_v33  ;;  %27659 = vmatprep.subr.bf16.mxu0 %v39685_v34  ;;  %v40368_v33 = vand.u32 4294901760, %v36564_v3 }
 0xdeb   : > { %27803 = vmatprep.subr.bf16.mxu1 %v39685_v34  ;;  %v36851_v2 = vsub.f32 %v36561_v11, %v40367_v16  ;;  %v27804_v11 = vpack.c.bf16 %v13965_v56, %v13958_v9  ;;  %v13283_v16 = vand.u32 4294901760, %v13282_v19  ;;  %v13979_v9 = vand.u32 4294901760, %v13978_v60 }
 0xdec   : > { %v36856_v18 = vsub.f32 %v36564_v3, %v40368_v33  ;;  %v13971_v3 = vsub.f32 %v36818_v20, %v39549_v58  ;;  %v13290_v33 = vand.u32 4294901760, %v13289_v42  ;;  %v36884_v19 = vsub.f32 %v36594_v54, %v40371_v14 }
 0xded   : > { %v39551_v7 = vand.u32 4294901760, %v36851_v2  ;;  %v13296_v58 = vsub.f32 %v36846_v10, %v39550_v61  ;;  %v40374_v14 = vand.u32 4294901760, %v36603_v38 }
 0xdee   : > { %v13972_v4 = vand.u32 4294901760, %v13971_v3  ;;  %v39552_v56 = vand.u32 4294901760, %v36856_v18  ;;  %v27663_v60 = vpack.c.bf16 %v13290_v33, %v13283_v16  ;;  %v40375_v16 = vand.u32 4294901760, %v36867_v21 }
 0xdef   : > { %v13303_v54 = vsub.f32 %v36851_v2, %v39551_v7  ;;  %v36905_v28 = vsub.f32 %v36603_v38, %v40374_v14  ;;  %v39553_v61 = vand.u32 4294901760, %v36884_v19 }
 0xdf0   : > { %v13992_v33 = vsub.f32 %v36867_v21, %v40375_v16  ;;  %v40376_v16 = vand.u32 4294901760, %v36630_v53 }
 0xdf1   : > { %27661 = vmatpush3.bf16.xpose.msra.mxu0 %v27660_v49  ;;  %v40372_v49 = vand.u32 4294901760, %v36597_v35 }
 0xdf2   : > { %27805 = vmatpush3.bf16.xpose.msra.mxu1 %v27804_v11  ;;  %27662 = vmatprep.subr.bf16.mxu0 %v39685_v34  ;;  %v40373_v11 = vand.u32 4294901760, %v36600_v15 }
 0xdf3   : > { %27806 = vmatprep.subr.bf16.mxu1 %v39685_v34  ;;  %v36889_v42 = vsub.f32 %v36597_v35, %v40372_v49  ;;  %v27807_v35 = vpack.c.bf16 %v13979_v9, %v13972_v4  ;;  %v13297_v49 = vand.u32 4294901760, %v13296_v58  ;;  %v13993_v4 = vand.u32 4294901760, %v13992_v33 }
 0xdf4   : > { %v36894_v3 = vsub.f32 %v36600_v15, %v40373_v11  ;;  %v13985_v15 = vsub.f32 %v36856_v18, %v39552_v56  ;;  %v13304_v11 = vand.u32 4294901760, %v13303_v54  ;;  %v36922_v58 = vsub.f32 %v36630_v53, %v40376_v16 }
 0xdf5   : > { %v39554_v7 = vand.u32 4294901760, %v36889_v42  ;;  %v13310_v56 = vsub.f32 %v36884_v19, %v39553_v61  ;;  %v40379_v16 = vand.u32 4294901760, %v36639_v25 }
 0xdf6   : > { %v13986_v38 = vand.u32 4294901760, %v13985_v15  ;;  %v39555_v9 = vand.u32 4294901760, %v36894_v3  ;;  %v27666_v33 = vpack.c.bf16 %v13304_v11, %v13297_v49  ;;  %v40380_v49 = vand.u32 4294901760, %v36905_v28 }
 0xdf7   : > { %v13317_v53 = vsub.f32 %v36889_v42, %v39554_v7  ;;  %v36943_v14 = vsub.f32 %v36639_v25, %v40379_v16  ;;  %v39556_v61 = vand.u32 4294901760, %v36922_v58 }
 0xdf8   : > { %v14006_v11 = vsub.f32 %v36905_v28, %v40380_v49  ;;  %v40381_v49 = vand.u32 4294901760, %v36686_v62 }
 0xdf9   : > { %27664 = vmatpush3.bf16.xpose.msra.mxu0 %v27663_v60  ;;  %v40377_v60 = vand.u32 4294901760, %v36633_v12 }
 0xdfa   : > { %27808 = vmatpush3.bf16.xpose.msra.mxu1 %v27807_v35  ;;  %27665 = vmatprep.subr.bf16.mxu0 %v39685_v34  ;;  %v40378_v35 = vand.u32 4294901760, %v36636_v44 }
 0xdfb   : > { %27809 = vmatprep.subr.bf16.mxu1 %v39685_v34  ;;  %v36927_v54 = vsub.f32 %v36633_v12, %v40377_v60  ;;  %v27810_v12 = vpack.c.bf16 %v13993_v4, %v13986_v38  ;;  %v13311_v60 = vand.u32 4294901760, %v13310_v56  ;;  %v14007_v38 = vand.u32 4294901760, %v14006_v11 }
 0xdfc   : > { %v36932_v15 = vsub.f32 %v36636_v44, %v40378_v35  ;;  %v13999_v44 = vsub.f32 %v36894_v3, %v39555_v9  ;;  %v13318_v35 = vand.u32 4294901760, %v13317_v53  ;;  %v36960_v56 = vsub.f32 %v36686_v62, %v40381_v49 }
 0xdfd   : > { %v39557_v7 = vand.u32 4294901760, %v36927_v54  ;;  %v13324_v9 = vsub.f32 %v36922_v58, %v39556_v61  ;;  %v40384_v49 = vand.u32 4294901760, %v36695_v46 }
 0xdfe   : > { %v14000_v25 = vand.u32 4294901760, %v13999_v44  ;;  %v39558_v4 = vand.u32 4294901760, %v36932_v15  ;;  %v27669_v11 = vpack.c.bf16 %v13318_v35, %v13311_v60  ;;  %v40385_v60 = vand.u32 4294901760, %v36943_v14 }
 0xdff   : > { %v13331_v62 = vsub.f32 %v36927_v54, %v39557_v7  ;;  %v36981_v16 = vsub.f32 %v36695_v46, %v40384_v49  ;;  %v13337_v61 = vand.u32 4294901760, %v36960_v56 }
 0xe00   : > { %v14020_v35 = vsub.f32 %v36943_v14, %v40385_v60 }
 0xe01   : > { %27667 = vmatpush3.bf16.xpose.msra.mxu0 %v27666_v33  ;;  %v40382_v33 = vand.u32 4294901760, %v36689_v47  ;;  %v39562_v49 = vand.u32 4294901760, %v36981_v16 }
 0xe02   : > { %27811 = vmatpush3.bf16.xpose.msra.mxu1 %v27810_v12  ;;  %27668 = vmatprep.subr.bf16.mxu0 %v39685_v34  ;;  %v40383_v12 = vand.u32 4294901760, %v36692_v40 }
 0xe03   : > { %27812 = vmatprep.subr.bf16.mxu1 %v39685_v34  ;;  %v36965_v53 = vsub.f32 %v36689_v47, %v40382_v33  ;;  %v27813_v47 = vpack.c.bf16 %v14007_v38, %v14000_v25  ;;  %v13325_v33 = vand.u32 4294901760, %v13324_v9  ;;  %v14021_v25 = vand.u32 4294901760, %v14020_v35 }
 0xe04   : > { %v36970_v44 = vsub.f32 %v36692_v40, %v40383_v12  ;;  %v14013_v40 = vsub.f32 %v36932_v15, %v39558_v4  ;;  %v13332_v12 = vand.u32 4294901760, %v13331_v62  ;;  %v13338_v9 = vsub.f32 %v36960_v56, %v13337_v61 }
 0xe05   : > { %v39559_v7 = vand.u32 4294901760, %v36965_v53 }
 0xe06   : > { %v14014_v46 = vand.u32 4294901760, %v14013_v40  ;;  %v14026_v38 = vand.u32 4294901760, %v36970_v44  ;;  %v27672_v4 = vpack.c.bf16 %v13332_v12, %v13325_v33  ;;  %v14034_v40 = vsub.f32 %v36981_v16, %v39562_v49  ;;  %v40396_v49 = vld [vmem:[#allocation5_spill] sm:$0xff] }
 0xe07   : > { %v13339_v60 = vand.u32 4294901760, %v13338_v9  ;;  %v27825_v9 = vpack.c.bf16 %v36739_v32, %v36722_v55 }
 0xe08   : > { %v27816_v62 = vpack.c.bf16 %v14021_v25, %v14014_v46  ;;  %v14035_v12 = vand.u32 4294901760, %v14034_v40  ;;  %v27822_v25 = vpack.c.bf16 %v36677_v1, %v36666_v41  ;;  %v27831_v40 = vpack.c.bf16 %v36829_v48, %v36818_v20 }
 0xe09   : > { %27670 = vmatpush3.bf16.xpose.msra.mxu0 %v27669_v11  ;;  %v13345_v11 = vsub.f32 %v36965_v53, %v39559_v7 }
 0xe0a   : > { %27814 = vmatpush3.bf16.xpose.msra.mxu1 %v27813_v47  ;;  %27671 = vmatprep.subr.bf16.mxu0 %v39685_v34  ;;  %v14027_v47 = vsub.f32 %v36970_v44, %v14026_v38 }
 0xe0b   : > { %27815 = vmatprep.subr.bf16.mxu1 %v39685_v34  ;;  %v13346_v35 = vand.u32 4294901760, %v13345_v11  ;;  %v27684_v11 = vpack.c.bf16 %v36769_v0, %v36764_v57 }
 0xe0c   : > { %v14028_v33 = vand.u32 4294901760, %v14027_v47  ;;  %v27687_v47 = vpack.c.bf16 %v36811_v37, %v36806_v17 }
 0xe0d   : > { %v27675_v7 = vpack.c.bf16 %v13346_v35, %v13339_v60  ;;  %v27690_v60 = vpack.c.bf16 %v36851_v2, %v36846_v10  ;;  %v27834_v35 = vpack.c.bf16 %v36867_v21, %v36856_v18 }
 0xe0e   : > { %v27819_v46 = vpack.c.bf16 %v14035_v12, %v14028_v33  ;;  %v27693_v33 = vpack.c.bf16 %v36889_v42, %v36884_v19  ;;  %v27837_v12 = vpack.c.bf16 %v36905_v28, %v36894_v3 }
 0xe11   : > { %27673 = vmatpush3.bf16.xpose.msra.mxu0 %v27672_v4  ;;  %v27678_v4 = vpack.c.bf16 %v36661_v45, %v36656_v27 }
 0xe12   : > { %27817 = vmatpush3.bf16.xpose.msra.mxu1 %v27816_v62  ;;  %27674 = vmatprep.subr.bf16.mxu0 %v39685_v34  ;;  %v27828_v62 = vpack.c.bf16 %v36785_v50, %v36774_v5 }
 0xe13   : > { %27818 = vmatprep.subr.bf16.mxu1 %v39685_v34 }
 0xe19   : > { %27676 = vmatpush3.bf16.xpose.msra.mxu0 %v27675_v7  ;;  %v27681_v7 = vpack.c.bf16 %v36717_v31, %v36712_v30 }
 0xe1a   : > { %27820 = vmatpush3.bf16.xpose.msra.mxu1 %v27819_v46  ;;  %27677 = vmatprep.subr.bf16.mxu0 %v39685_v34  ;;  %v27696_v46 = vpack.c.bf16 %v36927_v54, %v36922_v58 }
 0xe1b   : > { %27821 = vmatprep.subr.bf16.mxu1 %v39685_v34 }
 0xe20   : > { %23845 = vmatmul.mubr.f32.vlgmr.msra.gmra.mrb[2].mxu0 %v35821_v13 }
 0xe21   : > { %27679 = vmatpush3.bf16.xpose.msra.mxu0 %v27678_v4  ;;  %24055 = vmatmul.mubr.f32.vlgmr.msra.gmra.mrb[2].mxu1 %v35821_v13  ;;  %v27840_v4 = vpack.c.bf16 %v36943_v14, %v36932_v15 }
 0xe22   : > { %27823 = vmatpush3.bf16.xpose.msra.mxu1 %v27822_v25  ;;  %27680 = vmatprep.subr.bf16.mxu0 %v39685_v34  ;;  %v27699_v25 = vpack.c.bf16 %v36965_v53, %v36960_v56 }
 0xe23   : > { %27824 = vmatprep.subr.bf16.mxu1 %v39685_v34  ;;  %23879 = vmatprep.mubr.msk.f32.mxu0 %vm28907_vm0, %v39694_v24 }
 0xe24   : > { %24089 = vmatprep.mubr.msk.f32.mxu1 %vm28907_vm0, %v39694_v24 }
 0xe29   : > { %27682 = vmatpush3.bf16.xpose.msra.mxu0 %v27681_v7  ;;  %v27843_v7 = vpack.c.bf16 %v36981_v16, %v36970_v44 }
 0xe2a   : > { %27826 = vmatpush3.bf16.xpose.msra.mxu1 %v27825_v9  ;;  %27683 = vmatprep.subr.bf16.mxu0 %v39685_v34  ;;  %v17263_v9 = vlaneseq }
 0xe2b   : > { %27827 = vmatprep.subr.bf16.mxu1 %v39685_v34 }
 0xe31   : > { %27685 = vmatpush3.bf16.xpose.msra.mxu0 %v27684_v11  ;;  %v17239_v11 = vld [vmem:[%s37072_s9] sm:$0x1] }
 0xe32   : > { %27829 = vmatpush3.bf16.xpose.msra.mxu1 %v27828_v62  ;;  %27686 = vmatprep.subr.bf16.mxu0 %v39685_v34  ;;  %v17264_v62 = vshrl.u32 %v17263_v9, 7  ;;  %vm17247_vm2 = vcmp.ne.f32.partialorder %v17239_v11, 0.0 }
 0xe33   : > { %27830 = vmatprep.subr.bf16.mxu1 %v39685_v34 }
 0xe39   : > { %27688 = vmatpush3.bf16.xpose.msra.mxu0 %v27687_v47  ;;  %v17240_v47 = vld [vmem:[%s37072_s9 + $0x1] sm:$0x1] }
 0xe3a   : > { %27832 = vmatpush3.bf16.xpose.msra.mxu1 %v27831_v40  ;;  %27689 = vmatprep.subr.bf16.mxu0 %v39685_v34  ;;  %v37084_v40 = vsub.s32 0, %v17264_v62  ;;  %vm17248_vm3 = vcmp.ne.f32.partialorder %v17240_v47, 0.0 }
 0xe3b   : > { %27833 = vmatprep.subr.bf16.mxu1 %v39685_v34 }
 0xe41   : > { %27691 = vmatpush3.bf16.xpose.msra.mxu0 %v27690_v60  ;;  %v39560_v60 = vmov 0  }
 0xe42   : > { %27835 = vmatpush3.bf16.xpose.msra.mxu1 %v27834_v35  ;;  %27692 = vmatprep.subr.bf16.mxu0 %v39685_v34  ;;  %v17255_v35 = vsel %vm17247_vm2, 1, %v39560_v60 }
 0xe43   : > { %27836 = vmatprep.subr.bf16.mxu1 %v39685_v34 }
 0xe49   : > { %27694 = vmatpush3.bf16.xpose.msra.mxu0 %v27693_v33  ;;  %v17256_v33 = vsel %vm17248_vm3, 1, %v39560_v60 }
 0xe4a   : > { %27838 = vmatpush3.bf16.xpose.msra.mxu1 %v27837_v12  ;;  %27695 = vmatprep.subr.bf16.mxu0 %v39685_v34  ;;  %v17266_v12 = vrot.slane %v17255_v35, %v37084_v40 }
 0xe4b   : > { %27839 = vmatprep.subr.bf16.mxu1 %v39685_v34 }
 0xe4c   : > { %vm17295_vm4 = vcmp.eq.s32.totalorder %v17266_v12, 1  ;;  %v40389_v12 = vld [vmem:[#allocation10_spill] sm:$0xff] }
 0xe51   : > { %27697 = vmatpush3.bf16.xpose.msra.mxu0 %v27696_v46  ;;  %v17270_v46 = vrot.slane %v17256_v33, %v37084_v40  ;;  %v40388_v33 = vld [vmem:[#allocation8_spill] sm:$0xff] }
 0xe52   : > { %27841 = vmatpush3.bf16.xpose.msra.mxu1 %v27840_v4  ;;  %27698 = vmatprep.subr.bf16.mxu0 %v39685_v34 }
 0xe53   : > { %27842 = vmatprep.subr.bf16.mxu1 %v39685_v34  ;;  %vm17296_vm6 = vcmp.eq.s32.totalorder %v17270_v46, 1  ;;  %v40390_v46 = vld [vmem:[#allocation7_spill] sm:$0xff] }
 0xe59   : > { %27700 = vmatpush3.bf16.xpose.msra.mxu0 %v27699_v25 }
 0xe5a   : > { %27844 = vmatpush3.bf16.xpose.msra.mxu1 %v27843_v7  ;;  %27701 = vmatprep.subr.bf16.mxu0 %v39685_v34 }
 0xe5b   : > { %27845 = vmatprep.subr.bf16.mxu1 %v39685_v34 }
 0xe60   : > { %23880 = vmatmul.mubr.f32.vlgmr.msra.gmra.mrb[2].mxu0 %v35868_v59 }
 0xe61   : > { %27703 = vmatpush3.bf16.xpose.msra.mxu0 %v36435_v39  ;;  %24090 = vmatmul.mubr.f32.vlgmr.msra.gmra.mrb[2].mxu1 %v35868_v59 }
 0xe62   : > { %27847 = vmatpush3.bf16.xpose.msra.mxu1 %v36441_v63  ;;  %27704 = vmatprep.subr.bf16.mxu0 %v39685_v34 }
 0xe63   : > { %27848 = vmatprep.subr.bf16.mxu1 %v39685_v34  ;;  %23914 = vmatprep.mubr.msk.f32.mxu0 %vm28907_vm0, %v39694_v24 }
 0xe64   : > { %24124 = vmatprep.mubr.msk.f32.mxu1 %vm28907_vm0, %v39694_v24 }
 0xe69   : > { %27706 = vmatpush3.bf16.xpose.msra.mxu0 %v36477_v43 }
 0xe6a   : > { %27850 = vmatpush3.bf16.xpose.msra.mxu1 %v36483_v6  ;;  %27707 = vmatprep.subr.bf16.mxu0 %v39685_v34 }
 0xe6b   : > { %27851 = vmatprep.subr.bf16.mxu1 %v39685_v34 }
 0xe71   : > { %27709 = vmatpush3.bf16.xpose.msra.mxu0 %v36513_v36 }
 0xe72   : > { %27853 = vmatpush3.bf16.xpose.msra.mxu1 %v36519_v26  ;;  %27710 = vmatprep.subr.bf16.mxu0 %v39685_v34 }
 0xe73   : > { %v12404_v4 = vpop.f32.mrb[0].mxu0  ;;  %27854 = vmatprep.subr.bf16.mxu1 %v39685_v34 }
 0xe74   : > { %v37097_v25 = vsel %vm17295_vm4, %v12404_v4, -1e+30  ;;  %v13093_v7 = vpop.f32.mrb[0].mxu1  ;;  %v23566_v9 = vpop.f32.mrb[1].mxu0  ;;  %v40391_v4 = vld [vmem:[#allocation9_spill] sm:$0xff] }
 0xe75   : > { %40386 = vst [vmem:[#allocation11_spill] sm:$0xff] %v37097_v25  ;;  %v23776_v11 = vpop.f32.mrb[1].mxu1  ;;  %v17312_v62 = vsel %vm17311_vm5, %v37097_v25, -inf  ;;  %v37101_v47 = vsel %vm17296_vm6, %v13093_v7, -1e+30  ;;  %v40392_v7 = vand.u32 4294901760, %v36656_v27 }
 0xe76   : > { %40387 = vst [vmem:[#allocation12_spill] sm:$0xff] %v37101_v47  ;;  %17313 = vmax.xlane.f32.xlu0 %v17312_v62  ;;  %v17315_v35 = vsel %vm17311_vm5, %v37101_v47, -inf  ;;  %v40393_v9 = vand.u32 4294901760, %v36661_v45  ;;  %v40394_v62 = vand.u32 4294901760, %v36666_v41  ;;  %v40397_v41 = vand.u32 4294901760, %v36712_v30 }
 0xe77   : > { %v40398_v45 = vand.u32 4294901760, %v36717_v31  ;;  %v40403_v30 = vand.u32 4294901760, %v36774_v5  ;;  %v40404_v31 = vand.u32 4294901760, %v36785_v50  ;;  %v40409_v50 = vand.u32 4294901760, %v36846_v10 }
 0xe78   : > { %v27726_v11 = vpack.c.bf16 %v40393_v9, %v40392_v7  ;;  %v40400_v7 = vand.u32 4294901760, %v36739_v32  ;;  %v40401_v9 = vand.u32 4294901760, %v36764_v57  ;;  %v40406_v32 = vand.u32 4294901760, %v36811_v37 }
 0xe79   : > { %27712 = vmatpush3.bf16.xpose.msra.mxu0 %v36549_v8  ;;  %v27729_v27 = vpack.c.bf16 %v40398_v45, %v40397_v41  ;;  %v40407_v57 = vand.u32 4294901760, %v36818_v20  ;;  %v40410_v5 = vand.u32 4294901760, %v36851_v2  ;;  %v40412_v37 = vand.u32 4294901760, %v36867_v21 }
 0xe7a   : > { %27856 = vmatpush3.bf16.xpose.msra.mxu1 %v36555_v52  ;;  %17316 = vmax.xlane.f32.xlu0 %v17315_v35  ;;  %v40395_v35 = vand.u32 4294901760, %v36677_v1  ;;  %v40399_v1 = vand.u32 4294901760, %v36722_v55  ;;  %v40405_v55 = vand.u32 4294901760, %v36806_v17  ;;  %v40411_v17 = vand.u32 4294901760, %v36856_v18 }
 0xe7b   : > { %27713 = vmatprep.subr.bf16.mxu0 %v39685_v34  ;;  %27857 = vmatprep.subr.bf16.mxu1 %v39685_v34  ;;  %v40413_v20 = vand.u32 4294901760, %v36884_v19  ;;  %v40415_v10 = vand.u32 4294901760, %v36894_v3  ;;  %v40416_v2 = vand.u32 4294901760, %v36905_v28  ;;  %v40417_v21 = vand.u32 4294901760, %v36922_v58 }
 0xe7c   : > { %v27870_v60 = vpack.c.bf16 %v40395_v35, %v40394_v62  ;;  %v27876_v35 = vpack.c.bf16 %v40404_v31, %v40403_v30  ;;  %v27735_v41 = vpack.c.bf16 %v40406_v32, %v40405_v55  ;;  %v40418_v18 = vand.u32 4294901760, %v36927_v54  ;;  %v11656_v31 = vld [vmem:[%s35561_s25 + $0x220] sm:$0xff]  ;;  %v11673_v32 = vld [vmem:[%s35561_s25 + $0x2a8] sm:$0xff] }
 0xe7d   : > { %v40419_v19 = vand.u32 4294901760, %v36932_v15  ;;  %v40421_v28 = vand.u32 4294901760, %v36965_v53  ;;  %v40422_v58 = vand.u32 4294901760, %v36981_v16  ;;  %v11670_v15 = vld [vmem:[%s35561_s25 + $0x290] sm:$0xff]  ;;  %v11671_v16 = vld [vmem:[%s35561_s25 + $0x298] sm:$0xff]  ;;  %v11672_v55 = vld [vmem:[%s35561_s25 + $0x2a0] sm:$0xff] }
 0xe7f   : > { %v27747_v3 = vpack.c.bf16 %v40421_v28, %v13337_v61  ;;  %v27891_v54 = vpack.c.bf16 %v40422_v58, %v14026_v38  ;;  %v11654_v61 = vld [vmem:[%s35561_s25 + $0x210] sm:$0xff]  ;;  %v11660_v58 = vld [vmem:[%s35561_s25 + $0x240] sm:$0xff] }
 0xe80   : > { %v37286_v44 = vsel %vm557_vm1, %v11654_v61, 0  ;;  %v37400_v61 = vsel %vm557_vm1, %v11660_v58, 0 }
 0xe81   : > { %27715 = vmatpush3.bf16.xpose.msra.mxu0 %v36585_v22 }
 0xe82   : > { %27859 = vmatpush3.bf16.xpose.msra.mxu1 %v36591_v29  ;;  %27716 = vmatprep.subr.bf16.mxu0 %v39685_v34 }
 0xe83   : > { %27860 = vmatprep.subr.bf16.mxu1 %v39685_v34 }
 0xe89   : > { %27718 = vmatpush3.bf16.xpose.msra.mxu0 %v36621_v51 }
 0xe8a   : > { %27862 = vmatpush3.bf16.xpose.msra.mxu1 %v36627_v23  ;;  %27719 = vmatprep.subr.bf16.mxu0 %v39685_v34 }
 0xe8b   : > { %27863 = vmatprep.subr.bf16.mxu1 %v39685_v34 }
 0xe91   : > { %27721 = vmatpush3.bf16.xpose.msra.mxu0 %v40388_v33 }
 0xe92   : > { %27865 = vmatpush3.bf16.xpose.msra.mxu1 %v40389_v12  ;;  %27722 = vmatprep.subr.bf16.mxu0 %v39685_v34 }
 0xe93   : > { %27866 = vmatprep.subr.bf16.mxu1 %v39685_v34 }
 0xe99   : > { %27724 = vmatpush3.bf16.xpose.msra.mxu0 %v40390_v46 }
 0xe9a   : > { %27868 = vmatpush3.bf16.xpose.msra.mxu1 %v40391_v4  ;;  %27725 = vmatprep.subr.bf16.mxu0 %v39685_v34 }
 0xe9b   : > { %27869 = vmatprep.subr.bf16.mxu1 %v39685_v34 }
 0xea0   : > { %23915 = vmatmul.mubr.f32.vlgmr.msra.gmra.mrb[2].mxu0 %v40396_v49 }
 0xea1   : > { %27727 = vmatpush3.bf16.xpose.msra.mxu0 %v27726_v11  ;;  %24125 = vmatmul.mubr.f32.vlgmr.msra.gmra.mrb[2].mxu1 %v40396_v49  ;;  %v40402_v11 = vand.u32 4294901760, %v36769_v0  ;;  %v40408_v0 = vand.u32 4294901760, %v36829_v48  ;;  %v40414_v48 = vand.u32 4294901760, %v36889_v42  ;;  %v40420_v42 = vand.u32 4294901760, %v36943_v14  ;;  %v11655_v14 = vld [vmem:[%s35561_s25 + $0x218] sm:$0xff] }
 0xea2   : > { %27871 = vmatpush3.bf16.xpose.msra.mxu1 %v27870_v60  ;;  %27728 = vmatprep.subr.bf16.mxu0 %v39685_v34  ;;  %v27873_v60 = vpack.c.bf16 %v40400_v7, %v40399_v1  ;;  %v27882_v1 = vpack.c.bf16 %v40412_v37, %v40411_v17  ;;  %v37289_v38 = vsel %vm557_vm1, %v11655_v14, 0 }
 0xea3   : > { %27872 = vmatprep.subr.bf16.mxu1 %v39685_v34  ;;  %23949 = vmatprep.mubr.msk.f32.mxu0 %vm28907_vm0, %v39694_v24  ;;  %v27732_v62 = vpack.c.bf16 %v40402_v11, %v40401_v9  ;;  %v27879_v45 = vpack.c.bf16 %v40408_v0, %v40407_v57  ;;  %v27741_v7 = vpack.c.bf16 %v40414_v48, %v40413_v20  ;;  %v37328_v0 = vsel %vm557_vm1, %v11656_v31, 0  ;;  %v11658_v20 = vld [vmem:[%s35561_s25 + $0x230] sm:$0xff]  ;;  %v11659_v48 = vld [vmem:[%s35561_s25 + $0x238] sm:$0xff] }
 0xea4   : > { %24159 = vmatprep.mubr.msk.f32.mxu1 %vm28907_vm0, %v39694_v24  ;;  %v27744_v9 = vpack.c.bf16 %v40418_v18, %v40417_v21  ;;  %v27888_v11 = vpack.c.bf16 %v40420_v42, %v40419_v19  ;;  %v37364_v21 = vsel %vm557_vm1, %v11658_v20, 0  ;;  %v37367_v18 = vsel %vm557_vm1, %v11659_v48, 0  ;;  %v11662_v20 = vld [vmem:[%s35561_s25 + $0x250] sm:$0xff]  ;;  %v11663_v48 = vld [vmem:[%s35561_s25 + $0x258] sm:$0xff] }
 0xea5   : > { %v39570_v42 = vand.u32 4294901760, %v37364_v21  ;;  %v39565_v31 = vand.u32 4294901760, %v37400_v61 }
 0xea9   : > { %27730 = vmatpush3.bf16.xpose.msra.mxu0 %v27729_v27  ;;  %v27738_v27 = vpack.c.bf16 %v40410_v5, %v40409_v50  ;;  %v37334_v50 = vsel %vm557_vm1, %v11672_v55, 0  ;;  %v37337_v5 = vsel %vm557_vm1, %v11673_v32, 0 }
 0xeaa   : > { %27874 = vmatpush3.bf16.xpose.msra.mxu1 %v27873_v60  ;;  %27731 = vmatprep.subr.bf16.mxu0 %v39685_v34  ;;  %v27885_v60 = vpack.c.bf16 %v40416_v2, %v40415_v10  ;;  %v39572_v37 = vand.u32 4294901760, %v37334_v50  ;;  %v11675_v10 = vld [vmem:[%s35561_s25 + $0x2b8] sm:$0xff] }
 0xeab   : > { %27875 = vmatprep.subr.bf16.mxu1 %v39685_v34  ;;  %v37373_v19 = vsel %vm557_vm1, %v11675_v10, 0  ;;  %v11679_v10 = vld [vmem:[%s35561_s25 + $0x2d8] sm:$0xff] }
 0xeb1   : > { %27733 = vmatpush3.bf16.xpose.msra.mxu0 %v27732_v62 }
 0xeb2   : > { %27877 = vmatpush3.bf16.xpose.msra.mxu1 %v27876_v35  ;;  %27734 = vmatprep.subr.bf16.mxu0 %v39685_v34  ;;  %v11657_v35 = vld [vmem:[%s35561_s25 + $0x228] sm:$0xff] }
 0xeb3   : > { %27878 = vmatprep.subr.bf16.mxu1 %v39685_v34 }
 0xeb9   : > { %27736 = vmatpush3.bf16.xpose.msra.mxu0 %v27735_v41 }
 0xeba   : > { %27880 = vmatpush3.bf16.xpose.msra.mxu1 %v27879_v45  ;;  %27737 = vmatprep.subr.bf16.mxu0 %v39685_v34  ;;  %v37331_v45 = vsel %vm557_vm1, %v11657_v35, 0 }
 0xebb   : > { %27881 = vmatprep.subr.bf16.mxu1 %v39685_v34  ;;  %v39573_v17 = vand.u32 4294901760, %v37331_v45 }
 0xec1   : > { %27739 = vmatpush3.bf16.xpose.msra.mxu0 %v27738_v27  ;;  %v39578_v27 = vand.u32 4294901760, %v37328_v0 }
 0xec2   : > { %27883 = vmatpush3.bf16.xpose.msra.mxu1 %v27882_v1  ;;  %27740 = vmatprep.subr.bf16.mxu0 %v39685_v34  ;;  %v39571_v1 = vand.u32 4294901760, %v37337_v5 }
 0xec3   : > { %27884 = vmatprep.subr.bf16.mxu1 %v39685_v34  ;;  %v37355_v2 = vpack.c.bf16 %v39573_v17, %v39578_v27  ;;  %v11683_v27 = vld [vmem:[%s35561_s25 + $0x2f8] sm:$0xff] }
 0xec9   : > { %27742 = vmatpush3.bf16.xpose.msra.mxu0 %v27741_v7  ;;  %v11674_v7 = vld [vmem:[%s35561_s25 + $0x2b0] sm:$0xff] }
 0xeca   : > { %27886 = vmatpush3.bf16.xpose.msra.mxu1 %v27885_v60  ;;  %27743 = vmatprep.subr.bf16.mxu0 %v39685_v34  ;;  %v37361_v60 = vpack.c.bf16 %v39571_v1, %v39572_v37 }
 0xecb   : > { %27887 = vmatprep.subr.bf16.mxu1 %v39685_v34 }
 0xed1   : > { %27745 = vmatpush3.bf16.xpose.msra.mxu0 %v27744_v9  ;;  %v37370_v9 = vsel %vm557_vm1, %v11674_v7, 0  ;;  %v11678_v7 = vld [vmem:[%s35561_s25 + $0x2d0] sm:$0xff] }
 0xed2   : > { %27889 = vmatpush3.bf16.xpose.msra.mxu1 %v27888_v11  ;;  %27746 = vmatprep.subr.bf16.mxu0 %v39685_v34  ;;  %v39569_v11 = vand.u32 4294901760, %v37367_v18  ;;  %v39568_v28 = vand.u32 4294901760, %v37370_v9 }
 0xed3   : > { %27890 = vmatprep.subr.bf16.mxu1 %v39685_v34 }
 0xed9   : > { %27748 = vmatpush3.bf16.xpose.msra.mxu0 %v27747_v3  ;;  %v39563_v3 = vand.u32 4294901760, %v37373_v19 }
 0xeda   : > { %27892 = vmatpush3.bf16.xpose.msra.mxu1 %v27891_v54  ;;  %27749 = vmatprep.subr.bf16.mxu0 %v39685_v34  ;;  %v11661_v54 = vld [vmem:[%s35561_s25 + $0x248] sm:$0xff] }
 0xedb   : > { %27893 = vmatprep.subr.bf16.mxu1 %v39685_v34  ;;  %v37403_v14 = vsel %vm557_vm1, %v11661_v54, 0 }
 0xedc   : > { %v39564_v35 = vand.u32 4294901760, %v37403_v14 }
 0xede   : > { %v37427_v58 = vpack.c.bf16 %v39564_v35, %v39565_v31  ;;  %v37445_v35 = vsel %vm557_vm1, %v11679_v10, 0  ;;  %v11680_v10 = vld [vmem:[%s35561_s25 + $0x2e0] sm:$0xff] }
 0xedf   : > { %v37478_v17 = vsel %vm557_vm1, %v11680_v10, 0  ;;  %v11666_v10 = vld [vmem:[%s35561_s25 + $0x270] sm:$0xff] }
 0xee0   : > { %23950 = vmatmul.mubr.f32.vlgmr.msra.gmra.mrb[2].mxu0 %v35821_v13 }
 0xee1   : > { %27751 = vmatpush3.bf16.xpose.msra.mxu0 %v36435_v39  ;;  %24160 = vmatmul.mubr.f32.vlgmr.msra.gmra.mrb[2].mxu1 %v35821_v13  ;;  %v11652_v39 = vld [vmem:[%s35561_s25 + $0x200] sm:$0xff] }
 0xee2   : > { %27895 = vmatpush3.bf16.xpose.msra.mxu1 %v36441_v63  ;;  %27752 = vmatprep.subr.bf16.mxu0 %v39685_v34  ;;  %v11653_v63 = vld [vmem:[%s35561_s25 + $0x208] sm:$0xff] }
 0xee3   : > { %27896 = vmatprep.subr.bf16.mxu1 %v39685_v34  ;;  %23984 = vmatprep.mubr.msk.f32.mxu0 %vm28907_vm0, %v39694_v24 }
 0xee4   : > { %24194 = vmatprep.mubr.msk.f32.mxu1 %vm28907_vm0, %v39694_v24 }
 0xee9   : > { %27754 = vmatpush3.bf16.xpose.msra.mxu0 %v36477_v43  ;;  %v11668_v43 = vld [vmem:[%s35561_s25 + $0x280] sm:$0xff] }
 0xeea   : > { %27898 = vmatpush3.bf16.xpose.msra.mxu1 %v36483_v6  ;;  %27755 = vmatprep.subr.bf16.mxu0 %v39685_v34  ;;  %v11669_v6 = vld [vmem:[%s35561_s25 + $0x288] sm:$0xff] }
 0xeeb   : > { %27899 = vmatprep.subr.bf16.mxu1 %v39685_v34 }
 0xef1   : > { %27757 = vmatpush3.bf16.xpose.msra.mxu0 %v36513_v36  ;;  %v37250_v36 = vsel %vm557_vm1, %v11652_v39, 0  ;;  %v11676_v39 = vld [vmem:[%s35561_s25 + $0x2c0] sm:$0xff] }
 0xef2   : > { %27901 = vmatpush3.bf16.xpose.msra.mxu1 %v36519_v26  ;;  %27758 = vmatprep.subr.bf16.mxu0 %v39685_v34  ;;  %v37253_v26 = vsel %vm557_vm1, %v11653_v63, 0  ;;  %v11677_v63 = vld [vmem:[%s35561_s25 + $0x2c8] sm:$0xff] }
 0xef3   : > { %27902 = vmatprep.subr.bf16.mxu1 %v39685_v34 }
 0xef9   : > { %27760 = vmatpush3.bf16.xpose.msra.mxu0 %v36549_v8  ;;  %v37259_v8 = vsel %vm557_vm1, %v11669_v6, 0  ;;  %v37397_v6 = vpack.c.bf16 %v39563_v3, %v39568_v28  ;;  %v37442_v3 = vsel %vm557_vm1, %v11678_v7, 0  ;;  %v11664_v7 = vld [vmem:[%s35561_s25 + $0x260] sm:$0xff]  ;;  %v11681_v28 = vld [vmem:[%s35561_s25 + $0x2e8] sm:$0xff] }
 0xefa   : > { %27904 = vmatpush3.bf16.xpose.msra.mxu1 %v36555_v52  ;;  %27761 = vmatprep.subr.bf16.mxu0 %v39685_v34  ;;  %v14524_v52 = vand.u32 4294901760, %v37250_v36  ;;  %v37472_v1 = vsel %vm557_vm1, %v11664_v7, 0  ;;  %v39584_v7 = vand.u32 4294901760, %v37478_v17 }
 0xefb   : > { %27905 = vmatprep.subr.bf16.mxu1 %v39685_v34 }
 0xf01   : > { %27763 = vmatpush3.bf16.xpose.msra.mxu0 %v36585_v22 }
 0xf02   : > { %27907 = vmatpush3.bf16.xpose.msra.mxu1 %v36591_v29  ;;  %27764 = vmatprep.subr.bf16.mxu0 %v39685_v34  ;;  %v15216_v29 = vand.u32 4294901760, %v37259_v8 }
 0xf03   : > { %27908 = vmatprep.subr.bf16.mxu1 %v39685_v34 }
 0xf09   : > { %27766 = vmatpush3.bf16.xpose.msra.mxu0 %v36621_v51  ;;  %v14527_v51 = vand.u32 4294901760, %v37253_v26 }
 0xf0a   : > { %27910 = vmatpush3.bf16.xpose.msra.mxu1 %v36627_v23  ;;  %27767 = vmatprep.subr.bf16.mxu0 %v39685_v34  ;;  %v37256_v23 = vsel %vm557_vm1, %v11668_v43, 0  ;;  %v37391_v43 = vpack.c.bf16 %v39569_v11, %v39570_v42 }
 0xf0b   : > { %27911 = vmatprep.subr.bf16.mxu1 %v39685_v34  ;;  %v15213_v22 = vand.u32 4294901760, %v37256_v23  ;;  %v37277_v56 = vpack.c.bf16 %v14527_v51, %v14524_v52 }
 0xf0d   : > { %v37283_v53 = vpack.c.bf16 %v15216_v29, %v15213_v22 }
 0xf11   : > { %27769 = vmatpush3.bf16.xpose.msra.mxu0 %v40388_v33  ;;  %v37292_v33 = vsel %vm557_vm1, %v11670_v15, 0  ;;  %v37406_v15 = vsel %vm557_vm1, %v11676_v39, 0  ;;  %v37436_v39 = vsel %vm557_vm1, %v11662_v20, 0  ;;  %v39577_v20 = vand.u32 4294901760, %v37442_v3 }
 0xf12   : > { %27913 = vmatpush3.bf16.xpose.msra.mxu1 %v40389_v12  ;;  %27770 = vmatprep.subr.bf16.mxu0 %v39685_v34  ;;  %v37295_v12 = vsel %vm557_vm1, %v11671_v16, 0  ;;  %v39580_v62 = vand.u32 4294901760, %v37292_v33  ;;  %v37409_v16 = vsel %vm557_vm1, %v11677_v63, 0  ;;  %v39567_v55 = vand.u32 4294901760, %v37406_v15 }
 0xf13   : > { %27914 = vmatprep.subr.bf16.mxu1 %v39685_v34  ;;  %v39579_v30 = vand.u32 4294901760, %v37295_v12  ;;  %v39566_v32 = vand.u32 4294901760, %v37409_v16  ;;  %v37439_v63 = vsel %vm557_vm1, %v11663_v48, 0  ;;  %v39575_v31 = vand.u32 4294901760, %v37436_v39 }
 0xf14   : > { %v39576_v48 = vand.u32 4294901760, %v37445_v35 }
 0xf15   : > { %v37325_v57 = vpack.c.bf16 %v39579_v30, %v39580_v62  ;;  %v37433_v54 = vpack.c.bf16 %v39566_v32, %v39567_v55  ;;  %v39574_v32 = vand.u32 4294901760, %v37439_v63  ;;  %v11665_v55 = vld [vmem:[%s35561_s25 + $0x268] sm:$0xff]  ;;  %v37498_v30 = vsub.f32 %v37250_v36, %v14524_v52 }
 0xf16   : > { %v37469_v42 = vpack.c.bf16 %v39576_v48, %v39577_v20  ;;  %v37475_v37 = vsel %vm557_vm1, %v11665_v55, 0  ;;  %v11667_v20 = vld [vmem:[%s35561_s25 + $0x278] sm:$0xff]  ;;  %v37503_v62 = vsub.f32 %v37253_v26, %v14527_v51  ;;  %v37519_v36 = vsub.f32 %v37259_v8, %v15216_v29 }
 0xf17   : > { %v37463_v11 = vpack.c.bf16 %v39574_v32, %v39575_v31  ;;  %v37481_v32 = vsel %vm557_vm1, %v11681_v28, 0  ;;  %v39586_v31 = vand.u32 4294901760, %v37472_v1  ;;  %v39585_v48 = vand.u32 4294901760, %v37475_v37  ;;  %v11682_v28 = vld [vmem:[%s35561_s25 + $0x2f0] sm:$0xff] }
 0xf18   : > { %40423 = vst [vmem:[#allocation8_spill] sm:$0xff] %v37469_v42  ;;  %v39583_v55 = vand.u32 4294901760, %v37481_v32  ;;  %v37531_v52 = vsel %vm557_vm1, %v11667_v20, 0  ;;  %v37534_v51 = vsel %vm557_vm1, %v11682_v28, 0  ;;  %v40428_v20 = vand.u32 4294901760, %v37292_v33 }
 0xf19   : > { %27772 = vmatpush3.bf16.xpose.msra.mxu0 %v40390_v46  ;;  %v39582_v46 = vand.u32 4294901760, %v37286_v44  ;;  %v39589_v29 = vand.u32 4294901760, %v37531_v52 }
 0xf1a   : > { %27916 = vmatpush3.bf16.xpose.msra.mxu1 %v40391_v4  ;;  %27917 = vmatprep.subr.bf16.mxu0 %v39685_v34  ;;  %v39581_v4 = vand.u32 4294901760, %v37289_v38  ;;  %v37525_v26 = vpack.c.bf16 %v39583_v55, %v39584_v7  ;;  %v37564_v28 = vsub.f32 %v37292_v33, %v40428_v20  ;;  %v40433_v33 = vand.u32 4294901760, %v37534_v51 }
 0xf1b   : > { %28061 = vmatprep.subr.bf16.mxu1 %v39685_v34 }
 0xf1c   : > { %v37319_v41 = vpack.c.bf16 %v39581_v4, %v39582_v46  ;;  %v37508_v4 = vsub.f32 %v37256_v23, %v15213_v22  ;;  %v37514_v46 = vpack.c.bf16 %v39585_v48, %v39586_v31  ;;  %40425 = vst [vmem:[#allocation7_spill] sm:$0xff] %v37525_v26  ;;  %v37528_v23 = vsel %vm557_vm1, %v11666_v10, 0 }
 0xf1d   : > { %v37537_v22 = vsel %vm557_vm1, %v11683_v27, 0  ;;  %v39590_v8 = vand.u32 4294901760, %v37528_v23  ;;  %v40426_v48 = vand.u32 4294901760, %v37286_v44  ;;  %v40427_v10 = vand.u32 4294901760, %v37289_v38 }
 0xf1e   : > { %40424 = vst [vmem:[#allocation10_spill] sm:$0xff] %v37514_v46  ;;  %v40430_v27 = vand.u32 4294901760, %v37498_v30  ;;  %v40434_v20 = vand.u32 4294901760, %v37537_v22 }
 0xf1f   : > { %v37554_v31 = vsub.f32 %v37286_v44, %v40426_v48  ;;  %v37559_v55 = vsub.f32 %v37289_v38, %v40427_v10  ;;  %v37570_v7 = vpack.c.bf16 %v39589_v29, %v39590_v8  ;;  %v40431_v48 = vand.u32 4294901760, %v37503_v62 }
 0xf20   : > { %23985 = vmatmul.mubr.f32.vlgmr.msra.gmra.mrb[2].mxu0 %v35821_v13  ;;  %v14618_v44 = vsub.f32 %v37498_v30, %v40430_v27  ;;  %v40432_v10 = vand.u32 4294901760, %v37295_v12  ;;  %v37587_v25 = vpack.c.bf16 %v40434_v20, %v40433_v33  ;;  %v40436_v29 = vand.u32 4294901760, %v37508_v4 }
 0xf21   : > { %24195 = vmatmul.mubr.f32.vlgmr.msra.gmra.mrb[2].mxu1 %v35821_v13  ;;  %27919 = vmatpush3.bf16.xpose.msra.mxu0 %v37277_v56  ;;  %40429 = vst [vmem:[#allocation9_spill] sm:$0xff] %v37570_v7  ;;  %v14625_v38 = vsub.f32 %v37503_v62, %v40431_v48  ;;  %v40437_v27 = vand.u32 4294901760, %v37519_v36 }
 0xf22   : > { %28063 = vmatpush3.bf16.xpose.msra.mxu1 %v37283_v53  ;;  %27920 = vmatprep.subr.bf16.mxu0 %v39685_v34  ;;  %v37581_v47 = vsub.f32 %v37295_v12, %v40432_v10  ;;  %40435 = vst [vmem:[#allocation13_spill] sm:$0xff] %v37587_v25  ;;  %v15307_v8 = vsub.f32 %v37508_v4, %v40436_v29  ;;  %v14619_v48 = vand.u32 4294901760, %v14618_v44  ;;  %v40440_v12 = vand.u32 4294901760, %v37334_v50 }
 0xf23   : > { %28064 = vmatprep.subr.bf16.mxu1 %v39685_v34  ;;  %24229 = vmatprep.mubr.msk.f32.mxu0 %vm28907_vm0, %v39694_v24  ;;  %v15314_v49 = vsub.f32 %v37519_v36, %v40437_v27  ;;  %v40438_v27 = vand.u32 4294901760, %v37328_v0 }
 0xf24   : > { %24439 = vmatprep.mubr.msk.f32.mxu1 %vm28907_vm0, %v39694_v24  ;;  %v15308_v33 = vand.u32 4294901760, %v15307_v8 }
 0xf25   : > { %v15315_v20 = vand.u32 4294901760, %v15314_v49  ;;  %v37606_v44 = vsub.f32 %v37328_v0, %v40438_v27  ;;  %v37616_v49 = vsub.f32 %v37334_v50, %v40440_v12  ;;  %v40443_v27 = vand.u32 4294901760, %v37337_v5  ;;  %v40446_v12 = vld [vmem:[#allocation6_spill] sm:$0xff] }
 0xf29   : > { %27922 = vmatpush3.bf16.xpose.msra.mxu0 %v37319_v41 }
 0xf2a   : > { %28066 = vmatpush3.bf16.xpose.msra.mxu1 %v37325_v57  ;;  %27923 = vmatprep.subr.bf16.mxu0 %v39685_v34 }
 0xf2b   : > { %28067 = vmatprep.subr.bf16.mxu1 %v39685_v34 }
 0xf31   : > { %27925 = vmatpush3.bf16.xpose.msra.mxu0 %v37355_v2 }
 0xf32   : > { %28069 = vmatpush3.bf16.xpose.msra.mxu1 %v37361_v60  ;;  %27926 = vmatprep.subr.bf16.mxu0 %v39685_v34 }
 0xf33   : > { %28070 = vmatprep.subr.bf16.mxu1 %v39685_v34 }
 0xf39   : > { %27928 = vmatpush3.bf16.xpose.msra.mxu0 %v37391_v43 }
 0xf3a   : > { %28072 = vmatpush3.bf16.xpose.msra.mxu1 %v37397_v6  ;;  %27929 = vmatprep.subr.bf16.mxu0 %v39685_v34 }
 0xf3b   : > { %28073 = vmatprep.subr.bf16.mxu1 %v39685_v34 }
 0xf41   : > { %27931 = vmatpush3.bf16.xpose.msra.mxu0 %v37427_v58 }
 0xf42   : > { %28075 = vmatpush3.bf16.xpose.msra.mxu1 %v37433_v54  ;;  %27932 = vmatprep.subr.bf16.mxu0 %v39685_v34 }
 0xf43   : > { %28076 = vmatprep.subr.bf16.mxu1 %v39685_v34 }
 0xf49   : > { %27934 = vmatpush3.bf16.xpose.msra.mxu0 %v37463_v11 }
 0xf4a   : > { %28078 = vmatpush3.bf16.xpose.msra.mxu1 %v37469_v42  ;;  %27935 = vmatprep.subr.bf16.mxu0 %v39685_v34  ;;  %v39602_v42 = vand.u32 4294901760, %v37606_v44 }
 0xf4b   : > { %28079 = vmatprep.subr.bf16.mxu1 %v39685_v34 }
 0xf51   : > { %27937 = vmatpush3.bf16.xpose.msra.mxu0 %v37514_v46  ;;  %v40441_v46 = vand.u32 4294901760, %v37554_v31 }
 0xf52   : > { %28081 = vmatpush3.bf16.xpose.msra.mxu1 %v37525_v26  ;;  %27938 = vmatprep.subr.bf16.mxu0 %v39685_v34  ;;  %v14626_v26 = vand.u32 4294901760, %v14625_v38  ;;  %v40439_v38 = vand.u32 4294901760, %v37331_v45 }
 0xf53   : > { %28082 = vmatprep.subr.bf16.mxu1 %v39685_v34  ;;  %v14632_v29 = vsub.f32 %v37554_v31, %v40441_v46 }
 0xf54   : > { %v37611_v10 = vsub.f32 %v37331_v45, %v40439_v38  ;;  %v27942_v8 = vpack.c.bf16 %v14626_v26, %v14619_v48  ;;  %v28086_v45 = vpack.c.bf16 %v15315_v20, %v15308_v33  ;;  %v40444_v38 = vand.u32 4294901760, %v37564_v28 }
 0xf55   : > { %v40445_v26 = vand.u32 4294901760, %v37581_v47 }
 0xf56   : > { %v15321_v50 = vsub.f32 %v37564_v28, %v40444_v38  ;;  %v14646_v38 = vsub.f32 %v37606_v44, %v39602_v42 }
 0xf57   : > { %v15328_v48 = vsub.f32 %v37581_v47, %v40445_v26 }
 0xf58   : > { %v15322_v33 = vand.u32 4294901760, %v15321_v50  ;;  %v40449_v50 = vand.u32 4294901760, %v37370_v9 }
 0xf59   : > { %27940 = vmatpush3.bf16.xpose.msra.mxu0 %v37570_v7  ;;  %v37627_v7 = vsub.f32 %v37337_v5, %v40443_v27  ;;  %v39604_v5 = vand.u32 4294901760, %v37611_v10  ;;  %v15329_v20 = vand.u32 4294901760, %v15328_v48  ;;  %v39605_v27 = vand.u32 4294901760, %v37616_v49 }
 0xf5a   : > { %28084 = vmatpush3.bf16.xpose.msra.mxu1 %v37587_v25  ;;  %27941 = vmatprep.subr.bf16.mxu0 %v39685_v34  ;;  %v40442_v25 = vand.u32 4294901760, %v37559_v55  ;;  %v37660_v26 = vsub.f32 %v37370_v9, %v40449_v50  ;;  %v14647_v50 = vand.u32 4294901760, %v14646_v38 }
 0xf5b   : > { %28085 = vmatprep.subr.bf16.mxu1 %v39685_v34  ;;  %v15335_v9 = vsub.f32 %v37616_v49, %v39605_v27 }
 0xf5c   : > { %v14639_v0 = vsub.f32 %v37559_v55, %v40442_v25  ;;  %v14633_v25 = vand.u32 4294901760, %v14632_v29  ;;  %v40447_v29 = vand.u32 4294901760, %v37364_v21 }
 0xf5e   : > { %v14640_v46 = vand.u32 4294901760, %v14639_v0  ;;  %v40448_v0 = vand.u32 4294901760, %v37367_v18 }
 0xf60   : > { %24230 = vmatmul.mubr.f32.vlgmr.msra.gmra.mrb[4].mxu0 %v40446_v12  ;;  %v27945_v48 = vpack.c.bf16 %v14640_v46, %v14633_v25  ;;  %v40451_v25 = vand.u32 4294901760, %v37627_v7 }
 0xf61   : > { %27943 = vmatpush3.bf16.xpose.msra.mxu0 %v27942_v8  ;;  %24440 = vmatmul.mubr.f32.vlgmr.msra.gmra.mrb[4].mxu1 %v40446_v12  ;;  %v37648_v8 = vsub.f32 %v37364_v21, %v40447_v29  ;;  %v14653_v21 = vsub.f32 %v37611_v10, %v39604_v5 }
 0xf62   : > { %28087 = vmatpush3.bf16.xpose.msra.mxu1 %v28086_v45  ;;  %27944 = vmatprep.subr.bf16.mxu0 %v39685_v34  ;;  %v37653_v45 = vsub.f32 %v37367_v18, %v40448_v0  ;;  %v40450_v18 = vand.u32 4294901760, %v37373_v19  ;;  %v28089_v0 = vpack.c.bf16 %v15329_v20, %v15322_v33  ;;  %v15342_v46 = vsub.f32 %v37627_v7, %v40451_v25 }
 0xf63   : > { %28088 = vmatprep.subr.bf16.mxu1 %v39685_v34  ;;  %24264 = vmatprep.mubr.msk.f32.mxu0 %vm28907_vm0, %v39694_v24  ;;  %v14654_v42 = vand.u32 4294901760, %v14653_v21  ;;  %v39606_v12 = vand.u32 4294901760, %v37648_v8  ;;  %v39608_v20 = vand.u32 4294901760, %v37660_v26  ;;  %v40452_v25 = vand.u32 4294901760, %v37400_v61 }
 0xf64   : > { %24474 = vmatprep.mubr.msk.f32.mxu1 %vm28907_vm0, %v39694_v24  ;;  %v37671_v29 = vsub.f32 %v37373_v19, %v40450_v18  ;;  %v39607_v5 = vand.u32 4294901760, %v37653_v45  ;;  %v15336_v19 = vand.u32 4294901760, %v15335_v9  ;;  %v15343_v33 = vand.u32 4294901760, %v15342_v46 }
 0xf65   : > { %v37688_v38 = vsub.f32 %v37400_v61, %v40452_v25  ;;  %v27948_v46 = vpack.c.bf16 %v14654_v42, %v14647_v50  ;;  %v14660_v27 = vsub.f32 %v37648_v8, %v39606_v12  ;;  %v40455_v25 = vand.u32 4294901760, %v37409_v16 }
 0xf66   : > { %v14667_v61 = vsub.f32 %v37653_v45, %v39607_v5  ;;  %v40456_v42 = vand.u32 4294901760, %v37671_v29 }
 0xf67   : > { %v37709_v18 = vsub.f32 %v37409_v16, %v40455_v25  ;;  %v39609_v12 = vand.u32 4294901760, %v37688_v38 }
 0xf68   : > { %v15356_v50 = vsub.f32 %v37671_v29, %v40456_v42  ;;  %v40457_v42 = vand.u32 4294901760, %v37436_v39 }
 0xf69   : > { %27946 = vmatpush3.bf16.xpose.msra.mxu0 %v27945_v48  ;;  %v40453_v48 = vand.u32 4294901760, %v37403_v14 }
 0xf6a   : > { %28090 = vmatpush3.bf16.xpose.msra.mxu1 %v28089_v0  ;;  %27947 = vmatprep.subr.bf16.mxu0 %v39685_v34  ;;  %v40454_v0 = vand.u32 4294901760, %v37406_v15 }
 0xf6b   : > { %28091 = vmatprep.subr.bf16.mxu1 %v39685_v34  ;;  %v37693_v21 = vsub.f32 %v37403_v14, %v40453_v48  ;;  %v28092_v14 = vpack.c.bf16 %v15343_v33, %v15336_v19  ;;  %v14661_v48 = vand.u32 4294901760, %v14660_v27  ;;  %v15357_v19 = vand.u32 4294901760, %v15356_v50 }
 0xf6c   : > { %v37698_v9 = vsub.f32 %v37406_v15, %v40454_v0  ;;  %v15349_v15 = vsub.f32 %v37660_v26, %v39608_v20  ;;  %v14668_v0 = vand.u32 4294901760, %v14667_v61  ;;  %v37726_v27 = vsub.f32 %v37436_v39, %v40457_v42 }
 0xf6d   : > { %v39610_v5 = vand.u32 4294901760, %v37693_v21  ;;  %v14674_v20 = vsub.f32 %v37688_v38, %v39609_v12  ;;  %v40460_v42 = vand.u32 4294901760, %v37445_v35 }
 0xf6e   : > { %v15350_v16 = vand.u32 4294901760, %v15349_v15  ;;  %v39611_v33 = vand.u32 4294901760, %v37698_v9  ;;  %v27951_v50 = vpack.c.bf16 %v14668_v0, %v14661_v48  ;;  %v40461_v48 = vand.u32 4294901760, %v37709_v18 }
 0xf6f   : > { %v14681_v39 = vsub.f32 %v37693_v21, %v39610_v5  ;;  %v37747_v25 = vsub.f32 %v37445_v35, %v40460_v42  ;;  %v39612_v12 = vand.u32 4294901760, %v37726_v27 }
 0xf70   : > { %v15370_v0 = vsub.f32 %v37709_v18, %v40461_v48  ;;  %v40462_v48 = vand.u32 4294901760, %v37472_v1 }
 0xf71   : > { %27949 = vmatpush3.bf16.xpose.msra.mxu0 %v27948_v46  ;;  %v40458_v46 = vand.u32 4294901760, %v37439_v63 }
 0xf72   : > { %28093 = vmatpush3.bf16.xpose.msra.mxu1 %v28092_v14  ;;  %27950 = vmatprep.subr.bf16.mxu0 %v39685_v34  ;;  %v40459_v14 = vand.u32 4294901760, %v37442_v3 }
 0xf73   : > { %28094 = vmatprep.subr.bf16.mxu1 %v39685_v34  ;;  %v37731_v61 = vsub.f32 %v37439_v63, %v40458_v46  ;;  %v28095_v63 = vpack.c.bf16 %v15357_v19, %v15350_v16  ;;  %v14675_v46 = vand.u32 4294901760, %v14674_v20  ;;  %v15371_v16 = vand.u32 4294901760, %v15370_v0 }
 0xf74   : > { %v37736_v15 = vsub.f32 %v37442_v3, %v40459_v14  ;;  %v15363_v3 = vsub.f32 %v37698_v9, %v39611_v33  ;;  %v14682_v14 = vand.u32 4294901760, %v14681_v39  ;;  %v37764_v20 = vsub.f32 %v37472_v1, %v40462_v48 }
 0xf75   : > { %v39613_v5 = vand.u32 4294901760, %v37731_v61  ;;  %v14688_v33 = vsub.f32 %v37726_v27, %v39612_v12  ;;  %v40465_v48 = vand.u32 4294901760, %v37481_v32 }
 0xf76   : > { %v15364_v35 = vand.u32 4294901760, %v15363_v3  ;;  %v39614_v19 = vand.u32 4294901760, %v37736_v15  ;;  %v27954_v0 = vpack.c.bf16 %v14682_v14, %v14675_v46  ;;  %v40466_v46 = vand.u32 4294901760, %v37747_v25 }
 0xf77   : > { %v14695_v1 = vsub.f32 %v37731_v61, %v39613_v5  ;;  %v37785_v42 = vsub.f32 %v37481_v32, %v40465_v48  ;;  %v39615_v12 = vand.u32 4294901760, %v37764_v20 }
 0xf78   : > { %v15384_v14 = vsub.f32 %v37747_v25, %v40466_v46  ;;  %v40467_v46 = vand.u32 4294901760, %v37528_v23 }
 0xf79   : > { %27952 = vmatpush3.bf16.xpose.msra.mxu0 %v27951_v50  ;;  %v40463_v50 = vand.u32 4294901760, %v37475_v37 }
 0xf7a   : > { %28096 = vmatpush3.bf16.xpose.msra.mxu1 %v28095_v63  ;;  %27953 = vmatprep.subr.bf16.mxu0 %v39685_v34  ;;  %v40464_v63 = vand.u32 4294901760, %v37478_v17 }
 0xf7b   : > { %28097 = vmatprep.subr.bf16.mxu1 %v39685_v34  ;;  %v37769_v39 = vsub.f32 %v37475_v37, %v40463_v50  ;;  %v28098_v37 = vpack.c.bf16 %v15371_v16, %v15364_v35  ;;  %v14689_v50 = vand.u32 4294901760, %v14688_v33  ;;  %v15385_v35 = vand.u32 4294901760, %v15384_v14 }
 0xf7c   : > { %v37774_v3 = vsub.f32 %v37478_v17, %v40464_v63  ;;  %v15377_v17 = vsub.f32 %v37736_v15, %v39614_v19  ;;  %v14696_v63 = vand.u32 4294901760, %v14695_v1  ;;  %v37802_v33 = vsub.f32 %v37528_v23, %v40467_v46 }
 0xf7d   : > { %v39616_v5 = vand.u32 4294901760, %v37769_v39  ;;  %v14702_v19 = vsub.f32 %v37764_v20, %v39615_v12  ;;  %v40470_v46 = vand.u32 4294901760, %v37537_v22 }
 0xf7e   : > { %v15378_v32 = vand.u32 4294901760, %v15377_v17  ;;  %v39617_v16 = vand.u32 4294901760, %v37774_v3  ;;  %v27957_v14 = vpack.c.bf16 %v14696_v63, %v14689_v50  ;;  %v40471_v50 = vand.u32 4294901760, %v37785_v42 }
 0xf7f   : > { %v14709_v23 = vsub.f32 %v37769_v39, %v39616_v5  ;;  %v37823_v48 = vsub.f32 %v37537_v22, %v40470_v46  ;;  %v14715_v12 = vand.u32 4294901760, %v37802_v33 }
 0xf80   : > { %v15398_v63 = vsub.f32 %v37785_v42, %v40471_v50 }
 0xf81   : > { %27955 = vmatpush3.bf16.xpose.msra.mxu0 %v27954_v0  ;;  %v40468_v0 = vand.u32 4294901760, %v37531_v52  ;;  %v39619_v46 = vand.u32 4294901760, %v37823_v48 }
 0xf82   : > { %28099 = vmatpush3.bf16.xpose.msra.mxu1 %v28098_v37  ;;  %27956 = vmatprep.subr.bf16.mxu0 %v39685_v34  ;;  %v40469_v37 = vand.u32 4294901760, %v37534_v51 }
 0xf83   : > { %28100 = vmatprep.subr.bf16.mxu1 %v39685_v34  ;;  %v37807_v1 = vsub.f32 %v37531_v52, %v40468_v0  ;;  %v28101_v52 = vpack.c.bf16 %v15385_v35, %v15378_v32  ;;  %v14703_v0 = vand.u32 4294901760, %v14702_v19  ;;  %v15399_v32 = vand.u32 4294901760, %v15398_v63 }
 0xf84   : > { %v37812_v17 = vsub.f32 %v37534_v51, %v40469_v37  ;;  %v15391_v51 = vsub.f32 %v37774_v3, %v39617_v16  ;;  %v14710_v37 = vand.u32 4294901760, %v14709_v23  ;;  %v14716_v19 = vsub.f32 %v37802_v33, %v14715_v12 }
 0xf85   : > { %v39618_v5 = vand.u32 4294901760, %v37807_v1 }
 0xf86   : > { %v15392_v22 = vand.u32 4294901760, %v15391_v51  ;;  %v39620_v35 = vand.u32 4294901760, %v37812_v17  ;;  %v27960_v16 = vpack.c.bf16 %v14710_v37, %v14703_v0  ;;  %v15412_v51 = vsub.f32 %v37823_v48, %v39619_v46 }
 0xf87   : > { %v14717_v50 = vand.u32 4294901760, %v14716_v19  ;;  %v28113_v19 = vpack.c.bf16 %v37581_v47, %v37564_v28 }
 0xf88   : > { %v28104_v23 = vpack.c.bf16 %v15399_v32, %v15392_v22  ;;  %v15413_v37 = vand.u32 4294901760, %v15412_v51  ;;  %v28110_v32 = vpack.c.bf16 %v37519_v36, %v37508_v4  ;;  %v28119_v51 = vpack.c.bf16 %v37671_v29, %v37660_v26 }
 0xf89   : > { %27958 = vmatpush3.bf16.xpose.msra.mxu0 %v27957_v14  ;;  %v14723_v14 = vsub.f32 %v37807_v1, %v39618_v5 }
 0xf8a   : > { %28102 = vmatpush3.bf16.xpose.msra.mxu1 %v28101_v52  ;;  %27959 = vmatprep.subr.bf16.mxu0 %v39685_v34  ;;  %v15405_v52 = vsub.f32 %v37812_v17, %v39620_v35  ;;  %v40484_v35 = vld [vmem:[#allocation5_spill] sm:$0xff] }
 0xf8b   : > { %28103 = vmatprep.subr.bf16.mxu1 %v39685_v34  ;;  %v14724_v63 = vand.u32 4294901760, %v14723_v14  ;;  %v27972_v14 = vpack.c.bf16 %v37611_v10, %v37606_v44 }
 0xf8c   : > { %v15406_v0 = vand.u32 4294901760, %v15405_v52  ;;  %v27975_v52 = vpack.c.bf16 %v37653_v45, %v37648_v8 }
 0xf8d   : > { %v27963_v5 = vpack.c.bf16 %v14724_v63, %v14717_v50  ;;  %v27978_v50 = vpack.c.bf16 %v37693_v21, %v37688_v38  ;;  %v28122_v63 = vpack.c.bf16 %v37709_v18, %v37698_v9 }
 0xf8e   : > { %v28107_v22 = vpack.c.bf16 %v15413_v37, %v15406_v0  ;;  %v27981_v0 = vpack.c.bf16 %v37731_v61, %v37726_v27  ;;  %v28125_v37 = vpack.c.bf16 %v37747_v25, %v37736_v15 }
 0xf91   : > { %27961 = vmatpush3.bf16.xpose.msra.mxu0 %v27960_v16  ;;  %v27966_v16 = vpack.c.bf16 %v37503_v62, %v37498_v30 }
 0xf92   : > { %28105 = vmatpush3.bf16.xpose.msra.mxu1 %v28104_v23  ;;  %27962 = vmatprep.subr.bf16.mxu0 %v39685_v34  ;;  %v28116_v23 = vpack.c.bf16 %v37627_v7, %v37616_v49 }
 0xf93   : > { %28106 = vmatprep.subr.bf16.mxu1 %v39685_v34 }
 0xf99   : > { %27964 = vmatpush3.bf16.xpose.msra.mxu0 %v27963_v5  ;;  %v27969_v5 = vpack.c.bf16 %v37559_v55, %v37554_v31 }
 0xf9a   : > { %28108 = vmatpush3.bf16.xpose.msra.mxu1 %v28107_v22  ;;  %27965 = vmatprep.subr.bf16.mxu0 %v39685_v34  ;;  %v27984_v22 = vpack.c.bf16 %v37769_v39, %v37764_v20 }
 0xf9b   : > { %28109 = vmatprep.subr.bf16.mxu1 %v39685_v34 }
 0xfa0   : > { %24265 = vmatmul.mubr.f32.vlgmr.msra.gmra.mrb[4].mxu0 %v35821_v13 }
 0xfa1   : > { %27967 = vmatpush3.bf16.xpose.msra.mxu0 %v27966_v16  ;;  %24475 = vmatmul.mubr.f32.vlgmr.msra.gmra.mrb[4].mxu1 %v35821_v13  ;;  %v28128_v16 = vpack.c.bf16 %v37785_v42, %v37774_v3 }
 0xfa2   : > { %28111 = vmatpush3.bf16.xpose.msra.mxu1 %v28110_v32  ;;  %27968 = vmatprep.subr.bf16.mxu0 %v39685_v34  ;;  %v27987_v32 = vpack.c.bf16 %v37807_v1, %v37802_v33  ;;  %v11703_v33 = vld [vmem:[%s35561_s25 + $0x398] sm:$0xff] }
 0xfa3   : > { %28112 = vmatprep.subr.bf16.mxu1 %v39685_v34  ;;  %24299 = vmatprep.mubr.msk.f32.mxu0 %vm28907_vm0, %v39694_v24 }
 0xfa4   : > { %24509 = vmatprep.mubr.msk.f32.mxu1 %vm28907_vm0, %v39694_v24 }
 0xfa9   : > { %27970 = vmatpush3.bf16.xpose.msra.mxu0 %v27969_v5  ;;  %v28131_v5 = vpack.c.bf16 %v37823_v48, %v37812_v17 }
 0xfaa   : > { %28114 = vmatpush3.bf16.xpose.msra.mxu1 %v28113_v19  ;;  %27971 = vmatprep.subr.bf16.mxu0 %v39685_v34  ;;  %v17241_v19 = vld [vmem:[%s37072_s9 + $0x2] sm:$0x1] }
 0xfab   : > { %28115 = vmatprep.subr.bf16.mxu1 %v39685_v34  ;;  %vm17249_vm7 = vcmp.ne.f32.partialorder %v17241_v19, 0.0 }
 0xfb1   : > { %27973 = vmatpush3.bf16.xpose.msra.mxu0 %v27972_v14  ;;  %v17242_v14 = vld [vmem:[%s37072_s9 + $0x3] sm:$0x1] }
 0xfb2   : > { %28117 = vmatpush3.bf16.xpose.msra.mxu1 %v28116_v23  ;;  %27974 = vmatprep.subr.bf16.mxu0 %v39685_v34  ;;  %vm17250_vm8 = vcmp.ne.f32.partialorder %v17242_v14, 0.0  ;;  %v40472_v23 = vmov 0  }
 0xfb3   : > { %28118 = vmatprep.subr.bf16.mxu1 %v39685_v34 }
 0xfb9   : > { %27976 = vmatpush3.bf16.xpose.msra.mxu0 %v27975_v52  ;;  %v17257_v52 = vsel %vm17249_vm7, 1, %v40472_v23 }
 0xfba   : > { %28120 = vmatpush3.bf16.xpose.msra.mxu1 %v28119_v51  ;;  %27977 = vmatprep.subr.bf16.mxu0 %v39685_v34  ;;  %v17258_v51 = vsel %vm17250_vm8, 1, %v40472_v23 }
 0xfbb   : > { %28121 = vmatprep.subr.bf16.mxu1 %v39685_v34 }
 0xfc1   : > { %27979 = vmatpush3.bf16.xpose.msra.mxu0 %v27978_v50  ;;  %v17274_v50 = vrot.slane %v17257_v52, %v37084_v40  ;;  %v40475_v52 = vld [vmem:[#allocation8_spill] sm:$0xff] }
 0xfc2   : > { %28123 = vmatpush3.bf16.xpose.msra.mxu1 %v28122_v63  ;;  %27980 = vmatprep.subr.bf16.mxu0 %v39685_v34  ;;  %v17278_v63 = vrot.slane %v17258_v51, %v37084_v40  ;;  %v40476_v51 = vld [vmem:[#allocation10_spill] sm:$0xff] }
 0xfc3   : > { %28124 = vmatprep.subr.bf16.mxu1 %v39685_v34  ;;  %vm17297_vm9 = vcmp.eq.s32.totalorder %v17274_v50, 1  ;;  %v40477_v50 = vld [vmem:[#allocation7_spill] sm:$0xff] }
 0xfc4   : > { %vm17298_vm10 = vcmp.eq.s32.totalorder %v17278_v63, 1  ;;  %v40478_v63 = vld [vmem:[#allocation9_spill] sm:$0xff] }
 0xfc9   : > { %27982 = vmatpush3.bf16.xpose.msra.mxu0 %v27981_v0 }
 0xfca   : > { %28126 = vmatpush3.bf16.xpose.msra.mxu1 %v28125_v37  ;;  %27983 = vmatprep.subr.bf16.mxu0 %v39685_v34 }
 0xfcb   : > { %28127 = vmatprep.subr.bf16.mxu1 %v39685_v34 }
 0xfd1   : > { %27985 = vmatpush3.bf16.xpose.msra.mxu0 %v27984_v22 }
 0xfd2   : > { %28129 = vmatpush3.bf16.xpose.msra.mxu1 %v28128_v16  ;;  %27986 = vmatprep.subr.bf16.mxu0 %v39685_v34 }
 0xfd3   : > { %28130 = vmatprep.subr.bf16.mxu1 %v39685_v34 }
 0xfd9   : > { %27988 = vmatpush3.bf16.xpose.msra.mxu0 %v27987_v32 }
 0xfda   : > { %28132 = vmatpush3.bf16.xpose.msra.mxu1 %v28131_v5  ;;  %27989 = vmatprep.subr.bf16.mxu0 %v39685_v34 }
 0xfdb   : > { %28133 = vmatprep.subr.bf16.mxu1 %v39685_v34 }
 0xfe0   : > { %24300 = vmatmul.mubr.f32.vlgmr.msra.gmra.mrb[4].mxu0 %v35868_v59 }
 0xfe1   : > { %27991 = vmatpush3.bf16.xpose.msra.mxu0 %v37277_v56  ;;  %24510 = vmatmul.mubr.f32.vlgmr.msra.gmra.mrb[4].mxu1 %v35868_v59 }
 0xfe2   : > { %28135 = vmatpush3.bf16.xpose.msra.mxu1 %v37283_v53  ;;  %27992 = vmatprep.subr.bf16.mxu0 %v39685_v34 }
 0xfe3   : > { %28136 = vmatprep.subr.bf16.mxu1 %v39685_v34  ;;  %24334 = vmatprep.mubr.msk.f32.mxu0 %vm28907_vm0, %v39694_v24 }
 0xfe4   : > { %24544 = vmatprep.mubr.msk.f32.mxu1 %vm28907_vm0, %v39694_v24 }
 0xfe9   : > { %27994 = vmatpush3.bf16.xpose.msra.mxu0 %v37319_v41 }
 0xfea   : > { %28138 = vmatpush3.bf16.xpose.msra.mxu1 %v37325_v57  ;;  %27995 = vmatprep.subr.bf16.mxu0 %v39685_v34 }
 0xfeb   : > { %28139 = vmatprep.subr.bf16.mxu1 %v39685_v34 }
 0xff1   : > { %27997 = vmatpush3.bf16.xpose.msra.mxu0 %v37355_v2 }
 0xff2   : > { %28141 = vmatpush3.bf16.xpose.msra.mxu1 %v37361_v60  ;;  %27998 = vmatprep.subr.bf16.mxu0 %v39685_v34 }
 0xff3   : > { %v13782_v0 = vpop.f32.mrb[2].mxu0  ;;  %28142 = vmatprep.subr.bf16.mxu1 %v39685_v34 }
 0xff4   : > { %v37931_v37 = vsel %vm17297_vm9, %v13782_v0, -1e+30  ;;  %v14471_v22 = vpop.f32.mrb[2].mxu1  ;;  %v23986_v16 = vpop.f32.mrb[3].mxu0  ;;  %v40479_v0 = vld [vmem:[#allocation13_spill] sm:$0xff] }
 0xff5   : > { %40473 = vst [vmem:[#allocation14_spill] sm:$0xff] %v37931_v37  ;;  %v24196_v32 = vpop.f32.mrb[3].mxu1  ;;  %v17318_v5 = vsel %vm17311_vm5, %v37931_v37, -inf  ;;  %v37935_v19 = vsel %vm17298_vm10, %v14471_v22, -1e+30  ;;  %v40480_v22 = vand.u32 4294901760, %v37498_v30 }
 0xff6   : > { %40474 = vst [vmem:[#allocation15_spill] sm:$0xff] %v37935_v19  ;;  %17319 = vmax.xlane.f32.xlu1 %v17318_v5  ;;  %v17321_v14 = vsel %vm17311_vm5, %v37935_v19, -inf  ;;  %v40481_v16 = vand.u32 4294901760, %v37503_v62  ;;  %v40482_v5 = vand.u32 4294901760, %v37508_v4  ;;  %v40485_v4 = vand.u32 4294901760, %v37554_v31 }
 0xff7   : > { %v40486_v62 = vand.u32 4294901760, %v37559_v55  ;;  %v40491_v31 = vand.u32 4294901760, %v37616_v49  ;;  %v40492_v55 = vand.u32 4294901760, %v37627_v7  ;;  %v40497_v7 = vand.u32 4294901760, %v37688_v38 }
 0xff8   : > { %v28014_v32 = vpack.c.bf16 %v40481_v16, %v40480_v22  ;;  %v40488_v22 = vand.u32 4294901760, %v37581_v47  ;;  %v40489_v16 = vand.u32 4294901760, %v37606_v44  ;;  %v40493_v47 = vand.u32 4294901760, %v37648_v8 }
 0xff9   : > { %28000 = vmatpush3.bf16.xpose.msra.mxu0 %v37391_v43  ;;  %v28017_v30 = vpack.c.bf16 %v40486_v62, %v40485_v4  ;;  %v40495_v44 = vand.u32 4294901760, %v37660_v26  ;;  %v40498_v49 = vand.u32 4294901760, %v37693_v21  ;;  %v40499_v8 = vand.u32 4294901760, %v37698_v9 }
 0xffa   : > { %28144 = vmatpush3.bf16.xpose.msra.mxu1 %v37397_v6  ;;  %17322 = vmax.xlane.f32.xlu1 %v17321_v14  ;;  %v40483_v14 = vand.u32 4294901760, %v37519_v36  ;;  %v40487_v36 = vand.u32 4294901760, %v37564_v28  ;;  %v40494_v28 = vand.u32 4294901760, %v37653_v45  ;;  %v40500_v45 = vand.u32 4294901760, %v37709_v18 }
 0xffb   : > { %28001 = vmatprep.subr.bf16.mxu0 %v39685_v34  ;;  %28145 = vmatprep.subr.bf16.mxu1 %v39685_v34  ;;  %v40501_v26 = vand.u32 4294901760, %v37726_v27  ;;  %v40503_v38 = vand.u32 4294901760, %v37736_v15  ;;  %v40504_v21 = vand.u32 4294901760, %v37747_v25  ;;  %v40505_v18 = vand.u32 4294901760, %v37764_v20 }
 0xffc   : > { %v28158_v46 = vpack.c.bf16 %v40483_v14, %v40482_v5  ;;  %v28164_v14 = vpack.c.bf16 %v40492_v55, %v40491_v31  ;;  %v28023_v4 = vpack.c.bf16 %v40494_v28, %v40493_v47  ;;  %v40506_v9 = vand.u32 4294901760, %v37769_v39  ;;  %v11688_v47 = vld [vmem:[%s35561_s25 + $0x320] sm:$0xff]  ;;  %v11689_v28 = vld [vmem:[%s35561_s25 + $0x328] sm:$0xff] }
 0xffd   : > { %v40507_v27 = vand.u32 4294901760, %v37774_v3  ;;  %v40509_v25 = vand.u32 4294901760, %v37807_v1  ;;  %v40510_v20 = vand.u32 4294901760, %v37812_v17  ;;  %v40511_v39 = vand.u32 4294901760, %v37823_v48  ;;  %v11687_v3 = vld [vmem:[%s35561_s25 + $0x318] sm:$0xff]  ;;  %v11702_v48 = vld [vmem:[%s35561_s25 + $0x390] sm:$0xff] }
 0xfff   : > { %v28035_v15 = vpack.c.bf16 %v40509_v25, %v14715_v12 }
0x1001   : > { %28003 = vmatpush3.bf16.xpose.msra.mxu0 %v37427_v58 }
0x1002   : > { %28147 = vmatpush3.bf16.xpose.msra.mxu1 %v37433_v54  ;;  %28004 = vmatprep.subr.bf16.mxu0 %v39685_v34 }
0x1003   : > { %28148 = vmatprep.subr.bf16.mxu1 %v39685_v34 }
0x1009   : > { %28006 = vmatpush3.bf16.xpose.msra.mxu0 %v37463_v11 }
0x100a   : > { %28150 = vmatpush3.bf16.xpose.msra.mxu1 %v40475_v52  ;;  %28007 = vmatprep.subr.bf16.mxu0 %v39685_v34 }
0x100b   : > { %28151 = vmatprep.subr.bf16.mxu1 %v39685_v34 }
0x1011   : > { %28009 = vmatpush3.bf16.xpose.msra.mxu0 %v40476_v51 }
0x1012   : > { %28153 = vmatpush3.bf16.xpose.msra.mxu1 %v40477_v50  ;;  %28010 = vmatprep.subr.bf16.mxu0 %v39685_v34 }
0x1013   : > { %28154 = vmatprep.subr.bf16.mxu1 %v39685_v34 }
0x1019   : > { %28012 = vmatpush3.bf16.xpose.msra.mxu0 %v40478_v63 }
0x101a   : > { %28156 = vmatpush3.bf16.xpose.msra.mxu1 %v40479_v0  ;;  %28013 = vmatprep.subr.bf16.mxu0 %v39685_v34 }
0x101b   : > { %28157 = vmatprep.subr.bf16.mxu1 %v39685_v34 }
0x1020   : > { %24335 = vmatmul.mubr.f32.vlgmr.msra.gmra.mrb[4].mxu0 %v40484_v35 }
0x1021   : > { %28015 = vmatpush3.bf16.xpose.msra.mxu0 %v28014_v32  ;;  %24545 = vmatmul.mubr.f32.vlgmr.msra.gmra.mrb[4].mxu1 %v40484_v35  ;;  %v40490_v32 = vand.u32 4294901760, %v37611_v10  ;;  %v40496_v10 = vand.u32 4294901760, %v37671_v29  ;;  %v40502_v29 = vand.u32 4294901760, %v37731_v61  ;;  %v40508_v61 = vand.u32 4294901760, %v37785_v42  ;;  %v11686_v42 = vld [vmem:[%s35561_s25 + $0x310] sm:$0xff] }
0x1022   : > { %28159 = vmatpush3.bf16.xpose.msra.mxu1 %v28158_v46  ;;  %28016 = vmatprep.subr.bf16.mxu0 %v39685_v34  ;;  %v28161_v46 = vpack.c.bf16 %v40488_v22, %v40487_v36  ;;  %v28170_v36 = vpack.c.bf16 %v40500_v45, %v40499_v8 }
0x1023   : > { %28160 = vmatprep.subr.bf16.mxu1 %v39685_v34  ;;  %24369 = vmatprep.mubr.msk.f32.mxu0 %vm28907_vm0, %v39694_v24  ;;  %v28020_v5 = vpack.c.bf16 %v40490_v32, %v40489_v16  ;;  %v28167_v62 = vpack.c.bf16 %v40496_v10, %v40495_v44  ;;  %v28029_v22 = vpack.c.bf16 %v40502_v29, %v40501_v26  ;;  %v11705_v44 = vld [vmem:[%s35561_s25 + $0x3a8] sm:$0xff] }
0x1024   : > { %24579 = vmatprep.mubr.msk.f32.mxu1 %vm28907_vm0, %v39694_v24  ;;  %v28032_v16 = vpack.c.bf16 %v40506_v9, %v40505_v18  ;;  %v28176_v32 = vpack.c.bf16 %v40508_v61, %v40507_v27  ;;  %v38171_v8 = vsel %vm557_vm1, %v11705_v44, 0 }
0x1025   : > { %v39629_v29 = vand.u32 4294901760, %v38171_v8 }
0x1029   : > { %28018 = vmatpush3.bf16.xpose.msra.mxu0 %v28017_v30  ;;  %v28026_v30 = vpack.c.bf16 %v40498_v49, %v40497_v7  ;;  %v38162_v7 = vsel %vm557_vm1, %v11688_v47, 0  ;;  %v38165_v49 = vsel %vm557_vm1, %v11689_v28, 0 }
0x102a   : > { %28162 = vmatpush3.bf16.xpose.msra.mxu1 %v28161_v46  ;;  %28019 = vmatprep.subr.bf16.mxu0 %v39685_v34  ;;  %v28173_v46 = vpack.c.bf16 %v40504_v21, %v40503_v38  ;;  %v39632_v45 = vand.u32 4294901760, %v38162_v7  ;;  %v11691_v38 = vld [vmem:[%s35561_s25 + $0x338] sm:$0xff]  ;;  %v11706_v21 = vld [vmem:[%s35561_s25 + $0x3b0] sm:$0xff] }
0x102b   : > { %28163 = vmatprep.subr.bf16.mxu1 %v39685_v34  ;;  %v38201_v27 = vsel %vm557_vm1, %v11691_v38, 0  ;;  %v38204_v61 = vsel %vm557_vm1, %v11706_v21, 0  ;;  %v11694_v38 = vld [vmem:[%s35561_s25 + $0x350] sm:$0xff]  ;;  %v11695_v21 = vld [vmem:[%s35561_s25 + $0x358] sm:$0xff] }
0x1031   : > { %28021 = vmatpush3.bf16.xpose.msra.mxu0 %v28020_v5  ;;  %v28179_v5 = vpack.c.bf16 %v40511_v39, %v40510_v20  ;;  %v39622_v20 = vand.u32 4294901760, %v38204_v61 }
0x1032   : > { %28165 = vmatpush3.bf16.xpose.msra.mxu1 %v28164_v14  ;;  %28022 = vmatprep.subr.bf16.mxu0 %v39685_v34 }
0x1033   : > { %28166 = vmatprep.subr.bf16.mxu1 %v39685_v34 }
0x1039   : > { %28024 = vmatpush3.bf16.xpose.msra.mxu0 %v28023_v4  ;;  %v11704_v4 = vld [vmem:[%s35561_s25 + $0x3a0] sm:$0xff] }
0x103a   : > { %28168 = vmatpush3.bf16.xpose.msra.mxu1 %v28167_v62  ;;  %28025 = vmatprep.subr.bf16.mxu0 %v39685_v34 }
0x103b   : > { %28169 = vmatprep.subr.bf16.mxu1 %v39685_v34 }
0x1041   : > { %28027 = vmatpush3.bf16.xpose.msra.mxu0 %v28026_v30  ;;  %v38168_v30 = vsel %vm557_vm1, %v11704_v4, 0 }
0x1042   : > { %28171 = vmatpush3.bf16.xpose.msra.mxu1 %v28170_v36  ;;  %28028 = vmatprep.subr.bf16.mxu0 %v39685_v34  ;;  %v39631_v36 = vand.u32 4294901760, %v38165_v49  ;;  %v39630_v26 = vand.u32 4294901760, %v38168_v30 }
0x1043   : > { %28172 = vmatprep.subr.bf16.mxu1 %v39685_v34 }
0x1044   : > { %v38189_v18 = vpack.c.bf16 %v39631_v36, %v39632_v45  ;;  %v38195_v9 = vpack.c.bf16 %v39629_v29, %v39630_v26 }
0x1049   : > { %28030 = vmatpush3.bf16.xpose.msra.mxu0 %v28029_v22  ;;  %v11690_v22 = vld [vmem:[%s35561_s25 + $0x330] sm:$0xff] }
0x104a   : > { %28174 = vmatpush3.bf16.xpose.msra.mxu1 %v28173_v46  ;;  %28031 = vmatprep.subr.bf16.mxu0 %v39685_v34  ;;  %v11707_v46 = vld [vmem:[%s35561_s25 + $0x3b8] sm:$0xff] }
0x104b   : > { %28175 = vmatprep.subr.bf16.mxu1 %v39685_v34 }
0x1051   : > { %28033 = vmatpush3.bf16.xpose.msra.mxu0 %v28032_v16  ;;  %v38198_v16 = vsel %vm557_vm1, %v11690_v22, 0 }
0x1052   : > { %28177 = vmatpush3.bf16.xpose.msra.mxu1 %v28176_v32  ;;  %28034 = vmatprep.subr.bf16.mxu0 %v39685_v34  ;;  %v38207_v32 = vsel %vm557_vm1, %v11707_v46, 0  ;;  %v39628_v25 = vand.u32 4294901760, %v38198_v16  ;;  %v11710_v46 = vld [vmem:[%s35561_s25 + $0x3d0] sm:$0xff] }
0x1053   : > { %28178 = vmatprep.subr.bf16.mxu1 %v39685_v34  ;;  %v39621_v39 = vand.u32 4294901760, %v38207_v32 }
0x1059   : > { %28036 = vmatpush3.bf16.xpose.msra.mxu0 %v28035_v15  ;;  %v39627_v15 = vand.u32 4294901760, %v38201_v27 }
0x105a   : > { %28180 = vmatpush3.bf16.xpose.msra.mxu1 %v28179_v5  ;;  %28037 = vmatprep.subr.bf16.mxu0 %v39685_v34  ;;  %v11692_v5 = vld [vmem:[%s35561_s25 + $0x340] sm:$0xff] }
0x105b   : > { %28181 = vmatprep.subr.bf16.mxu1 %v39685_v34 }
0x1060   : > { %24370 = vmatmul.mubr.f32.vlgmr.msra.gmra.mrb[4].mxu0 %v35821_v13 }
0x1061   : > { %28039 = vmatpush3.bf16.xpose.msra.mxu0 %v37277_v56  ;;  %24580 = vmatmul.mubr.f32.vlgmr.msra.gmra.mrb[4].mxu1 %v35821_v13  ;;  %v11684_v56 = vld [vmem:[%s35561_s25 + $0x300] sm:$0xff] }
0x1062   : > { %28183 = vmatpush3.bf16.xpose.msra.mxu1 %v37283_v53  ;;  %28040 = vmatprep.subr.bf16.mxu0 %v39685_v34  ;;  %v11685_v53 = vld [vmem:[%s35561_s25 + $0x308] sm:$0xff] }
0x1063   : > { %28184 = vmatprep.subr.bf16.mxu1 %v39685_v34  ;;  %24404 = vmatprep.mubr.msk.f32.mxu0 %vm28907_vm0, %v39694_v24 }
0x1064   : > { %24614 = vmatprep.mubr.msk.f32.mxu1 %vm28907_vm0, %v39694_v24 }
0x1069   : > { %28042 = vmatpush3.bf16.xpose.msra.mxu0 %v37319_v41  ;;  %v11700_v41 = vld [vmem:[%s35561_s25 + $0x380] sm:$0xff] }
0x106a   : > { %28186 = vmatpush3.bf16.xpose.msra.mxu1 %v37325_v57  ;;  %28043 = vmatprep.subr.bf16.mxu0 %v39685_v34  ;;  %v11701_v57 = vld [vmem:[%s35561_s25 + $0x388] sm:$0xff] }
0x106b   : > { %28187 = vmatprep.subr.bf16.mxu1 %v39685_v34 }
0x1071   : > { %28045 = vmatpush3.bf16.xpose.msra.mxu0 %v37355_v2  ;;  %v38084_v2 = vsel %vm557_vm1, %v11684_v56, 0  ;;  %v11693_v56 = vld [vmem:[%s35561_s25 + $0x348] sm:$0xff] }
0x1072   : > { %28189 = vmatpush3.bf16.xpose.msra.mxu1 %v37361_v60  ;;  %28046 = vmatprep.subr.bf16.mxu0 %v39685_v34  ;;  %v38087_v60 = vsel %vm557_vm1, %v11685_v53, 0  ;;  %v11708_v53 = vld [vmem:[%s35561_s25 + $0x3c0] sm:$0xff] }
0x1073   : > { %28190 = vmatprep.subr.bf16.mxu1 %v39685_v34 }
0x1079   : > { %28048 = vmatpush3.bf16.xpose.msra.mxu0 %v37391_v43  ;;  %v38093_v43 = vsel %vm557_vm1, %v11701_v57, 0  ;;  %v38225_v57 = vpack.c.bf16 %v39627_v15, %v39628_v25  ;;  %v11713_v15 = vld [vmem:[%s35561_s25 + $0x3e8] sm:$0xff] }
0x107a   : > { %28192 = vmatpush3.bf16.xpose.msra.mxu1 %v37397_v6  ;;  %28049 = vmatprep.subr.bf16.mxu0 %v39685_v34  ;;  %v15902_v6 = vand.u32 4294901760, %v38084_v2  ;;  %v16594_v12 = vand.u32 4294901760, %v38093_v43 }
0x107b   : > { %28193 = vmatprep.subr.bf16.mxu1 %v39685_v34 }
0x1081   : > { %28051 = vmatpush3.bf16.xpose.msra.mxu0 %v37427_v58  ;;  %v15905_v58 = vand.u32 4294901760, %v38087_v60 }
0x1082   : > { %28195 = vmatpush3.bf16.xpose.msra.mxu1 %v37433_v54  ;;  %28052 = vmatprep.subr.bf16.mxu0 %v39685_v34 }
0x1083   : > { %28196 = vmatprep.subr.bf16.mxu1 %v39685_v34  ;;  %v38111_v1 = vpack.c.bf16 %v15905_v58, %v15902_v6 }
0x1089   : > { %28054 = vmatpush3.bf16.xpose.msra.mxu0 %v37463_v11  ;;  %v38090_v11 = vsel %vm557_vm1, %v11700_v41, 0  ;;  %v11709_v41 = vld [vmem:[%s35561_s25 + $0x3c8] sm:$0xff] }
0x108a   : > { %28198 = vmatpush3.bf16.xpose.msra.mxu1 %v40475_v52  ;;  %28055 = vmatprep.subr.bf16.mxu0 %v39685_v34  ;;  %v16591_v54 = vand.u32 4294901760, %v38090_v11  ;;  %v38120_v52 = vsel %vm557_vm1, %v11686_v42, 0  ;;  %v38231_v42 = vpack.c.bf16 %v39621_v39, %v39622_v20  ;;  %v38243_v47 = vsel %vm557_vm1, %v11709_v41, 0 }
0x108b   : > { %28199 = vmatprep.subr.bf16.mxu1 %v39685_v34  ;;  %v39625_v22 = vand.u32 4294901760, %v38243_v47  ;;  %v38270_v41 = vsel %vm557_vm1, %v11694_v38, 0  ;;  %v38273_v39 = vsel %vm557_vm1, %v11695_v21, 0  ;;  %v38276_v20 = vsel %vm557_vm1, %v11710_v46, 0  ;;  %v11696_v46 = vld [vmem:[%s35561_s25 + $0x360] sm:$0xff] }
0x108c   : > { %v38117_v17 = vpack.c.bf16 %v16594_v12, %v16591_v54  ;;  %v39636_v38 = vand.u32 4294901760, %v38276_v20  ;;  %v38306_v26 = vsel %vm557_vm1, %v11696_v46, 0 }
0x1091   : > { %28057 = vmatpush3.bf16.xpose.msra.mxu0 %v40476_v51  ;;  %v38123_v51 = vsel %vm557_vm1, %v11687_v3, 0  ;;  %v38234_v3 = vsel %vm557_vm1, %v11692_v5, 0  ;;  %v11711_v5 = vld [vmem:[%s35561_s25 + $0x3d8] sm:$0xff] }
0x1092   : > { %28201 = vmatpush3.bf16.xpose.msra.mxu1 %v40477_v50  ;;  %28058 = vmatprep.subr.bf16.mxu0 %v39685_v34  ;;  %v38126_v50 = vsel %vm557_vm1, %v11702_v48, 0  ;;  %v39639_v31 = vand.u32 4294901760, %v38123_v51  ;;  %v38237_v48 = vsel %vm557_vm1, %v11693_v56, 0  ;;  %v39624_v28 = vand.u32 4294901760, %v38234_v3 }
0x1093   : > { %28202 = vmatprep.subr.bf16.mxu1 %v39685_v34  ;;  %v39638_v55 = vand.u32 4294901760, %v38126_v50  ;;  %v39623_v4 = vand.u32 4294901760, %v38237_v48 }
0x1095   : > { %v38261_v56 = vpack.c.bf16 %v39623_v4, %v39624_v28  ;;  %v38279_v4 = vsel %vm557_vm1, %v11711_v5, 0  ;;  %v39634_v28 = vand.u32 4294901760, %v38270_v41  ;;  %v11712_v5 = vld [vmem:[%s35561_s25 + $0x3e0] sm:$0xff] }
0x1096   : > { %v39635_v21 = vand.u32 4294901760, %v38279_v4  ;;  %v38312_v45 = vsel %vm557_vm1, %v11712_v5, 0  ;;  %v11698_v5 = vld [vmem:[%s35561_s25 + $0x370] sm:$0xff] }
0x1097   : > { %v39642_v46 = vand.u32 4294901760, %v38312_v45 }
0x1098   : > { %v38303_v29 = vpack.c.bf16 %v39635_v21, %v39636_v38  ;;  %v11699_v38 = vld [vmem:[%s35561_s25 + $0x378] sm:$0xff] }
0x1099   : > { %28060 = vmatpush3.bf16.xpose.msra.mxu0 %v40478_v63  ;;  %v38129_v63 = vsel %vm557_vm1, %v11703_v33, 0  ;;  %v38240_v33 = vsel %vm557_vm1, %v11708_v53, 0 }
0x109a   : > { %28204 = vmatpush3.bf16.xpose.msra.mxu1 %v40479_v0  ;;  %28205 = vmatprep.subr.bf16.mxu0 %v39685_v34  ;;  %v39640_v0 = vand.u32 4294901760, %v38120_v52  ;;  %v39637_v14 = vand.u32 4294901760, %v38129_v63  ;;  %v39626_v44 = vand.u32 4294901760, %v38240_v33  ;;  %40513 = vst [vmem:[#allocation10_spill] sm:$0xff] %v38303_v29 }
0x109b   : > { %28349 = vmatprep.subr.bf16.mxu1 %v39685_v34 }
0x109c   : > { %v38153_v10 = vpack.c.bf16 %v39639_v31, %v39640_v0  ;;  %v38159_v62 = vpack.c.bf16 %v39637_v14, %v39638_v55  ;;  %v38267_v53 = vpack.c.bf16 %v39625_v22, %v39626_v44  ;;  %v39633_v22 = vand.u32 4294901760, %v38273_v39  ;;  %v11697_v44 = vld [vmem:[%s35561_s25 + $0x368] sm:$0xff]  ;;  %v11715_v14 = vld [vmem:[%s35561_s25 + $0x3f8] sm:$0xff] }
0x109d   : > { %v38309_v36 = vsel %vm557_vm1, %v11697_v44, 0  ;;  %v38332_v55 = vsub.f32 %v38084_v2, %v15902_v6  ;;  %v38337_v31 = vsub.f32 %v38087_v60, %v15905_v58  ;;  %v38342_v0 = vsub.f32 %v38090_v11, %v16591_v54 }
0x109e   : > { %v38297_v25 = vpack.c.bf16 %v39633_v22, %v39634_v28  ;;  %v38315_v22 = vsel %vm557_vm1, %v11713_v15, 0  ;;  %v39643_v28 = vand.u32 4294901760, %v38306_v26  ;;  %v39641_v21 = vand.u32 4294901760, %v38309_v36  ;;  %v11714_v15 = vld [vmem:[%s35561_s25 + $0x3f0] sm:$0xff]  ;;  %s28846_s25 = sshll.u32 %s28910_s23, 4  ;;  %s28847_s25 = int_to_ptr.vmem [resolvable:$false] %s28846_s25 }
0x109f   : > { %v38353_v2 = vsub.f32 %v38093_v43, %v16594_v12  ;;  %v40515_v60 = vand.u32 4294901760, %v38315_v22  ;;  %v38362_v11 = vsel %vm557_vm1, %v11698_v5, 0  ;;  %v38365_v58 = vsel %vm557_vm1, %v11699_v38, 0  ;;  %s28848_s26 = scalar_lea.vmem %s28847_s25, 512  ;;  %p28849_p0 = scmp.lt.s32.totalorder %s38979_s13, %s28847_s25 }
0x10a0   : > { %24405 = vmatmul.mubr.f32.vlgmr.msra.gmra.mrb[4].mxu0 %v35821_v13  ;;  %40512 = vst [vmem:[#allocation8_spill] sm:$0xff] %v38297_v25  ;;  %v38348_v44 = vpack.c.bf16 %v39641_v21, %v39643_v28  ;;  %v38368_v54 = vsel %vm557_vm1, %v11714_v15, 0  ;;  %v38371_v21 = vsel %vm557_vm1, %v11715_v14, 0  ;;  %v39647_v43 = vand.u32 4294901760, %v38362_v11  ;;  %p28850_p1 = scmp.lt.s32.totalorder %s28848_s26, %s28842_s17 }
0x10a1   : > { %24615 = vmatmul.mubr.f32.vlgmr.msra.gmra.mrb[4].mxu1 %v35821_v13  ;;  %28207 = vmatpush3.bf16.xpose.msra.mxu0 %v38111_v1  ;;  %v38359_v6 = vpack.c.bf16 %v40515_v60, %v39642_v46  ;;  %v40517_v28 = vand.u32 4294901760, %v38120_v52  ;;  %v40518_v5 = vand.u32 4294901760, %v38123_v51  ;;  %v40519_v38 = vand.u32 4294901760, %v38126_v50 }
0x10a2   : > { %28351 = vmatpush3.bf16.xpose.msra.mxu1 %v38117_v17  ;;  %28208 = vmatprep.subr.bf16.mxu0 %v39685_v34  ;;  %40514 = vst [vmem:[#allocation7_spill] sm:$0xff] %v38348_v44  ;;  %v40520_v46 = vand.u32 4294901760, %v38365_v58  ;;  %v40522_v19 = vand.u32 4294901760, %v38332_v55  ;;  %p28851_p2 = por %p28850_p1, %p28849_p0 }
0x10a3   : > { %28352 = vmatprep.subr.bf16.mxu1 %v39685_v34  ;;  %24649 = vmatprep.mubr.msk.f32.mxu0 %vm28907_vm0, %v39694_v24  ;;  %40516 = vst [vmem:[#allocation9_spill] sm:$0xff] %v38359_v6  ;;  %v38388_v60 = vsub.f32 %v38120_v52, %v40517_v28  ;;  %v38393_v12 = vsub.f32 %v38123_v51, %v40518_v5  ;;  %v40523_v28 = vand.u32 4294901760, %v38337_v31  ;;  %v40524_v5 = vand.u32 4294901760, %v38129_v63 }
0x10a4   : > { %24859 = vmatprep.mubr.msk.f32.mxu1 %vm28907_vm0, %v39694_v24  ;;  %v38398_v15 = vsub.f32 %v38126_v50, %v40519_v38  ;;  %v38404_v14 = vpack.c.bf16 %v40520_v46, %v39647_v43  ;;  %v15996_v52 = vsub.f32 %v38332_v55, %v40522_v19  ;;  %v40525_v50 = vand.u32 4294901760, %v38368_v54  ;;  %p28852_p3 = pnand %p28851_p2, %p28845_p13 }
0x10a5   : > { %v16003_v51 = vsub.f32 %v38337_v31, %v40523_v28  ;;  %v38415_v37 = vsub.f32 %v38129_v63, %v40524_v5  ;;  %v40526_v38 = vand.u32 4294901760, %v38371_v21  ;;  %v40528_v46 = vand.u32 4294901760, %v38342_v0 }
0x10a6   : > { %40521 = vst [vmem:[#allocation13_spill] sm:$0xff] %v38404_v14  ;;  %v40529_v19 = vand.u32 4294901760, %v38353_v2  ;;  %v15997_v28 = vand.u32 4294901760, %v15996_v52  ;;  %v40532_v63 = vand.u32 4294901760, %v38168_v30 }
0x10a7   : > { %v38421_v35 = vpack.c.bf16 %v40526_v38, %v40525_v50  ;;  %v16685_v43 = vsub.f32 %v38342_v0, %v40528_v46 }
0x10a9   : > { %28210 = vmatpush3.bf16.xpose.msra.mxu0 %v38153_v10  ;;  %40527 = vst [vmem:[#allocation16_spill] sm:$0xff] %v38421_v35  ;;  %v16686_v50 = vand.u32 4294901760, %v16685_v43 }
0x10aa   : > { %28354 = vmatpush3.bf16.xpose.msra.mxu1 %v38159_v62  ;;  %28211 = vmatprep.subr.bf16.mxu0 %v39685_v34 }
0x10ab   : > { %28355 = vmatprep.subr.bf16.mxu1 %v39685_v34 }
0x10b1   : > { %28213 = vmatpush3.bf16.xpose.msra.mxu0 %v38189_v18 }
0x10b2   : > { %28357 = vmatpush3.bf16.xpose.msra.mxu1 %v38195_v9  ;;  %28214 = vmatprep.subr.bf16.mxu0 %v39685_v34 }
0x10b3   : > { %28358 = vmatprep.subr.bf16.mxu1 %v39685_v34 }
0x10b9   : > { %28216 = vmatpush3.bf16.xpose.msra.mxu0 %v38225_v57 }
0x10ba   : > { %28360 = vmatpush3.bf16.xpose.msra.mxu1 %v38231_v42  ;;  %28217 = vmatprep.subr.bf16.mxu0 %v39685_v34 }
0x10bb   : > { %28361 = vmatprep.subr.bf16.mxu1 %v39685_v34 }
0x10c1   : > { %28219 = vmatpush3.bf16.xpose.msra.mxu0 %v38261_v56 }
0x10c2   : > { %28363 = vmatpush3.bf16.xpose.msra.mxu1 %v38267_v53  ;;  %28220 = vmatprep.subr.bf16.mxu0 %v39685_v34 }
0x10c3   : > { %28364 = vmatprep.subr.bf16.mxu1 %v39685_v34 }
0x10c9   : > { %28222 = vmatpush3.bf16.xpose.msra.mxu0 %v38297_v25 }
0x10ca   : > { %28366 = vmatpush3.bf16.xpose.msra.mxu1 %v38303_v29  ;;  %28223 = vmatprep.subr.bf16.mxu0 %v39685_v34  ;;  %v40533_v29 = vand.u32 4294901760, %v38388_v60 }
0x10cb   : > { %28367 = vmatprep.subr.bf16.mxu1 %v39685_v34 }
0x10cc   : > { %v16010_v46 = vsub.f32 %v38388_v60, %v40533_v29 }
0x10d1   : > { %28225 = vmatpush3.bf16.xpose.msra.mxu0 %v38348_v44  ;;  %v16004_v44 = vand.u32 4294901760, %v16003_v51  ;;  %v40531_v51 = vand.u32 4294901760, %v38165_v49 }
0x10d2   : > { %28369 = vmatpush3.bf16.xpose.msra.mxu1 %v38359_v6  ;;  %28226 = vmatprep.subr.bf16.mxu0 %v39685_v34  ;;  %v16692_v6 = vsub.f32 %v38353_v2, %v40529_v19  ;;  %v40530_v19 = vand.u32 4294901760, %v38162_v7 }
0x10d3   : > { %28370 = vmatprep.subr.bf16.mxu1 %v39685_v34  ;;  %v38445_v5 = vsub.f32 %v38165_v49, %v40531_v51  ;;  %v28230_v43 = vpack.c.bf16 %v16004_v44, %v15997_v28  ;;  %v40536_v51 = vand.u32 4294901760, %v38398_v15  ;;  %v40537_v44 = vand.u32 4294901760, %v38415_v37 }
0x10d4   : > { %v16693_v38 = vand.u32 4294901760, %v16692_v6  ;;  %v38440_v52 = vsub.f32 %v38162_v7, %v40530_v19  ;;  %v38450_v6 = vsub.f32 %v38168_v30, %v40532_v63  ;;  %v40535_v19 = vand.u32 4294901760, %v38171_v8  ;;  %v40538_v63 = vld [vmem:[#allocation6_spill] sm:$0xff] }
0x10d5   : > { %v16699_v30 = vsub.f32 %v38398_v15, %v40536_v51  ;;  %v16706_v28 = vsub.f32 %v38415_v37, %v40537_v44 }
0x10d6   : > { %v28374_v49 = vpack.c.bf16 %v16693_v38, %v16686_v50  ;;  %v39660_v25 = vand.u32 4294901760, %v38440_v52 }
0x10d7   : > { %v16700_v50 = vand.u32 4294901760, %v16699_v30  ;;  %v16707_v38 = vand.u32 4294901760, %v16706_v28  ;;  %v40541_v30 = vand.u32 4294901760, %v38204_v61 }
0x10d9   : > { %28228 = vmatpush3.bf16.xpose.msra.mxu0 %v38404_v14  ;;  %v38461_v14 = vsub.f32 %v38171_v8, %v40535_v19  ;;  %v39661_v8 = vand.u32 4294901760, %v38445_v5  ;;  %v39663_v19 = vand.u32 4294901760, %v38450_v6  ;;  %v38494_v44 = vsub.f32 %v38204_v61, %v40541_v30 }
0x10da   : > { %28372 = vmatpush3.bf16.xpose.msra.mxu1 %v38421_v35  ;;  %28229 = vmatprep.subr.bf16.mxu0 %v39685_v34  ;;  %v40534_v35 = vand.u32 4294901760, %v38393_v12 }
0x10db   : > { %28373 = vmatprep.subr.bf16.mxu1 %v39685_v34  ;;  %v39662_v51 = vand.u32 4294901760, %v38461_v14  ;;  %v16713_v61 = vsub.f32 %v38450_v6, %v39663_v19 }
0x10dc   : > { %v16017_v7 = vsub.f32 %v38393_v12, %v40534_v35  ;;  %v16011_v35 = vand.u32 4294901760, %v16010_v46  ;;  %v40539_v46 = vand.u32 4294901760, %v38198_v16 }
0x10de   : > { %v16018_v29 = vand.u32 4294901760, %v16017_v7  ;;  %v40540_v7 = vand.u32 4294901760, %v38201_v27 }
0x10e0   : > { %24650 = vmatmul.mubr.f32.vlgmr.msra.gmra.mrb[6].mxu0 %v40538_v63  ;;  %v28233_v28 = vpack.c.bf16 %v16018_v29, %v16011_v35  ;;  %v16720_v35 = vsub.f32 %v38461_v14, %v39662_v51  ;;  %v40543_v51 = vand.u32 4294901760, %v38234_v3 }
0x10e1   : > { %28231 = vmatpush3.bf16.xpose.msra.mxu0 %v28230_v43  ;;  %24860 = vmatmul.mubr.f32.vlgmr.msra.gmra.mrb[6].mxu1 %v40538_v63  ;;  %v38482_v43 = vsub.f32 %v38198_v16, %v40539_v46  ;;  %v16024_v63 = vsub.f32 %v38440_v52, %v39660_v25  ;;  %v16031_v16 = vsub.f32 %v38445_v5, %v39661_v8 }
0x10e2   : > { %28375 = vmatpush3.bf16.xpose.msra.mxu1 %v28374_v49  ;;  %28232 = vmatprep.subr.bf16.mxu0 %v39685_v34  ;;  %v38487_v49 = vsub.f32 %v38201_v27, %v40540_v7  ;;  %v40542_v27 = vand.u32 4294901760, %v38207_v32  ;;  %v28377_v7 = vpack.c.bf16 %v16707_v38, %v16700_v50  ;;  %v16721_v50 = vand.u32 4294901760, %v16720_v35 }
0x10e3   : > { %28376 = vmatprep.subr.bf16.mxu1 %v39685_v34  ;;  %24684 = vmatprep.mubr.msk.f32.mxu0 %vm28907_vm0, %v39694_v24  ;;  %v16025_v29 = vand.u32 4294901760, %v16024_v63  ;;  %v16032_v30 = vand.u32 4294901760, %v16031_v16  ;;  %v39664_v25 = vand.u32 4294901760, %v38482_v43  ;;  %v39666_v38 = vand.u32 4294901760, %v38494_v44 }
0x10e4   : > { %24894 = vmatprep.mubr.msk.f32.mxu1 %vm28907_vm0, %v39694_v24  ;;  %v38505_v46 = vsub.f32 %v38207_v32, %v40542_v27  ;;  %v39665_v8 = vand.u32 4294901760, %v38487_v49  ;;  %v16714_v32 = vand.u32 4294901760, %v16713_v61  ;;  %v40544_v63 = vand.u32 4294901760, %v38237_v48 }
0x10e5   : > { %v28236_v35 = vpack.c.bf16 %v16032_v30, %v16025_v29  ;;  %v16038_v19 = vsub.f32 %v38482_v43, %v39664_v25 }
0x10e6   : > { %v38527_v16 = vsub.f32 %v38237_v48, %v40544_v63  ;;  %v28380_v48 = vpack.c.bf16 %v16721_v50, %v16714_v32  ;;  %v40547_v29 = vand.u32 4294901760, %v38505_v46 }
0x10e7   : > { %v16039_v63 = vand.u32 4294901760, %v16038_v19 }
0x10e8   : > { %v16734_v30 = vsub.f32 %v38505_v46, %v40547_v29  ;;  %v40548_v29 = vand.u32 4294901760, %v38270_v41 }
0x10e9   : > { %28234 = vmatpush3.bf16.xpose.msra.mxu0 %v28233_v28  ;;  %v38522_v28 = vsub.f32 %v38234_v3, %v40543_v51  ;;  %v16045_v3 = vsub.f32 %v38487_v49, %v39665_v8  ;;  %v40546_v51 = vand.u32 4294901760, %v38243_v47  ;;  %v39668_v8 = vand.u32 4294901760, %v38527_v16 }
0x10ea   : > { %28378 = vmatpush3.bf16.xpose.msra.mxu1 %v28377_v7  ;;  %28235 = vmatprep.subr.bf16.mxu0 %v39685_v34  ;;  %v40545_v7 = vand.u32 4294901760, %v38240_v33  ;;  %v16735_v32 = vand.u32 4294901760, %v16734_v30  ;;  %v38560_v19 = vsub.f32 %v38270_v41, %v40548_v29  ;;  %v40551_v29 = vand.u32 4294901760, %v38279_v4 }
0x10eb   : > { %28379 = vmatprep.subr.bf16.mxu1 %v39685_v34  ;;  %v38543_v27 = vsub.f32 %v38243_v47, %v40546_v51  ;;  %v39667_v25 = vand.u32 4294901760, %v38522_v28  ;;  %v16059_v41 = vsub.f32 %v38527_v16, %v39668_v8 }
0x10ec   : > { %v38532_v61 = vsub.f32 %v38240_v33, %v40545_v7  ;;  %v16727_v33 = vsub.f32 %v38494_v44, %v39666_v38  ;;  %v16046_v7 = vand.u32 4294901760, %v16045_v3  ;;  %v38581_v51 = vsub.f32 %v38279_v4, %v40551_v29 }
0x10ed   : > { %v16052_v38 = vsub.f32 %v38522_v28, %v39667_v25  ;;  %v39670_v25 = vand.u32 4294901760, %v38560_v19 }
0x10ee   : > { %v16728_v47 = vand.u32 4294901760, %v16727_v33  ;;  %v39669_v50 = vand.u32 4294901760, %v38532_v61  ;;  %v28239_v30 = vpack.c.bf16 %v16046_v7, %v16039_v63  ;;  %v40552_v63 = vand.u32 4294901760, %v38543_v27 }
0x10f0   : > { %v16748_v7 = vsub.f32 %v38543_v27, %v40552_v63  ;;  %v40553_v63 = vand.u32 4294901760, %v38306_v26 }
0x10f1   : > { %28237 = vmatpush3.bf16.xpose.msra.mxu0 %v28236_v35  ;;  %v40549_v35 = vand.u32 4294901760, %v38273_v39 }
0x10f2   : > { %28381 = vmatpush3.bf16.xpose.msra.mxu1 %v28380_v48  ;;  %28238 = vmatprep.subr.bf16.mxu0 %v39685_v34  ;;  %v40550_v48 = vand.u32 4294901760, %v38276_v20 }
0x10f3   : > { %28382 = vmatprep.subr.bf16.mxu1 %v39685_v34  ;;  %v38565_v3 = vsub.f32 %v38273_v39, %v40549_v35  ;;  %v28383_v39 = vpack.c.bf16 %v16735_v32, %v16728_v47  ;;  %v16053_v35 = vand.u32 4294901760, %v16052_v38  ;;  %v16749_v47 = vand.u32 4294901760, %v16748_v7 }
0x10f4   : > { %v38570_v33 = vsub.f32 %v38276_v20, %v40550_v48  ;;  %v16741_v20 = vsub.f32 %v38532_v61, %v39669_v50  ;;  %v16060_v48 = vand.u32 4294901760, %v16059_v41  ;;  %v38598_v38 = vsub.f32 %v38306_v26, %v40553_v63 }
0x10f5   : > { %v39671_v8 = vand.u32 4294901760, %v38565_v3  ;;  %v16066_v50 = vsub.f32 %v38560_v19, %v39670_v25  ;;  %v40556_v63 = vand.u32 4294901760, %v38315_v22 }
0x10f6   : > { %v16742_v4 = vand.u32 4294901760, %v16741_v20  ;;  %v39672_v32 = vand.u32 4294901760, %v38570_v33  ;;  %v28242_v7 = vpack.c.bf16 %v16060_v48, %v16053_v35  ;;  %v40557_v35 = vand.u32 4294901760, %v38581_v51 }
0x10f7   : > { %v16073_v26 = vsub.f32 %v38565_v3, %v39671_v8  ;;  %v38619_v29 = vsub.f32 %v38315_v22, %v40556_v63  ;;  %v39673_v25 = vand.u32 4294901760, %v38598_v38 }
0x10f8   : > { %v16762_v48 = vsub.f32 %v38581_v51, %v40557_v35  ;;  %v40558_v35 = vand.u32 4294901760, %v38362_v11 }
0x10f9   : > { %28240 = vmatpush3.bf16.xpose.msra.mxu0 %v28239_v30  ;;  %v40554_v30 = vand.u32 4294901760, %v38309_v36 }
0x10fa   : > { %28384 = vmatpush3.bf16.xpose.msra.mxu1 %v28383_v39  ;;  %28241 = vmatprep.subr.bf16.mxu0 %v39685_v34  ;;  %v40555_v39 = vand.u32 4294901760, %v38312_v45 }
0x10fb   : > { %28385 = vmatprep.subr.bf16.mxu1 %v39685_v34  ;;  %v38603_v41 = vsub.f32 %v38309_v36, %v40554_v30  ;;  %v28386_v36 = vpack.c.bf16 %v16749_v47, %v16742_v4  ;;  %v16067_v30 = vand.u32 4294901760, %v16066_v50  ;;  %v16763_v4 = vand.u32 4294901760, %v16762_v48 }
0x10fc   : > { %v38608_v20 = vsub.f32 %v38312_v45, %v40555_v39  ;;  %v16755_v45 = vsub.f32 %v38570_v33, %v39672_v32  ;;  %v16074_v39 = vand.u32 4294901760, %v16073_v26  ;;  %v38636_v50 = vsub.f32 %v38362_v11, %v40558_v35 }
0x10fd   : > { %v39674_v8 = vand.u32 4294901760, %v38603_v41  ;;  %v16080_v32 = vsub.f32 %v38598_v38, %v39673_v25  ;;  %v40561_v35 = vand.u32 4294901760, %v38371_v21 }
0x10fe   : > { %v16756_v22 = vand.u32 4294901760, %v16755_v45  ;;  %v39675_v47 = vand.u32 4294901760, %v38608_v20  ;;  %v28245_v48 = vpack.c.bf16 %v16074_v39, %v16067_v30  ;;  %v40562_v30 = vand.u32 4294901760, %v38619_v29 }
0x10ff   : > { %v16087_v11 = vsub.f32 %v38603_v41, %v39674_v8  ;;  %v38657_v63 = vsub.f32 %v38371_v21, %v40561_v35  ;;  %v16093_v25 = vand.u32 4294901760, %v38636_v50 }
0x1100   : > { %v16776_v39 = vsub.f32 %v38619_v29, %v40562_v30 }
0x1101   : > { %28243 = vmatpush3.bf16.xpose.msra.mxu0 %v28242_v7  ;;  %v40559_v7 = vand.u32 4294901760, %v38365_v58  ;;  %v39677_v35 = vand.u32 4294901760, %v38657_v63 }
0x1102   : > { %28387 = vmatpush3.bf16.xpose.msra.mxu1 %v28386_v36  ;;  %28244 = vmatprep.subr.bf16.mxu0 %v39685_v34  ;;  %v40560_v36 = vand.u32 4294901760, %v38368_v54 }
0x1103   : > { %28388 = vmatprep.subr.bf16.mxu1 %v39685_v34  ;;  %v38641_v26 = vsub.f32 %v38365_v58, %v40559_v7  ;;  %v28389_v58 = vpack.c.bf16 %v16763_v4, %v16756_v22  ;;  %v16081_v7 = vand.u32 4294901760, %v16080_v32  ;;  %v16777_v22 = vand.u32 4294901760, %v16776_v39 }
0x1104   : > { %v38646_v45 = vsub.f32 %v38368_v54, %v40560_v36  ;;  %v16769_v54 = vsub.f32 %v38608_v20, %v39675_v47  ;;  %v16088_v36 = vand.u32 4294901760, %v16087_v11  ;;  %v16094_v32 = vsub.f32 %v38636_v50, %v16093_v25 }
0x1105   : > { %v39676_v8 = vand.u32 4294901760, %v38641_v26 }
0x1106   : > { %v16770_v21 = vand.u32 4294901760, %v16769_v54  ;;  %v16782_v4 = vand.u32 4294901760, %v38646_v45  ;;  %v28248_v47 = vpack.c.bf16 %v16088_v36, %v16081_v7  ;;  %v16790_v54 = vsub.f32 %v38657_v63, %v39677_v35  ;;  %v40573_v35 = vld [vmem:[#allocation5_spill] sm:$0xff] }
0x1107   : > { %v16095_v30 = vand.u32 4294901760, %v16094_v32  ;;  %v28401_v32 = vpack.c.bf16 %v38415_v37, %v38398_v15 }
0x1108   : > { %v28392_v11 = vpack.c.bf16 %v16777_v22, %v16770_v21  ;;  %v16791_v36 = vand.u32 4294901760, %v16790_v54  ;;  %v28398_v22 = vpack.c.bf16 %v38353_v2, %v38342_v0  ;;  %v28407_v54 = vpack.c.bf16 %v38505_v46, %v38494_v44 }
0x1109   : > { %28246 = vmatpush3.bf16.xpose.msra.mxu0 %v28245_v48  ;;  %v16101_v48 = vsub.f32 %v38641_v26, %v39676_v8 }
0x110a   : > { %28390 = vmatpush3.bf16.xpose.msra.mxu1 %v28389_v58  ;;  %28247 = vmatprep.subr.bf16.mxu0 %v39685_v34  ;;  %v16783_v58 = vsub.f32 %v38646_v45, %v16782_v4 }
0x110b   : > { %28391 = vmatprep.subr.bf16.mxu1 %v39685_v34  ;;  %v16102_v39 = vand.u32 4294901760, %v16101_v48  ;;  %v28260_v48 = vpack.c.bf16 %v38445_v5, %v38440_v52 }
0x110c   : > { %v16784_v7 = vand.u32 4294901760, %v16783_v58  ;;  %v28263_v58 = vpack.c.bf16 %v38487_v49, %v38482_v43 }
0x110d   : > { %v28251_v8 = vpack.c.bf16 %v16102_v39, %v16095_v30  ;;  %v28266_v30 = vpack.c.bf16 %v38527_v16, %v38522_v28  ;;  %v28410_v39 = vpack.c.bf16 %v38543_v27, %v38532_v61 }
0x110e   : > { %v28395_v21 = vpack.c.bf16 %v16791_v36, %v16784_v7  ;;  %v28269_v7 = vpack.c.bf16 %v38565_v3, %v38560_v19  ;;  %v28413_v36 = vpack.c.bf16 %v38581_v51, %v38570_v33 }
0x1111   : > { %28249 = vmatpush3.bf16.xpose.msra.mxu0 %v28248_v47  ;;  %v28254_v47 = vpack.c.bf16 %v38337_v31, %v38332_v55 }
0x1112   : > { %28393 = vmatpush3.bf16.xpose.msra.mxu1 %v28392_v11  ;;  %28250 = vmatprep.subr.bf16.mxu0 %v39685_v34  ;;  %v28404_v11 = vpack.c.bf16 %v38461_v14, %v38450_v6 }
0x1113   : > { %28394 = vmatprep.subr.bf16.mxu1 %v39685_v34 }
0x1119   : > { %28252 = vmatpush3.bf16.xpose.msra.mxu0 %v28251_v8  ;;  %v28257_v8 = vpack.c.bf16 %v38393_v12, %v38388_v60 }
0x111a   : > { %28396 = vmatpush3.bf16.xpose.msra.mxu1 %v28395_v21  ;;  %28253 = vmatprep.subr.bf16.mxu0 %v39685_v34  ;;  %v28272_v21 = vpack.c.bf16 %v38603_v41, %v38598_v38 }
0x111b   : > { %28397 = vmatprep.subr.bf16.mxu1 %v39685_v34 }
0x1120   : > { %24685 = vmatmul.mubr.f32.vlgmr.msra.gmra.mrb[6].mxu0 %v35821_v13 }
0x1121   : > { %28255 = vmatpush3.bf16.xpose.msra.mxu0 %v28254_v47  ;;  %24895 = vmatmul.mubr.f32.vlgmr.msra.gmra.mrb[6].mxu1 %v35821_v13  ;;  %v28416_v47 = vpack.c.bf16 %v38619_v29, %v38608_v20 }
0x1122   : > { %28399 = vmatpush3.bf16.xpose.msra.mxu1 %v28398_v22  ;;  %28256 = vmatprep.subr.bf16.mxu0 %v39685_v34  ;;  %v28275_v22 = vpack.c.bf16 %v38641_v26, %v38636_v50 }
0x1123   : > { %28400 = vmatprep.subr.bf16.mxu1 %v39685_v34  ;;  %24719 = vmatprep.mubr.msk.f32.mxu0 %vm28907_vm0, %v39694_v24 }
0x1124   : > { %24929 = vmatprep.mubr.msk.f32.mxu1 %vm28907_vm0, %v39694_v24 }
0x1129   : > { %28258 = vmatpush3.bf16.xpose.msra.mxu0 %v28257_v8  ;;  %v28419_v8 = vpack.c.bf16 %v38657_v63, %v38646_v45 }
0x112a   : > { %28402 = vmatpush3.bf16.xpose.msra.mxu1 %v28401_v32  ;;  %28259 = vmatprep.subr.bf16.mxu0 %v39685_v34  ;;  %v17243_v32 = vld [vmem:[%s37072_s9 + $0x4] sm:$0x1] }
0x112b   : > { %28403 = vmatprep.subr.bf16.mxu1 %v39685_v34  ;;  %vm17251_vm11 = vcmp.ne.f32.partialorder %v17243_v32, 0.0  ;;  %v40563_v32 = vld [vmem:[#allocation8_spill] sm:$0xff] }
0x1131   : > { %28261 = vmatpush3.bf16.xpose.msra.mxu0 %v28260_v48  ;;  %v17244_v48 = vld [vmem:[%s37072_s9 + $0x5] sm:$0x1] }
0x1132   : > { %28405 = vmatpush3.bf16.xpose.msra.mxu1 %v28404_v11  ;;  %28262 = vmatprep.subr.bf16.mxu0 %v39685_v34  ;;  %vm17252_vm12 = vcmp.ne.f32.partialorder %v17244_v48, 0.0  ;;  %v40564_v48 = vld [vmem:[#allocation10_spill] sm:$0xff] }
0x1133   : > { %28406 = vmatprep.subr.bf16.mxu1 %v39685_v34  ;;  %v17260_v11 = vsel %vm17252_vm12, 1, %v40472_v23 }
0x1139   : > { %28264 = vmatpush3.bf16.xpose.msra.mxu0 %v28263_v58 }
0x113a   : > { %28408 = vmatpush3.bf16.xpose.msra.mxu1 %v28407_v54  ;;  %28265 = vmatprep.subr.bf16.mxu0 %v39685_v34  ;;  %v17286_v54 = vrot.slane %v17260_v11, %v37084_v40  ;;  %v40566_v11 = vld [vmem:[#allocation9_spill] sm:$0xff] }
0x113b   : > { %28409 = vmatprep.subr.bf16.mxu1 %v39685_v34 }
0x113c   : > { %vm17300_vm14 = vcmp.eq.s32.totalorder %v17286_v54, 1  ;;  %v40568_v54 = vld [vmem:[#allocation16_spill] sm:$0xff] }
0x1141   : > { %28267 = vmatpush3.bf16.xpose.msra.mxu0 %v28266_v30 }
0x1142   : > { %28411 = vmatpush3.bf16.xpose.msra.mxu1 %v28410_v39  ;;  %28268 = vmatprep.subr.bf16.mxu0 %v39685_v34 }
0x1143   : > { %28412 = vmatprep.subr.bf16.mxu1 %v39685_v34 }
0x1149   : > { %28270 = vmatpush3.bf16.xpose.msra.mxu0 %v28269_v7 }
0x114a   : > { %28414 = vmatpush3.bf16.xpose.msra.mxu1 %v28413_v36  ;;  %28271 = vmatprep.subr.bf16.mxu0 %v39685_v34 }
0x114b   : > { %28415 = vmatprep.subr.bf16.mxu1 %v39685_v34 }
0x1151   : > { %28273 = vmatpush3.bf16.xpose.msra.mxu0 %v28272_v21 }
0x1152   : > { %28417 = vmatpush3.bf16.xpose.msra.mxu1 %v28416_v47  ;;  %28274 = vmatprep.subr.bf16.mxu0 %v39685_v34 }
0x1153   : > { %28418 = vmatprep.subr.bf16.mxu1 %v39685_v34 }
0x1159   : > { %28276 = vmatpush3.bf16.xpose.msra.mxu0 %v28275_v22 }
0x115a   : > { %28420 = vmatpush3.bf16.xpose.msra.mxu1 %v28419_v8  ;;  %28277 = vmatprep.subr.bf16.mxu0 %v39685_v34 }
0x115b   : > { %28421 = vmatprep.subr.bf16.mxu1 %v39685_v34 }
0x1160   : > { %24720 = vmatmul.mubr.f32.vlgmr.msra.gmra.mrb[6].mxu0 %v35868_v59 }
0x1161   : > { %28279 = vmatpush3.bf16.xpose.msra.mxu0 %v38111_v1  ;;  %24930 = vmatmul.mubr.f32.vlgmr.msra.gmra.mrb[6].mxu1 %v35868_v59  ;;  %v17259_v59 = vsel %vm17251_vm11, 1, %v40472_v23 }
0x1162   : > { %28423 = vmatpush3.bf16.xpose.msra.mxu1 %v38117_v17  ;;  %28280 = vmatprep.subr.bf16.mxu0 %v39685_v34  ;;  %v17282_v58 = vrot.slane %v17259_v59, %v37084_v40  ;;  %v40565_v59 = vld [vmem:[#allocation7_spill] sm:$0xff] }
0x1163   : > { %28424 = vmatprep.subr.bf16.mxu1 %v39685_v34  ;;  %24754 = vmatprep.mubr.msk.f32.mxu0 %vm28907_vm0, %v39694_v24 }
0x1164   : > { %24964 = vmatprep.mubr.msk.f32.mxu1 %vm28907_vm0, %v39694_v24  ;;  %vm17299_vm13 = vcmp.eq.s32.totalorder %v17282_v58, 1  ;;  %v40567_v58 = vld [vmem:[#allocation13_spill] sm:$0xff] }
0x1169   : > { %28282 = vmatpush3.bf16.xpose.msra.mxu0 %v38153_v10 }
0x116a   : > { %28426 = vmatpush3.bf16.xpose.msra.mxu1 %v38159_v62  ;;  %28283 = vmatprep.subr.bf16.mxu0 %v39685_v34 }
0x116b   : > { %28427 = vmatprep.subr.bf16.mxu1 %v39685_v34 }
0x1171   : > { %28285 = vmatpush3.bf16.xpose.msra.mxu0 %v38189_v18 }
0x1172   : > { %28429 = vmatpush3.bf16.xpose.msra.mxu1 %v38195_v9  ;;  %28286 = vmatprep.subr.bf16.mxu0 %v39685_v34 }
0x1173   : > { %v15160_v30 = vpop.f32.mrb[4].mxu0  ;;  %28430 = vmatprep.subr.bf16.mxu1 %v39685_v34 }
0x1174   : > { %v38765_v39 = vsel %vm17299_vm13, %v15160_v30, -1e+30  ;;  %v15849_v7 = vpop.f32.mrb[4].mxu1  ;;  %v24406_v36 = vpop.f32.mrb[5].mxu0  ;;  %v40569_v30 = vand.u32 4294901760, %v38332_v55 }
0x1175   : > { %v38767_v21 = vsel %vm17300_vm14, %v15849_v7, -1e+30  ;;  %v24616_v47 = vpop.f32.mrb[5].mxu1  ;;  %v17324_v22 = vsel %vm17311_vm5, %v38765_v39, -inf  ;;  %v40570_v7 = vand.u32 4294901760, %v38337_v31  ;;  %v40575_v31 = vand.u32 4294901760, %v38393_v12 }
0x1176   : > { %v17327_v8 = vsel %vm17311_vm5, %v38767_v21, -inf  ;;  %17325 = vmax.xlane.f32.xlu0 %v17324_v22  ;;  %v40571_v47 = vand.u32 4294901760, %v38342_v0  ;;  %v40572_v22 = vand.u32 4294901760, %v38353_v2  ;;  %v40574_v0 = vand.u32 4294901760, %v38388_v60 }
0x1177   : > { %17328 = vmax.xlane.f32.xlu1 %v17327_v8  ;;  %v28302_v36 = vpack.c.bf16 %v40570_v7, %v40569_v30  ;;  %v40576_v2 = vand.u32 4294901760, %v38398_v15  ;;  %v40578_v7 = vand.u32 4294901760, %v38440_v52  ;;  %v40580_v60 = vand.u32 4294901760, %v38450_v6 }
0x1178   : > { %v28446_v8 = vpack.c.bf16 %v40572_v22, %v40571_v47  ;;  %v28305_v55 = vpack.c.bf16 %v40575_v31, %v40574_v0  ;;  %v40581_v12 = vand.u32 4294901760, %v38461_v14  ;;  %v40583_v15 = vand.u32 4294901760, %v38487_v49 }
0x1179   : > { %28288 = vmatpush3.bf16.xpose.msra.mxu0 %v38225_v57  ;;  %v40584_v52 = vand.u32 4294901760, %v38494_v44  ;;  %v40586_v14 = vand.u32 4294901760, %v38522_v28  ;;  %v40587_v6 = vand.u32 4294901760, %v38527_v16  ;;  %v40589_v49 = vand.u32 4294901760, %v38543_v27 }
0x117a   : > { %28432 = vmatpush3.bf16.xpose.msra.mxu1 %v38231_v42  ;;  %28289 = vmatprep.subr.bf16.mxu0 %v39685_v34  ;;  %v28452_v22 = vpack.c.bf16 %v40581_v12, %v40580_v60  ;;  %v40590_v44 = vand.u32 4294901760, %v38560_v19  ;;  %v40592_v28 = vand.u32 4294901760, %v38570_v33  ;;  %v40593_v16 = vand.u32 4294901760, %v38581_v51 }
0x117b   : > { %28433 = vmatprep.subr.bf16.mxu1 %v39685_v34  ;;  %v28314_v31 = vpack.c.bf16 %v40587_v6, %v40586_v14  ;;  %v40594_v27 = vand.u32 4294901760, %v38598_v38  ;;  %v40596_v19 = vand.u32 4294901760, %v38608_v20  ;;  %v40598_v51 = vand.u32 4294901760, %v38641_v26 }
0x117c   : > { %v40599_v38 = vand.u32 4294901760, %v38657_v63 }
0x117d   : > { %v28323_v33 = vpack.c.bf16 %v40598_v51, %v16093_v25 }
0x1181   : > { %28291 = vmatpush3.bf16.xpose.msra.mxu0 %v38261_v56 }
0x1182   : > { %28435 = vmatpush3.bf16.xpose.msra.mxu1 %v38267_v53  ;;  %28292 = vmatprep.subr.bf16.mxu0 %v39685_v34 }
0x1183   : > { %28436 = vmatprep.subr.bf16.mxu1 %v39685_v34 }
0x1189   : > { %28294 = vmatpush3.bf16.xpose.msra.mxu0 %v40563_v32 }
0x118a   : > { %28438 = vmatpush3.bf16.xpose.msra.mxu1 %v40564_v48  ;;  %28295 = vmatprep.subr.bf16.mxu0 %v39685_v34 }
0x118b   : > { %28439 = vmatprep.subr.bf16.mxu1 %v39685_v34 }
0x1191   : > { %28297 = vmatpush3.bf16.xpose.msra.mxu0 %v40565_v59 }
0x1192   : > { %28441 = vmatpush3.bf16.xpose.msra.mxu1 %v40566_v11  ;;  %28298 = vmatprep.subr.bf16.mxu0 %v39685_v34 }
0x1193   : > { %28442 = vmatprep.subr.bf16.mxu1 %v39685_v34 }
0x1199   : > { %28300 = vmatpush3.bf16.xpose.msra.mxu0 %v40567_v58 }
0x119a   : > { %28444 = vmatpush3.bf16.xpose.msra.mxu1 %v40568_v54  ;;  %28301 = vmatprep.subr.bf16.mxu0 %v39685_v34 }
0x119b   : > { %28445 = vmatprep.subr.bf16.mxu1 %v39685_v34 }
0x11a0   : > { %24755 = vmatmul.mubr.f32.vlgmr.msra.gmra.mrb[6].mxu0 %v40573_v35 }
0x11a1   : > { %28303 = vmatpush3.bf16.xpose.msra.mxu0 %v28302_v36  ;;  %24965 = vmatmul.mubr.f32.vlgmr.msra.gmra.mrb[6].mxu1 %v40573_v35  ;;  %v40577_v35 = vand.u32 4294901760, %v38415_v37  ;;  %v40579_v36 = vand.u32 4294901760, %v38445_v5  ;;  %v40582_v37 = vand.u32 4294901760, %v38482_v43  ;;  %v40585_v5 = vand.u32 4294901760, %v38505_v46 }
0x11a2   : > { %28447 = vmatpush3.bf16.xpose.msra.mxu1 %v28446_v8  ;;  %28304 = vmatprep.subr.bf16.mxu0 %v39685_v34  ;;  %v40588_v43 = vand.u32 4294901760, %v38532_v61  ;;  %v40591_v46 = vand.u32 4294901760, %v38565_v3  ;;  %v40595_v61 = vand.u32 4294901760, %v38603_v41  ;;  %v40597_v3 = vand.u32 4294901760, %v38619_v29  ;;  %v40603_v29 = vld [vmem:[#allocation15_spill] sm:$0xff] }
0x11a3   : > { %28448 = vmatprep.subr.bf16.mxu1 %v39685_v34  ;;  %24789 = vmatprep.mubr.msk.f32.mxu0 %vm28907_vm0, %v39694_v24  ;;  %v28449_v30 = vpack.c.bf16 %v40577_v35, %v40576_v2  ;;  %v28308_v47 = vpack.c.bf16 %v40579_v36, %v40578_v7  ;;  %v28311_v8 = vpack.c.bf16 %v40583_v15, %v40582_v37 }
0x11a4   : > { %24999 = vmatprep.mubr.msk.f32.mxu1 %vm28907_vm0, %v39694_v24  ;;  %v28455_v0 = vpack.c.bf16 %v40585_v5, %v40584_v52  ;;  %v28317_v2 = vpack.c.bf16 %v40591_v46, %v40590_v44  ;;  %v28461_v35 = vpack.c.bf16 %v40593_v16, %v40592_v28  ;;  %v28464_v7 = vpack.c.bf16 %v40597_v3, %v40596_v19 }
0x11a5   : > { %v28467_v41 = vpack.c.bf16 %v40599_v38, %v16782_v4 }
0x11a9   : > { %28306 = vmatpush3.bf16.xpose.msra.mxu0 %v28305_v55  ;;  %v28458_v55 = vpack.c.bf16 %v40589_v49, %v40588_v43 }
0x11aa   : > { %28450 = vmatpush3.bf16.xpose.msra.mxu1 %v28449_v30  ;;  %28307 = vmatprep.subr.bf16.mxu0 %v39685_v34  ;;  %v28320_v30 = vpack.c.bf16 %v40595_v61, %v40594_v27 }
0x11ab   : > { %28451 = vmatprep.subr.bf16.mxu1 %v39685_v34 }
0x11b1   : > { %28309 = vmatpush3.bf16.xpose.msra.mxu0 %v28308_v47 }
0x11b2   : > { %28453 = vmatpush3.bf16.xpose.msra.mxu1 %v28452_v22  ;;  %28310 = vmatprep.subr.bf16.mxu0 %v39685_v34 }
0x11b3   : > { %28454 = vmatprep.subr.bf16.mxu1 %v39685_v34 }
0x11b9   : > { %28312 = vmatpush3.bf16.xpose.msra.mxu0 %v28311_v8 }
0x11ba   : > { %28456 = vmatpush3.bf16.xpose.msra.mxu1 %v28455_v0  ;;  %28313 = vmatprep.subr.bf16.mxu0 %v39685_v34 }
0x11bb   : > { %28457 = vmatprep.subr.bf16.mxu1 %v39685_v34 }
0x11c1   : > { %28315 = vmatpush3.bf16.xpose.msra.mxu0 %v28314_v31 }
0x11c2   : > { %28459 = vmatpush3.bf16.xpose.msra.mxu1 %v28458_v55  ;;  %28316 = vmatprep.subr.bf16.mxu0 %v39685_v34 }
0x11c3   : > { %28460 = vmatprep.subr.bf16.mxu1 %v39685_v34 }
0x11c9   : > { %28318 = vmatpush3.bf16.xpose.msra.mxu0 %v28317_v2 }
0x11ca   : > { %28462 = vmatpush3.bf16.xpose.msra.mxu1 %v28461_v35  ;;  %28319 = vmatprep.subr.bf16.mxu0 %v39685_v34 }
0x11cb   : > { %28463 = vmatprep.subr.bf16.mxu1 %v39685_v34 }
0x11d1   : > { %28321 = vmatpush3.bf16.xpose.msra.mxu0 %v28320_v30 }
0x11d2   : > { %28465 = vmatpush3.bf16.xpose.msra.mxu1 %v28464_v7  ;;  %28322 = vmatprep.subr.bf16.mxu0 %v39685_v34 }
0x11d3   : > { %28466 = vmatprep.subr.bf16.mxu1 %v39685_v34 }
0x11d9   : > { %28324 = vmatpush3.bf16.xpose.msra.mxu0 %v28323_v33 }
0x11da   : > { %28468 = vmatpush3.bf16.xpose.msra.mxu1 %v28467_v41  ;;  %28325 = vmatprep.subr.bf16.mxu0 %v39685_v34 }
0x11db   : > { %28469 = vmatprep.subr.bf16.mxu1 %v39685_v34 }
0x11e0   : > { %24790 = vmatmul.mubr.f32.vlgmr.msra.gmra.mrb[6].mxu0 %v35821_v13 }
0x11e1   : > { %28327 = vmatpush3.bf16.xpose.msra.mxu0 %v38111_v1  ;;  %25000 = vmatmul.mubr.f32.vlgmr.msra.gmra.mrb[6].mxu1 %v35821_v13  ;;  %v17320_v1 = vpop.xlane.xlu1 %17319 }
0x11e2   : > { %28471 = vmatpush3.bf16.xpose.msra.mxu1 %v38117_v17  ;;  %28328 = vmatprep.subr.bf16.mxu0 %v39685_v34 }
0x11e3   : > { %28472 = vmatprep.subr.bf16.mxu1 %v39685_v34  ;;  %24824 = vmatprep.mubr.msk.f32.mxu0 %vm28907_vm0, %v39694_v24 }
0x11e4   : > { %25034 = vmatprep.mubr.msk.f32.mxu1 %vm28907_vm0, %v39694_v24  ;;  %v17314_v24 = vpop.xlane.xlu0 %17313 }
0x11e8   : > { %v17317_v17 = vpop.xlane.xlu0 %17316 }
0x11e9   : > { %28330 = vmatpush3.bf16.xpose.msra.mxu0 %v38153_v10  ;;  %v40600_v10 = vld [vmem:[#allocation11_spill] sm:$0xff] }
0x11ea   : > { %28474 = vmatpush3.bf16.xpose.msra.mxu1 %v38159_v62  ;;  %28331 = vmatprep.subr.bf16.mxu0 %v39685_v34  ;;  %v38918_v62 = vsub.f32 %v40600_v10, %v17314_v24 }
0x11eb   : > { %28475 = vmatprep.subr.bf16.mxu1 %v39685_v34 }
0x11f1   : > { %28333 = vmatpush3.bf16.xpose.msra.mxu0 %v38189_v18  ;;  %v17245_v18 = vld [vmem:[%s37072_s9 + $0x6] sm:$0x1] }
0x11f2   : > { %28477 = vmatpush3.bf16.xpose.msra.mxu1 %v38195_v9  ;;  %28334 = vmatprep.subr.bf16.mxu0 %v39685_v34  ;;  %v40601_v9 = vld [vmem:[#allocation12_spill] sm:$0xff]  ;;  %vm17253_vm15 = vcmp.ne.f32.partialorder %v17245_v18, 0.0 }
0x11f3   : > { %28478 = vmatprep.subr.bf16.mxu1 %v39685_v34  ;;  %v38922_v25 = vsub.f32 %v40601_v9, %v17317_v17  ;;  %v17261_v26 = vsel %vm17253_vm15, 1, %v40472_v23 }
0x11f9   : > { %28336 = vmatpush3.bf16.xpose.msra.mxu0 %v38225_v57  ;;  %v17246_v57 = vld [vmem:[%s37072_s9 + $0x7] sm:$0x1] }
0x11fa   : > { %28480 = vmatpush3.bf16.xpose.msra.mxu1 %v38231_v42  ;;  %28337 = vmatprep.subr.bf16.mxu0 %v39685_v34  ;;  %v17344_v42 = vmul.f32 1.442695, %v38918_v62  ;;  %vm17254_vm0 = vcmp.ne.f32.partialorder %v17246_v57, 0.0 }
0x11fb   : > { %28481 = vmatprep.subr.bf16.mxu1 %v39685_v34  ;;  %v17262_v45 = vsel %vm17254_vm0, 1, %v40472_v23 }
0x11fc   : > { %28810 = vpow2.f32 %v17344_v42 }
0x1201   : > { %28339 = vmatpush3.bf16.xpose.msra.mxu0 %v38261_v56  ;;  %v40602_v56 = vld [vmem:[#allocation14_spill] sm:$0xff] }
0x1202   : > { %28483 = vmatpush3.bf16.xpose.msra.mxu1 %v38267_v53  ;;  %28340 = vmatprep.subr.bf16.mxu0 %v39685_v34  ;;  %v38927_v53 = vsub.f32 %v40602_v56, %v17320_v1 }
0x1203   : > { %28484 = vmatprep.subr.bf16.mxu1 %v39685_v34  ;;  %v17326_v63 = vpop.xlane.xlu0 %17325 }
0x1204   : > { %v17348_v4 = vmul.f32 1.442695, %v38927_v53 }
0x1206   : > { %v28811_v37 = vpop.eup %28810 }
0x1207   : > { %v17360_v8 = vsel %vm17311_vm5, %v28811_v37, 0.0 }
0x1209   : > { %28342 = vmatpush3.bf16.xpose.msra.mxu0 %v40563_v32  ;;  %v38937_v32 = vsub.f32 %v38765_v39, %v17326_v63 }
0x120a   : > { %28486 = vmatpush3.bf16.xpose.msra.mxu1 %v40564_v48  ;;  %28343 = vmatprep.subr.bf16.mxu0 %v39685_v34 }
0x120b   : > { %28487 = vmatprep.subr.bf16.mxu1 %v39685_v34 }
0x1211   : > { %28345 = vmatpush3.bf16.xpose.msra.mxu0 %v40565_v59 }
0x1212   : > { %28489 = vmatpush3.bf16.xpose.msra.mxu1 %v40566_v11  ;;  %28346 = vmatprep.subr.bf16.mxu0 %v39685_v34  ;;  %v17290_v11 = vrot.slane %v17261_v26, %v37084_v40 }
0x1213   : > { %28490 = vmatprep.subr.bf16.mxu1 %v39685_v34  ;;  %v17323_v34 = vpop.xlane.xlu1 %17322 }
0x1214   : > { %v38931_v20 = vsub.f32 %v40603_v29, %v17323_v34  ;;  %vm17301_vm1 = vcmp.eq.s32.totalorder %v17290_v11, 1 }
0x1216   : > { %v17350_v48 = vmul.f32 1.442695, %v38931_v20 }
0x1217   : > { %v17329_v50 = vpop.xlane.xlu1 %17328 }
0x1218   : > { %v38941_v59 = vsub.f32 %v38767_v21, %v17329_v50 }
0x1219   : > { %28348 = vmatpush3.bf16.xpose.msra.mxu0 %v40567_v58  ;;  %v17294_v58 = vrot.slane %v17262_v45, %v37084_v40 }
0x121a   : > { %28492 = vmatpush3.bf16.xpose.msra.mxu1 %v40568_v54  ;;  %v17352_v54 = vmul.f32 1.442695, %v38937_v32  ;;  %v17354_v23 = vmul.f32 1.442695, %v38941_v59 }
0x121b   : > { %vm17302_vm2 = vcmp.eq.s32.totalorder %v17294_v58, 1 }
0x1220   : > { %24825 = vmatmul.mubr.f32.vlgmr.msra.gmra.mrb[6].mxu0 %v35821_v13 }
0x1221   : > { %25035 = vmatmul.mubr.f32.vlgmr.msra.gmra.mrb[6].mxu1 %v35821_v13  ;;  %v17346_v13 = vmul.f32 1.442695, %v38922_v25 }
0x1223   : > { %28812 = vpow2.f32 %v17346_v13 }
0x1224   : > { %28814 = vpow2.f32 %v17348_v4 }
0x1225   : > { %28816 = vpow2.f32 %v17350_v48 }
0x1226   : > { %28818 = vpow2.f32 %v17352_v54 }
0x1227   : > { %28820 = vpow2.f32 %v17354_v23 }
0x122d   : > { %v28813_v15 = vpop.eup %28812 }
0x122e   : > { %v28815_v52 = vpop.eup %28814  ;;  %v17363_v5 = vsel %vm17311_vm5, %v28813_v15, 0.0 }
0x122f   : > { %v28817_v0 = vpop.eup %28816  ;;  %v17366_v14 = vsel %vm17311_vm5, %v28815_v52, 0.0 }
0x1230   : > { %v28819_v6 = vpop.eup %28818  ;;  %v17369_v31 = vsel %vm17311_vm5, %v28817_v0, 0.0 }
0x1231   : > { %v28821_v43 = vpop.eup %28820  ;;  %v17372_v49 = vsel %vm17311_vm5, %v28819_v6, 0.0 }
0x1232   : > { %v17375_v55 = vsel %vm17311_vm5, %v28821_v43, 0.0 }
0x12f3   : > { %v16538_v39 = vpop.f32.mrb[6].mxu0 }
0x12f4   : > { %v17309_v36 = vsel %vm17301_vm1, %v16538_v39, -1e+30  ;;  %v17227_v47 = vpop.f32.mrb[6].mxu1  ;;  %v24826_v60 = vpop.f32.mrb[7].mxu0 }
0x12f5   : > { %v17310_v21 = vsel %vm17302_vm2, %v17227_v47, -1e+30  ;;  %v25036_v12 = vpop.f32.mrb[7].mxu1  ;;  %v17330_v22 = vsel %vm17311_vm5, %v17309_v36, -inf }
0x12f6   : > { %v17333_v40 = vsel %vm17311_vm5, %v17310_v21, -inf  ;;  %17331 = vmax.xlane.f32.xlu0 %v17330_v22 }
0x12f7   : > { %17334 = vmax.xlane.f32.xlu1 %v17333_v40 }
0x12fa   : > { %17361 = vadd.xlane.f32.xlu0 %v17360_v8 }
0x12fb   : > { %17364 = vadd.xlane.f32.xlu1 %v17363_v5 }
0x12fe   : > { %17367 = vadd.xlane.f32.xlu0 %v17366_v14 }
0x12ff   : > { %17370 = vadd.xlane.f32.xlu1 %v17369_v31 }
0x1302   : > { %17373 = vadd.xlane.f32.xlu0 %v17372_v49 }
0x1303   : > { %17376 = vadd.xlane.f32.xlu1 %v17375_v55 }
0x1383   : > { %v17332_v44 = vpop.xlane.xlu0 %17331 }
0x1384   : > { %v17335_v46 = vpop.xlane.xlu1 %17334  ;;  %v38955_v2 = vsub.f32 %v17309_v36, %v17332_v44 }
0x1385   : > { %v38957_v28 = vsub.f32 %v17310_v21, %v17335_v46 }
0x1386   : > { %v17356_v16 = vmul.f32 1.442695, %v38955_v2 }
0x1387   : > { %v17358_v35 = vmul.f32 1.442695, %v38957_v28  ;;  %v17362_v27 = vpop.xlane.xlu0 %17361 }
0x1388   : > { %28822 = vpow2.f32 %v17356_v16  ;;  %v17365_v61 = vpop.xlane.xlu1 %17364 }
0x1389   : > { %28824 = vpow2.f32 %v17358_v35 }
0x138a   : > { %28826 = vlog2.f32 %v17365_v61 }
0x138b   : > { %28828 = vlog2.f32 %v17362_v27  ;;  %v17368_v30 = vpop.xlane.xlu0 %17367 }
0x138c   : > { %v17371_v19 = vpop.xlane.xlu1 %17370  ;;  %28830 = vlog2.f32 %v17368_v30 }
0x138d   : > { %28832 = vlog2.f32 %v17371_v19 }
0x138f   : > { %v17374_v3 = vpop.xlane.xlu0 %17373 }
0x1390   : > { %v17377_v7 = vpop.xlane.xlu1 %17376  ;;  %28834 = vlog2.f32 %v17374_v3 }
0x1391   : > { %28836 = vlog2.f32 %v17377_v7 }
0x1392   : > { %v28823_v51 = vpop.eup %28822 }
0x1393   : > { %v28825_v33 = vpop.eup %28824  ;;  %v17378_v38 = vsel %vm17311_vm5, %v28823_v51, 0.0 }
0x1394   : > { %v28827_v41 = vpop.eup %28826  ;;  %v17381_v24 = vsel %vm17311_vm5, %v28825_v33, 0.0  ;;  %17379 = vadd.xlane.f32.xlu0 %v17378_v38 }
0x1395   : > { %v28829_v1 = vpop.eup %28828  ;;  %v17387_v17 = vmul.f32 0.6931472, %v28827_v41  ;;  %17382 = vadd.xlane.f32.xlu1 %v17381_v24 }
0x1396   : > { %v28831_v10 = vpop.eup %28830  ;;  %v17385_v18 = vmul.f32 0.6931472, %v28829_v1 }
0x1397   : > { %v28833_v9 = vpop.eup %28832  ;;  %v17401_v57 = vsub.f32 %v38922_v25, %v17387_v17  ;;  %v17389_v34 = vmul.f32 0.6931472, %v28831_v10 }
0x1398   : > { %v17400_v42 = vsub.f32 %v38918_v62, %v17385_v18  ;;  %v17391_v56 = vmul.f32 0.6931472, %v28833_v9 }
0x1399   : > { %17409 = vst [vmem:[%s270_s11 + $0x2] sm:$0x3] %v17401_v57  ;;  %v17402_v13 = vsub.f32 %v38927_v53, %v17389_v34 }
0x139a   : > { %v28835_v29 = vpop.eup %28834  ;;  %17408 = vst [vmem:[%s270_s11] sm:$0x3] %v17400_v42  ;;  %v17403_v63 = vsub.f32 %v38931_v20, %v17391_v56 }
0x139b   : > { %v28837_v50 = vpop.eup %28836  ;;  %17410 = vst [vmem:[%s270_s11 + $0x4] sm:$0x3] %v17402_v13  ;;  %v17393_v26 = vmul.f32 0.6931472, %v28835_v29 }
0x139c   : > { %17411 = vst [vmem:[%s270_s11 + $0x6] sm:$0x3] %v17403_v63  ;;  %v17395_v45 = vmul.f32 0.6931472, %v28837_v50 }
0x139d   : > { %v17404_v25 = vsub.f32 %v38937_v32, %v17393_v26 }
0x139e   : > { %v17405_v4 = vsub.f32 %v38941_v59, %v17395_v45 }
0x139f   : > { %17412 = vst [vmem:[%s270_s11 + $0x8] sm:$0x3] %v17404_v25 }
0x13a0   : > { %17413 = vst [vmem:[%s270_s11 + $0xa] sm:$0x3] %v17405_v4 }
0x1421   : > { %v17380_v62 = vpop.xlane.xlu0 %17379 }
0x1422   : > { %v17383_v48 = vpop.xlane.xlu1 %17382  ;;  %28838 = vlog2.f32 %v17380_v62 }
0x1423   : > { %28840 = vlog2.f32 %v17383_v48 }
0x142c   : > { %v28839_v53 = vpop.eup %28838 }
0x142d   : > { %v28841_v20 = vpop.eup %28840  ;;  %v17397_v11 = vmul.f32 0.6931472, %v28839_v53 }
0x142e   : > { %v17399_v58 = vmul.f32 0.6931472, %v28841_v20 }
0x142f   : > { %v17406_v54 = vsub.f32 %v38955_v2, %v17397_v11 }
0x1430   : > { %v17407_v32 = vsub.f32 %v38957_v28, %v17399_v58 }
0x1431   : > { %17414 = vst [vmem:[%s270_s11 + $0xc] sm:$0x3] %v17406_v54 }
0x1432   : > { %17415 = vst [vmem:[%s270_s11 + $0xe] sm:$0x3] %v17407_v32 }
0x1433   : > { %28855 = shalt.err (!%p28852_p3)
}
0x1434   : > { %s28856_s6 = scalar_lea.hbm %s38977_s16, 256  ;;  %s28860_s9 = scalar_lea.hbm %s39030_s5, 512 }
0x1435   : > { %p28857_p4 = scmp.ne.s32.totalorder %s38977_s16, %s28856_s6  ;;  %p28861_p9 = scmp.lt.u32.totalorder %s38977_s16, %s39030_s5 }
0x1436   : > { %p28862_p10 = scmp.lt.u32.totalorder %s28860_s9, %s28856_s6  ;;  %p28864_p12 = scmp.lt.u32.totalorder %s28856_s6, %s38977_s16 }
0x1437   : > { %p28858_p7 = pnand %p28857_p4, %p28981_p5 }
0x1438   : > { %p28863_p11 = por %p28862_p10, %p28861_p9 }
0x1439   : > { %p28859_p8 = pneg %p28858_p7 }
0x143a   : > { %p28865_p13 = por %p28864_p12, %p28863_p11 }
0x143c   : > { %p28866_p0 = pnand %p28865_p13, %p28859_p8 }
0x143e   : > { %28869 = shalt.err (!%p28866_p0)
}
0x143f   : > { %s28911_s11 = smov 32   ;;  %s28912_s12 = smov 2  }
0x1440   : > { %28765 = dma.vmem_to_hbm [thread:$0]  (%p28981_p5), %s38979_s13, 256, %s38977_s16, %s38984_s22, %s28911_s11, %s28911_s11, %s28912_s12  }
0x1441 PF: > { %p28771_p1 = scmp.ge.s32.totalorder %s28904_s21, 2  ;;  %s17445_s14 = sand.u32 1, %s28892_s18  }
0x1442   : > { %s17446_s15 = scalar_lea.sflag [#allocation3], %s17445_s14 }
0x1443   : > { %p28768_p2 = pnand %p28771_p1, %p28985_p6 }
0x1445   : > { %28887 = dma.done.wait (!%p28768_p2), %s17446_s15, 256  }
0x1446   : > { %28889 = vsyncadd (!%p28768_p2), %s17446_s15, 4294967040  ;;  %p15_p3 = scmp.ge.s32.totalorder %s28968_s24, 4   ;;  %s40604_s18 = smov %s28896_s19 }
0x1447   : > { %s40605_s19 = smov %s28900_s20  ;;  %s40606_s20 = smov %s28979_s27 }
0x1448   : > { %s40607_s21 = smov %s28968_s24  ;;  %17 = sbr.rel (!%p15_p3) target bundleno = 3 (0x3), region = 84 }
0x144f   :  { %17451 = vsyncpa [#allocation3], 1 }
0x1450   :  { %17453 = vsyncpa [#allocation3 + $0x1], 1 }

</bundles_post_ra>
